<compile_context>
chip_gen: v5e
topology: v5e:2x2
jax: 0.10.0
libtpu: 0.0.40
codegen_flags: <defaults>
</compile_context>

<pallas_src>
import functools

import jax
import jax.numpy as jnp
from jax.experimental import pallas as pl
from jax.experimental.pallas import tpu as pltpu


def msfaa_kernel(x_ref, p_ref, wcc_ref, bcc_ref, wse_ref, bse_ref,
                 wconv_ref, bconv_ref, out_ref, *, gc, hw, b_tile):
    # x_ref    : (b_tile, gc, hw)        lane-dense group images
    # p_ref    : (K_pad, b_tile*hw)      im2col patches for this step
    # wconv_ref: (M_pad, K_pad)          fused 3x3+5x5 weights (zero padded)
    # other weight refs: small VMEM tiles; biases as (gc, 1) columns.

    # ---- fused conv3x3 + conv5x5 for ALL b_tile images: one MXU matmul ----
    conv_all = jnp.dot(wconv_ref[...], p_ref[...],
                       preferred_element_type=jnp.float32,
                       precision=jax.lax.Precision.HIGHEST)   # (M_pad, b_tile*hw)

    wcc = wcc_ref[...]          # (gc, 2*gc)
    bcc = bcc_ref[...]          # (gc, 1)
    wse = wse_ref[...]          # (gc, gc)
    bse = bse_ref[...]          # (gc, 1)
    bconv = bconv_ref[...]      # (gc, 1)  (= b3 + b5 folded)

    for bi in range(b_tile):
        xi = x_ref[bi]                                        # (gc, hw)

        # ---- global average / max pooling (cross-lane reductions) ----
        x_avg = jnp.mean(xi, axis=-1, keepdims=True)          # (gc, 1)
        x_max = jnp.max(xi, axis=-1, keepdims=True)           # (gc, 1)

        # ---- criss-cross attention: 1x1 conv on [avg ; max], sigmoid ----
        att = bcc
        for c in range(gc):
            att = att + wcc[:, c:c + 1] * x_avg[c:c + 1, :]
            att = att + wcc[:, gc + c:gc + c + 1] * x_max[c:c + 1, :]
        att = jax.nn.sigmoid(att)                             # (gc, 1)
        x_att = xi * att                                      # (gc, hw)

        # ---- squeeze & excitation 1x1 conv as gc rank-1 broadcast FMAs ----
        se = wse[:, 0:1] * x_att[0:1, :]
        for c in range(1, gc):
            se = se + wse[:, c:c + 1] * x_att[c:c + 1, :]
        x1 = x_att + se + bse                                 # (gc, hw)

        # ---- conv branch output for this image (slice of the big matmul) ----
        x2 = conv_all[:gc, bi * hw:(bi + 1) * hw] + bconv     # (gc, hw)

        # ---- channel softmax of the spatially averaged maps ----
        m1 = jnp.mean(x1, axis=-1, keepdims=True)             # (gc, 1)
        m2 = jnp.mean(x2, axis=-1, keepdims=True)             # (gc, 1)

        def channel_softmax(m):
            mx = m[0:1, :]
            for c in range(1, gc):
                mx = jnp.maximum(mx, m[c:c + 1, :])
            e = jnp.exp(m - mx)                               # (gc, 1)
            tot = e[0:1, :]
            for c in range(1, gc):
                tot = tot + e[c:c + 1, :]
            return e / tot

        s1 = channel_softmax(m1)
        s2 = channel_softmax(m2)

        # ---- weights = s1 . x2 + s2 . x1 (contract channels), sigmoid gate ----
        comb = s1 * x2 + s2 * x1                              # (gc, hw)
        wmap = comb[0:1, :]
        for c in range(1, gc):
            wmap = wmap + comb[c:c + 1, :]                    # (1, hw)
        gate = jax.nn.sigmoid(wmap)

        out_ref[bi] = xi * gate                               # (gc, hw)


def _pick_b_tile(B):
    # Prefer fat grid steps but keep >=2 steps so v7x can shard across its 2 TCs.
    for cand in (4, 2):
        if B % cand == 0 and B // cand >= 2:
            return cand
    return 1


def msfaa_forward(x, params, groups):
    wcc, bcc, wse, bse, w3, b3, w5, b5 = params
    b, c, h, w = x.shape
    assert c % groups == 0, "Channels must be divisible by groups"
    gc = c // groups
    B = b * groups
    hw = h * w
    f32 = jnp.float32

    gx = x.reshape(B, gc, h, w).astype(f32)

    b_tile = _pick_b_tile(B)
    num_blocks = B // b_tile

    # ---- lane-dense activations: (B, gc, h*w) ----
    x_flat = gx.reshape(B, gc, hw)

    # ---- im2col patches for the fused 3x3 + 5x5 convolution (wrapper side) ----
    K = gc * 34                               # 9 + 25 taps per input channel
    xpad = jnp.pad(gx, ((0, 0), (0, 0), (2, 2), (2, 2)))
    wins = []
    for di in range(3):
        for dj in range(3):
            wins.append(xpad[:, :, 1 + di:1 + di + h, 1 + dj:1 + dj + w])
    for di in range(5):
        for dj in range(5):
            wins.append(xpad[:, :, di:di + h, dj:dj + w])
    patches = jnp.stack(wins, axis=2).reshape(B, K, hw)       # (B, gc*34, hw)

    # Pad K to a 128 multiple (zero rows) and pack b_tile images side by side
    # along lanes so each grid step performs a single big matmul.
    K_pad = ((K + 127) // 128) * 128
    M_pad = ((gc + 7) // 8) * 8
    patches = jnp.pad(patches, ((0, 0), (0, K_pad - K), (0, 0)))
    patches = patches.reshape(num_blocks, b_tile, K_pad, hw)
    patches = jnp.transpose(patches, (0, 2, 1, 3)).reshape(num_blocks, K_pad,
                                                           b_tile * hw)

    # ---- weights in matmul / vector friendly layouts (all VMEM) ----
    w3f = w3.astype(f32).reshape(gc, gc, 9)
    w5f = w5.astype(f32).reshape(gc, gc, 25)
    wconv = jnp.concatenate([w3f, w5f], axis=2).reshape(gc, K)
    wconv_p = jnp.zeros((M_pad, K_pad), f32).at[:gc, :K].set(wconv)
    bconv = (b3 + b5).astype(f32).reshape(gc, 1)

    wcc_v = wcc.astype(f32).reshape(gc, 2 * gc)
    bcc_v = bcc.astype(f32).reshape(gc, 1)
    wse_v = wse.astype(f32).reshape(gc, gc)
    bse_v = bse.astype(f32).reshape(gc, 1)

    kernel = functools.partial(msfaa_kernel, gc=gc, hw=hw, b_tile=b_tile)

    out = pl.pallas_call(
        kernel,
        out_shape=jax.ShapeDtypeStruct((B, gc, hw), f32),
        grid_spec=pltpu.PrefetchScalarGridSpec(
            num_scalar_prefetch=0,
            grid=(num_blocks,),
            in_specs=[
                pl.BlockSpec((b_tile, gc, hw), lambda i: (i, 0, 0)),
                pl.BlockSpec((None, K_pad, b_tile * hw), lambda i: (i, 0, 0)),
                pl.BlockSpec((gc, 2 * gc), lambda i: (0, 0)),
                pl.BlockSpec((gc, 1), lambda i: (0, 0)),
                pl.BlockSpec((gc, gc), lambda i: (0, 0)),
                pl.BlockSpec((gc, 1), lambda i: (0, 0)),
                pl.BlockSpec((M_pad, K_pad), lambda i: (0, 0)),
                pl.BlockSpec((gc, 1), lambda i: (0, 0)),
            ],
            out_specs=pl.BlockSpec((b_tile, gc, hw), lambda i: (i, 0, 0)),
        ),
        compiler_params=pltpu.CompilerParams(
            dimension_semantics=("parallel",)),
    )(x_flat, patches, wcc_v, bcc_v, wse_v, bse_v, wconv_p, bconv)

    return out.reshape(b, c, h, w)


def msfaa_reference(x, params, groups):
    """Pure-JAX reference mirroring the PyTorch forward."""
    wcc, bcc, wse, bse, w3, b3, w5, b5 = params
    b, c, h, w = x.shape
    gc = c // groups
    B = b * groups
    gx = x.reshape(B, gc, h, w)

    x_avg = jnp.mean(gx, axis=(2, 3))
    x_max = jnp.max(gx, axis=(2, 3))
    comb = jnp.concatenate([x_avg, x_max], axis=1)            # (B, 2gc)
    att = jax.nn.sigmoid(comb @ wcc.T + bcc)                  # (B, gc)
    x_att = gx * att[:, :, None, None]
    se = jnp.einsum('bchw,oc->bohw', x_att, wse) + bse[None, :, None, None]
    x1 = x_att + se

    dn = ('NCHW', 'OIHW', 'NCHW')
    hi = jax.lax.Precision.HIGHEST
    c3 = jax.lax.conv_general_dilated(gx, w3, (1, 1), 'SAME',
                                      dimension_numbers=dn,
                                      precision=hi) + b3[None, :, None, None]
    c5 = jax.lax.conv_general_dilated(gx, w5, (1, 1), 'SAME',
                                      dimension_numbers=dn,
                                      precision=hi) + b5[None, :, None, None]
    x2 = c3 + c5

    s1 = jax.nn.softmax(jnp.mean(x1, axis=(2, 3)), axis=-1)
    s2 = jax.nn.softmax(jnp.mean(x2, axis=(2, 3)), axis=-1)
    wmap = (jnp.einsum('bc,bchw->bhw', s1, x2)
            + jnp.einsum('bc,bchw->bhw', s2, x1))
    out = gx * jax.nn.sigmoid(wmap[:, None, :, :])
    return out.reshape(b, c, h, w)


if __name__ == "__main__":
    b, channels, h, w = 2, 16, 16, 16
    factor = 4                      # groups; gc = channels // factor = 4
    gc = channels // factor

    key = jax.random.PRNGKey(0)
    keys = jax.random.split(key, 10)
    x = jax.random.normal(keys[0], (b, channels, h, w), jnp.float32)

    def init_w(k, shape, fan_in):
        bound = 1.0 / (fan_in ** 0.5)
        return jax.random.uniform(k, shape, jnp.float32, -bound, bound)

    # Conv2d weight shapes (out, in, kh, kw), squeezed to math shapes for 1x1 convs.
    wcc = init_w(keys[1], (gc, 2 * gc), 2 * gc)          # criss_cross_attention 1x1
    bcc = init_w(keys[2], (gc,), 2 * gc)
    wse = init_w(keys[3], (gc, gc), gc)                  # squeeze_and_excitation 1x1
    bse = init_w(keys[4], (gc,), gc)
    w3 = init_w(keys[5], (gc, gc, 3, 3), gc * 9)         # conv3x3
    b3 = init_w(keys[6], (gc,), gc * 9)
    w5 = init_w(keys[7], (gc, gc, 5, 5), gc * 25)        # conv5x5
    b5 = init_w(keys[8], (gc,), gc * 25)
    params = (wcc, bcc, wse, bse, w3, b3, w5, b5)

    out = msfaa_forward(x, params, factor)
    out = jax.block_until_ready(out)

    ref = msfaa_reference(x, params, factor)
    assert out.shape == (b, channels, h, w)
    assert jnp.allclose(out, ref, atol=1e-3, rtol=1e-3), float(jnp.max(jnp.abs(out - ref)))
    print("KERNEL_OK")
</pallas_src>

<mosaic_0001>
module attributes {stable_mosaic.version = 11 : i64} {
  func.func @msfaa_kernel(%arg0: i32, %arg1: memref<4x4x256xf32, #tpu.memory_space<vmem>>, %arg2: memref<1x256x1024xf32, #tpu.memory_space<vmem>>, %arg3: memref<4x8xf32, #tpu.memory_space<vmem>>, %arg4: memref<4x1xf32, #tpu.memory_space<vmem>>, %arg5: memref<4x4xf32, #tpu.memory_space<vmem>>, %arg6: memref<4x1xf32, #tpu.memory_space<vmem>>, %arg7: memref<8x256xf32, #tpu.memory_space<vmem>>, %arg8: memref<4x1xf32, #tpu.memory_space<vmem>>, %arg9: memref<4x4x256xf32, #tpu.memory_space<vmem>>) attributes {dimension_semantics = [#tpu.dimension_semantics<parallel>], iteration_bounds = array<i64: 2>, scalar_prefetch = 0 : i64, scratch_operands = 0 : i64, tpu.core_type = #tpu.core_type<tc>, window_params = [{transform_indices = @transform_0, window_bounds = array<i64: 4, 4, 256>}, {transform_indices = @transform_1, window_bounds = array<i64: 1, 256, 1024>}, {pipeline_mode = #tpu.pipeline_mode<synchronous>, transform_indices = @transform_2, window_bounds = array<i64: 4, 8>}, {pipeline_mode = #tpu.pipeline_mode<synchronous>, transform_indices = @transform_3, window_bounds = array<i64: 4, 1>}, {pipeline_mode = #tpu.pipeline_mode<synchronous>, transform_indices = @transform_4, window_bounds = array<i64: 4, 4>}, {pipeline_mode = #tpu.pipeline_mode<synchronous>, transform_indices = @transform_5, window_bounds = array<i64: 4, 1>}, {pipeline_mode = #tpu.pipeline_mode<synchronous>, transform_indices = @transform_6, window_bounds = array<i64: 8, 256>}, {pipeline_mode = #tpu.pipeline_mode<synchronous>, transform_indices = @transform_7, window_bounds = array<i64: 4, 1>}, {transform_indices = @transform_8, window_bounds = array<i64: 4, 4, 256>}]} {
    %c0 = arith.constant 0 : index
    %c0_0 = arith.constant 0 : index
    %0 = vector.load %arg7[%c0, %c0_0] : memref<8x256xf32, #tpu.memory_space<vmem>>, vector<8x256xf32>
    %c0_1 = arith.constant 0 : index
    %c0_2 = arith.constant 0 : index
    %c0_3 = arith.constant 0 : index
    %1 = vector.load %arg2[%c0_1, %c0_2, %c0_3] : memref<1x256x1024xf32, #tpu.memory_space<vmem>>, vector<1x256x1024xf32>
    %2 = vector.shape_cast %1 : vector<1x256x1024xf32> to vector<256x1024xf32>
    %cst = arith.constant dense<0.000000e+00> : vector<8x1024xf32>
    %3 = tpu.matmul %0, %2, %cst {dimension_numbers = #tpu.dot_dimension_numbers<[1], [0], [0], [1], [0, 0, 1, 1], [], []>, precision = #tpu.contract_precision<fp32>} : vector<8x256xf32>, vector<256x1024xf32>, vector<8x1024xf32> -> vector<8x1024xf32>
    %c0_4 = arith.constant 0 : index
    %c0_5 = arith.constant 0 : index
    %4 = vector.load %arg3[%c0_4, %c0_5] : memref<4x8xf32, #tpu.memory_space<vmem>>, vector<4x8xf32>
    %c0_6 = arith.constant 0 : index
    %c0_7 = arith.constant 0 : index
    %5 = vector.load %arg4[%c0_6, %c0_7] : memref<4x1xf32, #tpu.memory_space<vmem>>, vector<4x1xf32>
    %c0_8 = arith.constant 0 : index
    %c0_9 = arith.constant 0 : index
    %6 = vector.load %arg5[%c0_8, %c0_9] : memref<4x4xf32, #tpu.memory_space<vmem>>, vector<4x4xf32>
    %c0_10 = arith.constant 0 : index
    %c0_11 = arith.constant 0 : index
    %7 = vector.load %arg6[%c0_10, %c0_11] : memref<4x1xf32, #tpu.memory_space<vmem>>, vector<4x1xf32>
    %c0_12 = arith.constant 0 : index
    %c0_13 = arith.constant 0 : index
    %8 = vector.load %arg8[%c0_12, %c0_13] : memref<4x1xf32, #tpu.memory_space<vmem>>, vector<4x1xf32>
    %c0_14 = arith.constant 0 : index
    %c0_15 = arith.constant 0 : index
    %c0_16 = arith.constant 0 : index
    %9 = vector.load %arg1[%c0_14, %c0_15, %c0_16] : memref<4x4x256xf32, #tpu.memory_space<vmem>>, vector<1x4x256xf32>
    %10 = vector.shape_cast %9 : vector<1x4x256xf32> to vector<4x256xf32>
    %cst_17 = arith.constant dense<0.000000e+00> : vector<4xf32>
    %11 = vector.multi_reduction <add>, %10, %cst_17 [1] : vector<4x256xf32> to vector<4xf32>
    %12 = vector.shape_cast %11 : vector<4xf32> to vector<4x1xf32>
    %cst_18 = arith.constant 2.560000e+02 : f32
    %13 = vector.broadcast %cst_18 : f32 to vector<4x1xf32>
    %14 = arith.divf %12, %13 : vector<4x1xf32>
    %cst_19 = arith.constant dense<0xFF800000> : vector<4xf32>
    %15 = vector.multi_reduction <maximumf>, %10, %cst_19 [1] : vector<4x256xf32> to vector<4xf32>
    %16 = vector.shape_cast %15 : vector<4xf32> to vector<4x1xf32>
    %17 = vector.extract_strided_slice %4 {offsets = [0, 0], sizes = [4, 1], strides = [1, 1]} : vector<4x8xf32> to vector<4x1xf32>
    %18 = vector.extract_strided_slice %14 {offsets = [0, 0], sizes = [1, 1], strides = [1, 1]} : vector<4x1xf32> to vector<1x1xf32>
    %19 = vector.broadcast %18 : vector<1x1xf32> to vector<4x1xf32>
    %20 = arith.mulf %17, %19 : vector<4x1xf32>
    %21 = arith.addf %5, %20 : vector<4x1xf32>
    %22 = vector.extract_strided_slice %4 {offsets = [0, 4], sizes = [4, 1], strides = [1, 1]} : vector<4x8xf32> to vector<4x1xf32>
    %23 = vector.extract_strided_slice %16 {offsets = [0, 0], sizes = [1, 1], strides = [1, 1]} : vector<4x1xf32> to vector<1x1xf32>
    %24 = vector.broadcast %23 : vector<1x1xf32> to vector<4x1xf32>
    %25 = arith.mulf %22, %24 : vector<4x1xf32>
    %26 = arith.addf %21, %25 : vector<4x1xf32>
    %27 = vector.extract_strided_slice %4 {offsets = [0, 1], sizes = [4, 1], strides = [1, 1]} : vector<4x8xf32> to vector<4x1xf32>
    %28 = vector.extract_strided_slice %14 {offsets = [1, 0], sizes = [1, 1], strides = [1, 1]} : vector<4x1xf32> to vector<1x1xf32>
    %29 = vector.broadcast %28 : vector<1x1xf32> to vector<4x1xf32>
    %30 = arith.mulf %27, %29 : vector<4x1xf32>
    %31 = arith.addf %26, %30 : vector<4x1xf32>
    %32 = vector.extract_strided_slice %4 {offsets = [0, 5], sizes = [4, 1], strides = [1, 1]} : vector<4x8xf32> to vector<4x1xf32>
    %33 = vector.extract_strided_slice %16 {offsets = [1, 0], sizes = [1, 1], strides = [1, 1]} : vector<4x1xf32> to vector<1x1xf32>
    %34 = vector.broadcast %33 : vector<1x1xf32> to vector<4x1xf32>
    %35 = arith.mulf %32, %34 : vector<4x1xf32>
    %36 = arith.addf %31, %35 : vector<4x1xf32>
    %37 = vector.extract_strided_slice %4 {offsets = [0, 2], sizes = [4, 1], strides = [1, 1]} : vector<4x8xf32> to vector<4x1xf32>
    %38 = vector.extract_strided_slice %14 {offsets = [2, 0], sizes = [1, 1], strides = [1, 1]} : vector<4x1xf32> to vector<1x1xf32>
    %39 = vector.broadcast %38 : vector<1x1xf32> to vector<4x1xf32>
    %40 = arith.mulf %37, %39 : vector<4x1xf32>
    %41 = arith.addf %36, %40 : vector<4x1xf32>
    %42 = vector.extract_strided_slice %4 {offsets = [0, 6], sizes = [4, 1], strides = [1, 1]} : vector<4x8xf32> to vector<4x1xf32>
    %43 = vector.extract_strided_slice %16 {offsets = [2, 0], sizes = [1, 1], strides = [1, 1]} : vector<4x1xf32> to vector<1x1xf32>
    %44 = vector.broadcast %43 : vector<1x1xf32> to vector<4x1xf32>
    %45 = arith.mulf %42, %44 : vector<4x1xf32>
    %46 = arith.addf %41, %45 : vector<4x1xf32>
    %47 = vector.extract_strided_slice %4 {offsets = [0, 3], sizes = [4, 1], strides = [1, 1]} : vector<4x8xf32> to vector<4x1xf32>
    %48 = vector.extract_strided_slice %14 {offsets = [3, 0], sizes = [1, 1], strides = [1, 1]} : vector<4x1xf32> to vector<1x1xf32>
    %49 = vector.broadcast %48 : vector<1x1xf32> to vector<4x1xf32>
    %50 = arith.mulf %47, %49 : vector<4x1xf32>
    %51 = arith.addf %46, %50 : vector<4x1xf32>
    %52 = vector.extract_strided_slice %4 {offsets = [0, 7], sizes = [4, 1], strides = [1, 1]} : vector<4x8xf32> to vector<4x1xf32>
    %53 = vector.extract_strided_slice %16 {offsets = [3, 0], sizes = [1, 1], strides = [1, 1]} : vector<4x1xf32> to vector<1x1xf32>
    %54 = vector.broadcast %53 : vector<1x1xf32> to vector<4x1xf32>
    %55 = arith.mulf %52, %54 : vector<4x1xf32>
    %56 = arith.addf %51, %55 : vector<4x1xf32>
    %57 = arith.negf %56 : vector<4x1xf32>
    %58 = math.exp %57 : vector<4x1xf32>
    %cst_20 = arith.constant 1.000000e+00 : f32
    %59 = vector.broadcast %cst_20 : f32 to vector<4x1xf32>
    %60 = arith.addf %59, %58 : vector<4x1xf32>
    %61 = arith.divf %59, %60 : vector<4x1xf32>
    %62 = vector.broadcast %61 : vector<4x1xf32> to vector<4x256xf32>
    %63 = arith.mulf %10, %62 : vector<4x256xf32>
    %64 = vector.extract_strided_slice %6 {offsets = [0, 0], sizes = [4, 1], strides = [1, 1]} : vector<4x4xf32> to vector<4x1xf32>
    %65 = vector.extract_strided_slice %63 {offsets = [0, 0], sizes = [1, 256], strides = [1, 1]} : vector<4x256xf32> to vector<1x256xf32>
    %66 = vector.broadcast %64 : vector<4x1xf32> to vector<4x256xf32>
    %67 = vector.broadcast %65 : vector<1x256xf32> to vector<4x256xf32>
    %68 = arith.mulf %66, %67 : vector<4x256xf32>
    %69 = vector.extract_strided_slice %6 {offsets = [0, 1], sizes = [4, 1], strides = [1, 1]} : vector<4x4xf32> to vector<4x1xf32>
    %70 = vector.extract_strided_slice %63 {offsets = [1, 0], sizes = [1, 256], strides = [1, 1]} : vector<4x256xf32> to vector<1x256xf32>
    %71 = vector.broadcast %69 : vector<4x1xf32> to vector<4x256xf32>
    %72 = vector.broadcast %70 : vector<1x256xf32> to vector<4x256xf32>
    %73 = arith.mulf %71, %72 : vector<4x256xf32>
    %74 = arith.addf %68, %73 : vector<4x256xf32>
    %75 = vector.extract_strided_slice %6 {offsets = [0, 2], sizes = [4, 1], strides = [1, 1]} : vector<4x4xf32> to vector<4x1xf32>
    %76 = vector.extract_strided_slice %63 {offsets = [2, 0], sizes = [1, 256], strides = [1, 1]} : vector<4x256xf32> to vector<1x256xf32>
    %77 = vector.broadcast %75 : vector<4x1xf32> to vector<4x256xf32>
    %78 = vector.broadcast %76 : vector<1x256xf32> to vector<4x256xf32>
    %79 = arith.mulf %77, %78 : vector<4x256xf32>
    %80 = arith.addf %74, %79 : vector<4x256xf32>
    %81 = vector.extract_strided_slice %6 {offsets = [0, 3], sizes = [4, 1], strides = [1, 1]} : vector<4x4xf32> to vector<4x1xf32>
    %82 = vector.extract_strided_slice %63 {offsets = [3, 0], sizes = [1, 256], strides = [1, 1]} : vector<4x256xf32> to vector<1x256xf32>
    %83 = vector.broadcast %81 : vector<4x1xf32> to vector<4x256xf32>
    %84 = vector.broadcast %82 : vector<1x256xf32> to vector<4x256xf32>
    %85 = arith.mulf %83, %84 : vector<4x256xf32>
    %86 = arith.addf %80, %85 : vector<4x256xf32>
    %87 = arith.addf %63, %86 : vector<4x256xf32>
    %88 = vector.broadcast %7 : vector<4x1xf32> to vector<4x256xf32>
    %89 = arith.addf %87, %88 : vector<4x256xf32>
    %90 = vector.extract_strided_slice %3 {offsets = [0, 0], sizes = [4, 256], strides = [1, 1]} : vector<8x1024xf32> to vector<4x256xf32>
    %91 = vector.broadcast %8 : vector<4x1xf32> to vector<4x256xf32>
    %92 = arith.addf %90, %91 : vector<4x256xf32>
    %cst_21 = arith.constant dense<0.000000e+00> : vector<4xf32>
    %93 = vector.multi_reduction <add>, %89, %cst_21 [1] : vector<4x256xf32> to vector<4xf32>
    %94 = vector.shape_cast %93 : vector<4xf32> to vector<4x1xf32>
    %cst_22 = arith.constant 2.560000e+02 : f32
    %95 = vector.broadcast %cst_22 : f32 to vector<4x1xf32>
    %96 = arith.divf %94, %95 : vector<4x1xf32>
    %cst_23 = arith.constant dense<0.000000e+00> : vector<4xf32>
    %97 = vector.multi_reduction <add>, %92, %cst_23 [1] : vector<4x256xf32> to vector<4xf32>
    %98 = vector.shape_cast %97 : vector<4xf32> to vector<4x1xf32>
    %cst_24 = arith.constant 2.560000e+02 : f32
    %99 = vector.broadcast %cst_24 : f32 to vector<4x1xf32>
    %100 = arith.divf %98, %99 : vector<4x1xf32>
    %101 = vector.extract_strided_slice %96 {offsets = [0, 0], sizes = [1, 1], strides = [1, 1]} : vector<4x1xf32> to vector<1x1xf32>
    %102 = vector.extract_strided_slice %96 {offsets = [1, 0], sizes = [1, 1], strides = [1, 1]} : vector<4x1xf32> to vector<1x1xf32>
    %103 = arith.maximumf %101, %102 : vector<1x1xf32>
    %104 = vector.extract_strided_slice %96 {offsets = [2, 0], sizes = [1, 1], strides = [1, 1]} : vector<4x1xf32> to vector<1x1xf32>
    %105 = arith.maximumf %103, %104 : vector<1x1xf32>
    %106 = vector.extract_strided_slice %96 {offsets = [3, 0], sizes = [1, 1], strides = [1, 1]} : vector<4x1xf32> to vector<1x1xf32>
    %107 = arith.maximumf %105, %106 : vector<1x1xf32>
    %108 = vector.broadcast %107 : vector<1x1xf32> to vector<4x1xf32>
    %109 = arith.subf %96, %108 : vector<4x1xf32>
    %110 = math.exp %109 : vector<4x1xf32>
    %111 = vector.extract_strided_slice %110 {offsets = [0, 0], sizes = [1, 1], strides = [1, 1]} : vector<4x1xf32> to vector<1x1xf32>
    %112 = vector.extract_strided_slice %110 {offsets = [1, 0], sizes = [1, 1], strides = [1, 1]} : vector<4x1xf32> to vector<1x1xf32>
    %113 = arith.addf %111, %112 : vector<1x1xf32>
    %114 = vector.extract_strided_slice %110 {offsets = [2, 0], sizes = [1, 1], strides = [1, 1]} : vector<4x1xf32> to vector<1x1xf32>
    %115 = arith.addf %113, %114 : vector<1x1xf32>
    %116 = vector.extract_strided_slice %110 {offsets = [3, 0], sizes = [1, 1], strides = [1, 1]} : vector<4x1xf32> to vector<1x1xf32>
    %117 = arith.addf %115, %116 : vector<1x1xf32>
    %118 = vector.broadcast %117 : vector<1x1xf32> to vector<4x1xf32>
    %119 = arith.divf %110, %118 : vector<4x1xf32>
    %120 = vector.extract_strided_slice %100 {offsets = [0, 0], sizes = [1, 1], strides = [1, 1]} : vector<4x1xf32> to vector<1x1xf32>
    %121 = vector.extract_strided_slice %100 {offsets = [1, 0], sizes = [1, 1], strides = [1, 1]} : vector<4x1xf32> to vector<1x1xf32>
    %122 = arith.maximumf %120, %121 : vector<1x1xf32>
    %123 = vector.extract_strided_slice %100 {offsets = [2, 0], sizes = [1, 1], strides = [1, 1]} : vector<4x1xf32> to vector<1x1xf32>
    %124 = arith.maximumf %122, %123 : vector<1x1xf32>
    %125 = vector.extract_strided_slice %100 {offsets = [3, 0], sizes = [1, 1], strides = [1, 1]} : vector<4x1xf32> to vector<1x1xf32>
    %126 = arith.maximumf %124, %125 : vector<1x1xf32>
    %127 = vector.broadcast %126 : vector<1x1xf32> to vector<4x1xf32>
    %128 = arith.subf %100, %127 : vector<4x1xf32>
    %129 = math.exp %128 : vector<4x1xf32>
    %130 = vector.extract_strided_slice %129 {offsets = [0, 0], sizes = [1, 1], strides = [1, 1]} : vector<4x1xf32> to vector<1x1xf32>
    %131 = vector.extract_strided_slice %129 {offsets = [1, 0], sizes = [1, 1], strides = [1, 1]} : vector<4x1xf32> to vector<1x1xf32>
    %132 = arith.addf %130, %131 : vector<1x1xf32>
    %133 = vector.extract_strided_slice %129 {offsets = [2, 0], sizes = [1, 1], strides = [1, 1]} : vector<4x1xf32> to vector<1x1xf32>
    %134 = arith.addf %132, %133 : vector<1x1xf32>
    %135 = vector.extract_strided_slice %129 {offsets = [3, 0], sizes = [1, 1], strides = [1, 1]} : vector<4x1xf32> to vector<1x1xf32>
    %136 = arith.addf %134, %135 : vector<1x1xf32>
    %137 = vector.broadcast %136 : vector<1x1xf32> to vector<4x1xf32>
    %138 = arith.divf %129, %137 : vector<4x1xf32>
    %139 = vector.broadcast %119 : vector<4x1xf32> to vector<4x256xf32>
    %140 = arith.mulf %139, %92 : vector<4x256xf32>
    %141 = vector.broadcast %138 : vector<4x1xf32> to vector<4x256xf32>
    %142 = arith.mulf %141, %89 : vector<4x256xf32>
    %143 = arith.addf %140, %142 : vector<4x256xf32>
    %144 = vector.extract_strided_slice %143 {offsets = [0, 0], sizes = [1, 256], strides = [1, 1]} : vector<4x256xf32> to vector<1x256xf32>
    %145 = vector.extract_strided_slice %143 {offsets = [1, 0], sizes = [1, 256], strides = [1, 1]} : vector<4x256xf32> to vector<1x256xf32>
    %146 = arith.addf %144, %145 : vector<1x256xf32>
    %147 = vector.extract_strided_slice %143 {offsets = [2, 0], sizes = [1, 256], strides = [1, 1]} : vector<4x256xf32> to vector<1x256xf32>
    %148 = arith.addf %146, %147 : vector<1x256xf32>
    %149 = vector.extract_strided_slice %143 {offsets = [3, 0], sizes = [1, 256], strides = [1, 1]} : vector<4x256xf32> to vector<1x256xf32>
    %150 = arith.addf %148, %149 : vector<1x256xf32>
    %151 = arith.negf %150 : vector<1x256xf32>
    %152 = math.exp %151 : vector<1x256xf32>
    %cst_25 = arith.constant 1.000000e+00 : f32
    %153 = vector.broadcast %cst_25 : f32 to vector<1x256xf32>
    %154 = arith.addf %153, %152 : vector<1x256xf32>
    %155 = arith.divf %153, %154 : vector<1x256xf32>
    %156 = vector.broadcast %155 : vector<1x256xf32> to vector<4x256xf32>
    %157 = arith.mulf %10, %156 : vector<4x256xf32>
    %c0_26 = arith.constant 0 : index
    %c0_27 = arith.constant 0 : index
    %c0_28 = arith.constant 0 : index
    %158 = vector.load %arg9[%c0_26, %c0_27, %c0_28] : memref<4x4x256xf32, #tpu.memory_space<vmem>>, vector<1x4x256xf32>
    %159 = vector.shape_cast %158 : vector<1x4x256xf32> to vector<4x256xf32>
    %160 = vector.shape_cast %157 : vector<4x256xf32> to vector<1x4x256xf32>
    tpu.vector_store %arg9[%c0_26, %c0_27, %c0_28], %160 {strides = array<i32>} : memref<4x4x256xf32, #tpu.memory_space<vmem>>, vector<1x4x256xf32>,
    %c1 = arith.constant 1 : index
    %c0_29 = arith.constant 0 : index
    %c0_30 = arith.constant 0 : index
    %161 = vector.load %arg1[%c1, %c0_29, %c0_30] : memref<4x4x256xf32, #tpu.memory_space<vmem>>, vector<1x4x256xf32>
    %162 = vector.shape_cast %161 : vector<1x4x256xf32> to vector<4x256xf32>
    %cst_31 = arith.constant dense<0.000000e+00> : vector<4xf32>
    %163 = vector.multi_reduction <add>, %162, %cst_31 [1] : vector<4x256xf32> to vector<4xf32>
    %164 = vector.shape_cast %163 : vector<4xf32> to vector<4x1xf32>
    %cst_32 = arith.constant 2.560000e+02 : f32
    %165 = vector.broadcast %cst_32 : f32 to vector<4x1xf32>
    %166 = arith.divf %164, %165 : vector<4x1xf32>
    %cst_33 = arith.constant dense<0xFF800000> : vector<4xf32>
    %167 = vector.multi_reduction <maximumf>, %162, %cst_33 [1] : vector<4x256xf32> to vector<4xf32>
    %168 = vector.shape_cast %167 : vector<4xf32> to vector<4x1xf32>
    %169 = vector.extract_strided_slice %4 {offsets = [0, 0], sizes = [4, 1], strides = [1, 1]} : vector<4x8xf32> to vector<4x1xf32>
    %170 = vector.extract_strided_slice %166 {offsets = [0, 0], sizes = [1, 1], strides = [1, 1]} : vector<4x1xf32> to vector<1x1xf32>
    %171 = vector.broadcast %170 : vector<1x1xf32> to vector<4x1xf32>
    %172 = arith.mulf %169, %171 : vector<4x1xf32>
    %173 = arith.addf %5, %172 : vector<4x1xf32>
    %174 = vector.extract_strided_slice %4 {offsets = [0, 4], sizes = [4, 1], strides = [1, 1]} : vector<4x8xf32> to vector<4x1xf32>
    %175 = vector.extract_strided_slice %168 {offsets = [0, 0], sizes = [1, 1], strides = [1, 1]} : vector<4x1xf32> to vector<1x1xf32>
    %176 = vector.broadcast %175 : vector<1x1xf32> to vector<4x1xf32>
    %177 = arith.mulf %174, %176 : vector<4x1xf32>
    %178 = arith.addf %173, %177 : vector<4x1xf32>
    %179 = vector.extract_strided_slice %4 {offsets = [0, 1], sizes = [4, 1], strides = [1, 1]} : vector<4x8xf32> to vector<4x1xf32>
    %180 = vector.extract_strided_slice %166 {offsets = [1, 0], sizes = [1, 1], strides = [1, 1]} : vector<4x1xf32> to vector<1x1xf32>
    %181 = vector.broadcast %180 : vector<1x1xf32> to vector<4x1xf32>
    %182 = arith.mulf %179, %181 : vector<4x1xf32>
    %183 = arith.addf %178, %182 : vector<4x1xf32>
    %184 = vector.extract_strided_slice %4 {offsets = [0, 5], sizes = [4, 1], strides = [1, 1]} : vector<4x8xf32> to vector<4x1xf32>
    %185 = vector.extract_strided_slice %168 {offsets = [1, 0], sizes = [1, 1], strides = [1, 1]} : vector<4x1xf32> to vector<1x1xf32>
    %186 = vector.broadcast %185 : vector<1x1xf32> to vector<4x1xf32>
    %187 = arith.mulf %184, %186 : vector<4x1xf32>
    %188 = arith.addf %183, %187 : vector<4x1xf32>
    %189 = vector.extract_strided_slice %4 {offsets = [0, 2], sizes = [4, 1], strides = [1, 1]} : vector<4x8xf32> to vector<4x1xf32>
    %190 = vector.extract_strided_slice %166 {offsets = [2, 0], sizes = [1, 1], strides = [1, 1]} : vector<4x1xf32> to vector<1x1xf32>
    %191 = vector.broadcast %190 : vector<1x1xf32> to vector<4x1xf32>
    %192 = arith.mulf %189, %191 : vector<4x1xf32>
    %193 = arith.addf %188, %192 : vector<4x1xf32>
    %194 = vector.extract_strided_slice %4 {offsets = [0, 6], sizes = [4, 1], strides = [1, 1]} : vector<4x8xf32> to vector<4x1xf32>
    %195 = vector.extract_strided_slice %168 {offsets = [2, 0], sizes = [1, 1], strides = [1, 1]} : vector<4x1xf32> to vector<1x1xf32>
    %196 = vector.broadcast %195 : vector<1x1xf32> to vector<4x1xf32>
    %197 = arith.mulf %194, %196 : vector<4x1xf32>
    %198 = arith.addf %193, %197 : vector<4x1xf32>
    %199 = vector.extract_strided_slice %4 {offsets = [0, 3], sizes = [4, 1], strides = [1, 1]} : vector<4x8xf32> to vector<4x1xf32>
    %200 = vector.extract_strided_slice %166 {offsets = [3, 0], sizes = [1, 1], strides = [1, 1]} : vector<4x1xf32> to vector<1x1xf32>
    %201 = vector.broadcast %200 : vector<1x1xf32> to vector<4x1xf32>
    %202 = arith.mulf %199, %201 : vector<4x1xf32>
    %203 = arith.addf %198, %202 : vector<4x1xf32>
    %204 = vector.extract_strided_slice %4 {offsets = [0, 7], sizes = [4, 1], strides = [1, 1]} : vector<4x8xf32> to vector<4x1xf32>
    %205 = vector.extract_strided_slice %168 {offsets = [3, 0], sizes = [1, 1], strides = [1, 1]} : vector<4x1xf32> to vector<1x1xf32>
    %206 = vector.broadcast %205 : vector<1x1xf32> to vector<4x1xf32>
    %207 = arith.mulf %204, %206 : vector<4x1xf32>
    %208 = arith.addf %203, %207 : vector<4x1xf32>
    %209 = arith.negf %208 : vector<4x1xf32>
    %210 = math.exp %209 : vector<4x1xf32>
    %cst_34 = arith.constant 1.000000e+00 : f32
    %211 = vector.broadcast %cst_34 : f32 to vector<4x1xf32>
    %212 = arith.addf %211, %210 : vector<4x1xf32>
    %213 = arith.divf %211, %212 : vector<4x1xf32>
    %214 = vector.broadcast %213 : vector<4x1xf32> to vector<4x256xf32>
    %215 = arith.mulf %162, %214 : vector<4x256xf32>
    %216 = vector.extract_strided_slice %6 {offsets = [0, 0], sizes = [4, 1], strides = [1, 1]} : vector<4x4xf32> to vector<4x1xf32>
    %217 = vector.extract_strided_slice %215 {offsets = [0, 0], sizes = [1, 256], strides = [1, 1]} : vector<4x256xf32> to vector<1x256xf32>
    %218 = vector.broadcast %216 : vector<4x1xf32> to vector<4x256xf32>
    %219 = vector.broadcast %217 : vector<1x256xf32> to vector<4x256xf32>
    %220 = arith.mulf %218, %219 : vector<4x256xf32>
    %221 = vector.extract_strided_slice %6 {offsets = [0, 1], sizes = [4, 1], strides = [1, 1]} : vector<4x4xf32> to vector<4x1xf32>
    %222 = vector.extract_strided_slice %215 {offsets = [1, 0], sizes = [1, 256], strides = [1, 1]} : vector<4x256xf32> to vector<1x256xf32>
    %223 = vector.broadcast %221 : vector<4x1xf32> to vector<4x256xf32>
    %224 = vector.broadcast %222 : vector<1x256xf32> to vector<4x256xf32>
    %225 = arith.mulf %223, %224 : vector<4x256xf32>
    %226 = arith.addf %220, %225 : vector<4x256xf32>
    %227 = vector.extract_strided_slice %6 {offsets = [0, 2], sizes = [4, 1], strides = [1, 1]} : vector<4x4xf32> to vector<4x1xf32>
    %228 = vector.extract_strided_slice %215 {offsets = [2, 0], sizes = [1, 256], strides = [1, 1]} : vector<4x256xf32> to vector<1x256xf32>
    %229 = vector.broadcast %227 : vector<4x1xf32> to vector<4x256xf32>
    %230 = vector.broadcast %228 : vector<1x256xf32> to vector<4x256xf32>
    %231 = arith.mulf %229, %230 : vector<4x256xf32>
    %232 = arith.addf %226, %231 : vector<4x256xf32>
    %233 = vector.extract_strided_slice %6 {offsets = [0, 3], sizes = [4, 1], strides = [1, 1]} : vector<4x4xf32> to vector<4x1xf32>
    %234 = vector.extract_strided_slice %215 {offsets = [3, 0], sizes = [1, 256], strides = [1, 1]} : vector<4x256xf32> to vector<1x256xf32>
    %235 = vector.broadcast %233 : vector<4x1xf32> to vector<4x256xf32>
    %236 = vector.broadcast %234 : vector<1x256xf32> to vector<4x256xf32>
    %237 = arith.mulf %235, %236 : vector<4x256xf32>
    %238 = arith.addf %232, %237 : vector<4x256xf32>
    %239 = arith.addf %215, %238 : vector<4x256xf32>
    %240 = vector.broadcast %7 : vector<4x1xf32> to vector<4x256xf32>
    %241 = arith.addf %239, %240 : vector<4x256xf32>
    %242 = vector.extract_strided_slice %3 {offsets = [0, 256], sizes = [4, 256], strides = [1, 1]} : vector<8x1024xf32> to vector<4x256xf32>
    %243 = vector.broadcast %8 : vector<4x1xf32> to vector<4x256xf32>
    %244 = arith.addf %242, %243 : vector<4x256xf32>
    %cst_35 = arith.constant dense<0.000000e+00> : vector<4xf32>
    %245 = vector.multi_reduction <add>, %241, %cst_35 [1] : vector<4x256xf32> to vector<4xf32>
    %246 = vector.shape_cast %245 : vector<4xf32> to vector<4x1xf32>
    %cst_36 = arith.constant 2.560000e+02 : f32
    %247 = vector.broadcast %cst_36 : f32 to vector<4x1xf32>
    %248 = arith.divf %246, %247 : vector<4x1xf32>
    %cst_37 = arith.constant dense<0.000000e+00> : vector<4xf32>
    %249 = vector.multi_reduction <add>, %244, %cst_37 [1] : vector<4x256xf32> to vector<4xf32>
    %250 = vector.shape_cast %249 : vector<4xf32> to vector<4x1xf32>
    %cst_38 = arith.constant 2.560000e+02 : f32
    %251 = vector.broadcast %cst_38 : f32 to vector<4x1xf32>
    %252 = arith.divf %250, %251 : vector<4x1xf32>
    %253 = vector.extract_strided_slice %248 {offsets = [0, 0], sizes = [1, 1], strides = [1, 1]} : vector<4x1xf32> to vector<1x1xf32>
    %254 = vector.extract_strided_slice %248 {offsets = [1, 0], sizes = [1, 1], strides = [1, 1]} : vector<4x1xf32> to vector<1x1xf32>
    %255 = arith.maximumf %253, %254 : vector<1x1xf32>
    %256 = vector.extract_strided_slice %248 {offsets = [2, 0], sizes = [1, 1], strides = [1, 1]} : vector<4x1xf32> to vector<1x1xf32>
    %257 = arith.maximumf %255, %256 : vector<1x1xf32>
    %258 = vector.extract_strided_slice %248 {offsets = [3, 0], sizes = [1, 1], strides = [1, 1]} : vector<4x1xf32> to vector<1x1xf32>
    %259 = arith.maximumf %257, %258 : vector<1x1xf32>
    %260 = vector.broadcast %259 : vector<1x1xf32> to vector<4x1xf32>
    %261 = arith.subf %248, %260 : vector<4x1xf32>
    %262 = math.exp %261 : vector<4x1xf32>
    %263 = vector.extract_strided_slice %262 {offsets = [0, 0], sizes = [1, 1], strides = [1, 1]} : vector<4x1xf32> to vector<1x1xf32>
    %264 = vector.extract_strided_slice %262 {offsets = [1, 0], sizes = [1, 1], strides = [1, 1]} : vector<4x1xf32> to vector<1x1xf32>
    %265 = arith.addf %263, %264 : vector<1x1xf32>
    %266 = vector.extract_strided_slice %262 {offsets = [2, 0], sizes = [1, 1], strides = [1, 1]} : vector<4x1xf32> to vector<1x1xf32>
    %267 = arith.addf %265, %266 : vector<1x1xf32>
    %268 = vector.extract_strided_slice %262 {offsets = [3, 0], sizes = [1, 1], strides = [1, 1]} : vector<4x1xf32> to vector<1x1xf32>
    %269 = arith.addf %267, %268 : vector<1x1xf32>
    %270 = vector.broadcast %269 : vector<1x1xf32> to vector<4x1xf32>
    %271 = arith.divf %262, %270 : vector<4x1xf32>
    %272 = vector.extract_strided_slice %252 {offsets = [0, 0], sizes = [1, 1], strides = [1, 1]} : vector<4x1xf32> to vector<1x1xf32>
    %273 = vector.extract_strided_slice %252 {offsets = [1, 0], sizes = [1, 1], strides = [1, 1]} : vector<4x1xf32> to vector<1x1xf32>
    %274 = arith.maximumf %272, %273 : vector<1x1xf32>
    %275 = vector.extract_strided_slice %252 {offsets = [2, 0], sizes = [1, 1], strides = [1, 1]} : vector<4x1xf32> to vector<1x1xf32>
    %276 = arith.maximumf %274, %275 : vector<1x1xf32>
    %277 = vector.extract_strided_slice %252 {offsets = [3, 0], sizes = [1, 1], strides = [1, 1]} : vector<4x1xf32> to vector<1x1xf32>
    %278 = arith.maximumf %276, %277 : vector<1x1xf32>
    %279 = vector.broadcast %278 : vector<1x1xf32> to vector<4x1xf32>
    %280 = arith.subf %252, %279 : vector<4x1xf32>
    %281 = math.exp %280 : vector<4x1xf32>
    %282 = vector.extract_strided_slice %281 {offsets = [0, 0], sizes = [1, 1], strides = [1, 1]} : vector<4x1xf32> to vector<1x1xf32>
    %283 = vector.extract_strided_slice %281 {offsets = [1, 0], sizes = [1, 1], strides = [1, 1]} : vector<4x1xf32> to vector<1x1xf32>
    %284 = arith.addf %282, %283 : vector<1x1xf32>
    %285 = vector.extract_strided_slice %281 {offsets = [2, 0], sizes = [1, 1], strides = [1, 1]} : vector<4x1xf32> to vector<1x1xf32>
    %286 = arith.addf %284, %285 : vector<1x1xf32>
    %287 = vector.extract_strided_slice %281 {offsets = [3, 0], sizes = [1, 1], strides = [1, 1]} : vector<4x1xf32> to vector<1x1xf32>
    %288 = arith.addf %286, %287 : vector<1x1xf32>
    %289 = vector.broadcast %288 : vector<1x1xf32> to vector<4x1xf32>
    %290 = arith.divf %281, %289 : vector<4x1xf32>
    %291 = vector.broadcast %271 : vector<4x1xf32> to vector<4x256xf32>
    %292 = arith.mulf %291, %244 : vector<4x256xf32>
    %293 = vector.broadcast %290 : vector<4x1xf32> to vector<4x256xf32>
    %294 = arith.mulf %293, %241 : vector<4x256xf32>
    %295 = arith.addf %292, %294 : vector<4x256xf32>
    %296 = vector.extract_strided_slice %295 {offsets = [0, 0], sizes = [1, 256], strides = [1, 1]} : vector<4x256xf32> to vector<1x256xf32>
    %297 = vector.extract_strided_slice %295 {offsets = [1, 0], sizes = [1, 256], strides = [1, 1]} : vector<4x256xf32> to vector<1x256xf32>
    %298 = arith.addf %296, %297 : vector<1x256xf32>
    %299 = vector.extract_strided_slice %295 {offsets = [2, 0], sizes = [1, 256], strides = [1, 1]} : vector<4x256xf32> to vector<1x256xf32>
    %300 = arith.addf %298, %299 : vector<1x256xf32>
    %301 = vector.extract_strided_slice %295 {offsets = [3, 0], sizes = [1, 256], strides = [1, 1]} : vector<4x256xf32> to vector<1x256xf32>
    %302 = arith.addf %300, %301 : vector<1x256xf32>
    %303 = arith.negf %302 : vector<1x256xf32>
    %304 = math.exp %303 : vector<1x256xf32>
    %cst_39 = arith.constant 1.000000e+00 : f32
    %305 = vector.broadcast %cst_39 : f32 to vector<1x256xf32>
    %306 = arith.addf %305, %304 : vector<1x256xf32>
    %307 = arith.divf %305, %306 : vector<1x256xf32>
    %308 = vector.broadcast %307 : vector<1x256xf32> to vector<4x256xf32>
    %309 = arith.mulf %162, %308 : vector<4x256xf32>
    %c1_40 = arith.constant 1 : index
    %c0_41 = arith.constant 0 : index
    %c0_42 = arith.constant 0 : index
    %310 = vector.load %arg9[%c1_40, %c0_41, %c0_42] : memref<4x4x256xf32, #tpu.memory_space<vmem>>, vector<1x4x256xf32>
    %311 = vector.shape_cast %310 : vector<1x4x256xf32> to vector<4x256xf32>
    %312 = vector.shape_cast %309 : vector<4x256xf32> to vector<1x4x256xf32>
    tpu.vector_store %arg9[%c1_40, %c0_41, %c0_42], %312 {strides = array<i32>} : memref<4x4x256xf32, #tpu.memory_space<vmem>>, vector<1x4x256xf32>,
    %c2 = arith.constant 2 : index
    %c0_43 = arith.constant 0 : index
    %c0_44 = arith.constant 0 : index
    %313 = vector.load %arg1[%c2, %c0_43, %c0_44] : memref<4x4x256xf32, #tpu.memory_space<vmem>>, vector<1x4x256xf32>
    %314 = vector.shape_cast %313 : vector<1x4x256xf32> to vector<4x256xf32>
    %cst_45 = arith.constant dense<0.000000e+00> : vector<4xf32>
    %315 = vector.multi_reduction <add>, %314, %cst_45 [1] : vector<4x256xf32> to vector<4xf32>
    %316 = vector.shape_cast %315 : vector<4xf32> to vector<4x1xf32>
    %cst_46 = arith.constant 2.560000e+02 : f32
    %317 = vector.broadcast %cst_46 : f32 to vector<4x1xf32>
    %318 = arith.divf %316, %317 : vector<4x1xf32>
    %cst_47 = arith.constant dense<0xFF800000> : vector<4xf32>
    %319 = vector.multi_reduction <maximumf>, %314, %cst_47 [1] : vector<4x256xf32> to vector<4xf32>
    %320 = vector.shape_cast %319 : vector<4xf32> to vector<4x1xf32>
    %321 = vector.extract_strided_slice %4 {offsets = [0, 0], sizes = [4, 1], strides = [1, 1]} : vector<4x8xf32> to vector<4x1xf32>
    %322 = vector.extract_strided_slice %318 {offsets = [0, 0], sizes = [1, 1], strides = [1, 1]} : vector<4x1xf32> to vector<1x1xf32>
    %323 = vector.broadcast %322 : vector<1x1xf32> to vector<4x1xf32>
    %324 = arith.mulf %321, %323 : vector<4x1xf32>
    %325 = arith.addf %5, %324 : vector<4x1xf32>
    %326 = vector.extract_strided_slice %4 {offsets = [0, 4], sizes = [4, 1], strides = [1, 1]} : vector<4x8xf32> to vector<4x1xf32>
    %327 = vector.extract_strided_slice %320 {offsets = [0, 0], sizes = [1, 1], strides = [1, 1]} : vector<4x1xf32> to vector<1x1xf32>
    %328 = vector.broadcast %327 : vector<1x1xf32> to vector<4x1xf32>
    %329 = arith.mulf %326, %328 : vector<4x1xf32>
    %330 = arith.addf %325, %329 : vector<4x1xf32>
    %331 = vector.extract_strided_slice %4 {offsets = [0, 1], sizes = [4, 1], strides = [1, 1]} : vector<4x8xf32> to vector<4x1xf32>
    %332 = vector.extract_strided_slice %318 {offsets = [1, 0], sizes = [1, 1], strides = [1, 1]} : vector<4x1xf32> to vector<1x1xf32>
    %333 = vector.broadcast %332 : vector<1x1xf32> to vector<4x1xf32>
    %334 = arith.mulf %331, %333 : vector<4x1xf32>
    %335 = arith.addf %330, %334 : vector<4x1xf32>
    %336 = vector.extract_strided_slice %4 {offsets = [0, 5], sizes = [4, 1], strides = [1, 1]} : vector<4x8xf32> to vector<4x1xf32>
    %337 = vector.extract_strided_slice %320 {offsets = [1, 0], sizes = [1, 1], strides = [1, 1]} : vector<4x1xf32> to vector<1x1xf32>
    %338 = vector.broadcast %337 : vector<1x1xf32> to vector<4x1xf32>
    %339 = arith.mulf %336, %338 : vector<4x1xf32>
    %340 = arith.addf %335, %339 : vector<4x1xf32>
    %341 = vector.extract_strided_slice %4 {offsets = [0, 2], sizes = [4, 1], strides = [1, 1]} : vector<4x8xf32> to vector<4x1xf32>
    %342 = vector.extract_strided_slice %318 {offsets = [2, 0], sizes = [1, 1], strides = [1, 1]} : vector<4x1xf32> to vector<1x1xf32>
    %343 = vector.broadcast %342 : vector<1x1xf32> to vector<4x1xf32>
    %344 = arith.mulf %341, %343 : vector<4x1xf32>
    %345 = arith.addf %340, %344 : vector<4x1xf32>
    %346 = vector.extract_strided_slice %4 {offsets = [0, 6], sizes = [4, 1], strides = [1, 1]} : vector<4x8xf32> to vector<4x1xf32>
    %347 = vector.extract_strided_slice %320 {offsets = [2, 0], sizes = [1, 1], strides = [1, 1]} : vector<4x1xf32> to vector<1x1xf32>
    %348 = vector.broadcast %347 : vector<1x1xf32> to vector<4x1xf32>
    %349 = arith.mulf %346, %348 : vector<4x1xf32>
    %350 = arith.addf %345, %349 : vector<4x1xf32>
    %351 = vector.extract_strided_slice %4 {offsets = [0, 3], sizes = [4, 1], strides = [1, 1]} : vector<4x8xf32> to vector<4x1xf32>
    %352 = vector.extract_strided_slice %318 {offsets = [3, 0], sizes = [1, 1], strides = [1, 1]} : vector<4x1xf32> to vector<1x1xf32>
    %353 = vector.broadcast %352 : vector<1x1xf32> to vector<4x1xf32>
    %354 = arith.mulf %351, %353 : vector<4x1xf32>
    %355 = arith.addf %350, %354 : vector<4x1xf32>
    %356 = vector.extract_strided_slice %4 {offsets = [0, 7], sizes = [4, 1], strides = [1, 1]} : vector<4x8xf32> to vector<4x1xf32>
    %357 = vector.extract_strided_slice %320 {offsets = [3, 0], sizes = [1, 1], strides = [1, 1]} : vector<4x1xf32> to vector<1x1xf32>
    %358 = vector.broadcast %357 : vector<1x1xf32> to vector<4x1xf32>
    %359 = arith.mulf %356, %358 : vector<4x1xf32>
    %360 = arith.addf %355, %359 : vector<4x1xf32>
    %361 = arith.negf %360 : vector<4x1xf32>
    %362 = math.exp %361 : vector<4x1xf32>
    %cst_48 = arith.constant 1.000000e+00 : f32
    %363 = vector.broadcast %cst_48 : f32 to vector<4x1xf32>
    %364 = arith.addf %363, %362 : vector<4x1xf32>
    %365 = arith.divf %363, %364 : vector<4x1xf32>
    %366 = vector.broadcast %365 : vector<4x1xf32> to vector<4x256xf32>
    %367 = arith.mulf %314, %366 : vector<4x256xf32>
    %368 = vector.extract_strided_slice %6 {offsets = [0, 0], sizes = [4, 1], strides = [1, 1]} : vector<4x4xf32> to vector<4x1xf32>
    %369 = vector.extract_strided_slice %367 {offsets = [0, 0], sizes = [1, 256], strides = [1, 1]} : vector<4x256xf32> to vector<1x256xf32>
    %370 = vector.broadcast %368 : vector<4x1xf32> to vector<4x256xf32>
    %371 = vector.broadcast %369 : vector<1x256xf32> to vector<4x256xf32>
    %372 = arith.mulf %370, %371 : vector<4x256xf32>
    %373 = vector.extract_strided_slice %6 {offsets = [0, 1], sizes = [4, 1], strides = [1, 1]} : vector<4x4xf32> to vector<4x1xf32>
    %374 = vector.extract_strided_slice %367 {offsets = [1, 0], sizes = [1, 256], strides = [1, 1]} : vector<4x256xf32> to vector<1x256xf32>
    %375 = vector.broadcast %373 : vector<4x1xf32> to vector<4x256xf32>
    %376 = vector.broadcast %374 : vector<1x256xf32> to vector<4x256xf32>
    %377 = arith.mulf %375, %376 : vector<4x256xf32>
    %378 = arith.addf %372, %377 : vector<4x256xf32>
    %379 = vector.extract_strided_slice %6 {offsets = [0, 2], sizes = [4, 1], strides = [1, 1]} : vector<4x4xf32> to vector<4x1xf32>
    %380 = vector.extract_strided_slice %367 {offsets = [2, 0], sizes = [1, 256], strides = [1, 1]} : vector<4x256xf32> to vector<1x256xf32>
    %381 = vector.broadcast %379 : vector<4x1xf32> to vector<4x256xf32>
    %382 = vector.broadcast %380 : vector<1x256xf32> to vector<4x256xf32>
    %383 = arith.mulf %381, %382 : vector<4x256xf32>
    %384 = arith.addf %378, %383 : vector<4x256xf32>
    %385 = vector.extract_strided_slice %6 {offsets = [0, 3], sizes = [4, 1], strides = [1, 1]} : vector<4x4xf32> to vector<4x1xf32>
    %386 = vector.extract_strided_slice %367 {offsets = [3, 0], sizes = [1, 256], strides = [1, 1]} : vector<4x256xf32> to vector<1x256xf32>
    %387 = vector.broadcast %385 : vector<4x1xf32> to vector<4x256xf32>
    %388 = vector.broadcast %386 : vector<1x256xf32> to vector<4x256xf32>
    %389 = arith.mulf %387, %388 : vector<4x256xf32>
    %390 = arith.addf %384, %389 : vector<4x256xf32>
    %391 = arith.addf %367, %390 : vector<4x256xf32>
    %392 = vector.broadcast %7 : vector<4x1xf32> to vector<4x256xf32>
    %393 = arith.addf %391, %392 : vector<4x256xf32>
    %394 = vector.extract_strided_slice %3 {offsets = [0, 512], sizes = [4, 256], strides = [1, 1]} : vector<8x1024xf32> to vector<4x256xf32>
    %395 = vector.broadcast %8 : vector<4x1xf32> to vector<4x256xf32>
    %396 = arith.addf %394, %395 : vector<4x256xf32>
    %cst_49 = arith.constant dense<0.000000e+00> : vector<4xf32>
    %397 = vector.multi_reduction <add>, %393, %cst_49 [1] : vector<4x256xf32> to vector<4xf32>
    %398 = vector.shape_cast %397 : vector<4xf32> to vector<4x1xf32>
    %cst_50 = arith.constant 2.560000e+02 : f32
    %399 = vector.broadcast %cst_50 : f32 to vector<4x1xf32>
    %400 = arith.divf %398, %399 : vector<4x1xf32>
    %cst_51 = arith.constant dense<0.000000e+00> : vector<4xf32>
    %401 = vector.multi_reduction <add>, %396, %cst_51 [1] : vector<4x256xf32> to vector<4xf32>
    %402 = vector.shape_cast %401 : vector<4xf32> to vector<4x1xf32>
    %cst_52 = arith.constant 2.560000e+02 : f32
    %403 = vector.broadcast %cst_52 : f32 to vector<4x1xf32>
    %404 = arith.divf %402, %403 : vector<4x1xf32>
    %405 = vector.extract_strided_slice %400 {offsets = [0, 0], sizes = [1, 1], strides = [1, 1]} : vector<4x1xf32> to vector<1x1xf32>
    %406 = vector.extract_strided_slice %400 {offsets = [1, 0], sizes = [1, 1], strides = [1, 1]} : vector<4x1xf32> to vector<1x1xf32>
    %407 = arith.maximumf %405, %406 : vector<1x1xf32>
    %408 = vector.extract_strided_slice %400 {offsets = [2, 0], sizes = [1, 1], strides = [1, 1]} : vector<4x1xf32> to vector<1x1xf32>
    %409 = arith.maximumf %407, %408 : vector<1x1xf32>
    %410 = vector.extract_strided_slice %400 {offsets = [3, 0], sizes = [1, 1], strides = [1, 1]} : vector<4x1xf32> to vector<1x1xf32>
    %411 = arith.maximumf %409, %410 : vector<1x1xf32>
    %412 = vector.broadcast %411 : vector<1x1xf32> to vector<4x1xf32>
    %413 = arith.subf %400, %412 : vector<4x1xf32>
    %414 = math.exp %413 : vector<4x1xf32>
    %415 = vector.extract_strided_slice %414 {offsets = [0, 0], sizes = [1, 1], strides = [1, 1]} : vector<4x1xf32> to vector<1x1xf32>
    %416 = vector.extract_strided_slice %414 {offsets = [1, 0], sizes = [1, 1], strides = [1, 1]} : vector<4x1xf32> to vector<1x1xf32>
    %417 = arith.addf %415, %416 : vector<1x1xf32>
    %418 = vector.extract_strided_slice %414 {offsets = [2, 0], sizes = [1, 1], strides = [1, 1]} : vector<4x1xf32> to vector<1x1xf32>
    %419 = arith.addf %417, %418 : vector<1x1xf32>
    %420 = vector.extract_strided_slice %414 {offsets = [3, 0], sizes = [1, 1], strides = [1, 1]} : vector<4x1xf32> to vector<1x1xf32>
    %421 = arith.addf %419, %420 : vector<1x1xf32>
    %422 = vector.broadcast %421 : vector<1x1xf32> to vector<4x1xf32>
    %423 = arith.divf %414, %422 : vector<4x1xf32>
    %424 = vector.extract_strided_slice %404 {offsets = [0, 0], sizes = [1, 1], strides = [1, 1]} : vector<4x1xf32> to vector<1x1xf32>
    %425 = vector.extract_strided_slice %404 {offsets = [1, 0], sizes = [1, 1], strides = [1, 1]} : vector<4x1xf32> to vector<1x1xf32>
    %426 = arith.maximumf %424, %425 : vector<1x1xf32>
    %427 = vector.extract_strided_slice %404 {offsets = [2, 0], sizes = [1, 1], strides = [1, 1]} : vector<4x1xf32> to vector<1x1xf32>
    %428 = arith.maximumf %426, %427 : vector<1x1xf32>
    %429 = vector.extract_strided_slice %404 {offsets = [3, 0], sizes = [1, 1], strides = [1, 1]} : vector<4x1xf32> to vector<1x1xf32>
    %430 = arith.maximumf %428, %429 : vector<1x1xf32>
    %431 = vector.broadcast %430 : vector<1x1xf32> to vector<4x1xf32>
    %432 = arith.subf %404, %431 : vector<4x1xf32>
    %433 = math.exp %432 : vector<4x1xf32>
    %434 = vector.extract_strided_slice %433 {offsets = [0, 0], sizes = [1, 1], strides = [1, 1]} : vector<4x1xf32> to vector<1x1xf32>
    %435 = vector.extract_strided_slice %433 {offsets = [1, 0], sizes = [1, 1], strides = [1, 1]} : vector<4x1xf32> to vector<1x1xf32>
    %436 = arith.addf %434, %435 : vector<1x1xf32>
    %437 = vector.extract_strided_slice %433 {offsets = [2, 0], sizes = [1, 1], strides = [1, 1]} : vector<4x1xf32> to vector<1x1xf32>
    %438 = arith.addf %436, %437 : vector<1x1xf32>
    %439 = vector.extract_strided_slice %433 {offsets = [3, 0], sizes = [1, 1], strides = [1, 1]} : vector<4x1xf32> to vector<1x1xf32>
    %440 = arith.addf %438, %439 : vector<1x1xf32>
    %441 = vector.broadcast %440 : vector<1x1xf32> to vector<4x1xf32>
    %442 = arith.divf %433, %441 : vector<4x1xf32>
    %443 = vector.broadcast %423 : vector<4x1xf32> to vector<4x256xf32>
    %444 = arith.mulf %443, %396 : vector<4x256xf32>
    %445 = vector.broadcast %442 : vector<4x1xf32> to vector<4x256xf32>
    %446 = arith.mulf %445, %393 : vector<4x256xf32>
    %447 = arith.addf %444, %446 : vector<4x256xf32>
    %448 = vector.extract_strided_slice %447 {offsets = [0, 0], sizes = [1, 256], strides = [1, 1]} : vector<4x256xf32> to vector<1x256xf32>
    %449 = vector.extract_strided_slice %447 {offsets = [1, 0], sizes = [1, 256], strides = [1, 1]} : vector<4x256xf32> to vector<1x256xf32>
    %450 = arith.addf %448, %449 : vector<1x256xf32>
    %451 = vector.extract_strided_slice %447 {offsets = [2, 0], sizes = [1, 256], strides = [1, 1]} : vector<4x256xf32> to vector<1x256xf32>
    %452 = arith.addf %450, %451 : vector<1x256xf32>
    %453 = vector.extract_strided_slice %447 {offsets = [3, 0], sizes = [1, 256], strides = [1, 1]} : vector<4x256xf32> to vector<1x256xf32>
    %454 = arith.addf %452, %453 : vector<1x256xf32>
    %455 = arith.negf %454 : vector<1x256xf32>
    %456 = math.exp %455 : vector<1x256xf32>
    %cst_53 = arith.constant 1.000000e+00 : f32
    %457 = vector.broadcast %cst_53 : f32 to vector<1x256xf32>
    %458 = arith.addf %457, %456 : vector<1x256xf32>
    %459 = arith.divf %457, %458 : vector<1x256xf32>
    %460 = vector.broadcast %459 : vector<1x256xf32> to vector<4x256xf32>
    %461 = arith.mulf %314, %460 : vector<4x256xf32>
    %c2_54 = arith.constant 2 : index
    %c0_55 = arith.constant 0 : index
    %c0_56 = arith.constant 0 : index
    %462 = vector.load %arg9[%c2_54, %c0_55, %c0_56] : memref<4x4x256xf32, #tpu.memory_space<vmem>>, vector<1x4x256xf32>
    %463 = vector.shape_cast %462 : vector<1x4x256xf32> to vector<4x256xf32>
    %464 = vector.shape_cast %461 : vector<4x256xf32> to vector<1x4x256xf32>
    tpu.vector_store %arg9[%c2_54, %c0_55, %c0_56], %464 {strides = array<i32>} : memref<4x4x256xf32, #tpu.memory_space<vmem>>, vector<1x4x256xf32>,
    %c3 = arith.constant 3 : index
    %c0_57 = arith.constant 0 : index
    %c0_58 = arith.constant 0 : index
    %465 = vector.load %arg1[%c3, %c0_57, %c0_58] : memref<4x4x256xf32, #tpu.memory_space<vmem>>, vector<1x4x256xf32>
    %466 = vector.shape_cast %465 : vector<1x4x256xf32> to vector<4x256xf32>
    %cst_59 = arith.constant dense<0.000000e+00> : vector<4xf32>
    %467 = vector.multi_reduction <add>, %466, %cst_59 [1] : vector<4x256xf32> to vector<4xf32>
    %468 = vector.shape_cast %467 : vector<4xf32> to vector<4x1xf32>
    %cst_60 = arith.constant 2.560000e+02 : f32
    %469 = vector.broadcast %cst_60 : f32 to vector<4x1xf32>
    %470 = arith.divf %468, %469 : vector<4x1xf32>
    %cst_61 = arith.constant dense<0xFF800000> : vector<4xf32>
    %471 = vector.multi_reduction <maximumf>, %466, %cst_61 [1] : vector<4x256xf32> to vector<4xf32>
    %472 = vector.shape_cast %471 : vector<4xf32> to vector<4x1xf32>
    %473 = vector.extract_strided_slice %4 {offsets = [0, 0], sizes = [4, 1], strides = [1, 1]} : vector<4x8xf32> to vector<4x1xf32>
    %474 = vector.extract_strided_slice %470 {offsets = [0, 0], sizes = [1, 1], strides = [1, 1]} : vector<4x1xf32> to vector<1x1xf32>
    %475 = vector.broadcast %474 : vector<1x1xf32> to vector<4x1xf32>
    %476 = arith.mulf %473, %475 : vector<4x1xf32>
    %477 = arith.addf %5, %476 : vector<4x1xf32>
    %478 = vector.extract_strided_slice %4 {offsets = [0, 4], sizes = [4, 1], strides = [1, 1]} : vector<4x8xf32> to vector<4x1xf32>
    %479 = vector.extract_strided_slice %472 {offsets = [0, 0], sizes = [1, 1], strides = [1, 1]} : vector<4x1xf32> to vector<1x1xf32>
    %480 = vector.broadcast %479 : vector<1x1xf32> to vector<4x1xf32>
    %481 = arith.mulf %478, %480 : vector<4x1xf32>
    %482 = arith.addf %477, %481 : vector<4x1xf32>
    %483 = vector.extract_strided_slice %4 {offsets = [0, 1], sizes = [4, 1], strides = [1, 1]} : vector<4x8xf32> to vector<4x1xf32>
    %484 = vector.extract_strided_slice %470 {offsets = [1, 0], sizes = [1, 1], strides = [1, 1]} : vector<4x1xf32> to vector<1x1xf32>
    %485 = vector.broadcast %484 : vector<1x1xf32> to vector<4x1xf32>
    %486 = arith.mulf %483, %485 : vector<4x1xf32>
    %487 = arith.addf %482, %486 : vector<4x1xf32>
    %488 = vector.extract_strided_slice %4 {offsets = [0, 5], sizes = [4, 1], strides = [1, 1]} : vector<4x8xf32> to vector<4x1xf32>
    %489 = vector.extract_strided_slice %472 {offsets = [1, 0], sizes = [1, 1], strides = [1, 1]} : vector<4x1xf32> to vector<1x1xf32>
    %490 = vector.broadcast %489 : vector<1x1xf32> to vector<4x1xf32>
    %491 = arith.mulf %488, %490 : vector<4x1xf32>
    %492 = arith.addf %487, %491 : vector<4x1xf32>
    %493 = vector.extract_strided_slice %4 {offsets = [0, 2], sizes = [4, 1], strides = [1, 1]} : vector<4x8xf32> to vector<4x1xf32>
    %494 = vector.extract_strided_slice %470 {offsets = [2, 0], sizes = [1, 1], strides = [1, 1]} : vector<4x1xf32> to vector<1x1xf32>
    %495 = vector.broadcast %494 : vector<1x1xf32> to vector<4x1xf32>
    %496 = arith.mulf %493, %495 : vector<4x1xf32>
    %497 = arith.addf %492, %496 : vector<4x1xf32>
    %498 = vector.extract_strided_slice %4 {offsets = [0, 6], sizes = [4, 1], strides = [1, 1]} : vector<4x8xf32> to vector<4x1xf32>
    %499 = vector.extract_strided_slice %472 {offsets = [2, 0], sizes = [1, 1], strides = [1, 1]} : vector<4x1xf32> to vector<1x1xf32>
    %500 = vector.broadcast %499 : vector<1x1xf32> to vector<4x1xf32>
    %501 = arith.mulf %498, %500 : vector<4x1xf32>
    %502 = arith.addf %497, %501 : vector<4x1xf32>
    %503 = vector.extract_strided_slice %4 {offsets = [0, 3], sizes = [4, 1], strides = [1, 1]} : vector<4x8xf32> to vector<4x1xf32>
    %504 = vector.extract_strided_slice %470 {offsets = [3, 0], sizes = [1, 1], strides = [1, 1]} : vector<4x1xf32> to vector<1x1xf32>
    %505 = vector.broadcast %504 : vector<1x1xf32> to vector<4x1xf32>
    %506 = arith.mulf %503, %505 : vector<4x1xf32>
    %507 = arith.addf %502, %506 : vector<4x1xf32>
    %508 = vector.extract_strided_slice %4 {offsets = [0, 7], sizes = [4, 1], strides = [1, 1]} : vector<4x8xf32> to vector<4x1xf32>
    %509 = vector.extract_strided_slice %472 {offsets = [3, 0], sizes = [1, 1], strides = [1, 1]} : vector<4x1xf32> to vector<1x1xf32>
    %510 = vector.broadcast %509 : vector<1x1xf32> to vector<4x1xf32>
    %511 = arith.mulf %508, %510 : vector<4x1xf32>
    %512 = arith.addf %507, %511 : vector<4x1xf32>
    %513 = arith.negf %512 : vector<4x1xf32>
    %514 = math.exp %513 : vector<4x1xf32>
    %cst_62 = arith.constant 1.000000e+00 : f32
    %515 = vector.broadcast %cst_62 : f32 to vector<4x1xf32>
    %516 = arith.addf %515, %514 : vector<4x1xf32>
    %517 = arith.divf %515, %516 : vector<4x1xf32>
    %518 = vector.broadcast %517 : vector<4x1xf32> to vector<4x256xf32>
    %519 = arith.mulf %466, %518 : vector<4x256xf32>
    %520 = vector.extract_strided_slice %6 {offsets = [0, 0], sizes = [4, 1], strides = [1, 1]} : vector<4x4xf32> to vector<4x1xf32>
    %521 = vector.extract_strided_slice %519 {offsets = [0, 0], sizes = [1, 256], strides = [1, 1]} : vector<4x256xf32> to vector<1x256xf32>
    %522 = vector.broadcast %520 : vector<4x1xf32> to vector<4x256xf32>
    %523 = vector.broadcast %521 : vector<1x256xf32> to vector<4x256xf32>
    %524 = arith.mulf %522, %523 : vector<4x256xf32>
    %525 = vector.extract_strided_slice %6 {offsets = [0, 1], sizes = [4, 1], strides = [1, 1]} : vector<4x4xf32> to vector<4x1xf32>
    %526 = vector.extract_strided_slice %519 {offsets = [1, 0], sizes = [1, 256], strides = [1, 1]} : vector<4x256xf32> to vector<1x256xf32>
    %527 = vector.broadcast %525 : vector<4x1xf32> to vector<4x256xf32>
    %528 = vector.broadcast %526 : vector<1x256xf32> to vector<4x256xf32>
    %529 = arith.mulf %527, %528 : vector<4x256xf32>
    %530 = arith.addf %524, %529 : vector<4x256xf32>
    %531 = vector.extract_strided_slice %6 {offsets = [0, 2], sizes = [4, 1], strides = [1, 1]} : vector<4x4xf32> to vector<4x1xf32>
    %532 = vector.extract_strided_slice %519 {offsets = [2, 0], sizes = [1, 256], strides = [1, 1]} : vector<4x256xf32> to vector<1x256xf32>
    %533 = vector.broadcast %531 : vector<4x1xf32> to vector<4x256xf32>
    %534 = vector.broadcast %532 : vector<1x256xf32> to vector<4x256xf32>
    %535 = arith.mulf %533, %534 : vector<4x256xf32>
    %536 = arith.addf %530, %535 : vector<4x256xf32>
    %537 = vector.extract_strided_slice %6 {offsets = [0, 3], sizes = [4, 1], strides = [1, 1]} : vector<4x4xf32> to vector<4x1xf32>
    %538 = vector.extract_strided_slice %519 {offsets = [3, 0], sizes = [1, 256], strides = [1, 1]} : vector<4x256xf32> to vector<1x256xf32>
    %539 = vector.broadcast %537 : vector<4x1xf32> to vector<4x256xf32>
    %540 = vector.broadcast %538 : vector<1x256xf32> to vector<4x256xf32>
    %541 = arith.mulf %539, %540 : vector<4x256xf32>
    %542 = arith.addf %536, %541 : vector<4x256xf32>
    %543 = arith.addf %519, %542 : vector<4x256xf32>
    %544 = vector.broadcast %7 : vector<4x1xf32> to vector<4x256xf32>
    %545 = arith.addf %543, %544 : vector<4x256xf32>
    %546 = vector.extract_strided_slice %3 {offsets = [0, 768], sizes = [4, 256], strides = [1, 1]} : vector<8x1024xf32> to vector<4x256xf32>
    %547 = vector.broadcast %8 : vector<4x1xf32> to vector<4x256xf32>
    %548 = arith.addf %546, %547 : vector<4x256xf32>
    %cst_63 = arith.constant dense<0.000000e+00> : vector<4xf32>
    %549 = vector.multi_reduction <add>, %545, %cst_63 [1] : vector<4x256xf32> to vector<4xf32>
    %550 = vector.shape_cast %549 : vector<4xf32> to vector<4x1xf32>
    %cst_64 = arith.constant 2.560000e+02 : f32
    %551 = vector.broadcast %cst_64 : f32 to vector<4x1xf32>
    %552 = arith.divf %550, %551 : vector<4x1xf32>
    %cst_65 = arith.constant dense<0.000000e+00> : vector<4xf32>
    %553 = vector.multi_reduction <add>, %548, %cst_65 [1] : vector<4x256xf32> to vector<4xf32>
    %554 = vector.shape_cast %553 : vector<4xf32> to vector<4x1xf32>
    %cst_66 = arith.constant 2.560000e+02 : f32
    %555 = vector.broadcast %cst_66 : f32 to vector<4x1xf32>
    %556 = arith.divf %554, %555 : vector<4x1xf32>
    %557 = vector.extract_strided_slice %552 {offsets = [0, 0], sizes = [1, 1], strides = [1, 1]} : vector<4x1xf32> to vector<1x1xf32>
    %558 = vector.extract_strided_slice %552 {offsets = [1, 0], sizes = [1, 1], strides = [1, 1]} : vector<4x1xf32> to vector<1x1xf32>
    %559 = arith.maximumf %557, %558 : vector<1x1xf32>
    %560 = vector.extract_strided_slice %552 {offsets = [2, 0], sizes = [1, 1], strides = [1, 1]} : vector<4x1xf32> to vector<1x1xf32>
    %561 = arith.maximumf %559, %560 : vector<1x1xf32>
    %562 = vector.extract_strided_slice %552 {offsets = [3, 0], sizes = [1, 1], strides = [1, 1]} : vector<4x1xf32> to vector<1x1xf32>
    %563 = arith.maximumf %561, %562 : vector<1x1xf32>
    %564 = vector.broadcast %563 : vector<1x1xf32> to vector<4x1xf32>
    %565 = arith.subf %552, %564 : vector<4x1xf32>
    %566 = math.exp %565 : vector<4x1xf32>
    %567 = vector.extract_strided_slice %566 {offsets = [0, 0], sizes = [1, 1], strides = [1, 1]} : vector<4x1xf32> to vector<1x1xf32>
    %568 = vector.extract_strided_slice %566 {offsets = [1, 0], sizes = [1, 1], strides = [1, 1]} : vector<4x1xf32> to vector<1x1xf32>
    %569 = arith.addf %567, %568 : vector<1x1xf32>
    %570 = vector.extract_strided_slice %566 {offsets = [2, 0], sizes = [1, 1], strides = [1, 1]} : vector<4x1xf32> to vector<1x1xf32>
    %571 = arith.addf %569, %570 : vector<1x1xf32>
    %572 = vector.extract_strided_slice %566 {offsets = [3, 0], sizes = [1, 1], strides = [1, 1]} : vector<4x1xf32> to vector<1x1xf32>
    %573 = arith.addf %571, %572 : vector<1x1xf32>
    %574 = vector.broadcast %573 : vector<1x1xf32> to vector<4x1xf32>
    %575 = arith.divf %566, %574 : vector<4x1xf32>
    %576 = vector.extract_strided_slice %556 {offsets = [0, 0], sizes = [1, 1], strides = [1, 1]} : vector<4x1xf32> to vector<1x1xf32>
    %577 = vector.extract_strided_slice %556 {offsets = [1, 0], sizes = [1, 1], strides = [1, 1]} : vector<4x1xf32> to vector<1x1xf32>
    %578 = arith.maximumf %576, %577 : vector<1x1xf32>
    %579 = vector.extract_strided_slice %556 {offsets = [2, 0], sizes = [1, 1], strides = [1, 1]} : vector<4x1xf32> to vector<1x1xf32>
    %580 = arith.maximumf %578, %579 : vector<1x1xf32>
    %581 = vector.extract_strided_slice %556 {offsets = [3, 0], sizes = [1, 1], strides = [1, 1]} : vector<4x1xf32> to vector<1x1xf32>
    %582 = arith.maximumf %580, %581 : vector<1x1xf32>
    %583 = vector.broadcast %582 : vector<1x1xf32> to vector<4x1xf32>
    %584 = arith.subf %556, %583 : vector<4x1xf32>
    %585 = math.exp %584 : vector<4x1xf32>
    %586 = vector.extract_strided_slice %585 {offsets = [0, 0], sizes = [1, 1], strides = [1, 1]} : vector<4x1xf32> to vector<1x1xf32>
    %587 = vector.extract_strided_slice %585 {offsets = [1, 0], sizes = [1, 1], strides = [1, 1]} : vector<4x1xf32> to vector<1x1xf32>
    %588 = arith.addf %586, %587 : vector<1x1xf32>
    %589 = vector.extract_strided_slice %585 {offsets = [2, 0], sizes = [1, 1], strides = [1, 1]} : vector<4x1xf32> to vector<1x1xf32>
    %590 = arith.addf %588, %589 : vector<1x1xf32>
    %591 = vector.extract_strided_slice %585 {offsets = [3, 0], sizes = [1, 1], strides = [1, 1]} : vector<4x1xf32> to vector<1x1xf32>
    %592 = arith.addf %590, %591 : vector<1x1xf32>
    %593 = vector.broadcast %592 : vector<1x1xf32> to vector<4x1xf32>
    %594 = arith.divf %585, %593 : vector<4x1xf32>
    %595 = vector.broadcast %575 : vector<4x1xf32> to vector<4x256xf32>
    %596 = arith.mulf %595, %548 : vector<4x256xf32>
    %597 = vector.broadcast %594 : vector<4x1xf32> to vector<4x256xf32>
    %598 = arith.mulf %597, %545 : vector<4x256xf32>
    %599 = arith.addf %596, %598 : vector<4x256xf32>
    %600 = vector.extract_strided_slice %599 {offsets = [0, 0], sizes = [1, 256], strides = [1, 1]} : vector<4x256xf32> to vector<1x256xf32>
    %601 = vector.extract_strided_slice %599 {offsets = [1, 0], sizes = [1, 256], strides = [1, 1]} : vector<4x256xf32> to vector<1x256xf32>
    %602 = arith.addf %600, %601 : vector<1x256xf32>
    %603 = vector.extract_strided_slice %599 {offsets = [2, 0], sizes = [1, 256], strides = [1, 1]} : vector<4x256xf32> to vector<1x256xf32>
    %604 = arith.addf %602, %603 : vector<1x256xf32>
    %605 = vector.extract_strided_slice %599 {offsets = [3, 0], sizes = [1, 256], strides = [1, 1]} : vector<4x256xf32> to vector<1x256xf32>
    %606 = arith.addf %604, %605 : vector<1x256xf32>
    %607 = arith.negf %606 : vector<1x256xf32>
    %608 = math.exp %607 : vector<1x256xf32>
    %cst_67 = arith.constant 1.000000e+00 : f32
    %609 = vector.broadcast %cst_67 : f32 to vector<1x256xf32>
    %610 = arith.addf %609, %608 : vector<1x256xf32>
    %611 = arith.divf %609, %610 : vector<1x256xf32>
    %612 = vector.broadcast %611 : vector<1x256xf32> to vector<4x256xf32>
    %613 = arith.mulf %466, %612 : vector<4x256xf32>
    %c3_68 = arith.constant 3 : index
    %c0_69 = arith.constant 0 : index
    %c0_70 = arith.constant 0 : index
    %614 = vector.load %arg9[%c3_68, %c0_69, %c0_70] : memref<4x4x256xf32, #tpu.memory_space<vmem>>, vector<1x4x256xf32>
    %615 = vector.shape_cast %614 : vector<1x4x256xf32> to vector<4x256xf32>
    %616 = vector.shape_cast %613 : vector<4x256xf32> to vector<1x4x256xf32>
    tpu.vector_store %arg9[%c3_68, %c0_69, %c0_70], %616 {strides = array<i32>} : memref<4x4x256xf32, #tpu.memory_space<vmem>>, vector<1x4x256xf32>,
    return
  }
  func.func @transform_0(%arg0: i32) -> (i32, i32, i32) {
    %c0_i32 = arith.constant 0 : i32
    %c0_i32_0 = arith.constant 0 : i32
    %c0_i32_1 = arith.constant 0 : i32
    return %arg0, %c0_i32, %c0_i32_0 : i32, i32, i32
  }
  func.func @transform_1(%arg0: i32) -> (i32, i32, i32) {
    %c0_i32 = arith.constant 0 : i32
    %c0_i32_0 = arith.constant 0 : i32
    %c0_i32_1 = arith.constant 0 : i32
    return %arg0, %c0_i32, %c0_i32_0 : i32, i32, i32
  }
  func.func @transform_2(%arg0: i32) -> (i32, i32) {
    %c0_i32 = arith.constant 0 : i32
    %c0_i32_0 = arith.constant 0 : i32
    %c0_i32_1 = arith.constant 0 : i32
    return %c0_i32, %c0_i32_0 : i32, i32
  }
  func.func @transform_3(%arg0: i32) -> (i32, i32) {
    %c0_i32 = arith.constant 0 : i32
    %c0_i32_0 = arith.constant 0 : i32
    %c0_i32_1 = arith.constant 0 : i32
    return %c0_i32, %c0_i32_0 : i32, i32
  }
  func.func @transform_4(%arg0: i32) -> (i32, i32) {
    %c0_i32 = arith.constant 0 : i32
    %c0_i32_0 = arith.constant 0 : i32
    %c0_i32_1 = arith.constant 0 : i32
    return %c0_i32, %c0_i32_0 : i32, i32
  }
  func.func @transform_5(%arg0: i32) -> (i32, i32) {
    %c0_i32 = arith.constant 0 : i32
    %c0_i32_0 = arith.constant 0 : i32
    %c0_i32_1 = arith.constant 0 : i32
    return %c0_i32, %c0_i32_0 : i32, i32
  }
  func.func @transform_6(%arg0: i32) -> (i32, i32) {
    %c0_i32 = arith.constant 0 : i32
    %c0_i32_0 = arith.constant 0 : i32
    %c0_i32_1 = arith.constant 0 : i32
    return %c0_i32, %c0_i32_0 : i32, i32
  }
  func.func @transform_7(%arg0: i32) -> (i32, i32) {
    %c0_i32 = arith.constant 0 : i32
    %c0_i32_0 = arith.constant 0 : i32
    %c0_i32_1 = arith.constant 0 : i32
    return %c0_i32, %c0_i32_0 : i32, i32
  }
  func.func @transform_8(%arg0: i32) -> (i32, i32, i32) {
    %c0_i32 = arith.constant 0 : i32
    %c0_i32_0 = arith.constant 0 : i32
    %c0_i32_1 = arith.constant 0 : i32
    return %arg0, %c0_i32, %c0_i32_0 : i32, i32, i32
  }
}

</mosaic_0001>

<bundles_post_ra>
// kernel: tpu_custom_call.1
= control target key start
LH: loop header
LB: loop body
LE: loop exit
PB: predicated region body
PF: predicated region fallthrough
CT: control target
= control target key end

     0   :  { %s13174_s0 = inlined_call_operand.hbm [shape: f32[8,4,256], index: 0, kind: input, shape index: {}]   ;;  %s13175_s1 = inlined_call_operand.hbm [shape: f32[2,256,1024], index: 1, kind: input, shape index: {}]   ;;  %s13176_s2 = inlined_call_operand.hbm [shape: f32[4,8], index: 2, kind: input, shape index: {}]   ;;  %s13177_s3 = inlined_call_operand.vmem [shape: f32[4,1], index: 3, kind: input, shape index: {}]   ;;  %s13178_s4 = inlined_call_operand.hbm [shape: f32[4,4], index: 4, kind: input, shape index: {}]   ;;  %s13179_s5 = inlined_call_operand.vmem [shape: f32[4,1], index: 5, kind: input, shape index: {}]   ;;  %s13180_s6 = inlined_call_operand.hbm [shape: f32[8,256], index: 6, kind: input, shape index: {}]   ;;  %s13181_s7 = inlined_call_operand.vmem [shape: f32[4,1], index: 7, kind: input, shape index: {}]   ;;  %s13182_s8 = inlined_call_operand.hbm [shape: f32[8,4,256], index: 8, kind: output, shape index: {}]  }
   0x1   :  { %13443 = sst [smem:[#allocation83_spill]] %s13174_s0 }
   0x2   :  { %13444 = sst [smem:[#allocation84_spill]] %s13176_s2 }
   0x3   :  { %13445 = sst [smem:[#allocation85_spill]] %s13178_s4 }
   0x4   :  { %13446 = sst [smem:[#allocation86_spill]] %s13180_s6 }
   0x5   :  { %13 = vsyncpa [#allocation3], 0 }
   0x6   :  { %15 = vsyncpa [#allocation3 + $0x1], 0 }
   0x7   :  { %16 = vsyncpa [#allocation6], 0 }
   0x8   :  { %18 = vsyncpa [#allocation6 + $0x1], 0 }
   0x9   :  { %19 = vsyncpa [#allocation9], 0 }
   0xa   :  { %20 = vsyncpa [#allocation4], 0 }
   0xb   :  { %22 = vsyncpa [#allocation4 + $0x1], 0  ;;  %s8212_s27 = smov 0   ;;  %s8214_s28 = smov 0  }
   0xc   :  { %s8216_s29 = smov 0   ;;  %s8218_s30 = smov 0  }
   0xd LB: > { %13447 = sst [smem:[#allocation17_spill]] %s8139_s29  ;;  %s8233_s9 = sadd.s32 4294967295, %s8143_s30   ;;  %s8143_s30 = sphi %s8218_s30, %s14001_s30   ;;  %s8139_s29 = sphi %s8216_s29, %s14003_s29   ;;  %s8135_s28 = sphi %s8214_s28, %s14005_s28   ;;  %s8131_s27 = sphi %s8212_s27, %s14004_s27  }
   0xe   : > { %s7671_s10 = sadd.s32 4294967294, %s8143_s30   ;;  %p48_p0 = scmp.ne.s32.totalorder %s8135_s28, %s8131_s27 }
   0xf   : > { %p49_p1 = scmp.eq.s32.totalorder %s8233_s9, 0  ;;  %p224_p2 = scmp.eq.s32.totalorder %s8233_s9, 1 }
  0x10   : > { %p230_p3 = scmp.eq.s32.totalorder %s7671_s10, 1  ;;  %p7672_p5 = scmp.ge.s32.totalorder %s8143_s30, 1 }
  0x11   : > { %p8242_p4 = por %p49_p1, %p48_p0  ;;  %p237_p7 = scmp.lt.s32.totalorder %s8143_s30, 3 }
  0x12   : > { %p8247_p6 = por %p230_p3, %p48_p0  ;;  %s13451_s2 = sld [smem:[#allocation84_spill]] }
  0x13   : > { %p8255_p8 = pnand %p7672_p5, %p237_p7  ;;  %s8145_s17 = smov [#allocation7]  }
  0x14   : > { %s13449_s12 = scalar_select %p8247_p6, 1, 0 }
  0x15   : > { %p7738_p10 = pneg %p8255_p8  ;;  %s251_s18 = sshll.u32 %s8145_s17, 4  ;;  %s252_s18 = int_to_ptr.vmem [resolvable:$true] %s251_s18 }
  0x16   : > { %13450 = sst [smem:[#allocation18_spill]] %s13449_s12  ;;  %s8146_s25 = smov [#allocation8]  }
  0x17   : > { %s13453_s4 = sld [smem:[#allocation85_spill]]  ;;  %p7739_p11 = pnand %p7738_p10, %p49_p1 }
  0x18   : > { %s249_s15 = sshll.u32 %s13451_s2, 4  ;;  %s13454_s6 = sld [smem:[#allocation86_spill]]  ;;  %s250_s15 = int_to_ptr.hbm [resolvable:$true] %s249_s15 }
  0x19   : > { %s266_s26 = sshll.u32 %s8146_s25, 4  ;;  %s8147_s10 = smov [#allocation10]   ;;  %s267_s26 = int_to_ptr.vmem [resolvable:$true] %s266_s26 }
  0x1a   : > { %7741 = dma.hbm_to_vmem [thread:$0]  (!%p7739_p11), %s250_s15, 64, %s252_s18, [#allocation6]  }
  0x1b   : > { %s281_s13 = sshll.u32 %s8147_s10, 4  ;;  %s8271_s14 = sadd.s32 1, %s8143_s30   ;;  %s282_s13 = int_to_ptr.vmem [resolvable:$true] %s281_s13 }
  0x1c   : > { %13455 = sst [smem:[#allocation19_spill]] %s8271_s14  ;;  %s32_s17 = ssub.s32 %s8143_s30, %s8271_s14 }
  0x1d   : > { %s264_s21 = sshll.u32 %s13453_s4, 4  ;;  %s35_s19 = sadd.s32 1, %s8139_s29  ;;  %s265_s21 = int_to_ptr.hbm [resolvable:$true] %s264_s21 }
  0x1e   : > { %s279_s24 = sshll.u32 %s13454_s6, 4  ;;  %p33_p12 = scmp.eq.s32.totalorder %s32_s17, 0  ;;  %s280_s24 = int_to_ptr.hbm [resolvable:$true] %s279_s24 }
  0x1f   : > { %7744 = dma.hbm_to_vmem [thread:$0]  (!%p7739_p11), %s265_s21, 64, %s267_s26, [#allocation9]  }
  0x20   : > { %7747 = dma.hbm_to_vmem [thread:$0]  (!%p7739_p11), %s280_s24, 256, %s282_s13, [#allocation9]  }
  0x21   : > { %p42_p13 = scmp.ne.s32.totalorder %s8139_s29, %s8135_s28  ;;  %p43_p0 = scmp.eq.s32.totalorder %s8143_s30, 0 }
  0x22   : > { %p7762_p3 = scmp.lt.s32.totalorder %s8143_s30, 2  ;;  %s8290_s20 = sand.u32 1, %s8139_s29  }
  0x23   : > { %s8281_s15 = scalar_select %p33_p12, %s8139_s29, %s35_s19  }
  0x24   : > { %p44_p5 = por %p43_p0, %p42_p13  ;;  %p8285_p7 = por %p224_p2, %p42_p13 }
  0x25   : > { %13456 = sst [smem:[#allocation20_spill]] %s8281_s15  ;;  %s7716_s21 = sshll.u32 %s8143_s30, 5 }
  0x26   : > { %s7677_s22 = sshll.u32 %s8290_s20, 5  ;;  %s13458_s0 = sld [smem:[#allocation83_spill]] }
  0x27   : > { %s299_s10 = scalar_lea.vmem [#allocation2], %s7677_s22  ;;  %p8299_p2 = pnand %p7762_p3, %p44_p5 }
  0x28   : > { %s308_s13 = sshll.u32 %s299_s10, 4  ;;  %s318_s19 = sand.u32 1, %s8143_s30   ;;  %s309_s13 = int_to_ptr.vmem [resolvable:$true] %s308_s13 }
  0x29   : > { %s296_s2 = scalar_lea.sflag [#allocation3], %s8290_s20  ;;  %p8009_p11 = pneg %p8299_p2 }
  0x2c   : > { %s305_s25 = scalar_lea.hbm %s13458_s0, %s7716_s21  ;;  %s8012_s23 = scalar_lea.hbm %s13458_s0, 64 }
  0x2d   : > { %s306_s26 = sshll.u32 %s305_s25, 4  ;;  %s307_s26 = int_to_ptr.hbm [resolvable:$true] %s306_s26 }
  0x2e   : > { %s8005_s4 = sshra.s32 %s307_s26, 4  ;;  %s8006_s4 = int_to_ptr.hbm [resolvable:$true] %s8005_s4 }
  0x2f   : > { %s8007_s6 = scalar_lea.hbm %s8006_s4, 32  ;;  %p8013_p0 = scmp.lt.s32.totalorder %s8006_s4, %s13458_s0 }
  0x30   : > { %p8008_p10 = scmp.ne.s32.totalorder %s8006_s4, %s8007_s6  ;;  %p8014_p3 = scmp.lt.s32.totalorder %s8012_s23, %s8007_s6 }
  0x32   : > { %p8010_p12 = pnand %p8009_p11, %p8008_p10  ;;  %p8015_p5 = por %p8014_p3, %p8013_p0 }
  0x34   : > { %p8011_p13 = pneg %p8010_p12 }
  0x36   : > { %p8016_p9 = pnand %p8015_p5, %p8011_p13 }
  0x38   : > { %8019 = shalt.err (!%p8016_p9)
}
  0x39   : > { %s8148_s10 = smov 128   ;;  %s8149_s15 = smov 8  }
  0x3a   : > { %7751 = dma.hbm_to_vmem [thread:$0]  (!%p8299_p2), %s307_s26, 512, %s309_s13, %s296_s2, %s8148_s10, %s8148_s10, %s8149_s15  }
  0x3b   : > { %s7681_s29 = sshll.u32 %s8290_s20, 11  ;;  %s7717_s14 = sshll.u32 %s8143_s30, 11 }
  0x3c   : > { %s327_s12 = scalar_lea.hbm %s13175_s1, %s7717_s14  ;;  %s322_s4 = scalar_lea.vmem [#allocation5], %s7681_s29 }
  0x3d   : > { %s328_s24 = sshll.u32 %s327_s12, 4  ;;  %s330_s6 = sshll.u32 %s322_s4, 4  ;;  %s329_s24 = int_to_ptr.hbm [resolvable:$true] %s328_s24  ;;  %s331_s6 = int_to_ptr.vmem [resolvable:$true] %s330_s6 }
  0x3e   : > { %s319_s23 = scalar_lea.sflag [#allocation6], %s318_s19  ;;  %s8035_s25 = sshra.s32 %s329_s24, 4  ;;  %s8036_s25 = int_to_ptr.hbm [resolvable:$true] %s8035_s25 }
  0x3f   : > { %s8037_s0 = scalar_lea.hbm %s8036_s25, 2048  ;;  %s8042_s20 = scalar_lea.hbm %s13175_s1, 4096 }
  0x40   : > { %p8038_p9 = scmp.ne.s32.totalorder %s8036_s25, %s8037_s0  ;;  %p8043_p13 = scmp.lt.s32.totalorder %s8036_s25, %s13175_s1 }
  0x41   : > { %p8044_p0 = scmp.lt.s32.totalorder %s8042_s20, %s8037_s0 }
  0x42   : > { %p8040_p10 = pnand %p8038_p9, %p8009_p11 }
  0x43   : > { %p8045_p3 = por %p8044_p0, %p8043_p13 }
  0x44   : > { %p8041_p12 = pneg %p8040_p10 }
  0x46   : > { %p8046_p5 = pnand %p8045_p3, %p8041_p12 }
  0x48   : > { %8049 = shalt.err (!%p8046_p5)
}
  0x49   : > { %s8150_s29 = smov 1024   ;;  %s8151_s12 = smov 64  }
  0x4a   : > { %7754 = dma.hbm_to_vmem [thread:$0]  (!%p8299_p2), %s329_s24, 32768, %s331_s6, %s319_s23, %s8150_s29, %s8150_s29, %s8151_s12  }
  0x4b   : > { %342 = sbr.rel (%p8255_p8) target bundleno = 2305 (0x901), region = 52 }
  0x50   : > { %s8337_s13 = sand.u32 1, %s8135_s28  }
  0x51   : > { %s7685_s19 = sshll.u32 %s8337_s13, 5  ;;  %s345_s0 = scalar_lea.sflag [#allocation3], %s8337_s13 }
  0x52   : > { %s8343_s10 = scalar_lea.vmem [#allocation2], %s7685_s19 }
  0x53   : > { %8110 = dma.done.wait (%p8242_p4), %s345_s0, 512  }
  0x54   : > { %8112 = vsyncadd (%p8242_p4), %s345_s0, 4294966784  ;;  %s354_s16 = sand.u32 1, %s8233_s9   ;;  %s7686_s17 = sshll.u32 %s8337_s13, 11 }
  0x55   : > { %s355_s21 = scalar_lea.sflag [#allocation6], %s354_s16  ;;  %s8351_s22 = scalar_lea.vmem [#allocation5], %s7686_s17 }
  0x56   : > { %8114 = dma.done.wait (%p8242_p4), %s355_s21, 32768  }
  0x57   : > { %8116 = vsyncadd (%p8242_p4), %s355_s21, 4294934528 }
  0x58   : > { %8118 = dma.done.wait (%p49_p1), [#allocation6], 64  }
  0x59   : > { %8120 = vsyncadd (%p49_p1), [#allocation6], 4294967232 }
  0x5a   : > { %8122 = dma.done.wait (%p49_p1), [#allocation9], 320  }
  0x5b   : > { %8124 = vsyncadd (%p49_p1), [#allocation9], 4294966976  ;;  %v8366_v0 = vld [vmem:[%s8343_s10] sm:$0xff]  ;;  %vm6140_vm0 = vcmask 1043456   ;;  %v8152_v11 = vmov 256.0   ;;  %s8153_s11 = smov 126  }
  0x5c   : > { %13460 = vst [vmem:[#allocation21_spill] sm:$0xff] %v8366_v0  ;;  %7829 = vrcp.f32 %v8152_v11  ;;  %v8377_v20 = vld [vmem:[#allocation7] sm:$0xf]  ;;  %s8154_s24 = smov 122   ;;  %s8155_s4 = smov 124   ;;  %v8160_v40 = vmov 0  }
  0x5d   : > { %6135 = vst [vmem:[#allocation1] ss:$2 sm:$0xff] %v8366_v0  ;;  %s8156_s6 = smov 123   ;;  %s8157_s23 = smov 127   ;;  %7822 = vset.pattern.permute.xlu1 %v8160_v40  ;;  %7821 = vset.pattern.permute.xlu2 %v8160_v40  ;;  %v8397_v41 = vld [vmem:[%s13177_s3] sm:$0xf] }
  0x5e   : > { %s8158_s25 = smov 121   ;;  %s8159_s2 = smov 125   ;;  %v6130_v53 = vld [vmem:[#allocation8] sm:$0xf]  ;;  %v8161_v55 = vmov 3   ;;  %v8162_v60 = vmov 2  }
  0x5f   : > { %7825 = vset.pattern.permute.xlu0 %v8161_v55  ;;  %s13118_s21 = scalar_lea.vmem [#allocation11], %s7685_s19  ;;  %s7719_s19 = sshll.u32 %s8233_s9, 5 }
  0x60   : > { %s7544_s9 = sshll.u32 %s13118_s21, 4  ;;  %s8085_s20 = scalar_lea.hbm %s13182_s8, 64  ;;  %s7545_s9 = int_to_ptr.vmem [resolvable:$true] %s7544_s9 }
  0x62   : > { %v7830_v12 = vpop.eup %7829 }
  0x63   : > { %v6147_v13 = vmul.f32 256.0, %v7830_v12  ;;  %vm6151_vm1 = vweird.f32 %v7830_v12 }
  0x64   : > { %v6136_v1 = vld.sshfl [vmem:[#allocation1] sm:$0xff pattern:$0x75316420]  ;;  %v6137_v2 = vld.sshfl [vmem:[#allocation1 + $0x8] sm:$0xff pattern:$0x75316420] }
  0x65   : > { %v6141_v3 = vsel %vm6140_vm0, %v6136_v1, 0.0  ;;  %v6142_v4 = vsel %vm6140_vm0, %v6137_v2, 0.0  ;;  %6154 = vst [vmem:[#allocation1] ss:$2 sm:$0xff] %v8366_v0  ;;  %v6148_v14 = vsub.f32 1.0, %v6147_v13 }
  0x66   : > { %v6143_v5 = vadd.f32 %v6142_v4, %v6141_v3 }
  0x67   : > { %v6149_v15 = vmul.f32 %v7830_v12, %v6148_v14 }
  0x68   : > { %6144 = vadd.xlane.f32.xlu0 %v6143_v5 }
  0x69   : > { %v6150_v16 = vadd.f32 %v7830_v12, %v6149_v15 }
  0x6b   : > { %v8374_v17 = vsel %vm6151_vm1, %v7830_v12, %v6150_v16 }
  0x6c   : > { %v6155_v6 = vld.sshfl [vmem:[#allocation1] sm:$0xff pattern:$0x75316420]  ;;  %v6156_v7 = vld.sshfl [vmem:[#allocation1 + $0x8] sm:$0xff pattern:$0x75316420] }
  0x6d   : > { %v6159_v8 = vsel %vm6140_vm0, %v6155_v6, -inf  ;;  %v6160_v9 = vsel %vm6140_vm0, %v6156_v7, -inf  ;;  %13461 = vst [vmem:[#allocation22_spill] sm:$0xff] %v8374_v17 }
  0x6e   : > { %v6161_v10 = vmax.f32 %v6159_v8, %v6160_v9  ;;  %v8163_v8 = vmov 1   ;;  %v6131_v9 = vld [vmem:[%s13179_s5] sm:$0xf] }
  0x70   : > { %6162 = vmax.xlane.f32.xlu0 %v6161_v10  ;;  %v8164_v10 = vmov 839922192  }
  0x71   : > { %v6240_v11 = vunpack.c.l.s4 %v8164_v10 }
  0x73   : > { %v8403_v12 = vunpack.c.0.s8 %v6240_v11 }
  0x75   : > { %13462 = vst [vmem:[#allocation23_spill] sm:$0xff] %v8403_v12 }
  0xdb   : > { %v6145_v18 = vpop.xlane.xlu0 %6144 }
  0xdc   : > { %v6153_v19 = vmul.f32 %v8374_v17, %v6145_v18 }
  0xde   : > { %v6188_v21 = vperm.slane %v6153_v19, 2  ;;  %v6174_v30 = vperm.slane %v6153_v19, 1  ;;  %v6202_v34 = vperm.slane %v6153_v19, 3  ;;  %v6164_v36 = vperm.slane %v6153_v19, 0 }
  0xe0   : > { %v6189_v22 = vmul.f32 %v6188_v21, %v8377_v20  ;;  %v6175_v32 = vmul.f32 %v6174_v30, %v8377_v20  ;;  %v6203_v35 = vmul.f32 %v6202_v34, %v8377_v20  ;;  %v6165_v39 = vmul.f32 %v6164_v36, %v8377_v20 }
  0xe2   : > { %6191 = vrot.lane.b32.xlu2 %v6189_v22, %s8153_s11  ;;  %v6166_v42 = vadd.f32 %v6165_v39, %v8397_v41 }
  0xe3   : > { %v6163_v23 = vpop.xlane.xlu0 %6162 }
  0xe4   : > { %v6181_v24 = vperm.slane %v6163_v23, 1  ;;  %v6195_v25 = vperm.slane %v6163_v23, 2  ;;  %v6167_v26 = vperm.slane %v6163_v23, 0  ;;  %v6209_v31 = vperm.slane %v6163_v23, 3 }
  0xe6   : > { %v6196_v27 = vmul.f32 %v6195_v25, %v8377_v20  ;;  %v6168_v28 = vmul.f32 %v6167_v26, %v8377_v20  ;;  %v6182_v29 = vmul.f32 %v6181_v24, %v8377_v20  ;;  %v6210_v33 = vmul.f32 %v6209_v31, %v8377_v20 }
  0xe8   : > { %6198 = vrot.lane.b32.xlu0 %v6196_v27, %s8154_s24  ;;  %6170 = vrot.lane.b32.xlu1 %v6168_v28, %s8155_s4 }
  0xea   : > { %6184 = vrot.lane.b32.xlu2 %v6182_v29, %s8156_s6 }
  0xf0   : > { %6177 = vrot.lane.b32.xlu1 %v6175_v32, %s8157_s23  ;;  %6288 = vperm.xlu0 %7825, %v6130_v53  }
  0xf2   : > { %6212 = vrot.lane.b32.xlu2 %v6210_v33, %s8158_s25 }
  0xf8   : > { %6205 = vrot.lane.b32.xlu1 %v6203_v35, %s8159_s2  ;;  %7827 = vset.pattern.permute.xlu0 %v8160_v40 }
  0xfa   : > { %6247 = vperm.xlu2 %7821, %v6130_v53  }
 0x102   : > { %7824 = vset.pattern.permute.xlu2 %v8162_v60 }
 0x103   : > { %6274 = vperm.xlu2 %7824, %v6130_v53  }
 0x10b   : > { %7828 = vset.pattern.permute.xlu2 %v8160_v40 }
 0x13c   : > { %v6192_v37 = vpop.permute.xlu2 %6191 }
 0x144   : > { %v6185_v44 = vpop.permute.xlu2 %6184 }
 0x14c   : > { %v6213_v54 = vpop.permute.xlu2 %6212 }
 0x154   : > { %v8405_v13 = vpop.permute.xlu2 %6247 }
 0x155   : > { %13463 = vst [vmem:[#allocation24_spill] sm:$0xff] %v8405_v13 }
 0x15a   : > { %v6171_v38 = vpop.permute.xlu1 %6170  ;;  %v6199_v49 = vpop.permute.xlu0 %6198 }
 0x15b   : > { %v6173_v43 = vadd.f32 %v6171_v38, %v6166_v42 }
 0x15d   : > { %v8409_v33 = vpop.permute.xlu2 %6274 }
 0x15e   : > { %13464 = vst [vmem:[#allocation25_spill] sm:$0xff] %v8409_v33 }
 0x162   : > { %v6178_v45 = vpop.permute.xlu1 %6177 }
 0x163   : > { %v6180_v46 = vadd.f32 %v6178_v45, %v6173_v43 }
 0x165   : > { %v6187_v47 = vadd.f32 %v6185_v44, %v6180_v46 }
 0x167   : > { %v6194_v48 = vadd.f32 %v6192_v37, %v6187_v47 }
 0x169   : > { %v6201_v50 = vadd.f32 %v6199_v49, %v6194_v48 }
 0x16a   : > { %v6206_v51 = vpop.permute.xlu1 %6205 }
 0x16b   : > { %v6208_v52 = vadd.f32 %v6206_v51, %v6201_v50 }
 0x16d   : > { %v6215_v56 = vadd.f32 %v6213_v54, %v6208_v52 }
 0x16f   : > { %v7691_v57 = vmul.f32 -1.442695, %v6215_v56 }
 0x171   : > { %7831 = vpow2.f32 %v7691_v57 }
 0x177   : > { %v7832_v58 = vpop.eup %7831 }
 0x178   : > { %v6219_v59 = vadd.f32 1.0, %v7832_v58 }
 0x17a   : > { %7833 = vrcp.f32 %v6219_v59  ;;  %v6231_v1 = vand.u32 2147483648, %v6219_v59  ;;  %v6229_v3 = vand.u32 2147483647, %v6219_v59  ;;  %vm6225_vm3 = vweird.f32 %v6219_v59 }
 0x17c   : > { %v6232_v5 = vor.u32 1.1754944e-38, %v6231_v1  ;;  %vm6230_vm5 = vcmp.eq.f32.partialorder %v6229_v3, 8.507059e+37 }
 0x180   : > { %v7834_v61 = vpop.eup %7833 }
 0x181   : > { %v6221_v62 = vmul.f32 %v7834_v61, %v6219_v59  ;;  %vm6226_vm2 = vweird.f32 %v7834_v61 }
 0x182   : > { %vm6227_vm4 = vmor %vm6225_vm3, %vm6226_vm2 }
 0x183   : > { %v6222_v63 = vsub.f32 1.0, %v6221_v62 }
 0x185   : > { %v6223_v2 = vmul.f32 %v7834_v61, %v6222_v63 }
 0x187   : > { %v6224_v4 = vadd.f32 %v7834_v61, %v6223_v2 }
 0x189   : > { %v6228_v6 = vsel %vm6227_vm4, %v7834_v61, %v6224_v4  ;;  %v8433_v61 = vld [vmem:[%s8343_s10 + $0x8] sm:$0xff] }
 0x18a   : > { %v6233_v7 = vsel %vm6230_vm5, %v6232_v5, %v6228_v6  ;;  %13470 = vst [vmem:[#allocation31_spill] sm:$0xff] %v8433_v61 }
 0x18b   : > { %6237 = vperm.xlu1 %7822, %v6233_v7  }
 0x193   : > { %7823 = vset.pattern.permute.xlu1 %v8163_v8 }
 0x194   : > { %6260 = vperm.xlu1 %7823, %v6130_v53  }
 0x19c   : > { %7826 = vset.pattern.permute.xlu1 %v8160_v40  ;;  %v8417_v40 = vpop.permute.xlu0 %6288 }
 0x19d   : > { %6309 = vperm.xlu1 %7826, %v6131_v9   ;;  %13466 = vst [vmem:[#allocation27_spill] sm:$0xff] %v8417_v40 }
 0x1fd   : > { %v6238_v14 = vpop.permute.xlu1 %6237 }
 0x1fe   : > { %v6242_v15 = vperm.slane %v6238_v14, %v8403_v12 }
 0x200   : > { %v6244_v16 = vmul.f32 %v6242_v15, %v8366_v0 }
 0x202   : > { %v6277_v18 = vperm.slane %v6244_v16, 2  ;;  %v6278_v19 = vperm.slane %v6244_v16, 6  ;;  %v6263_v21 = vperm.slane %v6244_v16, 1  ;;  %v6264_v22 = vperm.slane %v6244_v16, 5 }
 0x203   : > { %v6251_v23 = vperm.slane %v6244_v16, 0  ;;  %v6252_v24 = vperm.slane %v6244_v16, 4  ;;  %v6292_v25 = vperm.slane %v6244_v16, 7  ;;  %v6291_v28 = vperm.slane %v6244_v16, 3 }
 0x204   : > { %v6267_v26 = vperm.slane %v6263_v21, 1  ;;  %v6268_v27 = vperm.slane %v6264_v22, 1  ;;  %v6281_v29 = vperm.slane %v6277_v18, 2  ;;  %v6282_v30 = vperm.slane %v6278_v19, 2 }
 0x205   : > { %v6255_v31 = vperm.slane %v6251_v23, 0  ;;  %v6256_v32 = vperm.slane %v6252_v24, 0  ;;  %v6296_v35 = vperm.slane %v6292_v25, 3  ;;  %v6295_v42 = vperm.slane %v6291_v28, 3 }
 0x206   : > { %v8411_v34 = vpop.permute.xlu1 %6260  ;;  %v6283_v43 = vmul.f32 %v6281_v29, %v8409_v33  ;;  %v6284_v44 = vmul.f32 %v6282_v30, %v8409_v33 }
 0x207   : > { %13465 = vst [vmem:[#allocation26_spill] sm:$0xff] %v8411_v34  ;;  %v6269_v36 = vmul.f32 %v6267_v26, %v8411_v34  ;;  %v6270_v37 = vmul.f32 %v6268_v27, %v8411_v34  ;;  %v6257_v38 = vmul.f32 %v6255_v31, %v8405_v13  ;;  %v6258_v39 = vmul.f32 %v6256_v32, %v8405_v13 }
 0x208   : > { %v6298_v49 = vmul.f32 %v6296_v35, %v8417_v40  ;;  %v6297_v50 = vmul.f32 %v6295_v42, %v8417_v40  ;;  %v616_v40 = vld [vmem:[%s8351_s22 + $0x640] sm:$0xff] }
 0x209   : > { %v6271_v45 = vadd.f32 %v6269_v36, %v6257_v38  ;;  %v6272_v46 = vadd.f32 %v6270_v37, %v6258_v39 }
 0x20b   : > { %v6285_v47 = vadd.f32 %v6283_v43, %v6271_v45  ;;  %v6286_v48 = vadd.f32 %v6284_v44, %v6272_v46 }
 0x20d   : > { %v6300_v51 = vadd.f32 %v6298_v49, %v6286_v48  ;;  %v6299_v52 = vadd.f32 %v6297_v50, %v6285_v47 }
 0x20f   : > { %v6303_v53 = vrot.slane %v6300_v51, 4  ;;  %v6310_v54 = vpop.permute.xlu1 %6309  ;;  %v536_v51 = vld [vmem:[%s8351_s22 + $0x3c0] sm:$0xff] }
 0x210   : > { %v8424_v55 = vperm.slane %v6310_v54, %v8403_v12  ;;  %v8465_v54 = vand.u32 4294901760, %v536_v51  ;;  %v584_v12 = vld [vmem:[%s8351_s22 + $0x540] sm:$0xff] }
 0x211   : > { %v6304_v56 = vsel %vm6140_vm0, %v6299_v52, %v6303_v53  ;;  %v528_v52 = vld [vmem:[%s8351_s22 + $0x380] sm:$0xff] }
 0x212   : > { %13467 = vst [vmem:[#allocation28_spill] sm:$0xff] %v8424_v55  ;;  %v6306_v57 = vadd.f32 %v6304_v56, %v6244_v16  ;;  %v520_v53 = vld [vmem:[%s8351_s22 + $0x340] sm:$0xff]  ;;  %673 = vmatpush.msra.mxu0 %v8465_v54  ;;  %869 = vmatpush.msra.mxu3 %v8465_v54 }
 0x213   : > { %v8469_v56 = vand.u32 4294901760, %v520_v53 }
 0x214   : > { %v6316_v58 = vadd.f32 %v8424_v55, %v6306_v57  ;;  %v512_v57 = vld [vmem:[%s8351_s22 + $0x300] sm:$0xff] }
 0x216   : > { %6325 = vst [vmem:[#allocation1] ss:$2 sm:$0xff] %v6316_v58 }
 0x21d   : > { %v8428_v59 = vld.sshfl [vmem:[#allocation1] sm:$0xff pattern:$0x75316420]  ;;  %v8430_v60 = vld.sshfl [vmem:[#allocation1 + $0x8] sm:$0xff pattern:$0x75316420] }
 0x21e   : > { %13468 = vst [vmem:[#allocation29_spill] sm:$0xff] %v8428_v59 }
 0x21f   : > { %13469 = vst [vmem:[#allocation30_spill] sm:$0xff] %v8430_v60 }
 0x220   : > { %6434 = vst [vmem:[#allocation1] ss:$2 sm:$0xff] %v6316_v58  ;;  %v504_v58 = vld [vmem:[%s8351_s22 + $0x2c0] sm:$0xff] }
 0x227   : > { %v8435_v62 = vld.sshfl [vmem:[#allocation1] sm:$0xff pattern:$0x75316420]  ;;  %v8437_v63 = vld.sshfl [vmem:[#allocation1 + $0x8] sm:$0xff pattern:$0x75316420] }
 0x228   : > { %13471 = vst [vmem:[#allocation32_spill] sm:$0xff] %v8435_v62 }
 0x229   : > { %13472 = vst [vmem:[#allocation33_spill] sm:$0xff] %v8437_v63 }
 0x22a   : > { %6513 = vst [vmem:[#allocation1] ss:$2 sm:$0xff] %v8433_v61 }
 0x231   : > { %v6514_v1 = vld.sshfl [vmem:[#allocation1] sm:$0xff pattern:$0x75316420]  ;;  %v6515_v2 = vld.sshfl [vmem:[#allocation1 + $0x8] sm:$0xff pattern:$0x75316420] }
 0x232   : > { %v6518_v3 = vsel %vm6140_vm0, %v6514_v1, 0.0  ;;  %v6519_v4 = vsel %vm6140_vm0, %v6515_v2, 0.0  ;;  %6524 = vst [vmem:[#allocation1] ss:$2 sm:$0xff] %v8433_v61  ;;  %v496_v1 = vld [vmem:[%s8351_s22 + $0x280] sm:$0xff] }
 0x233   : > { %v6520_v5 = vadd.f32 %v6519_v4, %v6518_v3  ;;  %v8474_v3 = vand.u32 4294901760, %v512_v57  ;;  %v8476_v4 = vand.u32 4294901760, %v504_v58 }
 0x235   : > { %6521 = vadd.xlane.f32.xlu2 %v6520_v5  ;;  %v8478_v5 = vand.u32 4294901760, %v496_v1 }
 0x239   : > { %v6525_v6 = vld.sshfl [vmem:[#allocation1] sm:$0xff pattern:$0x75316420]  ;;  %v6526_v7 = vld.sshfl [vmem:[#allocation1 + $0x8] sm:$0xff pattern:$0x75316420] }
 0x23a   : > { %v6529_v8 = vsel %vm6140_vm0, %v6525_v6, -inf  ;;  %v6530_v9 = vsel %vm6140_vm0, %v6526_v7, -inf  ;;  %v488_v6 = vld [vmem:[%s8351_s22 + $0x240] sm:$0xff]  ;;  %v8482_v7 = vsub.f32 %v536_v51, %v8465_v54 }
 0x23b   : > { %v6531_v10 = vmax.f32 %v6529_v8, %v6530_v9  ;;  %v8490_v9 = vsub.f32 %v520_v53, %v8469_v56 }
 0x23c   : > { %816 = vmatpush.msra.mxu2 %v8482_v7 }
 0x23d   : > { %6532 = vmax.xlane.f32.xlu1 %v6531_v10  ;;  %v8492_v10 = vand.u32 4294901760, %v488_v6 }
 0x2a8   : > { %v6522_v11 = vpop.xlane.xlu2 %6521 }
 0x2a9   : > { %v6523_v14 = vmul.f32 %v6522_v11, %v8374_v17 }
 0x2ab   : > { %v6544_v15 = vperm.slane %v6523_v14, 1  ;;  %v6558_v19 = vperm.slane %v6523_v14, 2  ;;  %v6572_v30 = vperm.slane %v6523_v14, 3  ;;  %v6534_v36 = vperm.slane %v6523_v14, 0 }
 0x2ac   : > { %v8495_v14 = vsub.f32 %v512_v57, %v8474_v3 }
 0x2ad   : > { %v6545_v16 = vmul.f32 %v6544_v15, %v8377_v20  ;;  %v6559_v25 = vmul.f32 %v6558_v19, %v8377_v20  ;;  %v6573_v31 = vmul.f32 %v6572_v30, %v8377_v20  ;;  %v6535_v37 = vmul.f32 %v6534_v36, %v8377_v20  ;;  %v456_v36 = vld [vmem:[%s8351_s22 + $0x140] sm:$0xff] }
 0x2ae   : > { %v8498_v15 = vsub.f32 %v504_v58, %v8476_v4  ;;  %v13195_v19 = vand.u32 4294901760, %v8482_v7 }
 0x2af   : > { %6547 = vrot.lane.b32.xlu0 %v6545_v16, %s8157_s23  ;;  %v6536_v39 = vadd.f32 %v6535_v37, %v8397_v41  ;;  %v8467_v41 = vand.u32 4294901760, %v528_v52  ;;  %v8501_v16 = vsub.f32 %v496_v1, %v8478_v5 }
 0x2b0   : > { %v6533_v18 = vpop.xlane.xlu1 %6532 }
 0x2b1   : > { %v6565_v21 = vperm.slane %v6533_v18, 2  ;;  %v6579_v22 = vperm.slane %v6533_v18, 3  ;;  %v6537_v26 = vperm.slane %v6533_v18, 0  ;;  %v6551_v28 = vperm.slane %v6533_v18, 1  ;;  %v480_v18 = vld [vmem:[%s8351_s22 + $0x200] sm:$0xff]  ;;  %675 = vmatpush.msra.mxu0 %v8467_v41  ;;  %871 = vmatpush.msra.mxu3 %v8467_v41 }
 0x2b2   : > { %v8486_v8 = vsub.f32 %v528_v52, %v8467_v41 }
 0x2b3   : > { %v6580_v23 = vmul.f32 %v6579_v22, %v8377_v20  ;;  %v6566_v24 = vmul.f32 %v6565_v21, %v8377_v20  ;;  %v6538_v27 = vmul.f32 %v6537_v26, %v8377_v20  ;;  %v6552_v29 = vmul.f32 %v6551_v28, %v8377_v20  ;;  %677 = vmatpush.msra.mxu0 %v8469_v56 }
 0x2b4   : > { %v13194_v21 = vand.u32 4294901760, %v8486_v8  ;;  %v13193_v22 = vand.u32 4294901760, %v8490_v9  ;;  %819 = vmatpush.msra.mxu2 %v8486_v8  ;;  %v716_v26 = vsub.f32 %v8482_v7, %v13195_v19  ;;  %873 = vmatpush.msra.mxu3 %v8469_v56 }
 0x2b5   : > { %6582 = vrot.lane.b32.xlu1 %v6580_v23, %s8158_s25  ;;  %6568 = vrot.lane.b32.xlu2 %v6566_v24, %s8154_s24  ;;  %v13192_v23 = vand.u32 4294901760, %v8495_v14  ;;  %v13191_v24 = vand.u32 4294901760, %v8498_v15 }
 0x2b6   : > { %v728_v28 = vsub.f32 %v8490_v9, %v13193_v22  ;;  %v717_v37 = vand.u32 4294901760, %v716_v26  ;;  %822 = vmatpush.msra.mxu2 %v8490_v9  ;;  %679 = vmatpush.msra.mxu0 %v8474_v3 }
 0x2b7   : > { %6561 = vrot.lane.b32.xlu0 %v6559_v25, %s8153_s11  ;;  %v8513_v25 = vsub.f32 %v488_v6, %v8492_v10  ;;  %v734_v30 = vsub.f32 %v8495_v14, %v13192_v23  ;;  %875 = vmatpush.msra.mxu3 %v8474_v3 }
 0x2b8   : > { %718 = vmatpush.msra.mxu1 %v717_v37  ;;  %825 = vmatpush.msra.mxu2 %v8495_v14 }
 0x2b9   : > { %681 = vmatpush.msra.mxu0 %v8476_v4  ;;  %v735_v51 = vand.u32 4294901760, %v734_v30  ;;  %877 = vmatpush.msra.mxu3 %v8476_v4  ;;  %v424_v30 = vld [vmem:[%s8351_s22 + $0x40] sm:$0xff] }
 0x2ba   : > { %828 = vmatpush.msra.mxu2 %v8498_v15 }
 0x2bb   : > { %683 = vmatpush.msra.mxu0 %v8478_v5  ;;  %879 = vmatpush.msra.mxu3 %v8478_v5 }
 0x2bc   : > { %831 = vmatpush.msra.mxu2 %v8501_v16 }
 0x2bd   : > { %685 = vmatpush.msra.mxu0 %v8492_v10  ;;  %881 = vmatpush.msra.mxu3 %v8492_v10 }
 0x2be   : > { %834 = vmatpush.msra.mxu2 %v8513_v25 }
 0x2bf   : > { %6540 = vrot.lane.b32.xlu0 %v6538_v27, %s8155_s4  ;;  %v722_v27 = vsub.f32 %v8486_v8, %v13194_v21  ;;  %v648_v21 = vld [vmem:[%s8351_s22 + $0x740] sm:$0xff] }
 0x2c7   : > { %6554 = vrot.lane.b32.xlu0 %v6552_v29, %s8156_s6  ;;  %v8526_v29 = vand.u32 4294901760, %v480_v18 }
 0x2c9   : > { %687 = vmatpush.msra.mxu0 %v8526_v29  ;;  %883 = vmatpush.msra.mxu3 %v8526_v29 }
 0x2cf   : > { %6575 = vrot.lane.b32.xlu0 %v6573_v31, %s8159_s2  ;;  %v13189_v31 = vand.u32 4294901760, %v8501_v16 }
 0x2d1   : > { %v746_v52 = vsub.f32 %v8501_v16, %v13189_v31 }
 0x30f   : > { %v6569_v47 = vpop.permute.xlu2 %6568 }
 0x321   : > { %v6548_v32 = vpop.permute.xlu0 %6547 }
 0x327   : > { %v6583_v20 = vpop.permute.xlu1 %6582 }
 0x329   : > { %v6562_v35 = vpop.permute.xlu0 %6561 }
 0x331   : > { %v6541_v38 = vpop.permute.xlu0 %6540 }
 0x332   : > { %v6543_v42 = vadd.f32 %v6541_v38, %v6536_v39  ;;  %v723_v38 = vand.u32 4294901760, %v722_v27  ;;  %v8539_v39 = vsub.f32 %v480_v18, %v8526_v29 }
 0x334   : > { %v6550_v43 = vadd.f32 %v6548_v32, %v6543_v42  ;;  %v472_v32 = vld [vmem:[%s8351_s22 + $0x1c0] sm:$0xff]  ;;  %724 = vmatpush.msra.mxu1 %v723_v38  ;;  %v13187_v58 = vand.u32 4294901760, %v8539_v39  ;;  %837 = vmatpush.msra.mxu2 %v8539_v39 }
 0x335   : > { %v448_v42 = vld [vmem:[%s8351_s22 + $0x100] sm:$0xff] }
 0x336   : > { %v8560_v53 = vand.u32 4294901760, %v448_v42  ;;  %v416_v38 = vld [vmem:[%s8351_s22] sm:$0xff] }
 0x339   : > { %v6555_v44 = vpop.permute.xlu0 %6554 }
 0x33a   : > { %v6557_v45 = vadd.f32 %v6555_v44, %v6550_v43  ;;  %v740_v43 = vsub.f32 %v8498_v15, %v13191_v24  ;;  %v13188_v44 = vand.u32 4294901760, %v8513_v25 }
 0x33c   : > { %v6564_v46 = vadd.f32 %v6562_v35, %v6557_v45  ;;  %v464_v35 = vld [vmem:[%s8351_s22 + $0x180] sm:$0xff]  ;;  %v729_v45 = vand.u32 4294901760, %v728_v28  ;;  %v741_v18 = vand.u32 4294901760, %v740_v43  ;;  %v752_v26 = vsub.f32 %v8513_v25, %v13188_v44 }
 0x33d   : > { %v8589_v28 = vsub.f32 %v448_v42, %v8560_v53 }
 0x33e   : > { %v6571_v48 = vadd.f32 %v6569_v47, %v6564_v46  ;;  %v8548_v46 = vand.u32 4294901760, %v472_v32  ;;  %v8550_v47 = vand.u32 4294901760, %v464_v35  ;;  %730 = vmatpush.msra.mxu1 %v729_v45 }
 0x340   : > { %v8566_v57 = vsub.f32 %v472_v32, %v8548_v46  ;;  %v8570_v1 = vsub.f32 %v464_v35, %v8550_v47  ;;  %736 = vmatpush.msra.mxu1 %v735_v51  ;;  %v747_v32 = vand.u32 4294901760, %v746_v52  ;;  %v758_v35 = vsub.f32 %v8539_v39, %v13187_v58  ;;  %689 = vmatpush.msra.mxu0 %v8548_v46 }
 0x341   : > { %v6576_v49 = vpop.permute.xlu0 %6575  ;;  %v753_v51 = vand.u32 4294901760, %v752_v26  ;;  %v8612_v58 = vand.u32 4294901760, %v424_v30  ;;  %885 = vmatpush.msra.mxu3 %v8548_v46  ;;  %v656_v26 = vld [vmem:[%s8351_s22 + $0x780] sm:$0xff] }
 0x342   : > { %v6578_v50 = vadd.f32 %v6576_v49, %v6571_v48  ;;  %v8552_v48 = vand.u32 4294901760, %v456_v36  ;;  %v440_v49 = vld [vmem:[%s8351_s22 + $0xc0] sm:$0xff]  ;;  %v13190_v27 = vand.u32 4294901760, %v8566_v57  ;;  %742 = vmatpush.msra.mxu1 %v741_v18  ;;  %v8619_v18 = vand.u32 4294901760, %v416_v38  ;;  %840 = vmatpush.msra.mxu2 %v8566_v57 }
 0x343   : > { %v8577_v6 = vand.u32 4294901760, %v440_v49  ;;  %691 = vmatpush.msra.mxu0 %v8550_v47  ;;  %887 = vmatpush.msra.mxu3 %v8550_v47  ;;  %v8651_v0 = vand.u32 4294901760, %v656_v26 }
 0x344   : > { %v6585_v2 = vadd.f32 %v6583_v20, %v6578_v50  ;;  %v764_v52 = vsub.f32 %v8566_v57, %v13190_v27  ;;  %748 = vmatpush.msra.mxu1 %v747_v32  ;;  %v759_v27 = vand.u32 4294901760, %v758_v35  ;;  %v640_v35 = vld [vmem:[%s8351_s22 + $0x700] sm:$0xff]  ;;  %843 = vmatpush.msra.mxu2 %v8570_v1 }
 0x345   : > { %v8605_v45 = vsub.f32 %v440_v49, %v8577_v6  ;;  %693 = vmatpush.msra.mxu0 %v8552_v48  ;;  %889 = vmatpush.msra.mxu3 %v8552_v48  ;;  %v632_v32 = vld [vmem:[%s8351_s22 + $0x6c0] sm:$0xff]  ;;  %v8670_v60 = vsub.f32 %v656_v26, %v8651_v0  ;;  %v8672_v59 = vand.u32 4294901760, %v640_v35 }
 0x346   : > { %v7695_v11 = vmul.f32 -1.442695, %v6585_v2  ;;  %v8575_v2 = vsub.f32 %v456_v36, %v8552_v48  ;;  %v13196_v36 = vand.u32 4294901760, %v8570_v1  ;;  %754 = vmatpush.msra.mxu1 %v753_v51  ;;  %v8688_v55 = vand.u32 4294901760, %v632_v32 }
 0x347   : > { %13477 = vst [vmem:[#allocation35_spill] sm:$0xff] %v8670_v60  ;;  %695 = vmatpush.msra.mxu0 %v8560_v53  ;;  %891 = vmatpush.msra.mxu3 %v8560_v53  ;;  %v13483_v49 = vand.u32 4294901760, %v8670_v60 }
 0x348   : > { %7835 = vpow2.f32 %v7695_v11  ;;  %v432_v11 = vld [vmem:[%s8351_s22 + $0x80] sm:$0xff]  ;;  %v13198_v42 = vand.u32 4294901760, %v8575_v2  ;;  %v770_v24 = vsub.f32 %v8570_v1, %v13196_v36  ;;  %v765_v36 = vand.u32 4294901760, %v764_v52  ;;  %760 = vmatpush.msra.mxu1 %v759_v27  ;;  %846 = vmatpush.msra.mxu2 %v8575_v2 }
 0x349   : > { %v8597_v37 = vand.u32 4294901760, %v432_v11  ;;  %v8662_v52 = vsub.f32 %v416_v38, %v8619_v18  ;;  %v13478_v27 = vand.u32 4294901760, %v8605_v45  ;;  %697 = vmatpush.msra.mxu0 %v8577_v6  ;;  %893 = vmatpush.msra.mxu3 %v8577_v6 }
 0x34a   : > { %766 = vmatpush.msra.mxu1 %v765_v36  ;;  %849 = vmatpush.msra.mxu2 %v8589_v28  ;;  %v8726_v36 = vsub.f32 %v632_v32, %v8688_v55 }
 0x34b   : > { %v8629_v23 = vsub.f32 %v432_v11, %v8597_v37  ;;  %v776_v11 = vsub.f32 %v8575_v2, %v13198_v42  ;;  %v13476_v42 = vand.u32 4294901760, %v8589_v28  ;;  %699 = vmatpush.msra.mxu0 %v8597_v37  ;;  %895 = vmatpush.msra.mxu3 %v8597_v37 }
 0x34c   : > { %852 = vmatpush.msra.mxu2 %v8605_v45 }
 0x34d   : > { %v782_v51 = vsub.f32 %v8589_v28, %v13476_v42  ;;  %v777_v26 = vand.u32 4294901760, %v776_v11  ;;  %701 = vmatpush.msra.mxu0 %v8612_v58  ;;  %897 = vmatpush.msra.mxu3 %v8612_v58 }
 0x34e   : > { %v7836_v50 = vpop.eup %7835  ;;  %855 = vmatpush.msra.mxu2 %v8629_v23 }
 0x34f   : > { %v8562_v20 = vadd.f32 1.0, %v7836_v50  ;;  %v664_v50 = vld [vmem:[%s8351_s22 + $0x7c0] sm:$0xff]  ;;  %703 = vmatpush.msra.mxu0 %v8619_v18  ;;  %899 = vmatpush.msra.mxu3 %v8619_v18 }
 0x350   : > { %v8631_v22 = vand.u32 4294901760, %v664_v50 }
 0x351   : > { %7837 = vrcp.f32 %v8562_v20  ;;  %v6599_v43 = vand.u32 2147483647, %v8562_v20  ;;  %vm6595_vm6 = vweird.f32 %v8562_v20  ;;  %v6601_v44 = vand.u32 2147483648, %v8562_v20 }
 0x352   : > { %13473 = vst [vmem:[#allocation34_spill] sm:$0xff] %v8631_v22  ;;  %v8654_v63 = vsub.f32 %v664_v50, %v8631_v22  ;;  %v771_v50 = vand.u32 4294901760, %v770_v24  ;;  %v788_v24 = vsub.f32 %v8605_v45, %v13478_v27  ;;  %v8705_v27 = vsub.f32 %v640_v35, %v8672_v59 }
 0x353   : > { %vm8636_vm7 = vcmp.eq.f32.partialorder %v6599_v43, 8.507059e+37  ;;  %v8649_v43 = vsub.f32 %v424_v30, %v8612_v58  ;;  %v8664_v30 = vand.u32 4294901760, %v648_v21  ;;  %v6602_v34 = vor.u32 1.1754944e-38, %v6601_v44 }
 0x354   : > { %v13209_v38 = vand.u32 4294901760, %v8654_v63  ;;  %772 = vmatpush.msra.mxu1 %v771_v50  ;;  %v13480_v44 = vand.u32 4294901760, %v8629_v23  ;;  %v8715_v50 = vand.u32 4294901760, %v616_v40 }
 0x355   : > { %858 = vmatpush.msra.mxu2 %v8649_v43 }
 0x356   : > { %778 = vmatpush.msra.mxu1 %v777_v26  ;;  %v1063_v26 = vsub.f32 %v8670_v60, %v13483_v49  ;;  %v8746_v49 = vsub.f32 %v616_v40, %v8715_v50 }
 0x357   : > { %v8622_v31 = vpop.eup %7837  ;;  %861 = vmatpush.msra.mxu2 %v8662_v52 }
 0x358   : > { %v6591_v19 = vmul.f32 %v8622_v31, %v8562_v20  ;;  %vm6596_vm8 = vweird.f32 %v8622_v31  ;;  %v789_v20 = vand.u32 4294901760, %v788_v24 }
 0x359   : > { %vm6597_vm9 = vmor %vm6595_vm6, %vm6596_vm8  ;;  %1014 = vmatpush.msrb.mxu2 %v8631_v22 }
 0x35a   : > { %v6592_v62 = vsub.f32 1.0, %v6591_v19  ;;  %v624_v19 = vld [vmem:[%s8351_s22 + $0x680] sm:$0xff] }
 0x35b   : > { %v8707_v17 = vand.u32 4294901760, %v624_v19  ;;  %1016 = vmatpush.msrb.mxu2 %v8651_v0 }
 0x35c   : > { %v6593_v42 = vmul.f32 %v8622_v31, %v6592_v62  ;;  %v8686_v62 = vsub.f32 %v648_v21, %v8664_v30  ;;  %v783_v21 = vand.u32 4294901760, %v782_v51  ;;  %v1057_v51 = vsub.f32 %v8654_v63, %v13209_v38 }
 0x35d   : > { %v13482_v38 = vand.u32 4294901760, %v8662_v52  ;;  %v8739_v24 = vsub.f32 %v624_v19, %v8707_v17  ;;  %1018 = vmatpush.msrb.mxu2 %v8664_v30 }
 0x35e   : > { %13479 = vst [vmem:[#allocation36_spill] sm:$0xff] %v8686_v62  ;;  %v6594_v33 = vadd.f32 %v8622_v31, %v6593_v42  ;;  %v794_v42 = vsub.f32 %v8629_v23, %v13480_v44  ;;  %v608_v44 = vld [vmem:[%s8351_s22 + $0x600] sm:$0xff]  ;;  %784 = vmatpush.msra.mxu1 %v783_v21  ;;  %v13484_v19 = vand.u32 4294901760, %v8686_v62 }
 0x35f   : > { %v592_v21 = vld [vmem:[%s8351_s22 + $0x580] sm:$0xff]  ;;  %1020 = vmatpush.msrb.mxu2 %v8672_v59 }
 0x360   : > { %v6598_v11 = vsel %vm6597_vm9, %v8622_v31, %v6594_v33  ;;  %v13481_v33 = vand.u32 4294901760, %v8649_v43  ;;  %790 = vmatpush.msra.mxu1 %v789_v20  ;;  %v1069_v32 = vsub.f32 %v8686_v62, %v13484_v19  ;;  %v13485_v20 = vand.u32 4294901760, %v8482_v7  ;;  %v576_v62 = vld [vmem:[%s8351_s22 + $0x500] sm:$0xff] }
 0x361   : > { %v6603_v35 = vsel %vm8636_vm7, %v6602_v34, %v6598_v11  ;;  %v806_v34 = vsub.f32 %v8662_v52, %v13482_v38  ;;  %v600_v11 = vld [vmem:[%s8351_s22 + $0x5c0] sm:$0xff]  ;;  %v1058_v38 = vand.u32 4294901760, %v1057_v51  ;;  %v1064_v51 = vand.u32 4294901760, %v1063_v26  ;;  %1022 = vmatpush.msrb.mxu2 %v8688_v55 }
 0x362   : > { %v800_v31 = vsub.f32 %v8649_v43, %v13481_v33  ;;  %6607 = vperm.xlu0 %7827, %v6603_v35   ;;  %v795_v33 = vand.u32 4294901760, %v794_v42  ;;  %v8741_v35 = vand.u32 4294901760, %v608_v44  ;;  %v8754_v61 = vand.u32 4294901760, %v600_v11  ;;  %910 = vmatpush.msrb.mxu0 %v13485_v20 }
 0x363   : > { %v807_v40 = vand.u32 4294901760, %v806_v34  ;;  %v13222_v19 = vand.u32 4294901760, %v8739_v24  ;;  %v8768_v22 = vand.u32 4294901760, %v592_v21  ;;  %1059 = vmatpush.msrb.mxu3 %v1058_v38  ;;  %v13223_v34 = vand.u32 4294901760, %v8746_v49  ;;  %1024 = vmatpush.msrb.mxu2 %v8707_v17 }
 0x364   : > { %v801_v42 = vand.u32 4294901760, %v800_v31  ;;  %796 = vmatpush.msra.mxu1 %v795_v33  ;;  %v13486_v31 = vand.u32 4294901760, %v8705_v27  ;;  %v8766_v13 = vsub.f32 %v608_v44, %v8741_v35  ;;  %v13487_v7 = vand.u32 4294901760, %v8486_v8 }
 0x365   : > { %v1070_v26 = vand.u32 4294901760, %v1069_v32  ;;  %v13488_v33 = vand.u32 4294901760, %v8726_v36  ;;  %v8779_v44 = vsub.f32 %v600_v11, %v8754_v61  ;;  %1065 = vmatpush.msrb.mxu3 %v1064_v51  ;;  %v8784_v38 = vand.u32 4294901760, %v576_v62  ;;  %1026 = vmatpush.msrb.mxu2 %v8715_v50 }
 0x366   : > { %v1075_v60 = vsub.f32 %v8705_v27, %v13486_v31  ;;  %802 = vmatpush.msra.mxu1 %v801_v42  ;;  %914 = vmatpush.msrb.mxu0 %v13487_v7  ;;  %v8781_v31 = vand.u32 4294901760, %v584_v12  ;;  %v568_v42 = vld [vmem:[%s8351_s22 + $0x4c0] sm:$0xff]  ;;  %v13489_v8 = vand.u32 4294901760, %v8490_v9  ;;  %v1087_v7 = vsub.f32 %v8739_v24, %v13222_v19 }
 0x367   : > { %v1081_v20 = vsub.f32 %v8726_v36, %v13488_v33  ;;  %v13224_v11 = vand.u32 4294901760, %v8766_v13  ;;  %v8794_v33 = vsub.f32 %v592_v21, %v8768_v22  ;;  %v1093_v9 = vsub.f32 %v8746_v49, %v13223_v34  ;;  %1071 = vmatpush.msrb.mxu3 %v1070_v26  ;;  %v552_v26 = vld [vmem:[%s8351_s22 + $0x440] sm:$0xff]  ;;  %1028 = vmatpush.msrb.mxu2 %v8741_v35 }
 0x368   : > { %808 = vmatpush.msra.mxu1 %v807_v40  ;;  %918 = vmatpush.msrb.mxu0 %v13489_v8  ;;  %v1076_v32 = vand.u32 4294901760, %v1075_v60  ;;  %v560_v40 = vld [vmem:[%s8351_s22 + $0x480] sm:$0xff]  ;;  %v13490_v60 = vand.u32 4294901760, %v8495_v14  ;;  %v1104_v8 = vand.u32 4294901760, %v8779_v44  ;;  %v8806_v21 = vsub.f32 %v584_v12, %v8781_v31 }
 0x369   : > { %v1082_v51 = vand.u32 4294901760, %v1081_v20  ;;  %v8808_v19 = vand.u32 4294901760, %v568_v42  ;;  %v13491_v14 = vand.u32 4294901760, %v8498_v15  ;;  %v1088_v20 = vand.u32 4294901760, %v1087_v7  ;;  %1030 = vmatpush.msrb.mxu2 %v8754_v61 }
 0x36a   : > { %977 = vmatpush.msrb.mxu1 %v8465_v54  ;;  %922 = vmatpush.msrb.mxu0 %v13490_v60  ;;  %v8813_v54 = vsub.f32 %v576_v62, %v8784_v38  ;;  %v1099_v12 = vsub.f32 %v8766_v13, %v13224_v11  ;;  %v1110_v60 = vand.u32 4294901760, %v8794_v33  ;;  %v8822_v34 = vand.u32 4294901760, %v560_v40  ;;  %v544_v62 = vld [vmem:[%s8351_s22 + $0x400] sm:$0xff] }
 0x36b   : > { %1077 = vmatpush.msrb.mxu3 %v1076_v32  ;;  %v13492_v32 = vand.u32 4294901760, %v8501_v16  ;;  %v1105_v15 = vsub.f32 %v8779_v44, %v1104_v8  ;;  %v1116_v7 = vand.u32 4294901760, %v8806_v21  ;;  %v8836_v11 = vand.u32 4294901760, %v552_v26  ;;  %1032 = vmatpush.msrb.mxu2 %v8768_v22 }
 0x36c   : > { %979 = vmatpush.msrb.mxu1 %v8467_v41  ;;  %926 = vmatpush.msrb.mxu0 %v13491_v14  ;;  %v1094_v41 = vand.u32 4294901760, %v1093_v9  ;;  %v8834_v14 = vsub.f32 %v568_v42, %v8808_v19  ;;  %v13493_v16 = vand.u32 4294901760, %v8513_v25  ;;  %v1100_v9 = vand.u32 4294901760, %v1099_v12 }
 0x36d   : > { %1083 = vmatpush.msrb.mxu3 %v1082_v51  ;;  %v1111_v51 = vsub.f32 %v8794_v33, %v1110_v60  ;;  %v8847_v42 = vsub.f32 %v560_v40, %v8822_v34  ;;  %v1106_v25 = vand.u32 4294901760, %v1105_v15  ;;  %v8860_v40 = vsub.f32 %v552_v26, %v8836_v11  ;;  %1034 = vmatpush.msrb.mxu2 %v8781_v31 }
 0x36e   : > { %981 = vmatpush.msrb.mxu1 %v8469_v56  ;;  %930 = vmatpush.msrb.mxu0 %v13492_v32  ;;  %v1122_v56 = vand.u32 4294901760, %v8813_v54  ;;  %v8849_v32 = vand.u32 4294901760, %v544_v62  ;;  %v1128_v12 = vand.u32 4294901760, %v8834_v14 }
 0x36f   : > { %1089 = vmatpush.msrb.mxu3 %v1088_v20  ;;  %v1117_v20 = vsub.f32 %v8806_v21, %v1116_v7  ;;  %v1134_v15 = vand.u32 4294901760, %v8847_v42  ;;  %1036 = vmatpush.msrb.mxu2 %v8784_v38 }
 0x370   : > { %983 = vmatpush.msrb.mxu1 %v8474_v3  ;;  %934 = vmatpush.msrb.mxu0 %v13493_v16  ;;  %v13494_v3 = vand.u32 4294901760, %v8539_v39  ;;  %v1112_v39 = vand.u32 4294901760, %v1111_v51  ;;  %v8871_v16 = vsub.f32 %v544_v62, %v8849_v32  ;;  %v1129_v26 = vsub.f32 %v8834_v14, %v1128_v12 }
 0x371   : > { %1095 = vmatpush.msrb.mxu3 %v1094_v41  ;;  %v1123_v41 = vsub.f32 %v8813_v54, %v1122_v56  ;;  %1038 = vmatpush.msrb.mxu2 %v8808_v19 }
 0x372   : > { %985 = vmatpush.msrb.mxu1 %v8476_v4  ;;  %938 = vmatpush.msrb.mxu0 %v13494_v3  ;;  %v13495_v4 = vand.u32 4294901760, %v8566_v57  ;;  %v1118_v57 = vand.u32 4294901760, %v1117_v20  ;;  %v1146_v51 = vand.u32 4294901760, %v8871_v16  ;;  %v414_v3 = vld [vmem:[#allocation10] sm:$0xff]  ;;  %v13499_v20 = vand.u32 4294901760, %v8605_v45 }
 0x373   : > { %1101 = vmatpush.msrb.mxu3 %v1100_v9  ;;  %v1140_v9 = vand.u32 4294901760, %v8860_v40  ;;  %v1124_v62 = vand.u32 4294901760, %v1123_v41  ;;  %1040 = vmatpush.msrb.mxu2 %v8822_v34  ;;  %v13502_v45 = vand.u32 4294901760, %v8649_v43 }
 0x374   : > { %987 = vmatpush.msrb.mxu1 %v8478_v5  ;;  %942 = vmatpush.msrb.mxu0 %v13495_v4  ;;  %v13496_v5 = vand.u32 4294901760, %v8570_v1  ;;  %v1135_v1 = vsub.f32 %v8847_v42, %v1134_v15  ;;  %v8900_v4 = vand.u32 4294901760, %v414_v3 }
 0x375   : > { %1107 = vmatpush.msrb.mxu3 %v1106_v25  ;;  %v1130_v25 = vand.u32 4294901760, %v1129_v26  ;;  %1042 = vmatpush.msrb.mxu2 %v8836_v11  ;;  %v13510_v26 = vand.u32 4294901760, %v8705_v27 }
 0x376   : > { %989 = vmatpush.msrb.mxu1 %v8492_v10  ;;  %946 = vmatpush.msrb.mxu0 %v13496_v5  ;;  %v13497_v10 = vand.u32 4294901760, %v8575_v2  ;;  %v1141_v2 = vsub.f32 %v8860_v40, %v1140_v9  ;;  %13500 = vst [vmem:[#allocation37_spill] sm:$0xff] %v8900_v4  ;;  %v8914_v41 = vsub.f32 %v414_v3, %v8900_v4 }
 0x377   : > { %1113 = vmatpush.msrb.mxu3 %v1112_v39  ;;  %1044 = vmatpush.msrb.mxu2 %v8849_v32 }
 0x378   : > { %991 = vmatpush.msrb.mxu1 %v8526_v29  ;;  %950 = vmatpush.msrb.mxu0 %v13497_v10  ;;  %v13498_v29 = vand.u32 4294901760, %v8589_v28  ;;  %v1147_v28 = vsub.f32 %v8871_v16, %v1146_v51  ;;  %v1142_v39 = vand.u32 4294901760, %v1141_v2  ;;  %v13514_v10 = vand.u32 4294901760, %v8766_v13 }
 0x379   : > { %1119 = vmatpush.msrb.mxu3 %v1118_v57  ;;  %864 = vmatmul.f32.vlgmr.msra.gmra.mxu2 %v8914_v41 }
 0x37a   : > { %993 = vmatpush.msrb.mxu1 %v8548_v46  ;;  %954 = vmatpush.msrb.mxu0 %v13498_v29  ;;  %v1136_v46 = vand.u32 4294901760, %v1135_v1  ;;  %v1148_v5 = vand.u32 4294901760, %v1147_v28 }
 0x37b   : > { %1125 = vmatpush.msrb.mxu3 %v1124_v62  ;;  %810 = vmatmul.f32.vlgmr.msra.gmra.mxu1 %v8900_v4 }
 0x37c   : > { %995 = vmatpush.msrb.mxu1 %v8550_v47  ;;  %958 = vmatpush.msrb.mxu0 %v13499_v20  ;;  %v13501_v47 = vand.u32 4294901760, %v8629_v23  ;;  %v13503_v23 = vand.u32 4294901760, %v8654_v63 }
 0x37d   : > { %1131 = vmatpush.msrb.mxu3 %v1130_v25 }
 0x37e   : > { %997 = vmatpush.msrb.mxu1 %v8552_v48  ;;  %962 = vmatpush.msrb.mxu0 %v13501_v47  ;;  %v13504_v48 = vand.u32 4294901760, %v8662_v52  ;;  %v13511_v52 = vand.u32 4294901760, %v8726_v36  ;;  %v13521_v47 = vld [vmem:[#allocation23_spill] sm:$0xff] }
 0x37f   : > { %1137 = vmatpush.msrb.mxu3 %v1136_v46  ;;  %1251 = vmatpush.msra.mxu2 %v13503_v23 }
 0x380   : > { %999 = vmatpush.msrb.mxu1 %v8560_v53  ;;  %966 = vmatpush.msrb.mxu0 %v13502_v45  ;;  %v13505_v53 = vld [vmem:[#allocation35_spill] sm:$0xff] }
 0x381   : > { %1143 = vmatpush.msrb.mxu3 %v1142_v39  ;;  %v13506_v43 = vand.u32 4294901760, %v13505_v53 }
 0x382   : > { %1001 = vmatpush.msrb.mxu1 %v8577_v6  ;;  %970 = vmatpush.msrb.mxu0 %v13504_v48  ;;  %v13507_v6 = vld [vmem:[#allocation36_spill] sm:$0xff]  ;;  %v473_v48 = vld [vmem:[%s8351_s22 + $0x1c8] sm:$0xff] }
 0x383   : > { %1149 = vmatpush.msrb.mxu3 %v1148_v5  ;;  %1255 = vmatpush.msra.mxu2 %v13506_v43  ;;  %v13508_v57 = vand.u32 4294901760, %v13507_v6 }
 0x384   : > { %1003 = vmatpush.msrb.mxu1 %v8597_v37  ;;  %v13509_v37 = vld [vmem:[#allocation34_spill] sm:$0xff] }
 0x385   : > { %1259 = vmatpush.msra.mxu2 %v13508_v57 }
 0x386   : > { %1005 = vmatpush.msrb.mxu1 %v8612_v58  ;;  %v13512_v58 = vand.u32 4294901760, %v8739_v24 }
 0x387   : > { %1263 = vmatpush.msra.mxu2 %v13510_v26 }
 0x388   : > { %1007 = vmatpush.msrb.mxu1 %v8619_v18  ;;  %v13513_v18 = vand.u32 4294901760, %v8746_v49 }
 0x389   : > { %1267 = vmatpush.msra.mxu2 %v13511_v52  ;;  %1009 = vmatmul.f32.vlgmr.msrb.gmra.mxu1 %v8900_v4 }
 0x38a   : > { %1210 = vmatpush.msra.mxu1 %v13509_v37 }
 0x38b   : > { %1271 = vmatpush.msra.mxu2 %v13512_v58 }
 0x38c   : > { %1212 = vmatpush.msra.mxu1 %v8651_v0 }
 0x38d   : > { %1275 = vmatpush.msra.mxu2 %v13513_v18  ;;  %v9128_v18 = vand.u32 4294901760, %v473_v48 }
 0x38e   : > { %1214 = vmatpush.msra.mxu1 %v8664_v30 }
 0x38f   : > { %1279 = vmatpush.msra.mxu2 %v13514_v10 }
 0x390   : > { %1216 = vmatpush.msra.mxu1 %v8672_v59 }
 0x391   : > { %1283 = vmatpush.msra.mxu2 %v1104_v8  ;;  %v8975_v8 = vand.u32 4294901760, %v8914_v41 }
 0x392   : > { %1218 = vmatpush.msra.mxu1 %v8688_v55 }
 0x393   : > { %1287 = vmatpush.msra.mxu2 %v1110_v60  ;;  %13515 = vst [vmem:[#allocation35_spill] sm:$0xff] %v8975_v8  ;;  %v707_v60 = vsub.f32 %v8914_v41, %v8975_v8  ;;  %903 = vmatmul.f32.vlgmr.msra.gmra.mxu3 %v8975_v8 }
 0x394   : > { %1220 = vmatpush.msra.mxu1 %v8707_v17  ;;  %1318 = vmatpush.msra.mxu3 %v13509_v37 }
 0x395   : > { %1291 = vmatpush.msra.mxu2 %v1116_v7  ;;  %v8981_v7 = vand.u32 4294901760, %v707_v60 }
 0x396   : > { %1222 = vmatpush.msra.mxu1 %v8715_v50  ;;  %1320 = vmatpush.msra.mxu3 %v8651_v0  ;;  %v415_v0 = vld [vmem:[#allocation10 + $0x8] sm:$0xff] }
 0x397   : > { %1295 = vmatpush.msra.mxu2 %v1122_v56  ;;  %13516 = vst [vmem:[#allocation36_spill] sm:$0xff] %v8981_v7  ;;  %709 = vmatmul.f32.vlgmr.msra.gmra.mxu0 %v8981_v7 }
 0x398   : > { %1224 = vmatpush.msra.mxu1 %v8741_v35  ;;  %1157 = vmatpush.msra.mxu0 %v8654_v63 }
 0x399   : > { %1299 = vmatpush.msra.mxu2 %v1128_v12  ;;  %1322 = vmatpush.msra.mxu3 %v8664_v30 }
 0x39a   : > { %1226 = vmatpush.msra.mxu1 %v8754_v61  ;;  %1160 = vmatpush.msra.mxu0 %v13505_v53  ;;  %v465_v53 = vld [vmem:[%s8351_s22 + $0x188] sm:$0xff] }
 0x39b   : > { %1303 = vmatpush.msra.mxu2 %v1134_v15  ;;  %1324 = vmatpush.msra.mxu3 %v8672_v59  ;;  %v529_v59 = vld [vmem:[%s8351_s22 + $0x388] sm:$0xff]  ;;  %v9131_v60 = vand.u32 4294901760, %v465_v53 }
 0x39c   : > { %1228 = vmatpush.msra.mxu1 %v8768_v22  ;;  %1163 = vmatpush.msra.mxu0 %v13507_v6  ;;  %v9024_v30 = vand.u32 4294901760, %v529_v59 }
 0x39d   : > { %1307 = vmatpush.msra.mxu2 %v1140_v9  ;;  %1326 = vmatpush.msra.mxu3 %v8688_v55  ;;  %v537_v55 = vld [vmem:[%s8351_s22 + $0x3c8] sm:$0xff] }
 0x39e   : > { %1230 = vmatpush.msra.mxu1 %v8781_v31  ;;  %1166 = vmatpush.msra.mxu0 %v8705_v27  ;;  %v513_v27 = vld [vmem:[%s8351_s22 + $0x308] sm:$0xff] }
 0x39f   : > { %1311 = vmatpush.msra.mxu2 %v1146_v51  ;;  %1328 = vmatpush.msra.mxu3 %v8707_v17  ;;  %v9006_v17 = vand.u32 4294901760, %v415_v0 }
 0x3a0   : > { %1232 = vmatpush.msra.mxu1 %v8784_v38  ;;  %972 = vmatmul.f32.vlgmr.msrb.gmra.mxu0 %v8900_v4 }
 0x3a1   : > { %1169 = vmatpush.msra.mxu0 %v8726_v36  ;;  %1330 = vmatpush.msra.mxu3 %v8715_v50  ;;  %13517 = vst [vmem:[#allocation34_spill] sm:$0xff] %v9006_v17  ;;  %v505_v50 = vld [vmem:[%s8351_s22 + $0x2c8] sm:$0xff] }
 0x3a2   : > { %1234 = vmatpush.msra.mxu1 %v8808_v19  ;;  %1151 = vmatmul.f32.vlgmr.msrb.gmra.mxu3 %v9006_v17 }
 0x3a3   : > { %1172 = vmatpush.msra.mxu0 %v8739_v24  ;;  %1332 = vmatpush.msra.mxu3 %v8741_v35  ;;  %v9030_v24 = vand.u32 4294901760, %v513_v27  ;;  %v9032_v35 = vand.u32 4294901760, %v505_v50 }
 0x3a4   : > { %1236 = vmatpush.msra.mxu1 %v8822_v34 }
 0x3a5   : > { %1175 = vmatpush.msra.mxu0 %v8746_v49  ;;  %1334 = vmatpush.msra.mxu3 %v8754_v61  ;;  %v521_v61 = vld [vmem:[%s8351_s22 + $0x348] sm:$0xff] }
 0x3a6   : > { %1238 = vmatpush.msra.mxu1 %v8836_v11  ;;  %v9026_v36 = vand.u32 4294901760, %v521_v61  ;;  %v497_v49 = vld [vmem:[%s8351_s22 + $0x288] sm:$0xff] }
 0x3a7   : > { %1178 = vmatpush.msra.mxu0 %v8766_v13  ;;  %1336 = vmatpush.msra.mxu3 %v8768_v22  ;;  %v9011_v13 = vsub.f32 %v415_v0, %v9006_v17  ;;  %v9022_v22 = vand.u32 4294901760, %v537_v55 }
 0x3a8   : > { %1240 = vmatpush.msra.mxu1 %v8849_v32 }
 0x3a9   : > { %1181 = vmatpush.msra.mxu0 %v8779_v44  ;;  %1338 = vmatpush.msra.mxu3 %v8781_v31  ;;  %13518 = vst [vmem:[#allocation38_spill] sm:$0xff] %v9011_v13  ;;  %v9020_v63 = vand.u32 4294901760, %v9011_v13  ;;  %v9041_v44 = vsub.f32 %v537_v55, %v9022_v22  ;;  %v9044_v31 = vsub.f32 %v529_v59, %v9024_v30 }
 0x3ab   : > { %1184 = vmatpush.msra.mxu0 %v8794_v33  ;;  %1340 = vmatpush.msra.mxu3 %v8784_v38  ;;  %13519 = vst [vmem:[#allocation39_spill] sm:$0xff] %v9020_v63  ;;  %v9046_v38 = vand.u32 4294901760, %v497_v49  ;;  %v9049_v33 = vsub.f32 %v521_v61, %v9026_v36  ;;  %v13237_v12 = vand.u32 4294901760, %v9041_v44  ;;  %v13235_v15 = vand.u32 4294901760, %v9044_v31 }
 0x3ac   : > { %1244 = vmatmul.f32.vlgmr.msra.gmra.mxu1 %v9020_v63 }
 0x3ad   : > { %1187 = vmatpush.msra.mxu0 %v8806_v21  ;;  %1342 = vmatpush.msra.mxu3 %v8808_v19  ;;  %v489_v19 = vld [vmem:[%s8351_s22 + $0x248] sm:$0xff]  ;;  %v9052_v21 = vsub.f32 %v513_v27, %v9030_v24  ;;  %v9068_v9 = vsub.f32 %v497_v49, %v9046_v38  ;;  %v13234_v62 = vand.u32 4294901760, %v9049_v33  ;;  %v1404_v3 = vsub.f32 %v9044_v31, %v13235_v15 }
 0x3ae   : > { %v457_v27 = vld [vmem:[%s8351_s22 + $0x148] sm:$0xff] }
 0x3af   : > { %1190 = vmatpush.msra.mxu0 %v8813_v54  ;;  %1344 = vmatpush.msra.mxu3 %v8822_v34  ;;  %v1048_v34 = vsub.f32 %v9011_v13, %v9020_v63  ;;  %v9055_v54 = vsub.f32 %v505_v50, %v9032_v35  ;;  %v13232_v1 = vand.u32 4294901760, %v9052_v21  ;;  %v13230_v29 = vand.u32 4294901760, %v9068_v9 }
 0x3b0   : > { %v1405_v5 = vand.u32 4294901760, %v1404_v3 }
 0x3b1   : > { %1193 = vmatpush.msra.mxu0 %v8834_v14  ;;  %1346 = vmatpush.msra.mxu3 %v8836_v11  ;;  %v9057_v11 = vand.u32 4294901760, %v489_v19  ;;  %v481_v14 = vld [vmem:[%s8351_s22 + $0x208] sm:$0xff]  ;;  %v9062_v56 = vand.u32 4294901760, %v1048_v34  ;;  %v13231_v51 = vand.u32 4294901760, %v9055_v54  ;;  %v1416_v20 = vsub.f32 %v9052_v21, %v13232_v1 }
 0x3b2   : > { %v9086_v25 = vand.u32 4294901760, %v481_v14  ;;  %v9107_v23 = vsub.f32 %v9068_v9, %v13230_v29 }
 0x3b3   : > { %1196 = vmatpush.msra.mxu0 %v8847_v42  ;;  %13520 = vst [vmem:[#allocation40_spill] sm:$0xff] %v9062_v56  ;;  %1348 = vmatpush.msra.mxu3 %v8849_v32  ;;  %v9075_v42 = vsub.f32 %v489_v19, %v9057_v11  ;;  %v1398_v32 = vsub.f32 %v9041_v44, %v13237_v12  ;;  %v1417_v37 = vand.u32 4294901760, %v1416_v20  ;;  %v633_v12 = vld [vmem:[%s8351_s22 + $0x6c8] sm:$0xff] }
 0x3b4   : > { %1050 = vmatmul.f32.vlgmr.msrb.gmra.mxu2 %v9062_v56  ;;  %v9099_v46 = vsub.f32 %v9055_v54, %v13231_v51  ;;  %1350 = vmatmul.f32.vlgmr.msra.gmra.mxu3 %v9006_v17  ;;  %v9115_v6 = vsub.f32 %v481_v14, %v9086_v25  ;;  %v1429_v52 = vand.u32 4294901760, %v9107_v23  ;;  %v601_v56 = vld [vmem:[%s8351_s22 + $0x5c8] sm:$0xff] }
 0x3b5   : > { %1551 = vmatpush.msrb.mxu3 %v9022_v22  ;;  %1199 = vmatpush.msra.mxu0 %v8860_v40  ;;  %v1410_v40 = vsub.f32 %v9049_v33, %v13234_v62  ;;  %v13225_v28 = vand.u32 4294901760, %v9075_v42  ;;  %v1399_v45 = vand.u32 4294901760, %v1398_v32 }
 0x3b6   : > { %1498 = vmatpush.msrb.mxu2 %v9041_v44  ;;  %v1423_v26 = vand.u32 4294901760, %v9099_v46  ;;  %v13229_v10 = vand.u32 4294901760, %v9115_v6 }
 0x3b7   : > { %1553 = vmatpush.msrb.mxu3 %v9024_v30  ;;  %1202 = vmatpush.msra.mxu0 %v8871_v16  ;;  %v1411_v43 = vand.u32 4294901760, %v1410_v40  ;;  %v13522_v16 = vld [vmem:[#allocation31_spill] sm:$0xff]  ;;  %v1434_v58 = vsub.f32 %v9075_v42, %v13225_v28 }
 0x3b8   : > { %1501 = vmatpush.msrb.mxu2 %v9044_v31  ;;  %1400 = vmatpush.msrb.mxu1 %v1399_v45  ;;  %v13523_v45 = vld [vmem:[#allocation24_spill] sm:$0xff] }
 0x3b9   : > { %1355 = vmatpush.msrb.mxu0 %v9022_v22  ;;  %1555 = vmatpush.msrb.mxu3 %v9026_v36 }
 0x3ba   : > { %1504 = vmatpush.msrb.mxu2 %v9049_v33  ;;  %1406 = vmatpush.msrb.mxu1 %v1405_v5 }
 0x3bb   : > { %1357 = vmatpush.msrb.mxu0 %v9024_v30  ;;  %1557 = vmatpush.msrb.mxu3 %v9030_v24 }
 0x3bc   : > { %1507 = vmatpush.msrb.mxu2 %v9052_v21  ;;  %1412 = vmatpush.msrb.mxu1 %v1411_v43  ;;  %v13525_v43 = vld [vmem:[#allocation25_spill] sm:$0xff] }
 0x3bd   : > { %1359 = vmatpush.msrb.mxu0 %v9026_v36  ;;  %1559 = vmatpush.msrb.mxu3 %v9032_v35 }
 0x3be   : > { %1510 = vmatpush.msrb.mxu2 %v9055_v54  ;;  %1418 = vmatpush.msrb.mxu1 %v1417_v37  ;;  %v1440_v37 = vsub.f32 %v9115_v6, %v13229_v10 }
 0x3bf   : > { %1361 = vmatpush.msrb.mxu0 %v9030_v24  ;;  %1561 = vmatpush.msrb.mxu3 %v9046_v38 }
 0x3c0   : > { %1513 = vmatpush.msrb.mxu2 %v9068_v9  ;;  %1424 = vmatpush.msrb.mxu1 %v1423_v26 }
 0x3c1   : > { %1363 = vmatpush.msrb.mxu0 %v9032_v35  ;;  %1563 = vmatpush.msrb.mxu3 %v9057_v11 }
 0x3c2   : > { %1516 = vmatpush.msrb.mxu2 %v9075_v42  ;;  %1430 = vmatpush.msrb.mxu1 %v1429_v52 }
 0x3c3   : > { %1365 = vmatpush.msrb.mxu0 %v9046_v38  ;;  %1565 = vmatpush.msrb.mxu3 %v9086_v25 }
 0x3c4   : > { %1519 = vmatpush.msrb.mxu2 %v9115_v6  ;;  %1205 = vmatmul.f32.vlgmr.msra.gmra.mxu0 %v9011_v13  ;;  %v609_v13 = vld [vmem:[%s8351_s22 + $0x608] sm:$0xff] }
 0x3c5   : > { %1367 = vmatpush.msrb.mxu0 %v9057_v11  ;;  %1567 = vmatpush.msrb.mxu3 %v9128_v18 }
 0x3c6   : > { %1313 = vmatmul.f32.vlgmr.msra.gmra.mxu2 %v9006_v17  ;;  %v585_v17 = vld [vmem:[%s8351_s22 + $0x548] sm:$0xff] }
 0x3c7   : > { %1369 = vmatpush.msrb.mxu0 %v9086_v25  ;;  %1569 = vmatpush.msrb.mxu3 %v9131_v60 }
 0x3c9   : > { %1371 = vmatpush.msrb.mxu0 %v9128_v18 }
 0x3cb   : > { %1373 = vmatpush.msrb.mxu0 %v9131_v60 }
 0x3d4   : > { %v6608_v2 = vpop.permute.xlu0 %6607 }
 0x3d5   : > { %v6612_v39 = vperm.slane %v6608_v2, %v13521_v47 }
 0x3d7   : > { %v9118_v57 = vmul.f32 %v13522_v16, %v6612_v39  ;;  %v9148_v39 = vand.u32 4294901760, %v457_v27 }
 0x3d9   : > { %v6616_v0 = vperm.slane %v9118_v57, 0  ;;  %v6617_v55 = vperm.slane %v9118_v57, 4  ;;  %v6624_v59 = vperm.slane %v9118_v57, 1  ;;  %v6625_v61 = vperm.slane %v9118_v57, 5  ;;  %1375 = vmatpush.msrb.mxu0 %v9148_v39  ;;  %1571 = vmatpush.msrb.mxu3 %v9148_v39 }
 0x3da   : > { %v6634_v50 = vperm.slane %v9118_v57, 2  ;;  %v6635_v49 = vperm.slane %v9118_v57, 6  ;;  %v6644_v19 = vperm.slane %v9118_v57, 3  ;;  %v6645_v34 = vperm.slane %v9118_v57, 7 }
 0x3db   : > { %v6620_v14 = vperm.slane %v6616_v0, 0  ;;  %v6621_v32 = vperm.slane %v6617_v55, 0  ;;  %v6628_v3 = vperm.slane %v6624_v59, 1  ;;  %v6629_v2 = vperm.slane %v6625_v61, 1  ;;  %v13524_v0 = vld [vmem:[#allocation26_spill] sm:$0xff] }
 0x3dc   : > { %v6638_v40 = vperm.slane %v6634_v50, 2  ;;  %v6639_v20 = vperm.slane %v6635_v49, 2  ;;  %v6649_v46 = vperm.slane %v6645_v34, 3  ;;  %v6648_v49 = vperm.slane %v6644_v19, 3 }
 0x3dd   : > { %v6622_v5 = vmul.f32 %v6620_v14, %v13523_v45  ;;  %v6623_v23 = vmul.f32 %v6621_v32, %v13523_v45  ;;  %v6630_v55 = vmul.f32 %v6628_v3, %v13524_v0  ;;  %v6631_v59 = vmul.f32 %v6629_v2, %v13524_v0  ;;  %v13526_v3 = vld [vmem:[#allocation27_spill] sm:$0xff] }
 0x3de   : > { %v6640_v61 = vmul.f32 %v6638_v40, %v13525_v43  ;;  %v6641_v50 = vmul.f32 %v6639_v20, %v13525_v43  ;;  %v1435_v14 = vand.u32 4294901760, %v1434_v58  ;;  %v9159_v32 = vsub.f32 %v473_v48, %v9128_v18  ;;  %v617_v43 = vld [vmem:[%s8351_s22 + $0x648] sm:$0xff] }
 0x3df   : > { %v6632_v34 = vadd.f32 %v6630_v55, %v6622_v5  ;;  %v6633_v28 = vadd.f32 %v6631_v59, %v6623_v23  ;;  %v6651_v2 = vmul.f32 %v6649_v46, %v13526_v3  ;;  %v9168_v19 = vsub.f32 %v465_v53, %v9131_v60  ;;  %v449_v53 = vld [vmem:[%s8351_s22 + $0x108] sm:$0xff] }
 0x3e0   : > { %v13228_v48 = vand.u32 4294901760, %v9159_v32  ;;  %v9173_v58 = vsub.f32 %v457_v27, %v9148_v39  ;;  %v6650_v20 = vmul.f32 %v6648_v49, %v13526_v3  ;;  %v1441_v46 = vand.u32 4294901760, %v1440_v37  ;;  %1436 = vmatpush.msrb.mxu1 %v1435_v14  ;;  %v441_v55 = vld [vmem:[%s8351_s22 + $0xc8] sm:$0xff]  ;;  %1522 = vmatpush.msrb.mxu2 %v9159_v32 }
 0x3e1   : > { %v6642_v40 = vadd.f32 %v6640_v61, %v6632_v34  ;;  %v6643_v26 = vadd.f32 %v6641_v50, %v6633_v28  ;;  %v13227_v52 = vand.u32 4294901760, %v9168_v19  ;;  %v9186_v23 = vand.u32 4294901760, %v449_v53 }
 0x3e2   : > { %v1446_v28 = vsub.f32 %v9159_v32, %v13228_v48  ;;  %1442 = vmatpush.msrb.mxu1 %v1441_v46  ;;  %v13226_v49 = vand.u32 4294901760, %v9173_v58  ;;  %v9199_v14 = vand.u32 4294901760, %v441_v55  ;;  %1525 = vmatpush.msrb.mxu2 %v9168_v19  ;;  %v425_v46 = vld [vmem:[%s8351_s22 + $0x48] sm:$0xff]  ;;  %v9313_v63 = vand.u32 4294901760, %v617_v43 }
 0x3e3   : > { %v6653_v5 = vadd.f32 %v6651_v2, %v6643_v26  ;;  %v6652_v27 = vadd.f32 %v6650_v20, %v6642_v40  ;;  %v1452_v50 = vsub.f32 %v9168_v19, %v13227_v52  ;;  %v9197_v34 = vsub.f32 %v449_v53, %v9186_v23  ;;  %v433_v2 = vld [vmem:[%s8351_s22 + $0x88] sm:$0xff]  ;;  %1377 = vmatpush.msrb.mxu0 %v9186_v23 }
 0x3e4   : > { %v1447_v61 = vand.u32 4294901760, %v1446_v28  ;;  %v1458_v26 = vsub.f32 %v9173_v58, %v13226_v49  ;;  %v9207_v20 = vand.u32 4294901760, %v433_v2  ;;  %v417_v53 = vld [vmem:[%s8351_s22 + $0x8] sm:$0xff]  ;;  %1528 = vmatpush.msrb.mxu2 %v9173_v58  ;;  %1573 = vmatpush.msrb.mxu3 %v9186_v23 }
 0x3e5   : > { %v6656_v59 = vrot.slane %v6653_v5, 4  ;;  %v1453_v40 = vand.u32 4294901760, %v1452_v50  ;;  %v665_v5 = vld [vmem:[%s8351_s22 + $0x7c8] sm:$0xff]  ;;  %1379 = vmatpush.msrb.mxu0 %v9199_v14 }
 0x3e6   : > { %1448 = vmatpush.msrb.mxu1 %v1447_v61  ;;  %v9219_v61 = vand.u32 4294901760, %v425_v46  ;;  %v657_v50 = vld [vmem:[%s8351_s22 + $0x788] sm:$0xff]  ;;  %v1459_v49 = vand.u32 4294901760, %v1458_v26  ;;  %v9224_v52 = vsub.f32 %v433_v2, %v9207_v20  ;;  %1531 = vmatpush.msrb.mxu2 %v9197_v34 }
 0x3e7   : > { %v6657_v37 = vsel %vm6140_vm0, %v6652_v27, %v6656_v59  ;;  %v9216_v27 = vsub.f32 %v441_v55, %v9199_v14  ;;  %v13233_v59 = vand.u32 4294901760, %v9197_v34  ;;  %v649_v48 = vld [vmem:[%s8351_s22 + $0x748] sm:$0xff]  ;;  %v13529_v55 = vld [vmem:[#allocation28_spill] sm:$0xff]  ;;  %v9251_v1 = vand.u32 4294901760, %v657_v50  ;;  %1575 = vmatpush.msrb.mxu3 %v9199_v14  ;;  %1381 = vmatpush.msrb.mxu0 %v9207_v20 }
 0x3e8   : > { %v6659_v28 = vadd.f32 %v6657_v37, %v9118_v57  ;;  %1454 = vmatpush.msrb.mxu1 %v1453_v40  ;;  %v9226_v57 = vand.u32 4294901760, %v417_v53  ;;  %v9228_v37 = vand.u32 4294901760, %v665_v5  ;;  %v9241_v26 = vsub.f32 %v425_v46, %v9219_v61 }
 0x3e9   : > { %v1464_v40 = vsub.f32 %v9197_v34, %v13233_v59  ;;  %v13236_v2 = vand.u32 4294901760, %v9216_v27  ;;  %v13238_v29 = vand.u32 4294901760, %v9224_v52  ;;  %v641_v59 = vld [vmem:[%s8351_s22 + $0x708] sm:$0xff]  ;;  %v9261_v62 = vand.u32 4294901760, %v649_v48  ;;  %1534 = vmatpush.msrb.mxu2 %v9216_v27  ;;  %1577 = vmatpush.msrb.mxu3 %v9207_v20 }
 0x3ea   : > { %13527 = vst [vmem:[#allocation41_spill] sm:$0xff] %v9226_v57  ;;  %v9232_v10 = vadd.f32 %v6659_v28, %v13529_v55  ;;  %1460 = vmatpush.msrb.mxu1 %v1459_v49  ;;  %v9246_v28 = vsub.f32 %v417_v53, %v9226_v57  ;;  %v9249_v51 = vsub.f32 %v665_v5, %v9228_v37  ;;  %v13530_v16 = vand.u32 4294901760, %v9241_v26 }
 0x3eb   : > { %13528 = vst [vmem:[#allocation42_spill] sm:$0xff] %v9228_v37  ;;  %v1465_v46 = vand.u32 4294901760, %v1464_v40  ;;  %v1470_v49 = vsub.f32 %v9216_v27, %v13236_v2  ;;  %v1476_v5 = vsub.f32 %v9224_v52, %v13238_v29  ;;  %v9271_v2 = vsub.f32 %v657_v50, %v9251_v1  ;;  %1537 = vmatpush.msrb.mxu2 %v9224_v52 }
 0x3ec   : > { %6664 = vst [vmem:[#allocation1] ss:$2 sm:$0xff] %v9232_v10  ;;  %v13242_v15 = vand.u32 4294901760, %v9249_v51  ;;  %v1482_v29 = vsub.f32 %v9241_v26, %v13530_v16  ;;  %v9278_v55 = vand.u32 4294901760, %v641_v59  ;;  %v9281_v3 = vsub.f32 %v649_v48, %v9261_v62  ;;  %1383 = vmatpush.msrb.mxu0 %v9219_v61  ;;  %1579 = vmatpush.msrb.mxu3 %v9219_v61 }
 0x3ed   : > { %1466 = vmatpush.msrb.mxu1 %v1465_v46  ;;  %v1471_v53 = vand.u32 4294901760, %v1470_v49  ;;  %v1477_v50 = vand.u32 4294901760, %v1476_v5  ;;  %v625_v49 = vld [vmem:[%s8351_s22 + $0x688] sm:$0xff]  ;;  %v13532_v16 = vand.u32 4294901760, %v9246_v28  ;;  %v9296_v5 = vand.u32 4294901760, %v633_v12  ;;  %1540 = vmatpush.msrb.mxu2 %v9241_v26 }
 0x3ee   : > { %13531 = vst [vmem:[#allocation43_spill] sm:$0xff] %v9281_v3  ;;  %v1739_v40 = vsub.f32 %v9249_v51, %v13242_v15  ;;  %v9299_v15 = vsub.f32 %v641_v59, %v9278_v55  ;;  %v1483_v46 = vand.u32 4294901760, %v1482_v29  ;;  %v9303_v45 = vand.u32 4294901760, %v625_v49  ;;  %v593_v29 = vld [vmem:[%s8351_s22 + $0x588] sm:$0xff]  ;;  %1385 = vmatpush.msrb.mxu0 %v9226_v57  ;;  %1581 = vmatpush.msrb.mxu3 %v9226_v57 }
 0x3ef   : > { %1472 = vmatpush.msrb.mxu1 %v1471_v53  ;;  %v1488_v48 = vsub.f32 %v9246_v28, %v13532_v16  ;;  %v13534_v16 = vand.u32 4294901760, %v9271_v2  ;;  %v9311_v59 = vsub.f32 %v633_v12, %v9296_v5  ;;  %1543 = vmatpush.msrb.mxu2 %v9246_v28  ;;  %v13541_v57 = vand.u32 4294901760, %v9044_v31 }
 0x3f0   : > { %13533 = vst [vmem:[#allocation44_spill] sm:$0xff] %v9299_v15  ;;  %v1740_v53 = vand.u32 4294901760, %v1739_v40  ;;  %v9328_v12 = vsub.f32 %v625_v49, %v9303_v45  ;;  %v9341_v49 = vsub.f32 %v617_v43, %v9313_v63  ;;  %v13544_v31 = vand.u32 4294901760, %v9049_v33  ;;  %1546 = vmatmul.f32.vlgmr.msrb.gmra.mxu2 %v8914_v41  ;;  %1391 = vmatmul.f32.vlgmr.msrb.gmra.mxu0 %v8981_v7 }
 0x3f1   : > { %1478 = vmatpush.msrb.mxu1 %v1477_v50  ;;  %v1745_v0 = vsub.f32 %v9271_v2, %v13534_v16  ;;  %13535 = vst [vmem:[#allocation45_spill] sm:$0xff] %v9311_v59  ;;  %v13538_v50 = vand.u32 4294901760, %v9281_v3  ;;  %v1489_v47 = vand.u32 4294901760, %v1488_v48  ;;  %1696 = vmatpush.msra.mxu2 %v9228_v37  ;;  %v13540_v48 = vand.u32 4294901760, %v9041_v44 }
 0x3f2   : > { %v9350_v37 = vand.u32 4294901760, %v593_v29  ;;  %1741 = vmatpush.msra.mxu3 %v1740_v53  ;;  %v13542_v44 = vand.u32 4294901760, %v9311_v59  ;;  %v9366_v53 = vand.u32 4294901760, %v585_v17 }
 0x3f3   : > { %v9318_v40 = vld.sshfl [vmem:[#allocation1] sm:$0xff pattern:$0x75316420]  ;;  %v9320_v4 = vld.sshfl [vmem:[#allocation1 + $0x8] sm:$0xff pattern:$0x75316420]  ;;  %v1751_v16 = vsub.f32 %v9281_v3, %v13538_v50  ;;  %1484 = vmatpush.msrb.mxu1 %v1483_v46  ;;  %1592 = vmatpush.msra.mxu0 %v13540_v48 }
 0x3f4   : > { %13536 = vst [vmem:[#allocation46_spill] sm:$0xff] %v9318_v40  ;;  %v13539_v40 = vand.u32 4294901760, %v9299_v15  ;;  %v9338_v3 = vand.u32 4294901760, %v609_v13  ;;  %1698 = vmatpush.msra.mxu2 %v9251_v1  ;;  %1585 = vmatmul.f32.vlgmr.msrb.gmra.mxu3 %v8975_v8 }
 0x3f5   : > { %13537 = vst [vmem:[#allocation47_spill] sm:$0xff] %v9320_v4  ;;  %v1746_v4 = vand.u32 4294901760, %v1745_v0  ;;  %1490 = vmatpush.msrb.mxu1 %v1489_v47  ;;  %1596 = vmatpush.msra.mxu0 %v13541_v57  ;;  %v1763_v0 = vsub.f32 %v9311_v59, %v13542_v44  ;;  %v13545_v47 = vand.u32 4294901760, %v9328_v12  ;;  %v9380_v44 = vsub.f32 %v593_v29, %v9350_v37 }
 0x3f6   : > { %6773 = vst [vmem:[#allocation1] ss:$2 sm:$0xff] %v9232_v10  ;;  %v1757_v50 = vsub.f32 %v9299_v15, %v13539_v40  ;;  %v9343_v10 = vand.u32 4294901760, %v601_v56  ;;  %v1752_v40 = vand.u32 4294901760, %v1751_v16  ;;  %v9354_v43 = vsub.f32 %v609_v13, %v9338_v3  ;;  %v577_v15 = vld [vmem:[%s8351_s22 + $0x508] sm:$0xff]  ;;  %v9369_v16 = vld [vmem:[%s8343_s10 + $0x10] sm:$0xff]  ;;  %1700 = vmatpush.msra.mxu2 %v9261_v62 }
 0x3f7   : > { %13543 = vst [vmem:[#allocation48_spill] sm:$0xff] %v9369_v16  ;;  %1659 = vmatpush.msra.mxu1 %v9022_v22  ;;  %1747 = vmatpush.msra.mxu3 %v1746_v4  ;;  %v1769_v57 = vsub.f32 %v9328_v12, %v13545_v47  ;;  %v9382_v48 = vand.u32 4294901760, %v577_v15  ;;  %v569_v22 = vld [vmem:[%s8351_s22 + $0x4c8] sm:$0xff]  ;;  %v13548_v4 = vand.u32 4294901760, %v9052_v21  ;;  %v1764_v33 = vand.u32 4294901760, %v1763_v0 }
 0x3f8   : > { %v9364_v46 = vsub.f32 %v601_v56, %v9343_v10  ;;  %v1758_v13 = vand.u32 4294901760, %v1757_v50  ;;  %1600 = vmatpush.msra.mxu0 %v13544_v31  ;;  %1702 = vmatpush.msra.mxu2 %v9278_v55  ;;  %v13549_v29 = vand.u32 4294901760, %v9341_v49  ;;  %v9399_v56 = vsub.f32 %v585_v17, %v9366_v53 }
 0x3f9   : > { %1661 = vmatpush.msra.mxu1 %v9024_v30  ;;  %1753 = vmatpush.msra.mxu3 %v1752_v40  ;;  %v561_v30 = vld [vmem:[%s8351_s22 + $0x488] sm:$0xff]  ;;  %v9404_v40 = vand.u32 4294901760, %v569_v22  ;;  %v13550_v21 = vand.u32 4294901760, %v9055_v54  ;;  %v1770_v0 = vand.u32 4294901760, %v1769_v57  ;;  %v9413_v17 = vsub.f32 %v577_v15, %v9382_v48 }
 0x3fa   : > { %1604 = vmatpush.msra.mxu0 %v13548_v4  ;;  %v1775_v31 = vsub.f32 %v9341_v49, %v13549_v29  ;;  %1704 = vmatpush.msra.mxu2 %v9296_v5  ;;  %v13551_v4 = vand.u32 4294901760, %v9354_v43  ;;  %v13552_v54 = vand.u32 4294901760, %v9068_v9  ;;  %v13554_v9 = vand.u32 4294901760, %v9075_v42 }
 0x3fb   : > { %1663 = vmatpush.msra.mxu1 %v9026_v36  ;;  %1759 = vmatpush.msra.mxu3 %v1758_v13  ;;  %v9418_v36 = vand.u32 4294901760, %v561_v30  ;;  %v545_v13 = vld [vmem:[%s8351_s22 + $0x408] sm:$0xff] }
 0x3fc   : > { %1608 = vmatpush.msra.mxu0 %v13550_v21  ;;  %v1781_v29 = vsub.f32 %v9354_v43, %v13551_v4  ;;  %1706 = vmatpush.msra.mxu2 %v9303_v45  ;;  %v1776_v57 = vand.u32 4294901760, %v1775_v31  ;;  %v13553_v21 = vand.u32 4294901760, %v9364_v46  ;;  %v13555_v31 = vand.u32 4294901760, %v9380_v44 }
 0x3fd   : > { %v9385_v59 = vld.sshfl [vmem:[#allocation1] sm:$0xff pattern:$0x75316420]  ;;  %v9387_v50 = vld.sshfl [vmem:[#allocation1 + $0x8] sm:$0xff pattern:$0x75316420]  ;;  %1665 = vmatpush.msra.mxu1 %v9030_v24  ;;  %1765 = vmatpush.msra.mxu3 %v1764_v33  ;;  %v9430_v24 = vsub.f32 %v569_v22, %v9404_v40  ;;  %v9445_v22 = vsub.f32 %v561_v30, %v9418_v36 }
 0x3fe   : > { %13546 = vst [vmem:[#allocation49_spill] sm:$0xff] %v9385_v59  ;;  %1612 = vmatpush.msra.mxu0 %v13552_v54  ;;  %v1787_v4 = vsub.f32 %v9364_v46, %v13553_v21  ;;  %1708 = vmatpush.msra.mxu2 %v9313_v63  ;;  %v1782_v33 = vand.u32 4294901760, %v1781_v29  ;;  %v1793_v54 = vsub.f32 %v9380_v44, %v13555_v31  ;;  %v9440_v15 = vand.u32 4294901760, %v545_v13 }
 0x3ff   : > { %13547 = vst [vmem:[#allocation50_spill] sm:$0xff] %v9387_v50  ;;  %v553_v50 = vld [vmem:[%s8351_s22 + $0x448] sm:$0xff]  ;;  %1667 = vmatpush.msra.mxu1 %v9032_v35  ;;  %1771 = vmatpush.msra.mxu3 %v1770_v0  ;;  %v13556_v29 = vand.u32 4294901760, %v9115_v6  ;;  %v13557_v31 = vand.u32 4294901760, %v9399_v56  ;;  %v1810_v30 = vand.u32 4294901760, %v9430_v24 }
 0x400   : > { %6853 = vst [vmem:[#allocation1] ss:$2 sm:$0xff] %v9369_v16  ;;  %v9432_v47 = vand.u32 4294901760, %v553_v50  ;;  %1616 = vmatpush.msra.mxu0 %v13554_v9  ;;  %1710 = vmatpush.msra.mxu2 %v9338_v3  ;;  %v1788_v9 = vand.u32 4294901760, %v1787_v4  ;;  %v1794_v6 = vand.u32 4294901760, %v1793_v54  ;;  %v13559_v4 = vand.u32 4294901760, %v9413_v17 }
 0x401   : > { %1669 = vmatpush.msra.mxu1 %v9046_v38  ;;  %1777 = vmatpush.msra.mxu3 %v1776_v57  ;;  %v1799_v38 = vsub.f32 %v9399_v56, %v13557_v31  ;;  %v13558_v57 = vand.u32 4294901760, %v9159_v32  ;;  %v13560_v32 = vand.u32 4294901760, %v9168_v19 }
 0x402   : > { %1620 = vmatpush.msra.mxu0 %v13556_v29  ;;  %1712 = vmatpush.msra.mxu2 %v9343_v10  ;;  %v13561_v29 = vand.u32 4294901760, %v9173_v58 }
 0x403   : > { %1671 = vmatpush.msra.mxu1 %v9057_v11  ;;  %1783 = vmatpush.msra.mxu3 %v1782_v33  ;;  %v1816_v11 = vand.u32 4294901760, %v9445_v22  ;;  %v1811_v33 = vsub.f32 %v9430_v24, %v1810_v30 }
 0x404   : > { %1624 = vmatpush.msra.mxu0 %v13558_v57  ;;  %1714 = vmatpush.msra.mxu2 %v9350_v37  ;;  %v13563_v57 = vand.u32 4294901760, %v9216_v27  ;;  %v13565_v27 = vand.u32 4294901760, %v9241_v26  ;;  %v13570_v26 = vld [vmem:[#allocation41_spill] sm:$0xff] }
 0x405   : > { %1673 = vmatpush.msra.mxu1 %v9086_v25  ;;  %1789 = vmatpush.msra.mxu3 %v1788_v9  ;;  %v1812_v58 = vand.u32 4294901760, %v1811_v33 }
 0x406   : > { %1628 = vmatpush.msra.mxu0 %v13560_v32  ;;  %1716 = vmatpush.msra.mxu2 %v9366_v53 }
 0x407   : > { %v6854_v35 = vld.sshfl [vmem:[#allocation1] sm:$0xff pattern:$0x75316420]  ;;  %v6855_v59 = vld.sshfl [vmem:[#allocation1 + $0x8] sm:$0xff pattern:$0x75316420]  ;;  %1675 = vmatpush.msra.mxu1 %v9128_v18  ;;  %1795 = vmatpush.msra.mxu3 %v1794_v6  ;;  %v1817_v18 = vsub.f32 %v9445_v22, %v1816_v11 }
 0x408   : > { %v6858_v42 = vsel %vm6140_vm0, %v6854_v35, 0.0  ;;  %v6859_v0 = vsel %vm6140_vm0, %v6855_v59, 0.0  ;;  %6864 = vst [vmem:[#allocation1] ss:$2 sm:$0xff] %v9369_v16  ;;  %v9459_v59 = vsub.f32 %v553_v50, %v9432_v47  ;;  %v1805_v35 = vsub.f32 %v9413_v17, %v13559_v4  ;;  %1632 = vmatpush.msra.mxu0 %v13561_v29  ;;  %1718 = vmatpush.msra.mxu2 %v9382_v48  ;;  %v498_v29 = vld [vmem:[%s8351_s22 + $0x290] sm:$0xff] }
 0x409   : > { %v6860_v21 = vadd.f32 %v6859_v0, %v6858_v42  ;;  %v9467_v42 = vsub.f32 %v545_v13, %v9440_v15  ;;  %v1800_v50 = vand.u32 4294901760, %v1799_v38  ;;  %1677 = vmatpush.msra.mxu1 %v9131_v60  ;;  %v13562_v38 = vand.u32 4294901760, %v9197_v34 }
 0x40a   : > { %v1822_v13 = vand.u32 4294901760, %v9459_v59  ;;  %v1806_v25 = vand.u32 4294901760, %v1805_v35  ;;  %1720 = vmatpush.msra.mxu2 %v9404_v40  ;;  %v1818_v6 = vand.u32 4294901760, %v1817_v18  ;;  %v9613_v18 = vand.u32 4294901760, %v498_v29 }
 0x40b   : > { %6861 = vadd.xlane.f32.xlu2 %v6860_v21  ;;  %v1828_v54 = vand.u32 4294901760, %v9467_v42  ;;  %1801 = vmatpush.msra.mxu3 %v1800_v50  ;;  %v13571_v50 = vld [vmem:[#allocation37_spill] sm:$0xff] }
 0x40c   : > { %1636 = vmatpush.msra.mxu0 %v13562_v38  ;;  %1679 = vmatpush.msra.mxu1 %v9148_v39  ;;  %v1823_v60 = vsub.f32 %v9459_v59, %v1822_v13  ;;  %v13564_v39 = vand.u32 4294901760, %v9224_v52  ;;  %v13566_v52 = vand.u32 4294901760, %v9249_v51 }
 0x40d   : > { %1807 = vmatpush.msra.mxu3 %v1806_v25  ;;  %v1829_v34 = vsub.f32 %v9467_v42, %v1828_v54  ;;  %1722 = vmatpush.msra.mxu2 %v9418_v36 }
 0x40e   : > { %1640 = vmatpush.msra.mxu0 %v13563_v57  ;;  %1681 = vmatpush.msra.mxu1 %v9186_v23  ;;  %v1824_v4 = vand.u32 4294901760, %v1823_v60  ;;  %v13567_v23 = vand.u32 4294901760, %v9246_v28  ;;  %v466_v57 = vld [vmem:[%s8351_s22 + $0x190] sm:$0xff] }
 0x40f   : > { %v6865_v21 = vld.sshfl [vmem:[#allocation1] sm:$0xff pattern:$0x75316420]  ;;  %v6866_v0 = vld.sshfl [vmem:[#allocation1 + $0x8] sm:$0xff pattern:$0x75316420]  ;;  %1813 = vmatpush.msra.mxu3 %v1812_v58  ;;  %1724 = vmatpush.msra.mxu2 %v9432_v47 }
 0x410   : > { %v6869_v19 = vsel %vm6140_vm0, %v6865_v21, -inf  ;;  %v6870_v9 = vsel %vm6140_vm0, %v6866_v0, -inf  ;;  %1644 = vmatpush.msra.mxu0 %v13564_v39  ;;  %1683 = vmatpush.msra.mxu1 %v9199_v14  ;;  %v1830_v35 = vand.u32 4294901760, %v1829_v34  ;;  %v13568_v14 = vand.u32 4294901760, %v9271_v2  ;;  %v506_v0 = vld [vmem:[%s8351_s22 + $0x2d0] sm:$0xff] }
 0x411   : > { %v6871_v31 = vmax.f32 %v6869_v19, %v6870_v9  ;;  %1819 = vmatpush.msra.mxu3 %v1818_v6  ;;  %1726 = vmatpush.msra.mxu2 %v9440_v15  ;;  %v13584_v21 = vand.u32 4294901760, %v9413_v17  ;;  %v482_v19 = vld [vmem:[%s8351_s22 + $0x210] sm:$0xff]  ;;  %v13586_v6 = vld [vmem:[#allocation34_spill] sm:$0xff] }
 0x412   : > { %1648 = vmatpush.msra.mxu0 %v13565_v27  ;;  %1685 = vmatpush.msra.mxu1 %v9207_v20  ;;  %v13569_v20 = vld [vmem:[#allocation42_spill] sm:$0xff]  ;;  %v9650_v58 = vand.u32 4294901760, %v482_v19  ;;  %v458_v27 = vld [vmem:[%s8351_s22 + $0x150] sm:$0xff] }
 0x413   : > { %6872 = vmax.xlane.f32.xlu0 %v6871_v31  ;;  %1825 = vmatpush.msra.mxu3 %v1824_v4  ;;  %v474_v31 = vld [vmem:[%s8351_s22 + $0x1d0] sm:$0xff] }
 0x414   : > { %1933 = vmatpush.msrb.mxu2 %v13566_v52  ;;  %1652 = vmatpush.msra.mxu0 %v13567_v23  ;;  %v9654_v60 = vand.u32 4294901760, %v474_v31  ;;  %v9676_v23 = vsub.f32 %v482_v19, %v9650_v58  ;;  %v426_v19 = vld [vmem:[%s8351_s22 + $0x50] sm:$0xff] }
 0x415   : > { %1687 = vmatpush.msra.mxu1 %v9219_v61  ;;  %1831 = vmatpush.msra.mxu3 %v1830_v35  ;;  %v13572_v61 = vld [vmem:[#allocation43_spill] sm:$0xff] }
 0x416   : > { %1839 = vmatpush.msrb.mxu0 %v9249_v51  ;;  %1937 = vmatpush.msrb.mxu2 %v13568_v14  ;;  %v13573_v28 = vand.u32 4294901760, %v13572_v61  ;;  %v13574_v51 = vld [vmem:[#allocation44_spill] sm:$0xff]  ;;  %v9678_v14 = vand.u32 4294901760, %v466_v57 }
 0x417   : > { %2000 = vmatpush.msrb.mxu3 %v13569_v20  ;;  %1689 = vmatpush.msra.mxu1 %v13570_v26  ;;  %v13575_v32 = vand.u32 4294901760, %v13574_v51  ;;  %v450_v26 = vld [vmem:[%s8351_s22 + $0x110] sm:$0xff] }
 0x418   : > { %1492 = vmatmul.f32.vlgmr.msrb.gmra.mxu1 %v13571_v50  ;;  %1842 = vmatpush.msrb.mxu0 %v9271_v2  ;;  %v13576_v2 = vld [vmem:[#allocation45_spill] sm:$0xff] }
 0x419   : > { %1892 = vmatpush.msrb.mxu1 %v13569_v20  ;;  %1941 = vmatpush.msrb.mxu2 %v13573_v28  ;;  %v13577_v33 = vand.u32 4294901760, %v13576_v2  ;;  %v9683_v20 = vsub.f32 %v474_v31, %v9654_v60 }
 0x41a   : > { %2002 = vmatpush.msrb.mxu3 %v9251_v1  ;;  %1845 = vmatpush.msrb.mxu0 %v13572_v61 }
 0x41b   : > { %1894 = vmatpush.msrb.mxu1 %v9251_v1  ;;  %1945 = vmatpush.msrb.mxu2 %v13575_v32  ;;  %v13578_v1 = vand.u32 4294901760, %v9328_v12 }
 0x41c   : > { %2004 = vmatpush.msrb.mxu3 %v9261_v62  ;;  %1848 = vmatpush.msrb.mxu0 %v13574_v51  ;;  %v9691_v51 = vand.u32 4294901760, %v458_v27 }
 0x41d   : > { %1896 = vmatpush.msrb.mxu1 %v9261_v62  ;;  %1949 = vmatpush.msrb.mxu2 %v13577_v33  ;;  %v13579_v62 = vand.u32 4294901760, %v9341_v49 }
 0x41e   : > { %2006 = vmatpush.msrb.mxu3 %v9278_v55  ;;  %1851 = vmatpush.msrb.mxu0 %v13576_v2  ;;  %v442_v2 = vld [vmem:[%s8351_s22 + $0xd0] sm:$0xff] }
 0x41f   : > { %1898 = vmatpush.msrb.mxu1 %v9278_v55  ;;  %1953 = vmatpush.msrb.mxu2 %v13578_v1  ;;  %v13580_v55 = vand.u32 4294901760, %v9354_v43  ;;  %v13268_v1 = vand.u32 4294901760, %v9676_v23 }
 0x420   : > { %2008 = vmatpush.msrb.mxu3 %v9296_v5  ;;  %1854 = vmatpush.msrb.mxu0 %v9328_v12  ;;  %v538_v12 = vld [vmem:[%s8351_s22 + $0x3d0] sm:$0xff] }
 0x421   : > { %1900 = vmatpush.msrb.mxu1 %v9296_v5  ;;  %1957 = vmatpush.msrb.mxu2 %v13579_v62  ;;  %v13581_v5 = vand.u32 4294901760, %v9364_v46  ;;  %v9567_v25 = vand.u32 4294901760, %v538_v12  ;;  %v9702_v62 = vsub.f32 %v466_v57, %v9678_v14 }
 0x422   : > { %2010 = vmatpush.msrb.mxu3 %v9303_v45  ;;  %1857 = vmatpush.msrb.mxu0 %v9341_v49  ;;  %v530_v49 = vld [vmem:[%s8351_s22 + $0x390] sm:$0xff] }
 0x423   : > { %1902 = vmatpush.msrb.mxu1 %v9303_v45  ;;  %1961 = vmatpush.msrb.mxu2 %v13580_v55  ;;  %v13582_v45 = vand.u32 4294901760, %v9380_v44  ;;  %v9704_v55 = vand.u32 4294901760, %v450_v26 }
 0x424   : > { %2012 = vmatpush.msrb.mxu3 %v9313_v63  ;;  %1860 = vmatpush.msrb.mxu0 %v9354_v43  ;;  %v13583_v43 = vand.u32 4294901760, %v9399_v56 }
 0x425   : > { %1904 = vmatpush.msrb.mxu1 %v9313_v63  ;;  %1965 = vmatpush.msrb.mxu2 %v13581_v5  ;;  %v522_v63 = vld [vmem:[%s8351_s22 + $0x350] sm:$0xff] }
 0x426   : > { %2014 = vmatpush.msrb.mxu3 %v9338_v3  ;;  %1863 = vmatpush.msrb.mxu0 %v9364_v46  ;;  %v9575_v46 = vand.u32 4294901760, %v530_v49  ;;  %v434_v5 = vld [vmem:[%s8351_s22 + $0x90] sm:$0xff] }
 0x427   : > { %1906 = vmatpush.msrb.mxu1 %v9338_v3  ;;  %1969 = vmatpush.msrb.mxu2 %v13582_v45  ;;  %v514_v3 = vld [vmem:[%s8351_s22 + $0x310] sm:$0xff] }
 0x428   : > { %2016 = vmatpush.msrb.mxu3 %v9343_v10  ;;  %1866 = vmatpush.msrb.mxu0 %v9380_v44  ;;  %v9584_v44 = vsub.f32 %v538_v12, %v9567_v25  ;;  %v13266_v12 = vand.u32 4294901760, %v9683_v20 }
 0x429   : > { %1908 = vmatpush.msrb.mxu1 %v9343_v10  ;;  %1973 = vmatpush.msrb.mxu2 %v13583_v43  ;;  %v9586_v10 = vand.u32 4294901760, %v522_v63  ;;  %v9717_v43 = vand.u32 4294901760, %v442_v2 }
 0x42a   : > { %2018 = vmatpush.msrb.mxu3 %v9350_v37  ;;  %1869 = vmatpush.msrb.mxu0 %v9399_v56  ;;  %v9597_v56 = vand.u32 4294901760, %v514_v3 }
 0x42b   : > { %1910 = vmatpush.msrb.mxu1 %v9350_v37  ;;  %1977 = vmatpush.msrb.mxu2 %v13584_v21  ;;  %v9595_v37 = vsub.f32 %v530_v49, %v9575_v46  ;;  %v2122_v21 = vsub.f32 %v9676_v23, %v13268_v1  ;;  %v9740_v57 = vsub.f32 %v442_v2, %v9717_v43 }
 0x42c   : > { %2020 = vmatpush.msrb.mxu3 %v9366_v53  ;;  %1872 = vmatpush.msrb.mxu0 %v9413_v17  ;;  %v9607_v17 = vsub.f32 %v522_v63, %v9586_v10  ;;  %v9715_v63 = vsub.f32 %v458_v27, %v9691_v51  ;;  %v666_v27 = vld [vmem:[%s8351_s22 + $0x7d0] sm:$0xff] }
 0x42d   : > { %1912 = vmatpush.msrb.mxu1 %v9366_v53  ;;  %1981 = vmatpush.msrb.mxu2 %v1810_v30  ;;  %v13277_v53 = vand.u32 4294901760, %v9584_v44  ;;  %v9609_v30 = vand.u32 4294901760, %v506_v0  ;;  %v13267_v2 = vand.u32 4294901760, %v9740_v57 }
 0x42e   : > { %2022 = vmatpush.msrb.mxu3 %v9382_v48  ;;  %1875 = vmatpush.msrb.mxu0 %v9430_v24  ;;  %v490_v24 = vld [vmem:[%s8351_s22 + $0x250] sm:$0xff] }
 0x42f   : > { %1914 = vmatpush.msrb.mxu1 %v9382_v48  ;;  %1985 = vmatpush.msrb.mxu2 %v1816_v11  ;;  %v13276_v48 = vand.u32 4294901760, %v9595_v37  ;;  %v9621_v11 = vsub.f32 %v514_v3, %v9597_v56  ;;  %v9636_v9 = vand.u32 4294901760, %v490_v24 }
 0x430   : > { %2024 = vmatpush.msrb.mxu3 %v9404_v40  ;;  %1878 = vmatpush.msrb.mxu0 %v9445_v22  ;;  %v13274_v22 = vand.u32 4294901760, %v9607_v17 }
 0x431   : > { %1916 = vmatpush.msrb.mxu1 %v9404_v40  ;;  %1989 = vmatpush.msrb.mxu2 %v1822_v13  ;;  %v2080_v40 = vsub.f32 %v9584_v44, %v13277_v53  ;;  %v9634_v13 = vsub.f32 %v506_v0, %v9609_v30  ;;  %v13273_v38 = vand.u32 4294901760, %v9621_v11  ;;  %v9664_v4 = vsub.f32 %v490_v24, %v9636_v9 }
 0x432   : > { %2026 = vmatpush.msrb.mxu3 %v9418_v36  ;;  %1881 = vmatpush.msrb.mxu0 %v9459_v59  ;;  %v13585_v59 = vld [vmem:[#allocation40_spill] sm:$0xff]  ;;  %v2092_v34 = vsub.f32 %v9607_v17, %v13274_v22  ;;  %v13265_v0 = vand.u32 4294901760, %v9702_v62  ;;  %v9729_v24 = vand.u32 4294901760, %v434_v5 }
 0x433   : > { %1918 = vmatpush.msrb.mxu1 %v9418_v36  ;;  %1993 = vmatpush.msrb.mxu2 %v1828_v54  ;;  %v9642_v36 = vsub.f32 %v498_v29, %v9613_v18  ;;  %v2086_v54 = vsub.f32 %v9595_v37, %v13276_v48  ;;  %v13272_v39 = vand.u32 4294901760, %v9634_v13  ;;  %v2098_v52 = vsub.f32 %v9621_v11, %v13273_v38  ;;  %v602_v38 = vld [vmem:[%s8351_s22 + $0x5d0] sm:$0xff] }
 0x434   : > { %2028 = vmatpush.msrb.mxu3 %v9432_v47  ;;  %1732 = vmatmul.f32.vlgmr.msra.gmra.mxu2 %v13585_v59  ;;  %v13269_v28 = vand.u32 4294901760, %v9664_v4  ;;  %v9727_v29 = vsub.f32 %v450_v26, %v9704_v55 }
 0x435   : > { %2180 = vmatpush.msra.mxu2 %v9584_v44  ;;  %1884 = vmatpush.msrb.mxu0 %v9467_v42  ;;  %v2081_v42 = vand.u32 4294901760, %v2080_v40  ;;  %v2087_v35 = vand.u32 4294901760, %v2086_v54  ;;  %v2104_v61 = vsub.f32 %v9634_v13, %v13272_v39  ;;  %v2099_v33 = vand.u32 4294901760, %v2098_v52 }
 0x436   : > { %1920 = vmatpush.msrb.mxu1 %v9432_v47  ;;  %2030 = vmatpush.msrb.mxu3 %v9440_v15  ;;  %v13271_v47 = vand.u32 4294901760, %v9642_v36  ;;  %v2116_v45 = vsub.f32 %v9664_v4, %v13269_v28  ;;  %v2128_v40 = vsub.f32 %v9683_v20, %v13266_v12  ;;  %v13263_v54 = vand.u32 4294901760, %v9715_v63 }
 0x437   : > { %1654 = vmatmul.f32.vlgmr.msra.gmra.mxu0 %v13571_v50  ;;  %1833 = vmatmul.f32.vlgmr.msra.gmra.mxu3 %v13586_v6  ;;  %v2105_v49 = vand.u32 4294901760, %v2104_v61  ;;  %v2134_v52 = vsub.f32 %v9702_v62, %v13265_v0  ;;  %v13264_v26 = vand.u32 4294901760, %v9727_v29  ;;  %v642_v0 = vld [vmem:[%s8351_s22 + $0x710] sm:$0xff] }
 0x438   : > { %2037 = vmatpush.msra.mxu0 %v9567_v25  ;;  %2183 = vmatpush.msra.mxu2 %v9595_v37  ;;  %v2110_v32 = vsub.f32 %v9642_v36, %v13271_v47  ;;  %v2117_v31 = vand.u32 4294901760, %v2116_v45  ;;  %v2129_v61 = vand.u32 4294901760, %v2128_v40  ;;  %v9809_v1 = vand.u32 4294901760, %v642_v0 }
 0x439   : > { %2233 = vmatpush.msra.mxu3 %v9567_v25  ;;  %1922 = vmatpush.msrb.mxu1 %v9440_v15  ;;  %v2093_v15 = vand.u32 4294901760, %v2092_v34  ;;  %v418_v34 = vld [vmem:[%s8351_s22 + $0x10] sm:$0xff] }
 0x43a   : > { %1691 = vmatmul.f32.vlgmr.msra.gmra.mxu1 %v13571_v50  ;;  %2039 = vmatpush.msra.mxu0 %v9575_v46  ;;  %v2111_v3 = vand.u32 4294901760, %v2110_v32  ;;  %v2140_v32 = vsub.f32 %v9715_v63, %v13263_v54  ;;  %v9831_v22 = vsub.f32 %v642_v0, %v9809_v1  ;;  %v594_v50 = vld [vmem:[%s8351_s22 + $0x590] sm:$0xff] }
 0x43b   : > { %2082 = vmatpush.msra.mxu1 %v2081_v42  ;;  %2186 = vmatpush.msra.mxu2 %v9607_v17  ;;  %v9744_v42 = vand.u32 4294901760, %v426_v19 }
 0x43c   : > { %2235 = vmatpush.msra.mxu3 %v9575_v46  ;;  %2041 = vmatpush.msra.mxu0 %v9586_v10  ;;  %13591 = vst [vmem:[#allocation45_spill] sm:$0xff] %v9831_v22 }
 0x43d   : > { %2088 = vmatpush.msra.mxu1 %v2087_v35  ;;  %2189 = vmatpush.msra.mxu2 %v9621_v11  ;;  %v2123_v35 = vand.u32 4294901760, %v2122_v21  ;;  %v9771_v45 = vsub.f32 %v426_v19, %v9744_v42  ;;  %v2146_v21 = vsub.f32 %v9727_v29, %v13264_v26  ;;  %v2141_v19 = vand.u32 4294901760, %v2140_v32 }
 0x43e   : > { %2237 = vmatpush.msra.mxu3 %v9586_v10  ;;  %2043 = vmatpush.msra.mxu0 %v9597_v56 }
 0x43f   : > { %2094 = vmatpush.msra.mxu1 %v2093_v15  ;;  %2192 = vmatpush.msra.mxu2 %v9634_v13  ;;  %v9754_v15 = vsub.f32 %v434_v5, %v9729_v24  ;;  %v658_v5 = vld [vmem:[%s8351_s22 + $0x790] sm:$0xff]  ;;  %v2147_v32 = vand.u32 4294901760, %v2146_v21 }
 0x440   : > { %2239 = vmatpush.msra.mxu3 %v9597_v56  ;;  %2045 = vmatpush.msra.mxu0 %v9609_v30  ;;  %v9781_v54 = vand.u32 4294901760, %v658_v5 }
 0x441   : > { %2100 = vmatpush.msra.mxu1 %v2099_v33  ;;  %2195 = vmatpush.msra.mxu2 %v9642_v36  ;;  %v9763_v33 = vand.u32 4294901760, %v418_v34  ;;  %v13270_v40 = vand.u32 4294901760, %v9754_v15 }
 0x442   : > { %2241 = vmatpush.msra.mxu3 %v9609_v30  ;;  %2047 = vmatpush.msra.mxu0 %v9613_v18 }
 0x443   : > { %2106 = vmatpush.msra.mxu1 %v2105_v49  ;;  %2198 = vmatpush.msra.mxu2 %v9664_v4  ;;  %13587 = vst [vmem:[#allocation42_spill] sm:$0xff] %v9763_v33  ;;  %v9765_v49 = vand.u32 4294901760, %v666_v27 }
 0x444   : > { %2243 = vmatpush.msra.mxu3 %v9613_v18  ;;  %2049 = vmatpush.msra.mxu0 %v9636_v9 }
 0x445   : > { %2112 = vmatpush.msra.mxu1 %v2111_v3  ;;  %2201 = vmatpush.msra.mxu2 %v9676_v23  ;;  %13588 = vst [vmem:[#allocation41_spill] sm:$0xff] %v9765_v49  ;;  %v2135_v3 = vand.u32 4294901760, %v2134_v52  ;;  %v9788_v52 = vsub.f32 %v418_v34, %v9763_v33  ;;  %v9791_v26 = vsub.f32 %v666_v27, %v9765_v49  ;;  %v634_v27 = vld [vmem:[%s8351_s22 + $0x6d0] sm:$0xff] }
 0x446   : > { %2245 = vmatpush.msra.mxu3 %v9636_v9  ;;  %2051 = vmatpush.msra.mxu0 %v9650_v58  ;;  %v2158_v34 = vsub.f32 %v9754_v15, %v13270_v40  ;;  %v626_v40 = vld [vmem:[%s8351_s22 + $0x690] sm:$0xff] }
 0x447   : > { %2118 = vmatpush.msra.mxu1 %v2117_v31  ;;  %2204 = vmatpush.msra.mxu2 %v9683_v20  ;;  %v650_v31 = vld [vmem:[%s8351_s22 + $0x750] sm:$0xff]  ;;  %v13278_v21 = vand.u32 4294901760, %v9791_v26  ;;  %v13279_v28 = vand.u32 4294901760, %v9788_v52 }
 0x448   : > { %2247 = vmatpush.msra.mxu3 %v9650_v58  ;;  %2053 = vmatpush.msra.mxu0 %v9654_v60  ;;  %v9797_v12 = vand.u32 4294901760, %v650_v31  ;;  %v2159_v39 = vand.u32 4294901760, %v2158_v34 }
 0x449   : > { %2124 = vmatpush.msra.mxu1 %v2123_v35  ;;  %2207 = vmatpush.msra.mxu2 %v9702_v62  ;;  %v2152_v35 = vsub.f32 %v9740_v57, %v13267_v2  ;;  %v9807_v2 = vsub.f32 %v658_v5, %v9781_v54  ;;  %v2170_v34 = vsub.f32 %v9788_v52, %v13279_v28 }
 0x44a   : > { %2249 = vmatpush.msra.mxu3 %v9654_v60  ;;  %2055 = vmatpush.msra.mxu0 %v9678_v14  ;;  %v9821_v47 = vsub.f32 %v650_v31, %v9797_v12  ;;  %v610_v31 = vld [vmem:[%s8351_s22 + $0x610] sm:$0xff] }
 0x44b   : > { %2130 = vmatpush.msra.mxu1 %v2129_v61  ;;  %2210 = vmatpush.msra.mxu2 %v9715_v63  ;;  %v13275_v61 = vand.u32 4294901760, %v9771_v45  ;;  %13589 = vst [vmem:[#allocation43_spill] sm:$0xff] %v9807_v2  ;;  %v13592_v28 = vand.u32 4294901760, %v9807_v2  ;;  %v2171_v16 = vand.u32 4294901760, %v2170_v34  ;;  %v13595_v34 = vand.u32 4294901760, %v9584_v44 }
 0x44c   : > { %2251 = vmatpush.msra.mxu3 %v9678_v14  ;;  %2057 = vmatpush.msra.mxu0 %v9691_v51  ;;  %13590 = vst [vmem:[#allocation44_spill] sm:$0xff] %v9821_v47  ;;  %v13598_v44 = vand.u32 4294901760, %v9595_v37  ;;  %v13600_v37 = vand.u32 4294901760, %v9607_v17 }
 0x44d   : > { %2136 = vmatpush.msra.mxu1 %v2135_v3  ;;  %2213 = vmatpush.msra.mxu2 %v9727_v29  ;;  %v2153_v3 = vand.u32 4294901760, %v2152_v35  ;;  %v2164_v5 = vsub.f32 %v9771_v45, %v13275_v61  ;;  %v618_v35 = vld [vmem:[%s8351_s22 + $0x650] sm:$0xff]  ;;  %v9833_v61 = vand.u32 4294901760, %v626_v40 }
 0x44e   : > { %2253 = vmatpush.msra.mxu3 %v9691_v51  ;;  %2059 = vmatpush.msra.mxu0 %v9704_v55  ;;  %v9843_v48 = vand.u32 4294901760, %v618_v35 }
 0x44f   : > { %2142 = vmatpush.msra.mxu1 %v2141_v19  ;;  %2216 = vmatpush.msra.mxu2 %v9740_v57  ;;  %v9823_v19 = vand.u32 4294901760, %v634_v27  ;;  %v2165_v0 = vand.u32 4294901760, %v2164_v5  ;;  %v2427_v5 = vsub.f32 %v9807_v2, %v13592_v28  ;;  %v13593_v28 = vand.u32 4294901760, %v9821_v47 }
 0x450   : > { %2255 = vmatpush.msra.mxu3 %v9704_v55  ;;  %2061 = vmatpush.msra.mxu0 %v9717_v43  ;;  %v9867_v59 = vsub.f32 %v618_v35, %v9843_v48  ;;  %v9875_v2 = vand.u32 4294901760, %v602_v38 }
 0x451   : > { %2148 = vmatpush.msra.mxu1 %v2147_v32  ;;  %2219 = vmatpush.msra.mxu2 %v9754_v15  ;;  %v2421_v32 = vsub.f32 %v9791_v26, %v13278_v21  ;;  %v9852_v21 = vand.u32 4294901760, %v610_v31  ;;  %v2433_v53 = vsub.f32 %v9821_v47, %v13593_v28  ;;  %v13596_v28 = vand.u32 4294901760, %v9831_v22 }
 0x452   : > { %2257 = vmatpush.msra.mxu3 %v9717_v43  ;;  %2063 = vmatpush.msra.mxu0 %v9729_v24  ;;  %v9901_v47 = vsub.f32 %v602_v38, %v9875_v2 }
 0x453   : > { %2154 = vmatpush.msra.mxu1 %v2153_v3  ;;  %2222 = vmatpush.msra.mxu2 %v9771_v45  ;;  %v9849_v3 = vsub.f32 %v634_v27, %v9823_v19  ;;  %v9862_v27 = vsub.f32 %v626_v40, %v9833_v61  ;;  %v9880_v35 = vsub.f32 %v610_v31, %v9852_v21 }
 0x454   : > { %2259 = vmatpush.msra.mxu3 %v9729_v24  ;;  %2065 = vmatpush.msra.mxu0 %v9744_v42  ;;  %v2439_v40 = vsub.f32 %v9831_v22, %v13596_v28 }
 0x455   : > { %2160 = vmatpush.msra.mxu1 %v2159_v39  ;;  %2225 = vmatpush.msra.mxu2 %v9788_v52  ;;  %v2422_v39 = vand.u32 4294901760, %v2421_v32  ;;  %v586_v32 = vld [vmem:[%s8351_s22 + $0x550] sm:$0xff] }
 0x456   : > { %2261 = vmatpush.msra.mxu3 %v9744_v42  ;;  %1995 = vmatmul.f32.vlgmr.msrb.gmra.mxu2 %v13586_v6  ;;  %v9903_v22 = vand.u32 4294901760, %v586_v32 }
 0x457   : > { %2378 = vmatpush.msrb.mxu2 %v9765_v49  ;;  %2067 = vmatpush.msra.mxu0 %v9763_v33  ;;  %v13594_v49 = vld [vmem:[#allocation38_spill] sm:$0xff] }
 0x458   : > { %2166 = vmatpush.msra.mxu1 %v2165_v0  ;;  %2263 = vmatpush.msra.mxu3 %v9763_v33  ;;  %v2428_v0 = vand.u32 4294901760, %v2427_v5  ;;  %v13597_v33 = vld [vmem:[#allocation39_spill] sm:$0xff]  ;;  %v2434_v5 = vand.u32 4294901760, %v2433_v53  ;;  %v2440_v53 = vand.u32 4294901760, %v2439_v40  ;;  %v13603_v40 = vand.u32 4294901760, %v9621_v11 }
 0x459   : > { %1887 = vmatmul.f32.vlgmr.msrb.gmra.mxu0 %v13594_v49  ;;  %2032 = vmatmul.f32.vlgmr.msrb.gmra.mxu3 %v13586_v6  ;;  %v9890_v49 = vand.u32 4294901760, %v594_v50  ;;  %v578_v6 = vld [vmem:[%s8351_s22 + $0x510] sm:$0xff]  ;;  %v13605_v11 = vand.u32 4294901760, %v9634_v13  ;;  %v13607_v13 = vand.u32 4294901760, %v9901_v47 }
 0x45a   : > { %2274 = vmatpush.msrb.mxu0 %v13595_v34  ;;  %2380 = vmatpush.msrb.mxu2 %v9781_v54  ;;  %v13599_v34 = vand.u32 4294901760, %v9849_v3  ;;  %v9917_v31 = vand.u32 4294901760, %v578_v6 }
 0x45b   : > { %2423 = vmatpush.msrb.mxu3 %v2422_v39  ;;  %2172 = vmatpush.msra.mxu1 %v2171_v16  ;;  %v570_v39 = vld [vmem:[%s8351_s22 + $0x4d0] sm:$0xff]  ;;  %v9915_v38 = vsub.f32 %v594_v50, %v9890_v49  ;;  %v9929_v50 = vsub.f32 %v586_v32, %v9903_v22 }
 0x45c   : > { %1926 = vmatmul.f32.vlgmr.msrb.gmra.mxu1 %v13597_v33  ;;  %2278 = vmatpush.msrb.mxu0 %v13598_v44  ;;  %v2445_v28 = vsub.f32 %v9849_v3, %v13599_v34  ;;  %v13601_v44 = vand.u32 4294901760, %v9862_v27  ;;  %v9931_v16 = vand.u32 4294901760, %v570_v39  ;;  %v9943_v32 = vsub.f32 %v578_v6, %v9917_v31  ;;  %v546_v33 = vld [vmem:[%s8351_s22 + $0x410] sm:$0xff] }
 0x45d   : > { %2341 = vmatpush.msrb.mxu1 %v9567_v25  ;;  %2382 = vmatpush.msrb.mxu2 %v9797_v12  ;;  %v13602_v25 = vand.u32 4294901760, %v9867_v59 }
 0x45e   : > { %2429 = vmatpush.msrb.mxu3 %v2428_v0  ;;  %2282 = vmatpush.msrb.mxu0 %v13600_v37  ;;  %v2451_v34 = vsub.f32 %v9862_v27, %v13601_v44  ;;  %v562_v0 = vld [vmem:[%s8351_s22 + $0x490] sm:$0xff]  ;;  %v2446_v37 = vand.u32 4294901760, %v2445_v28  ;;  %v9957_v6 = vsub.f32 %v570_v39, %v9931_v16 }
 0x45f   : > { %2343 = vmatpush.msrb.mxu1 %v9575_v46  ;;  %2384 = vmatpush.msrb.mxu2 %v9809_v1  ;;  %v2457_v17 = vsub.f32 %v9867_v59, %v13602_v25  ;;  %v13604_v46 = vand.u32 4294901760, %v9880_v35  ;;  %v554_v25 = vld [vmem:[%s8351_s22 + $0x450] sm:$0xff]  ;;  %v9945_v44 = vand.u32 4294901760, %v562_v0 }
 0x460   : > { %2435 = vmatpush.msrb.mxu3 %v2434_v5  ;;  %2286 = vmatpush.msrb.mxu0 %v13603_v40  ;;  %v2452_v28 = vand.u32 4294901760, %v2451_v34  ;;  %v2474_v40 = vand.u32 4294901760, %v9915_v38  ;;  %v2469_v34 = vsub.f32 %v9901_v47, %v13607_v13 }
 0x461   : > { %2345 = vmatpush.msrb.mxu1 %v9586_v10  ;;  %2386 = vmatpush.msrb.mxu2 %v9823_v19  ;;  %v2463_v5 = vsub.f32 %v9880_v35, %v13604_v46  ;;  %v2458_v10 = vand.u32 4294901760, %v2457_v17  ;;  %v2480_v46 = vand.u32 4294901760, %v9929_v50  ;;  %v9970_v39 = vsub.f32 %v562_v0, %v9945_v44 }
 0x462   : > { %2441 = vmatpush.msrb.mxu3 %v2440_v53  ;;  %2290 = vmatpush.msrb.mxu0 %v13605_v11  ;;  %v13606_v53 = vand.u32 4294901760, %v9642_v36  ;;  %v9959_v11 = vand.u32 4294901760, %v554_v25  ;;  %v13608_v36 = vand.u32 4294901760, %v9664_v4  ;;  %v2475_v17 = vsub.f32 %v9915_v38, %v2474_v40 }
 0x463   : > { %2347 = vmatpush.msrb.mxu1 %v9597_v56  ;;  %2388 = vmatpush.msrb.mxu2 %v9833_v61  ;;  %v2464_v56 = vand.u32 4294901760, %v2463_v5  ;;  %v2470_v4 = vand.u32 4294901760, %v2469_v34  ;;  %v2481_v5 = vsub.f32 %v9929_v50, %v2480_v46  ;;  %v2498_v13 = vand.u32 4294901760, %v9970_v39 }
 0x464   : > { %2447 = vmatpush.msrb.mxu3 %v2446_v37  ;;  %2294 = vmatpush.msrb.mxu0 %v13606_v53  ;;  %v2486_v37 = vand.u32 4294901760, %v9943_v32  ;;  %v9972_v53 = vand.u32 4294901760, %v546_v33  ;;  %v9983_v0 = vsub.f32 %v554_v25, %v9959_v11 }
 0x465   : > { %2349 = vmatpush.msrb.mxu1 %v9609_v30  ;;  %2390 = vmatpush.msrb.mxu2 %v9843_v48  ;;  %v13609_v30 = vand.u32 4294901760, %v9676_v23  ;;  %v2476_v23 = vand.u32 4294901760, %v2475_v17 }
 0x466   : > { %2453 = vmatpush.msrb.mxu3 %v2452_v28  ;;  %2298 = vmatpush.msrb.mxu0 %v13608_v36  ;;  %v2492_v28 = vand.u32 4294901760, %v9957_v6  ;;  %v9994_v34 = vsub.f32 %v546_v33, %v9972_v53 }
 0x467   : > { %2351 = vmatpush.msrb.mxu1 %v9613_v18  ;;  %2392 = vmatpush.msrb.mxu2 %v9852_v21  ;;  %v13610_v18 = vand.u32 4294901760, %v9683_v20  ;;  %v2482_v20 = vand.u32 4294901760, %v2481_v5 }
 0x468   : > { %2459 = vmatpush.msrb.mxu3 %v2458_v10  ;;  %2302 = vmatpush.msrb.mxu0 %v13609_v30  ;;  %v2487_v10 = vsub.f32 %v9943_v32, %v2486_v37  ;;  %v2493_v25 = vsub.f32 %v9957_v6, %v2492_v28  ;;  %v2510_v36 = vand.u32 4294901760, %v9994_v34  ;;  %v13614_v30 = vand.u32 4294901760, %v9740_v57 }
 0x469   : > { %2353 = vmatpush.msrb.mxu1 %v9636_v9  ;;  %2394 = vmatpush.msrb.mxu2 %v9875_v2  ;;  %v13611_v9 = vand.u32 4294901760, %v9702_v62  ;;  %v2499_v62 = vsub.f32 %v9970_v39, %v2498_v13  ;;  %v13616_v57 = vand.u32 4294901760, %v9771_v45 }
 0x46a   : > { %2465 = vmatpush.msrb.mxu3 %v2464_v56  ;;  %2306 = vmatpush.msrb.mxu0 %v13610_v18  ;;  %v2504_v56 = vand.u32 4294901760, %v9983_v0  ;;  %v2488_v33 = vand.u32 4294901760, %v2487_v10  ;;  %v2494_v17 = vand.u32 4294901760, %v2493_v25  ;;  %v13625_v25 = vld [vmem:[#allocation42_spill] sm:$0xff] }
 0x46b   : > { %2355 = vmatpush.msrb.mxu1 %v9650_v58  ;;  %2396 = vmatpush.msrb.mxu2 %v9890_v49  ;;  %v13612_v58 = vand.u32 4294901760, %v9715_v63 }
 0x46c   : > { %2471 = vmatpush.msrb.mxu3 %v2470_v4  ;;  %2310 = vmatpush.msrb.mxu0 %v13611_v9  ;;  %v2505_v63 = vsub.f32 %v9983_v0, %v2504_v56  ;;  %v2511_v4 = vsub.f32 %v9994_v34, %v2510_v36  ;;  %v13622_v9 = vld [vmem:[#allocation43_spill] sm:$0xff] }
 0x46d   : > { %2357 = vmatpush.msrb.mxu1 %v9654_v60  ;;  %2398 = vmatpush.msrb.mxu2 %v9903_v22  ;;  %v13613_v60 = vand.u32 4294901760, %v9727_v29  ;;  %v13615_v29 = vand.u32 4294901760, %v9754_v15  ;;  %v13620_v15 = vand.u32 4294901760, %v9788_v52  ;;  %v13624_v52 = vld [vmem:[#allocation41_spill] sm:$0xff] }
 0x46e   : > { %2477 = vmatpush.msrb.mxu3 %v2476_v23  ;;  %2314 = vmatpush.msrb.mxu0 %v13612_v58  ;;  %v2512_v5 = vand.u32 4294901760, %v2511_v4 }
 0x46f   : > { %2359 = vmatpush.msrb.mxu1 %v9678_v14  ;;  %2400 = vmatpush.msrb.mxu2 %v9917_v31  ;;  %v2500_v14 = vand.u32 4294901760, %v2499_v62 }
 0x470   : > { %2483 = vmatpush.msrb.mxu3 %v2482_v20  ;;  %2318 = vmatpush.msrb.mxu0 %v13613_v60  ;;  %v13623_v20 = vand.u32 4294901760, %v13622_v9  ;;  %v13627_v60 = vld [vmem:[#allocation44_spill] sm:$0xff] }
 0x471   : > { %2361 = vmatpush.msrb.mxu1 %v9691_v51  ;;  %2402 = vmatpush.msrb.mxu2 %v9931_v16  ;;  %v2506_v51 = vand.u32 4294901760, %v2505_v63 }
 0x472   : > { %2489 = vmatpush.msrb.mxu3 %v2488_v33  ;;  %2322 = vmatpush.msrb.mxu0 %v13614_v30 }
 0x473   : > { %2363 = vmatpush.msrb.mxu1 %v9704_v55  ;;  %2404 = vmatpush.msrb.mxu2 %v9945_v44  ;;  %v13617_v55 = vld [vmem:[#allocation22_spill] sm:$0xff] }
 0x474   : > { %2495 = vmatpush.msrb.mxu3 %v2494_v17  ;;  %2326 = vmatpush.msrb.mxu0 %v13615_v29  ;;  %v13628_v17 = vand.u32 4294901760, %v13627_v60 }
 0x475   : > { %2365 = vmatpush.msrb.mxu1 %v9717_v43  ;;  %2406 = vmatpush.msrb.mxu2 %v9959_v11  ;;  %v13619_v43 = vand.u32 4294901760, %v9791_v26 }
 0x476   : > { %2501 = vmatpush.msrb.mxu3 %v2500_v14  ;;  %2330 = vmatpush.msrb.mxu0 %v13616_v57  ;;  %v13629_v14 = vld [vmem:[#allocation45_spill] sm:$0xff]  ;;  %v13633_v57 = vand.u32 4294901760, %v9867_v59 }
 0x477   : > { %2367 = vmatpush.msrb.mxu1 %v9729_v24  ;;  %2408 = vmatpush.msrb.mxu2 %v9972_v53  ;;  %v10048_v24 = vld [vmem:[#allocation7] sm:$0xf]  ;;  %v13630_v4 = vand.u32 4294901760, %v13629_v14 }
 0x478   : > { %2507 = vmatpush.msrb.mxu3 %v2506_v51  ;;  %2228 = vmatmul.f32.vlgmr.msra.gmra.mxu2 %v8914_v41  ;;  %13621 = vst [vmem:[#allocation52_spill] sm:$0xff] %v10048_v24 }
 0x479   : > { %2615 = vmatpush.msra.mxu2 %v13619_v43  ;;  %2334 = vmatpush.msrb.mxu0 %v13620_v15 }
 0x47a   : > { %2369 = vmatpush.msrb.mxu1 %v9744_v42  ;;  %2513 = vmatpush.msrb.mxu3 %v2512_v5  ;;  %v13626_v42 = vld [vmem:[#allocation37_spill] sm:$0xff] }
 0x47b   : > { %2073 = vmatmul.f32.vlgmr.msra.gmra.mxu0 %v8981_v7  ;;  %2267 = vmatmul.f32.vlgmr.msra.gmra.mxu3 %v8975_v8  ;;  %v595_v8 = vld [vmem:[%s8351_s22 + $0x598] sm:$0xff]  ;;  %v811_v7 = vpop.f32.mrf.mxu1 }
 0x47c   : > { %2521 = vmatpush.msra.mxu0 %v9791_v26  ;;  %2619 = vmatpush.msra.mxu2 %v13623_v20 }
 0x47d   : > { %2682 = vmatpush.msra.mxu3 %v13624_v52  ;;  %2371 = vmatpush.msrb.mxu1 %v13625_v25  ;;  %v467_v25 = vld [vmem:[%s8351_s22 + $0x198] sm:$0xff] }
 0x47e   : > { %v6862_v18 = vpop.xlane.xlu2 %6861  ;;  %2174 = vmatmul.f32.vlgmr.msra.gmra.mxu1 %v13626_v42  ;;  %2524 = vmatpush.msra.mxu0 %v13622_v9 }
 0x47f   : > { %v10037_v23 = vmul.f32 %v6862_v18, %v13617_v55  ;;  %2574 = vmatpush.msra.mxu1 %v13624_v52  ;;  %2623 = vmatpush.msra.mxu2 %v13628_v17 }
 0x480   : > { %2684 = vmatpush.msra.mxu3 %v9781_v54  ;;  %2527 = vmatpush.msra.mxu0 %v13627_v60  ;;  %v459_v60 = vld [vmem:[%s8351_s22 + $0x158] sm:$0xff] }
 0x481   : > { %13618 = vst [vmem:[#allocation51_spill] sm:$0xff] %v10037_v23  ;;  %v6884_v45 = vperm.slane %v10037_v23, 1  ;;  %v6898_v33 = vperm.slane %v10037_v23, 2  ;;  %2576 = vmatpush.msra.mxu1 %v9781_v54  ;;  %2627 = vmatpush.msra.mxu2 %v13630_v4  ;;  %v13631_v54 = vand.u32 4294901760, %v9849_v3 }
 0x482   : > { %2686 = vmatpush.msra.mxu3 %v9797_v12  ;;  %2530 = vmatpush.msra.mxu0 %v13629_v14  ;;  %v10225_v14 = vand.u32 4294901760, %v467_v25 }
 0x483   : > { %v6885_v10 = vmul.f32 %v10048_v24, %v6884_v45  ;;  %2578 = vmatpush.msra.mxu1 %v9797_v12  ;;  %v6899_v29 = vmul.f32 %v10048_v24, %v6898_v33  ;;  %2631 = vmatpush.msra.mxu2 %v13631_v54  ;;  %v13632_v12 = vand.u32 4294901760, %v9862_v27 }
 0x484   : > { %2688 = vmatpush.msra.mxu3 %v9809_v1  ;;  %2533 = vmatpush.msra.mxu0 %v9849_v3 }
 0x485   : > { %6887 = vrot.lane.b32.xlu1 %v6885_v10, %s8157_s23  ;;  %2580 = vmatpush.msra.mxu1 %v9809_v1  ;;  %v13634_v1 = vand.u32 4294901760, %v9880_v35 }
 0x486   : > { %v6873_v58 = vpop.xlane.xlu0 %6872  ;;  %2635 = vmatpush.msra.mxu2 %v13632_v12  ;;  %2690 = vmatpush.msra.mxu3 %v9823_v19  ;;  %v10238_v12 = vand.u32 4294901760, %v459_v60 }
 0x487   : > { %v6905_v62 = vperm.slane %v6873_v58, 2  ;;  %v6919_v26 = vperm.slane %v6873_v58, 3  ;;  %v6877_v51 = vperm.slane %v6873_v58, 0  ;;  %2536 = vmatpush.msra.mxu0 %v9862_v27  ;;  %2582 = vmatpush.msra.mxu1 %v9823_v19  ;;  %v13635_v19 = vand.u32 4294901760, %v9901_v47 }
 0x488   : > { %2639 = vmatpush.msra.mxu2 %v13633_v57  ;;  %2692 = vmatpush.msra.mxu3 %v9833_v61 }
 0x489   : > { %v6920_v63 = vmul.f32 %v10048_v24, %v6919_v26  ;;  %v6906_v30 = vmul.f32 %v10048_v24, %v6905_v62  ;;  %v6878_v5 = vmul.f32 %v10048_v24, %v6877_v51  ;;  %2539 = vmatpush.msra.mxu0 %v9867_v59  ;;  %2584 = vmatpush.msra.mxu1 %v9833_v61  ;;  %v539_v59 = vld [vmem:[%s8351_s22 + $0x3d8] sm:$0xff]  ;;  %v6891_v61 = vperm.slane %v6873_v58, 1  ;;  %v13637_v58 = vld [vmem:[#allocation34_spill] sm:$0xff] }
 0x48a   : > { %2643 = vmatpush.msra.mxu2 %v13634_v1  ;;  %2694 = vmatpush.msra.mxu3 %v9843_v48  ;;  %v10111_v3 = vand.u32 4294901760, %v539_v59 }
 0x48b   : > { %6922 = vrot.lane.b32.xlu0 %v6920_v63, %s8158_s25  ;;  %6908 = vrot.lane.b32.xlu2 %v6906_v30, %s8154_s24  ;;  %v6892_v27 = vmul.f32 %v10048_v24, %v6891_v61 }
 0x48c   : > { %2542 = vmatpush.msra.mxu0 %v9880_v35  ;;  %2586 = vmatpush.msra.mxu1 %v9843_v48  ;;  %v531_v48 = vld [vmem:[%s8351_s22 + $0x398] sm:$0xff]  ;;  %v10129_v35 = vsub.f32 %v539_v59, %v10111_v3  ;;  %v10249_v59 = vsub.f32 %v467_v25, %v10225_v14 }
 0x48d   : > { %6901 = vrot.lane.b32.xlu1 %v6899_v29, %s8153_s11  ;;  %2647 = vmatpush.msra.mxu2 %v13635_v19 }
 0x48e   : > { %2696 = vmatpush.msra.mxu3 %v9852_v21  ;;  %2545 = vmatpush.msra.mxu0 %v9901_v47  ;;  %v523_v47 = vld [vmem:[%s8351_s22 + $0x358] sm:$0xff] }
 0x48f   : > { %2588 = vmatpush.msra.mxu1 %v9852_v21  ;;  %2651 = vmatpush.msra.mxu2 %v2474_v40  ;;  %v10119_v21 = vand.u32 4294901760, %v531_v48  ;;  %v499_v40 = vld [vmem:[%s8351_s22 + $0x298] sm:$0xff] }
 0x490   : > { %2698 = vmatpush.msra.mxu3 %v9875_v2  ;;  %2548 = vmatpush.msra.mxu0 %v9915_v38  ;;  %v10131_v38 = vand.u32 4294901760, %v523_v47 }
 0x491   : > { %2590 = vmatpush.msra.mxu1 %v9875_v2  ;;  %2655 = vmatpush.msra.mxu2 %v2480_v46  ;;  %v515_v2 = vld [vmem:[%s8351_s22 + $0x318] sm:$0xff]  ;;  %v13307_v46 = vand.u32 4294901760, %v10129_v35 }
 0x492   : > { %2700 = vmatpush.msra.mxu3 %v9890_v49  ;;  %2551 = vmatpush.msra.mxu0 %v9929_v50  ;;  %v10140_v50 = vsub.f32 %v531_v48, %v10119_v21 }
 0x493   : > { %2592 = vmatpush.msra.mxu1 %v9890_v49  ;;  %2659 = vmatpush.msra.mxu2 %v2486_v37  ;;  %v507_v49 = vld [vmem:[%s8351_s22 + $0x2d8] sm:$0xff] }
 0x494   : > { %2702 = vmatpush.msra.mxu3 %v9903_v22  ;;  %2554 = vmatpush.msra.mxu0 %v9943_v32  ;;  %v6912_v32 = vperm.slane %v10037_v23, 3  ;;  %v10155_v37 = vand.u32 4294901760, %v507_v49 }
 0x495   : > { %6880 = vrot.lane.b32.xlu1 %v6878_v5, %s8155_s4  ;;  %2594 = vmatpush.msra.mxu1 %v9903_v22  ;;  %v10142_v22 = vand.u32 4294901760, %v515_v2  ;;  %v443_v5 = vld [vmem:[%s8351_s22 + $0xd8] sm:$0xff] }
 0x496   : > { %2663 = vmatpush.msra.mxu2 %v2492_v28  ;;  %2704 = vmatpush.msra.mxu3 %v9917_v31  ;;  %v491_v28 = vld [vmem:[%s8351_s22 + $0x258] sm:$0xff]  ;;  %v6913_v18 = vmul.f32 %v10048_v24, %v6912_v32  ;;  %v10181_v15 = vsub.f32 %v507_v49, %v10155_v37  ;;  %v10262_v49 = vsub.f32 %v459_v60, %v10238_v12 }
 0x497   : > { %2557 = vmatpush.msra.mxu0 %v9957_v6  ;;  %2596 = vmatpush.msra.mxu1 %v9917_v31  ;;  %v10153_v6 = vsub.f32 %v523_v47, %v10131_v38  ;;  %v10160_v31 = vand.u32 4294901760, %v499_v40  ;;  %v10183_v45 = vand.u32 4294901760, %v491_v28  ;;  %v435_v47 = vld [vmem:[%s8351_s22 + $0x98] sm:$0xff] }
 0x498   : > { %2667 = vmatpush.msra.mxu2 %v2498_v13  ;;  %2706 = vmatpush.msra.mxu3 %v9931_v16  ;;  %v10167_v13 = vsub.f32 %v515_v2, %v10142_v22  ;;  %v13301_v33 = vand.u32 4294901760, %v10181_v15  ;;  %v603_v24 = vld [vmem:[%s8351_s22 + $0x5d8] sm:$0xff] }
 0x499   : > { %2560 = vmatpush.msra.mxu0 %v9970_v39  ;;  %2598 = vmatpush.msra.mxu1 %v9931_v16  ;;  %v13305_v39 = vand.u32 4294901760, %v10140_v50  ;;  %v483_v16 = vld [vmem:[%s8351_s22 + $0x218] sm:$0xff]  ;;  %v13304_v43 = vand.u32 4294901760, %v10153_v6  ;;  %v10211_v62 = vsub.f32 %v491_v28, %v10183_v45 }
 0x49a   : > { %2671 = vmatpush.msra.mxu2 %v2504_v56  ;;  %2708 = vmatpush.msra.mxu3 %v9945_v44  ;;  %v13636_v56 = vld [vmem:[#allocation40_spill] sm:$0xff]  ;;  %v13302_v9 = vand.u32 4294901760, %v10167_v13  ;;  %v10197_v20 = vand.u32 4294901760, %v483_v16  ;;  %v2786_v54 = vsub.f32 %v10181_v15, %v13301_v33  ;;  %v427_v28 = vld [vmem:[%s8351_s22 + $0x58] sm:$0xff] }
 0x49b   : > { %2563 = vmatpush.msra.mxu0 %v9983_v0  ;;  %2600 = vmatpush.msra.mxu1 %v9945_v44  ;;  %v2762_v0 = vsub.f32 %v10129_v35, %v13307_v46  ;;  %v475_v44 = vld [vmem:[%s8351_s22 + $0x1d8] sm:$0xff]  ;;  %v2768_v10 = vsub.f32 %v10140_v50, %v13305_v39  ;;  %v13298_v51 = vand.u32 4294901760, %v10211_v62  ;;  %v10289_v60 = vand.u32 4294901760, %v427_v28 }
 0x49c   : > { %2675 = vmatpush.msra.mxu2 %v2510_v36  ;;  %2710 = vmatpush.msra.mxu3 %v9959_v11  ;;  %v10189_v36 = vsub.f32 %v499_v40, %v10160_v31  ;;  %v10201_v52 = vand.u32 4294901760, %v475_v44  ;;  %v2780_v63 = vsub.f32 %v10167_v13, %v13302_v9  ;;  %v10223_v30 = vsub.f32 %v483_v16, %v10197_v20  ;;  %v627_v33 = vld [vmem:[%s8351_s22 + $0x698] sm:$0xff] }
 0x49d   : > { %6894 = vrot.lane.b32.xlu1 %v6892_v27, %s8156_s6  ;;  %2414 = vmatmul.f32.vlgmr.msrb.gmra.mxu2 %v13636_v56  ;;  %v2769_v17 = vand.u32 4294901760, %v2768_v10  ;;  %v2787_v27 = vand.u32 4294901760, %v2786_v54  ;;  %v2798_v2 = vsub.f32 %v10211_v62, %v13298_v51  ;;  %v10264_v40 = vand.u32 4294901760, %v443_v5  ;;  %13638 = vst [vmem:[#allocation43_spill] sm:$0xff] %v10289_v60 }
 0x49e   : > { %2862 = vmatpush.msrb.mxu2 %v10129_v35  ;;  %2566 = vmatpush.msra.mxu0 %v9994_v34  ;;  %v2774_v34 = vsub.f32 %v10153_v6, %v13304_v43  ;;  %v13299_v26 = vand.u32 4294901760, %v10189_v36  ;;  %v10230_v4 = vsub.f32 %v475_v44, %v10201_v52  ;;  %v2781_v1 = vand.u32 4294901760, %v2780_v63  ;;  %v419_v63 = vld [vmem:[%s8351_s22 + $0x18] sm:$0xff] }
 0x49f   : > { %2602 = vmatpush.msra.mxu1 %v9959_v11  ;;  %2712 = vmatpush.msra.mxu3 %v9972_v53  ;;  %v2763_v11 = vand.u32 4294901760, %v2762_v0  ;;  %v13296_v19 = vand.u32 4294901760, %v10223_v30  ;;  %v13293_v16 = vand.u32 4294901760, %v10249_v59  ;;  %v10277_v44 = vand.u32 4294901760, %v435_v47 }
 0x4a0   : > { %2336 = vmatmul.f32.vlgmr.msrb.gmra.mxu0 %v13626_v42  ;;  %2515 = vmatmul.f32.vlgmr.msrb.gmra.mxu3 %v13637_v58  ;;  %v2775_v29 = vand.u32 4294901760, %v2774_v34  ;;  %v2792_v57 = vsub.f32 %v10189_v36, %v13299_v26  ;;  %v13295_v48 = vand.u32 4294901760, %v10230_v4  ;;  %v2799_v25 = vand.u32 4294901760, %v2798_v2 }
 0x4a1   : > { %2719 = vmatpush.msrb.mxu0 %v10111_v3  ;;  %2865 = vmatpush.msrb.mxu2 %v10140_v50  ;;  %v10287_v34 = vsub.f32 %v443_v5, %v10264_v40  ;;  %v10372_v39 = vand.u32 4294901760, %v627_v33 }
 0x4a2   : > { %2915 = vmatpush.msrb.mxu3 %v10111_v3  ;;  %2604 = vmatpush.msra.mxu1 %v9972_v53  ;;  %v451_v53 = vld [vmem:[%s8351_s22 + $0x118] sm:$0xff]  ;;  %v2793_v32 = vand.u32 4294901760, %v2792_v57  ;;  %v2810_v10 = vsub.f32 %v10230_v4, %v13295_v48  ;;  %v10301_v57 = vsub.f32 %v435_v47, %v10277_v44  ;;  %v10314_v47 = vsub.f32 %v427_v28, %v10289_v60 }
 0x4a3   : > { %2721 = vmatpush.msrb.mxu0 %v10119_v21  ;;  %2373 = vmatmul.f32.vlgmr.msrb.gmra.mxu1 %v13626_v42  ;;  %v10251_v61 = vand.u32 4294901760, %v451_v53  ;;  %v10414_v42 = vand.u32 4294901760, %v603_v24 }
 0x4a4   : > { %2868 = vmatpush.msrb.mxu2 %v10153_v6  ;;  %2764 = vmatpush.msrb.mxu1 %v2763_v11  ;;  %v13294_v11 = vand.u32 4294901760, %v10262_v49  ;;  %v2811_v5 = vand.u32 4294901760, %v2810_v10  ;;  %v13306_v26 = vand.u32 4294901760, %v10314_v47 }
 0x4a5   : > { %6915 = vrot.lane.b32.xlu1 %v6913_v18, %s8159_s2  ;;  %2917 = vmatpush.msrb.mxu3 %v10119_v21  ;;  %v2804_v18 = vsub.f32 %v10223_v30, %v13296_v19  ;;  %v10275_v0 = vsub.f32 %v451_v53, %v10251_v61  ;;  %v643_v19 = vld [vmem:[%s8351_s22 + $0x718] sm:$0xff] }
 0x4a6   : > { %2723 = vmatpush.msrb.mxu0 %v10131_v38  ;;  %2871 = vmatpush.msrb.mxu2 %v10167_v13  ;;  %v2822_v2 = vsub.f32 %v10262_v49, %v13294_v11  ;;  %v13303_v11 = vand.u32 4294901760, %v10301_v57 }
 0x4a7   : > { %2770 = vmatpush.msrb.mxu1 %v2769_v17  ;;  %2919 = vmatpush.msrb.mxu3 %v10131_v38  ;;  %v667_v17 = vld [vmem:[%s8351_s22 + $0x7d8] sm:$0xff]  ;;  %v2805_v53 = vand.u32 4294901760, %v2804_v18  ;;  %v13297_v54 = vand.u32 4294901760, %v10275_v0  ;;  %v10316_v18 = vand.u32 4294901760, %v419_v63 }
 0x4a8   : > { %2725 = vmatpush.msrb.mxu0 %v10142_v22  ;;  %2874 = vmatpush.msrb.mxu2 %v10181_v15 }
 0x4a9   : > { %2776 = vmatpush.msrb.mxu1 %v2775_v29  ;;  %2921 = vmatpush.msrb.mxu3 %v10142_v22  ;;  %v2816_v29 = vsub.f32 %v10249_v59, %v13293_v16  ;;  %13640 = vst [vmem:[#allocation42_spill] sm:$0xff] %v10316_v18  ;;  %v651_v16 = vld [vmem:[%s8351_s22 + $0x758] sm:$0xff]  ;;  %v10341_v51 = vsub.f32 %v419_v63, %v10316_v18  ;;  %v10354_v63 = vand.u32 4294901760, %v643_v19 }
 0x4aa   : > { %2727 = vmatpush.msrb.mxu0 %v10155_v37  ;;  %2877 = vmatpush.msrb.mxu2 %v10189_v36 }
 0x4ab   : > { %2782 = vmatpush.msrb.mxu1 %v2781_v1  ;;  %2923 = vmatpush.msrb.mxu3 %v10155_v37  ;;  %v10305_v1 = vand.u32 4294901760, %v667_v17  ;;  %v2817_v10 = vand.u32 4294901760, %v2816_v29  ;;  %v2823_v29 = vand.u32 4294901760, %v2822_v2  ;;  %v2840_v2 = vsub.f32 %v10301_v57, %v13303_v11  ;;  %v710_v11 = vpop.f32.mrf.mxu0 }
 0x4ac   : > { %2729 = vmatpush.msrb.mxu0 %v10160_v31  ;;  %2880 = vmatpush.msrb.mxu2 %v10211_v62 }
 0x4ad   : > { %2788 = vmatpush.msrb.mxu1 %v2787_v27  ;;  %2925 = vmatpush.msrb.mxu3 %v10160_v31  ;;  %13639 = vst [vmem:[#allocation41_spill] sm:$0xff] %v10305_v1  ;;  %v659_v27 = vld [vmem:[%s8351_s22 + $0x798] sm:$0xff]  ;;  %v10331_v48 = vsub.f32 %v667_v17, %v10305_v1 }
 0x4ae   : > { %2731 = vmatpush.msrb.mxu0 %v10183_v45  ;;  %2883 = vmatpush.msrb.mxu2 %v10223_v30  ;;  %v10326_v28 = vand.u32 4294901760, %v659_v27  ;;  %v635_v17 = vld [vmem:[%s8351_s22 + $0x6d8] sm:$0xff] }
 0x4af   : > { %2794 = vmatpush.msrb.mxu1 %v2793_v32  ;;  %2927 = vmatpush.msrb.mxu3 %v10183_v45  ;;  %v13300_v32 = vand.u32 4294901760, %v10287_v34  ;;  %v10368_v43 = vand.u32 4294901760, %v635_v17 }
 0x4b0   : > { %2733 = vmatpush.msrb.mxu0 %v10197_v20  ;;  %2886 = vmatpush.msrb.mxu2 %v10230_v4 }
 0x4b1   : > { %2800 = vmatpush.msrb.mxu1 %v2799_v25  ;;  %2929 = vmatpush.msrb.mxu3 %v10197_v20  ;;  %v2828_v25 = vsub.f32 %v10275_v0, %v13297_v54  ;;  %v2834_v54 = vsub.f32 %v10287_v34, %v13300_v32  ;;  %v10352_v32 = vsub.f32 %v659_v27, %v10326_v28 }
 0x4b2   : > { %2735 = vmatpush.msrb.mxu0 %v10201_v52  ;;  %2889 = vmatpush.msrb.mxu2 %v10249_v59  ;;  %v2846_v27 = vsub.f32 %v10314_v47, %v13306_v26  ;;  %v10378_v26 = vsub.f32 %v643_v19, %v10354_v63  ;;  %v10392_v55 = vsub.f32 %v635_v17, %v10368_v43 }
 0x4b3   : > { %2806 = vmatpush.msrb.mxu1 %v2805_v53  ;;  %2931 = vmatpush.msrb.mxu3 %v10201_v52  ;;  %v10333_v53 = vand.u32 4294901760, %v651_v16  ;;  %13641 = vst [vmem:[#allocation44_spill] sm:$0xff] %v10352_v32 }
 0x4b4   : > { %2737 = vmatpush.msrb.mxu0 %v10225_v14  ;;  %2892 = vmatpush.msrb.mxu2 %v10262_v49  ;;  %v13649_v17 = vand.u32 4294901760, %v10378_v26 }
 0x4b5   : > { %2812 = vmatpush.msrb.mxu1 %v2811_v5  ;;  %2933 = vmatpush.msrb.mxu3 %v10225_v14  ;;  %v2829_v5 = vand.u32 4294901760, %v2828_v25  ;;  %v10361_v9 = vsub.f32 %v651_v16, %v10333_v53  ;;  %v2835_v25 = vand.u32 4294901760, %v2834_v54  ;;  %v619_v16 = vld [vmem:[%s8351_s22 + $0x658] sm:$0xff]  ;;  %v2841_v54 = vand.u32 4294901760, %v2840_v2 }
 0x4b6   : > { %2739 = vmatpush.msrb.mxu0 %v10238_v12  ;;  %2895 = vmatpush.msrb.mxu2 %v10275_v0  ;;  %v2847_v2 = vand.u32 4294901760, %v2846_v27  ;;  %v10394_v56 = vand.u32 4294901760, %v619_v16  ;;  %v13645_v27 = vand.u32 4294901760, %v10352_v32 }
 0x4b7   : > { %2818 = vmatpush.msrb.mxu1 %v2817_v10  ;;  %2935 = vmatpush.msrb.mxu3 %v10238_v12  ;;  %v13309_v10 = vand.u32 4294901760, %v10331_v48  ;;  %13642 = vst [vmem:[#allocation45_spill] sm:$0xff] %v10361_v9 }
 0x4b8   : > { %2741 = vmatpush.msrb.mxu0 %v10251_v61  ;;  %2898 = vmatpush.msrb.mxu2 %v10287_v34 }
 0x4b9   : > { %2824 = vmatpush.msrb.mxu1 %v2823_v29  ;;  %2937 = vmatpush.msrb.mxu3 %v10251_v61  ;;  %v3103_v46 = vsub.f32 %v10331_v48, %v13309_v10  ;;  %v13643_v29 = vand.u32 4294901760, %v10341_v51 }
 0x4ba   : > { %2743 = vmatpush.msrb.mxu0 %v10264_v40  ;;  %2901 = vmatpush.msrb.mxu2 %v10301_v57 }
 0x4bb   : > { %2830 = vmatpush.msrb.mxu1 %v2829_v5  ;;  %2939 = vmatpush.msrb.mxu3 %v10264_v40  ;;  %v611_v5 = vld [vmem:[%s8351_s22 + $0x618] sm:$0xff]  ;;  %v2852_v19 = vsub.f32 %v10341_v51, %v13643_v29  ;;  %v3109_v29 = vsub.f32 %v10352_v32, %v13645_v27  ;;  %v3104_v23 = vand.u32 4294901760, %v3103_v46  ;;  %v10420_v32 = vsub.f32 %v619_v16, %v10394_v56  ;;  %v13647_v46 = vld [vmem:[#allocation38_spill] sm:$0xff] }
 0x4bc   : > { %2745 = vmatpush.msrb.mxu0 %v10277_v44  ;;  %2904 = vmatpush.msrb.mxu2 %v10314_v47  ;;  %v10407_v10 = vand.u32 4294901760, %v611_v5  ;;  %v3121_v16 = vsub.f32 %v10378_v26, %v13649_v17  ;;  %v13651_v17 = vand.u32 4294901760, %v10392_v55 }
 0x4bd   : > { %2836 = vmatpush.msrb.mxu1 %v2835_v25  ;;  %2941 = vmatpush.msrb.mxu3 %v10277_v44  ;;  %v10400_v25 = vsub.f32 %v627_v33, %v10372_v39  ;;  %v13646_v33 = vand.u32 4294901760, %v10361_v9  ;;  %v2853_v27 = vand.u32 4294901760, %v2852_v19  ;;  %v3110_v19 = vand.u32 4294901760, %v3109_v29 }
 0x4be   : > { %2747 = vmatpush.msrb.mxu0 %v10289_v60  ;;  %2907 = vmatpush.msrb.mxu2 %v10341_v51  ;;  %v13650_v29 = vand.u32 4294901760, %v10140_v50  ;;  %v571_v50 = vld [vmem:[%s8351_s22 + $0x4d8] sm:$0xff] }
 0x4bf   : > { %13644 = vst [vmem:[#allocation53_spill] sm:$0xff] %v10400_v25  ;;  %2842 = vmatpush.msrb.mxu1 %v2841_v54  ;;  %2943 = vmatpush.msrb.mxu3 %v10289_v60  ;;  %v3115_v54 = vsub.f32 %v10361_v9, %v13646_v33  ;;  %v587_v9 = vld [vmem:[%s8351_s22 + $0x558] sm:$0xff]  ;;  %v812_v60 = vadd.f32 %v811_v7, %v710_v11 }
 0x4c0   : > { %2677 = vmatmul.f32.vlgmr.msra.gmra.mxu2 %v13637_v58  ;;  %2749 = vmatpush.msrb.mxu0 %v10316_v18  ;;  %v10439_v11 = vsub.f32 %v603_v24, %v10414_v42  ;;  %v13653_v24 = vand.u32 4294901760, %v10400_v25 }
 0x4c1   : > { %3060 = vmatpush.msra.mxu2 %v10305_v1  ;;  %2848 = vmatpush.msrb.mxu1 %v2847_v2  ;;  %v13648_v2 = vand.u32 4294901760, %v10129_v35  ;;  %v10433_v1 = vsub.f32 %v611_v5, %v10407_v10  ;;  %v3116_v7 = vand.u32 4294901760, %v3115_v54  ;;  %v579_v35 = vld [vmem:[%s8351_s22 + $0x518] sm:$0xff]  ;;  %v3127_v5 = vsub.f32 %v10392_v55, %v13651_v17  ;;  %v13652_v54 = vld [vmem:[#allocation39_spill] sm:$0xff] }
 0x4c2   : > { %2945 = vmatpush.msrb.mxu3 %v10316_v18  ;;  %2569 = vmatmul.f32.vlgmr.msra.gmra.mxu0 %v13647_v46  ;;  %v10435_v18 = vand.u32 4294901760, %v595_v8  ;;  %v10448_v46 = vand.u32 4294901760, %v587_v9 }
 0x4c3   : > { %2714 = vmatmul.f32.vlgmr.msra.gmra.mxu3 %v13637_v58  ;;  %2956 = vmatpush.msra.mxu0 %v13648_v2  ;;  %v865_v2 = vpop.f32.mrf.mxu2  ;;  %v10461_v58 = vand.u32 4294901760, %v579_v35 }
 0x4c4   : > { %3062 = vmatpush.msra.mxu2 %v10326_v28  ;;  %3105 = vmatpush.msra.mxu3 %v3104_v23  ;;  %v866_v23 = vadd.f32 %v865_v2, %v812_v60  ;;  %v10459_v33 = vsub.f32 %v595_v8, %v10435_v18  ;;  %v904_v60 = vpop.f32.mrf.mxu3  ;;  %v13654_v2 = vand.u32 4294901760, %v10153_v6  ;;  %v13655_v8 = vand.u32 4294901760, %v10420_v32 }
 0x4c5   : > { %2854 = vmatpush.msrb.mxu1 %v2853_v27  ;;  %2960 = vmatpush.msra.mxu0 %v13650_v29  ;;  %v3133_v27 = vsub.f32 %v10400_v25, %v13653_v24  ;;  %v3122_v29 = vand.u32 4294901760, %v3121_v16  ;;  %v3150_v24 = vand.u32 4294901760, %v10439_v11  ;;  %v10473_v17 = vsub.f32 %v587_v9, %v10448_v46 }
 0x4c6   : > { %2608 = vmatmul.f32.vlgmr.msra.gmra.mxu1 %v13652_v54  ;;  %3064 = vmatpush.msra.mxu2 %v10333_v53  ;;  %v563_v54 = vld [vmem:[%s8351_s22 + $0x498] sm:$0xff]  ;;  %v3139_v16 = vsub.f32 %v10420_v32, %v13655_v8  ;;  %v10475_v6 = vand.u32 4294901760, %v571_v50  ;;  %v13656_v25 = vand.u32 4294901760, %v10167_v13  ;;  %v10487_v8 = vsub.f32 %v579_v35, %v10461_v58 }
 0x4c7   : > { %3023 = vmatpush.msra.mxu1 %v10111_v3  ;;  %3111 = vmatpush.msra.mxu3 %v3110_v19  ;;  %v905_v3 = vadd.f32 %v904_v60, %v866_v23  ;;  %v3128_v19 = vand.u32 4294901760, %v3127_v5  ;;  %v3134_v23 = vand.u32 4294901760, %v3133_v27  ;;  %v555_v60 = vld [vmem:[%s8351_s22 + $0x458] sm:$0xff]  ;;  %v3156_v5 = vand.u32 4294901760, %v10459_v33 }
 0x4c8   : > { %2964 = vmatpush.msra.mxu0 %v13654_v2  ;;  %3066 = vmatpush.msra.mxu2 %v10354_v63  ;;  %v973_v2 = vpop.f32.mrf.mxu0  ;;  %v10489_v13 = vand.u32 4294901760, %v563_v54  ;;  %v13658_v27 = vand.u32 4294901760, %v10181_v15  ;;  %v13327_v35 = vand.u32 4294901760, %v10473_v17  ;;  %v547_v15 = vld [vmem:[%s8351_s22 + $0x418] sm:$0xff] }
 0x4c9   : > { %3025 = vmatpush.msra.mxu1 %v10119_v21  ;;  %3117 = vmatpush.msra.mxu3 %v3116_v7  ;;  %v974_v21 = vadd.f32 %v973_v2, %v905_v3  ;;  %v13657_v7 = vand.u32 4294901760, %v10433_v1  ;;  %v3140_v3 = vand.u32 4294901760, %v3139_v16  ;;  %v10500_v2 = vsub.f32 %v571_v50, %v10475_v6 }
 0x4ca   : > { %2968 = vmatpush.msra.mxu0 %v13656_v25  ;;  %3068 = vmatpush.msra.mxu2 %v10368_v43  ;;  %v1010_v25 = vpop.f32.mrf.mxu1  ;;  %v10514_v50 = vsub.f32 %v563_v54, %v10489_v13  ;;  %v13660_v16 = vand.u32 4294901760, %v10211_v62 }
 0x4cb   : > { %3027 = vmatpush.msra.mxu1 %v10131_v38  ;;  %3123 = vmatpush.msra.mxu3 %v3122_v29  ;;  %v3145_v9 = vsub.f32 %v10433_v1, %v13657_v7  ;;  %v3151_v38 = vsub.f32 %v10439_v11, %v3150_v24  ;;  %v1011_v29 = vadd.f32 %v1010_v25, %v974_v21  ;;  %v10502_v7 = vand.u32 4294901760, %v555_v60 }
 0x4cc   : > { %2972 = vmatpush.msra.mxu0 %v13658_v27  ;;  %3070 = vmatpush.msra.mxu2 %v10372_v39  ;;  %v13659_v27 = vand.u32 4294901760, %v10189_v36  ;;  %v10519_v25 = vand.u32 4294901760, %v547_v15  ;;  %v3174_v54 = vand.u32 4294901760, %v10500_v2 }
 0x4cd   : > { %3029 = vmatpush.msra.mxu1 %v10142_v22  ;;  %3129 = vmatpush.msra.mxu3 %v3128_v19  ;;  %v3146_v21 = vand.u32 4294901760, %v3145_v9  ;;  %v3157_v22 = vsub.f32 %v10459_v33, %v3156_v5  ;;  %v3168_v19 = vand.u32 4294901760, %v10487_v8  ;;  %v3152_v36 = vand.u32 4294901760, %v3151_v38 }
 0x4ce   : > { %2976 = vmatpush.msra.mxu0 %v13659_v27  ;;  %3072 = vmatpush.msra.mxu2 %v10394_v56  ;;  %v3163_v9 = vsub.f32 %v10473_v17, %v13327_v35  ;;  %v10527_v27 = vsub.f32 %v555_v60, %v10502_v7  ;;  %v13663_v60 = vand.u32 4294901760, %v10230_v4 }
 0x4cf   : > { %3031 = vmatpush.msra.mxu1 %v10155_v37  ;;  %3135 = vmatpush.msra.mxu3 %v3134_v23  ;;  %v1051_v37 = vpop.f32.mrf.mxu2  ;;  %v1152_v23 = vpop.f32.mrf.mxu3  ;;  %v3169_v38 = vsub.f32 %v10487_v8, %v3168_v19 }
 0x4d0   : > { %2980 = vmatpush.msra.mxu0 %v13660_v16  ;;  %3074 = vmatpush.msra.mxu2 %v10407_v10  ;;  %v1052_v62 = vadd.f32 %v1051_v37, %v1011_v29  ;;  %v13661_v16 = vand.u32 4294901760, %v10223_v30  ;;  %v10543_v30 = vsub.f32 %v547_v15, %v10519_v25  ;;  %v3175_v29 = vsub.f32 %v10500_v2, %v3174_v54 }
 0x4d1   : > { %3033 = vmatpush.msra.mxu1 %v10160_v31  ;;  %3141 = vmatpush.msra.mxu3 %v3140_v3  ;;  %v3158_v31 = vand.u32 4294901760, %v3157_v22  ;;  %v3180_v3 = vand.u32 4294901760, %v10514_v50  ;;  %v13664_v22 = vand.u32 4294901760, %v10249_v59  ;;  %v3170_v4 = vand.u32 4294901760, %v3169_v38  ;;  %v13678_v38 = vld [vmem:[#allocation42_spill] sm:$0xff] }
 0x4d2   : > { %2984 = vmatpush.msra.mxu0 %v13661_v16  ;;  %3076 = vmatpush.msra.mxu2 %v10414_v42  ;;  %v10537_v35 = vadd.f32 %v1152_v23, %v1052_v62  ;;  %v13665_v15 = vand.u32 4294901760, %v10262_v49  ;;  %v3176_v59 = vand.u32 4294901760, %v3175_v29  ;;  %v13666_v37 = vand.u32 4294901760, %v10275_v0  ;;  %v13672_v62 = vld [vmem:[#allocation43_spill] sm:$0xff]  ;;  %v13675_v16 = vld [vmem:[#allocation44_spill] sm:$0xff] }
 0x4d3   : > { %3035 = vmatpush.msra.mxu1 %v10183_v45  ;;  %3147 = vmatpush.msra.mxu3 %v3146_v21  ;;  %v3164_v45 = vand.u32 4294901760, %v3163_v9  ;;  %v3186_v21 = vand.u32 4294901760, %v10527_v27  ;;  %v13667_v23 = vand.u32 4294901760, %v10287_v34  ;;  %v13668_v9 = vand.u32 4294901760, %v10301_v57 }
 0x4d4   : > { %13662 = vst [vmem:[#allocation54_spill] sm:$0xff] %v10537_v35  ;;  %2988 = vmatpush.msra.mxu0 %v13663_v60  ;;  %3078 = vmatpush.msra.mxu2 %v10435_v18  ;;  %v13671_v57 = vand.u32 4294901760, %v10331_v48  ;;  %v13680_v60 = vld [vmem:[#allocation45_spill] sm:$0xff]  ;;  %v13683_v29 = vand.u32 4294901760, %v10392_v55 }
 0x4d5   : > { %3037 = vmatpush.msra.mxu1 %v10197_v20  ;;  %3153 = vmatpush.msra.mxu3 %v3152_v36  ;;  %v3181_v20 = vsub.f32 %v10514_v50, %v3180_v3  ;;  %v3192_v36 = vand.u32 4294901760, %v10543_v30 }
 0x4d6   : > { %2992 = vmatpush.msra.mxu0 %v13664_v22  ;;  %3080 = vmatpush.msra.mxu2 %v10448_v46  ;;  %v13684_v22 = vld [vmem:[#allocation53_spill] sm:$0xff] }
 0x4d7   : > { %3039 = vmatpush.msra.mxu1 %v10201_v52  ;;  %3159 = vmatpush.msra.mxu3 %v3158_v31  ;;  %v3187_v52 = vsub.f32 %v10527_v27, %v3186_v21  ;;  %v3182_v49 = vand.u32 4294901760, %v3181_v20  ;;  %v13677_v31 = vld [vmem:[#allocation41_spill] sm:$0xff] }
 0x4d8   : > { %2996 = vmatpush.msra.mxu0 %v13665_v15  ;;  %3082 = vmatpush.msra.mxu2 %v10461_v58  ;;  %v500_v15 = vld [vmem:[%s8351_s22 + $0x2a0] sm:$0xff] }
 0x4d9   : > { %3041 = vmatpush.msra.mxu1 %v10225_v14  ;;  %3165 = vmatpush.msra.mxu3 %v3164_v45  ;;  %v3193_v14 = vsub.f32 %v10543_v30, %v3192_v36  ;;  %v3188_v0 = vand.u32 4294901760, %v3187_v52  ;;  %v13681_v45 = vand.u32 4294901760, %v13680_v60 }
 0x4da   : > { %3000 = vmatpush.msra.mxu0 %v13666_v37  ;;  %3084 = vmatpush.msra.mxu2 %v10475_v6 }
 0x4db   : > { %3043 = vmatpush.msra.mxu1 %v10238_v12  ;;  %3171 = vmatpush.msra.mxu3 %v3170_v4  ;;  %v13669_v12 = vand.u32 4294901760, %v10314_v47  ;;  %v3194_v34 = vand.u32 4294901760, %v3193_v14  ;;  %v13674_v47 = vld [vmem:[#allocation35_spill] sm:$0xff]  ;;  %v13685_v4 = vand.u32 4294901760, %v13684_v22 }
 0x4dc   : > { %3004 = vmatpush.msra.mxu0 %v13667_v23  ;;  %3086 = vmatpush.msra.mxu2 %v10489_v13 }
 0x4dd   : > { %3045 = vmatpush.msra.mxu1 %v10251_v61  ;;  %3177 = vmatpush.msra.mxu3 %v3176_v59  ;;  %v13670_v61 = vand.u32 4294901760, %v10341_v51  ;;  %v13679_v51 = vld [vmem:[#allocation37_spill] sm:$0xff] }
 0x4de   : > { %3008 = vmatpush.msra.mxu0 %v13668_v9  ;;  %3088 = vmatpush.msra.mxu2 %v10502_v7  ;;  %v13691_v9 = vld [vmem:[#allocation40_spill] sm:$0xff] }
 0x4df   : > { %3047 = vmatpush.msra.mxu1 %v10264_v40  ;;  %3183 = vmatpush.msra.mxu3 %v3182_v49  ;;  %v13673_v40 = vld [vmem:[#allocation36_spill] sm:$0xff]  ;;  %v484_v49 = vld [vmem:[%s8351_s22 + $0x220] sm:$0xff] }
 0x4e0   : > { %3012 = vmatpush.msra.mxu0 %v13669_v12  ;;  %3090 = vmatpush.msra.mxu2 %v10519_v25  ;;  %v10726_v12 = vand.u32 4294901760, %v484_v49 }
 0x4e1   : > { %3049 = vmatpush.msra.mxu1 %v10277_v44  ;;  %3189 = vmatpush.msra.mxu3 %v3188_v0  ;;  %v13676_v44 = vand.u32 4294901760, %v13675_v16 }
 0x4e2   : > { %2910 = vmatmul.f32.vlgmr.msrb.gmra.mxu2 %v8914_v41  ;;  %3016 = vmatpush.msra.mxu0 %v13670_v61 }
 0x4e3   : > { %3297 = vmatpush.msrb.mxu2 %v13671_v57  ;;  %3051 = vmatpush.msra.mxu1 %v13672_v62  ;;  %v468_v57 = vld [vmem:[%s8351_s22 + $0x1a0] sm:$0xff] }
 0x4e4   : > { %3195 = vmatpush.msra.mxu3 %v3194_v34  ;;  %2755 = vmatmul.f32.vlgmr.msrb.gmra.mxu0 %v13673_v40  ;;  %v13692_v62 = vld [vmem:[#allocation34_spill] sm:$0xff] }
 0x4e5   : > { %2949 = vmatmul.f32.vlgmr.msrb.gmra.mxu3 %v13674_v47  ;;  %3203 = vmatpush.msrb.mxu0 %v10331_v48  ;;  %v13682_v48 = vand.u32 4294901760, %v10378_v26 }
 0x4e6   : > { %3301 = vmatpush.msrb.mxu2 %v13676_v44  ;;  %3364 = vmatpush.msrb.mxu3 %v13677_v31 }
 0x4e7   : > { %3053 = vmatpush.msra.mxu1 %v13678_v38  ;;  %3206 = vmatpush.msrb.mxu0 %v13675_v16  ;;  %v460_v38 = vld [vmem:[%s8351_s22 + $0x160] sm:$0xff] }
 0x4e8   : > { %2856 = vmatmul.f32.vlgmr.msrb.gmra.mxu1 %v13679_v51  ;;  %3305 = vmatpush.msrb.mxu2 %v13681_v45 }
 0x4e9   : > { %3256 = vmatpush.msrb.mxu1 %v13677_v31  ;;  %3366 = vmatpush.msrb.mxu3 %v10326_v28 }
 0x4ea   : > { %3209 = vmatpush.msrb.mxu0 %v13680_v60  ;;  %3309 = vmatpush.msrb.mxu2 %v13682_v48  ;;  %v10754_v48 = vsub.f32 %v484_v49, %v10726_v12 }
 0x4eb   : > { %3258 = vmatpush.msrb.mxu1 %v10326_v28  ;;  %3368 = vmatpush.msrb.mxu3 %v10333_v53 }
 0x4ec   : > { %3212 = vmatpush.msrb.mxu0 %v10378_v26  ;;  %3313 = vmatpush.msrb.mxu2 %v13683_v29  ;;  %v13686_v26 = vand.u32 4294901760, %v10420_v32 }
 0x4ed   : > { %3260 = vmatpush.msrb.mxu1 %v10333_v53  ;;  %3370 = vmatpush.msrb.mxu3 %v10354_v63  ;;  %v540_v53 = vld [vmem:[%s8351_s22 + $0x3e0] sm:$0xff] }
 0x4ee   : > { %3215 = vmatpush.msrb.mxu0 %v10392_v55  ;;  %3317 = vmatpush.msrb.mxu2 %v13685_v4  ;;  %v13687_v55 = vand.u32 4294901760, %v10433_v1 }
 0x4ef   : > { %3262 = vmatpush.msrb.mxu1 %v10354_v63  ;;  %3372 = vmatpush.msrb.mxu3 %v10368_v43  ;;  %v13689_v63 = vld [vmem:[#allocation51_spill] sm:$0xff] }
 0x4f0   : > { %3218 = vmatpush.msrb.mxu0 %v13684_v22  ;;  %3321 = vmatpush.msrb.mxu2 %v13686_v26 }
 0x4f1   : > { %3264 = vmatpush.msrb.mxu1 %v10368_v43  ;;  %3374 = vmatpush.msrb.mxu3 %v10372_v39  ;;  %v532_v43 = vld [vmem:[%s8351_s22 + $0x3a0] sm:$0xff] }
 0x4f2   : > { %3221 = vmatpush.msrb.mxu0 %v10420_v32  ;;  %3325 = vmatpush.msrb.mxu2 %v13687_v55  ;;  %v524_v32 = vld [vmem:[%s8351_s22 + $0x360] sm:$0xff]  ;;  %v10768_v55 = vand.u32 4294901760, %v460_v38 }
 0x4f3   : > { %3266 = vmatpush.msrb.mxu1 %v10372_v39  ;;  %3376 = vmatpush.msrb.mxu3 %v10394_v56  ;;  %v10639_v39 = vand.u32 4294901760, %v540_v53 }
 0x4f4   : > { %3224 = vmatpush.msrb.mxu0 %v10433_v1  ;;  %3329 = vmatpush.msrb.mxu2 %v3150_v24  ;;  %v10653_v24 = vand.u32 4294901760, %v532_v43 }
 0x4f5   : > { %3268 = vmatpush.msrb.mxu1 %v10394_v56  ;;  %3378 = vmatpush.msrb.mxu3 %v10407_v10  ;;  %v13688_v56 = vand.u32 4294901760, %v10473_v17 }
 0x4f6   : > { %3227 = vmatpush.msrb.mxu0 %v10439_v11  ;;  %3333 = vmatpush.msrb.mxu2 %v3156_v5  ;;  %v6874_v11 = vperm.slane %v13689_v63, 0  ;;  %v508_v5 = vld [vmem:[%s8351_s22 + $0x2e0] sm:$0xff]  ;;  %v10674_v20 = vsub.f32 %v532_v43, %v10653_v24 }
 0x4f7   : > { %v10618_v28 = vpop.permute.xlu1 %6887  ;;  %3270 = vmatpush.msrb.mxu1 %v10407_v10  ;;  %3380 = vmatpush.msrb.mxu3 %v10414_v42  ;;  %v10659_v10 = vsub.f32 %v540_v53, %v10639_v39 }
 0x4f8   : > { %3230 = vmatpush.msrb.mxu0 %v10459_v33  ;;  %3337 = vmatpush.msrb.mxu2 %v13688_v56  ;;  %v516_v33 = vld [vmem:[%s8351_s22 + $0x320] sm:$0xff]  ;;  %v13340_v37 = vand.u32 4294901760, %v10674_v20 }
 0x4f9   : > { %3272 = vmatpush.msrb.mxu1 %v10414_v42  ;;  %3382 = vmatpush.msrb.mxu3 %v10435_v18  ;;  %v10664_v42 = vand.u32 4294901760, %v524_v32 }
 0x4fa   : > { %3233 = vmatpush.msrb.mxu0 %v10473_v17  ;;  %3341 = vmatpush.msrb.mxu2 %v3168_v19  ;;  %v13690_v17 = vld [vmem:[#allocation52_spill] sm:$0xff] }
 0x4fb   : > { %3274 = vmatpush.msrb.mxu1 %v10435_v18  ;;  %3384 = vmatpush.msrb.mxu3 %v10448_v46  ;;  %v6875_v19 = vmul.f32 %v13690_v17, %v6874_v11  ;;  %v10676_v18 = vand.u32 4294901760, %v516_v33  ;;  %v444_v11 = vld [vmem:[%s8351_s22 + $0xe0] sm:$0xff] }
 0x4fc   : > { %3236 = vmatpush.msrb.mxu0 %v10487_v8  ;;  %3345 = vmatpush.msrb.mxu2 %v3174_v54  ;;  %v13341_v8 = vand.u32 4294901760, %v10659_v10  ;;  %v10688_v54 = vand.u32 4294901760, %v508_v5 }
 0x4fd   : > { %3276 = vmatpush.msrb.mxu1 %v10448_v46  ;;  %3386 = vmatpush.msrb.mxu3 %v10461_v58  ;;  %v10686_v46 = vsub.f32 %v524_v32, %v10664_v42 }
 0x4fe   : > { %3239 = vmatpush.msrb.mxu0 %v10500_v2  ;;  %3349 = vmatpush.msrb.mxu2 %v3180_v3  ;;  %v10693_v2 = vand.u32 4294901760, %v500_v15  ;;  %v492_v3 = vld [vmem:[%s8351_s22 + $0x260] sm:$0xff]  ;;  %v10716_v14 = vsub.f32 %v508_v5, %v10688_v54 }
 0x4ff   : > { %v10644_v1 = vpop.permute.xlu1 %6901  ;;  %3278 = vmatpush.msrb.mxu1 %v10461_v58  ;;  %3388 = vmatpush.msrb.mxu3 %v10475_v6  ;;  %v7912_v58 = vld [vmem:[%s13177_s3] sm:$0xf]  ;;  %v10718_v0 = vand.u32 4294901760, %v492_v3 }
 0x500   : > { %3242 = vmatpush.msrb.mxu0 %v10514_v50  ;;  %3353 = vmatpush.msrb.mxu2 %v3186_v21  ;;  %v6876_v52 = vadd.f32 %v7912_v58, %v6875_v19  ;;  %v10703_v50 = vsub.f32 %v516_v33, %v10676_v18  ;;  %v3444_v21 = vsub.f32 %v10659_v10, %v13341_v8  ;;  %v13336_v44 = vand.u32 4294901760, %v10716_v14  ;;  %v6909_v19 = vpop.permute.xlu2 %6908  ;;  %v10914_v8 = vpop.f32.mrf.mxu1 }
 0x501   : > { %3280 = vmatpush.msrb.mxu1 %v10475_v6  ;;  %3390 = vmatpush.msrb.mxu3 %v10489_v13  ;;  %v13339_v6 = vand.u32 4294901760, %v10686_v46  ;;  %v10747_v31 = vsub.f32 %v492_v3, %v10718_v0  ;;  %v436_v3 = vld [vmem:[%s8351_s22 + $0xa0] sm:$0xff]  ;;  %13702 = vst [vmem:[#allocation56_spill] sm:$0xff] %v10914_v8 }
 0x502   : > { %3245 = vmatpush.msrb.mxu0 %v10527_v27  ;;  %3357 = vmatpush.msrb.mxu2 %v3192_v36  ;;  %v476_v27 = vld [vmem:[%s8351_s22 + $0x1e0] sm:$0xff]  ;;  %v10724_v36 = vsub.f32 %v500_v15, %v10693_v2  ;;  %v13337_v34 = vand.u32 4294901760, %v10703_v50  ;;  %v3468_v56 = vsub.f32 %v10716_v14, %v13336_v44  ;;  %v10894_v44 = vpop.f32.mrf.mxu0 }
 0x503   : > { %3282 = vmatpush.msrb.mxu1 %v10489_v13  ;;  %3392 = vmatpush.msrb.mxu3 %v10502_v7  ;;  %v3450_v13 = vsub.f32 %v10674_v20, %v13340_v37  ;;  %v10736_v61 = vand.u32 4294901760, %v476_v27  ;;  %v3456_v16 = vsub.f32 %v10686_v46, %v13339_v6  ;;  %v13333_v32 = vand.u32 4294901760, %v10747_v31  ;;  %13699 = vst [vmem:[#allocation51_spill] sm:$0xff] %v10894_v44  ;;  %v612_v44 = vld [vmem:[%s8351_s22 + $0x620] sm:$0xff] }
 0x504   : > { %3096 = vmatmul.f32.vlgmr.msra.gmra.mxu2 %v13691_v9  ;;  %3248 = vmatpush.msrb.mxu0 %v10543_v30  ;;  %v3445_v30 = vand.u32 4294901760, %v3444_v21  ;;  %v13334_v45 = vand.u32 4294901760, %v10724_v36  ;;  %v3462_v4 = vsub.f32 %v10703_v50, %v13337_v34  ;;  %v10801_v21 = vand.u32 4294901760, %v444_v11 }
 0x505   : > { %3544 = vmatpush.msra.mxu2 %v10659_v10  ;;  %3284 = vmatpush.msrb.mxu1 %v10502_v7  ;;  %v3451_v22 = vand.u32 4294901760, %v3450_v13  ;;  %v10766_v26 = vsub.f32 %v476_v27, %v10736_v61  ;;  %v3457_v43 = vand.u32 4294901760, %v3456_v16  ;;  %v3480_v49 = vsub.f32 %v10747_v31, %v13333_v32 }
 0x506   : > { %3394 = vmatpush.msrb.mxu3 %v10519_v25  ;;  %3018 = vmatmul.f32.vlgmr.msra.gmra.mxu0 %v13679_v51  ;;  %v3474_v63 = vsub.f32 %v10724_v36, %v13334_v45  ;;  %v3463_v33 = vand.u32 4294901760, %v3462_v4 }
 0x507   : > { %v6881_v59 = vpop.permute.xlu1 %6880  ;;  %3197 = vmatmul.f32.vlgmr.msra.gmra.mxu3 %v13692_v62  ;;  %3401 = vmatpush.msra.mxu0 %v10639_v39  ;;  %v13330_v15 = vand.u32 4294901760, %v10766_v26 }
 0x508   : > { %v6883_v23 = vadd.f32 %v6881_v59, %v6876_v52  ;;  %3547 = vmatpush.msra.mxu2 %v10674_v20  ;;  %3597 = vmatpush.msra.mxu3 %v10639_v39  ;;  %v10794_v59 = vsub.f32 %v460_v38, %v10768_v55  ;;  %v3469_v52 = vand.u32 4294901760, %v3468_v56  ;;  %v3475_v27 = vand.u32 4294901760, %v3474_v63  ;;  %v668_v56 = vld [vmem:[%s8351_s22 + $0x7e0] sm:$0xff] }
 0x509   : > { %3286 = vmatpush.msrb.mxu1 %v10519_v25  ;;  %3403 = vmatpush.msra.mxu0 %v10653_v24  ;;  %v452_v25 = vld [vmem:[%s8351_s22 + $0x120] sm:$0xff]  ;;  %v10814_v38 = vand.u32 4294901760, %v436_v3 }
 0x50a   : > { %v6890_v7 = vadd.f32 %v10618_v28, %v6883_v23  ;;  %v10761_v28 = vand.u32 4294901760, %v468_v57  ;;  %3055 = vmatmul.f32.vlgmr.msra.gmra.mxu1 %v13679_v51  ;;  %3550 = vmatpush.msra.mxu2 %v10686_v46  ;;  %v10788_v17 = vand.u32 4294901760, %v452_v25  ;;  %v1392_v47 = vpop.f32.mrf.mxu0 }
 0x50b   : > { %3446 = vmatpush.msra.mxu1 %v3445_v30  ;;  %3599 = vmatpush.msra.mxu3 %v10653_v24  ;;  %v428_v30 = vld [vmem:[%s8351_s22 + $0x60] sm:$0xff] }
 0x50c   : > { %3405 = vmatpush.msra.mxu0 %v10664_v42  ;;  %3553 = vmatpush.msra.mxu2 %v10703_v50  ;;  %v10786_v5 = vsub.f32 %v468_v57, %v10761_v28  ;;  %v10812_v16 = vsub.f32 %v452_v25, %v10788_v17  ;;  %v3481_v25 = vand.u32 4294901760, %v3480_v49  ;;  %v660_v49 = vld [vmem:[%s8351_s22 + $0x7a0] sm:$0xff] }
 0x50d   : > { %3452 = vmatpush.msra.mxu1 %v3451_v22  ;;  %3601 = vmatpush.msra.mxu3 %v10664_v42  ;;  %v13329_v22 = vand.u32 4294901760, %v10794_v59 }
 0x50e   : > { %3407 = vmatpush.msra.mxu0 %v10676_v18  ;;  %3556 = vmatpush.msra.mxu2 %v10716_v14 }
 0x50f   : > { %v6895_v60 = vpop.permute.xlu1 %6894  ;;  %3458 = vmatpush.msra.mxu1 %v3457_v43  ;;  %3603 = vmatpush.msra.mxu3 %v10676_v18  ;;  %v10826_v43 = vand.u32 4294901760, %v428_v30 }
 0x510   : > { %v6897_v29 = vadd.f32 %v6895_v60, %v6890_v7  ;;  %3409 = vmatpush.msra.mxu0 %v10688_v54  ;;  %3559 = vmatpush.msra.mxu2 %v10724_v36  ;;  %v13328_v7 = vand.u32 4294901760, %v10786_v5  ;;  %v6923_v60 = vpop.permute.xlu0 %6922 }
 0x511   : > { %3464 = vmatpush.msra.mxu1 %v3463_v33  ;;  %3605 = vmatpush.msra.mxu3 %v10688_v54  ;;  %13693 = vst [vmem:[#allocation43_spill] sm:$0xff] %v10826_v43  ;;  %v420_v33 = vld [vmem:[%s8351_s22 + $0x20] sm:$0xff] }
 0x512   : > { %v6904_v53 = vadd.f32 %v10644_v1, %v6897_v29  ;;  %v13332_v1 = vand.u32 4294901760, %v10754_v48  ;;  %3411 = vmatpush.msra.mxu0 %v10693_v2  ;;  %3562 = vmatpush.msra.mxu2 %v10747_v31  ;;  %v3492_v29 = vsub.f32 %v10766_v26, %v13330_v15 }
 0x513   : > { %3470 = vmatpush.msra.mxu1 %v3469_v52  ;;  %3607 = vmatpush.msra.mxu3 %v10693_v2  ;;  %v10838_v52 = vsub.f32 %v436_v3, %v10814_v38  ;;  %v10851_v3 = vsub.f32 %v428_v30, %v10826_v43 }
 0x514   : > { %v6911_v58 = vadd.f32 %v6909_v19, %v6904_v53  ;;  %v3486_v13 = vsub.f32 %v10754_v48, %v13332_v1  ;;  %v10824_v53 = vsub.f32 %v444_v11, %v10801_v21  ;;  %3413 = vmatpush.msra.mxu0 %v10718_v0  ;;  %3565 = vmatpush.msra.mxu2 %v10754_v48  ;;  %v13331_v11 = vand.u32 4294901760, %v10812_v16 }
 0x515   : > { %3476 = vmatpush.msra.mxu1 %v3475_v27  ;;  %3609 = vmatpush.msra.mxu3 %v10718_v0  ;;  %v3504_v27 = vsub.f32 %v10794_v59, %v13329_v22  ;;  %v13338_v30 = vand.u32 4294901760, %v10838_v52  ;;  %v13342_v32 = vand.u32 4294901760, %v10851_v3 }
 0x516   : > { %v3487_v63 = vand.u32 4294901760, %v3486_v13  ;;  %3415 = vmatpush.msra.mxu0 %v10726_v12  ;;  %3568 = vmatpush.msra.mxu2 %v10766_v26  ;;  %v10846_v13 = vand.u32 4294901760, %v668_v56 }
 0x517   : > { %v6916_v23 = vpop.permute.xlu1 %6915  ;;  %3482 = vmatpush.msra.mxu1 %v3481_v25  ;;  %3611 = vmatpush.msra.mxu3 %v10726_v12 }
 0x518   : > { %v6918_v57 = vadd.f32 %v6916_v23, %v6911_v58  ;;  %v3498_v58 = vsub.f32 %v10786_v5, %v13328_v7  ;;  %v3493_v23 = vand.u32 4294901760, %v3492_v29  ;;  %13694 = vst [vmem:[#allocation44_spill] sm:$0xff] %v10846_v13  ;;  %v644_v7 = vld [vmem:[%s8351_s22 + $0x720] sm:$0xff]  ;;  %3417 = vmatpush.msra.mxu0 %v10736_v61  ;;  %3571 = vmatpush.msra.mxu2 %v10786_v5  ;;  %v10859_v29 = vand.u32 4294901760, %v660_v49 }
 0x519   : > { %3488 = vmatpush.msra.mxu1 %v3487_v63  ;;  %3613 = vmatpush.msra.mxu3 %v10736_v61  ;;  %v10869_v22 = vsub.f32 %v668_v56, %v10846_v13  ;;  %v10873_v63 = vand.u32 4294901760, %v644_v7 }
 0x51a   : > { %v6925_v4 = vadd.f32 %v6923_v60, %v6918_v57  ;;  %v13335_v57 = vand.u32 4294901760, %v10824_v53  ;;  %v10853_v60 = vand.u32 4294901760, %v420_v33  ;;  %v3499_v25 = vand.u32 4294901760, %v3498_v58  ;;  %3419 = vmatpush.msra.mxu0 %v10761_v28  ;;  %3574 = vmatpush.msra.mxu2 %v10794_v59 }
 0x51b   : > { %13696 = vst [vmem:[#allocation42_spill] sm:$0xff] %v10869_v22  ;;  %3494 = vmatpush.msra.mxu1 %v3493_v23  ;;  %3615 = vmatpush.msra.mxu3 %v10761_v28  ;;  %v3505_v58 = vand.u32 4294901760, %v3504_v27  ;;  %v10886_v56 = vsub.f32 %v660_v49, %v10859_v29  ;;  %v636_v23 = vld [vmem:[%s8351_s22 + $0x6e0] sm:$0xff]  ;;  %v13343_v49 = vand.u32 4294901760, %v10869_v22 }
 0x51c   : > { %v7700_v19 = vmul.f32 -1.442695, %v6925_v4  ;;  %13695 = vst [vmem:[#allocation41_spill] sm:$0xff] %v10853_v60  ;;  %v652_v4 = vld [vmem:[%s8351_s22 + $0x760] sm:$0xff]  ;;  %v10880_v1 = vsub.f32 %v420_v33, %v10853_v60  ;;  %3421 = vmatpush.msra.mxu0 %v10768_v55  ;;  %3577 = vmatpush.msra.mxu2 %v10812_v16  ;;  %v3522_v33 = vsub.f32 %v10838_v52, %v13338_v30  ;;  %v10912_v37 = vand.u32 4294901760, %v636_v23 }
 0x51d   : > { %v10871_v15 = vand.u32 4294901760, %v652_v4  ;;  %13698 = vst [vmem:[#allocation53_spill] sm:$0xff] %v10886_v56  ;;  %3500 = vmatpush.msra.mxu1 %v3499_v25  ;;  %3617 = vmatpush.msra.mxu3 %v10768_v55  ;;  %v3785_v6 = vsub.f32 %v10869_v22, %v13343_v49  ;;  %v13705_v49 = vand.u32 4294901760, %v10886_v56 }
 0x51e   : > { %7839 = vpow2.f32 %v7700_v19  ;;  %v3510_v19 = vsub.f32 %v10812_v16, %v13331_v11  ;;  %v3516_v11 = vsub.f32 %v10824_v53, %v13335_v57  ;;  %13697 = vst [vmem:[#allocation45_spill] sm:$0xff] %v10880_v1  ;;  %v628_v57 = vld [vmem:[%s8351_s22 + $0x6a0] sm:$0xff]  ;;  %3423 = vmatpush.msra.mxu0 %v10788_v17  ;;  %3580 = vmatpush.msra.mxu2 %v10824_v53 }
 0x51f   : > { %v10902_v25 = vsub.f32 %v652_v4, %v10871_v15  ;;  %3506 = vmatpush.msra.mxu1 %v3505_v58  ;;  %3619 = vmatpush.msra.mxu3 %v10788_v17  ;;  %v620_v4 = vld [vmem:[%s8351_s22 + $0x660] sm:$0xff]  ;;  %v3523_v58 = vand.u32 4294901760, %v3522_v33  ;;  %v13704_v33 = vand.u32 4294901760, %v10880_v1  ;;  %v10939_v35 = vsub.f32 %v636_v23, %v10912_v37 }
 0x520   : > { %v3511_v27 = vand.u32 4294901760, %v3510_v19  ;;  %v10905_v19 = vsub.f32 %v644_v7, %v10873_v63  ;;  %v3517_v30 = vand.u32 4294901760, %v3516_v11  ;;  %3425 = vmatpush.msra.mxu0 %v10801_v21  ;;  %3583 = vmatpush.msra.mxu2 %v10838_v52  ;;  %v10920_v11 = vand.u32 4294901760, %v628_v57  ;;  %v10951_v7 = vpop.f32.mrf.mxu3 }
 0x521   : > { %13700 = vst [vmem:[#allocation52_spill] sm:$0xff] %v10902_v25  ;;  %3621 = vmatpush.msra.mxu3 %v10801_v21  ;;  %v10941_v9 = vand.u32 4294901760, %v620_v4  ;;  %v10954_v23 = vand.u32 4294901760, %v612_v44  ;;  %3359 = vmatmul.f32.vlgmr.msrb.gmra.mxu2 %v13692_v62  ;;  %v3786_v51 = vand.u32 4294901760, %v3785_v6 }
 0x522   : > { %13701 = vst [vmem:[#allocation55_spill] sm:$0xff] %v10905_v19  ;;  %3512 = vmatpush.msra.mxu1 %v3511_v27  ;;  %3427 = vmatpush.msra.mxu0 %v10814_v38 }
 0x523   : > { %3586 = vmatpush.msra.mxu2 %v10851_v3  ;;  %3623 = vmatpush.msra.mxu3 %v10814_v38  ;;  %13706 = vst [vmem:[#allocation58_spill] sm:$0xff] %v10951_v7  ;;  %v596_v7 = vld [vmem:[%s8351_s22 + $0x5a0] sm:$0xff] }
 0x524   : > { %v7840_v45 = vpop.eup %7839  ;;  %3518 = vmatpush.msra.mxu1 %v3517_v30  ;;  %3429 = vmatpush.msra.mxu0 %v10826_v43  ;;  %v3791_v30 = vsub.f32 %v10886_v56, %v13705_v49  ;;  %v13707_v49 = vand.u32 4294901760, %v10902_v25  ;;  %v13708_v56 = vand.u32 4294901760, %v10905_v19 }
 0x525   : > { %v10896_v34 = vadd.f32 1.0, %v7840_v45  ;;  %v3528_v45 = vsub.f32 %v10851_v3, %v13342_v32  ;;  %v10924_v32 = vpop.f32.mrf.mxu2  ;;  %3589 = vmatpush.msra.mxu2 %v10880_v1  ;;  %3625 = vmatpush.msra.mxu3 %v10826_v43 }
 0x526   : > { %13703 = vst [vmem:[#allocation57_spill] sm:$0xff] %v10924_v32  ;;  %v3534_v32 = vsub.f32 %v10880_v1, %v13704_v33  ;;  %3524 = vmatpush.msra.mxu1 %v3523_v58  ;;  %v604_v33 = vld [vmem:[%s8351_s22 + $0x5e0] sm:$0xff]  ;;  %3431 = vmatpush.msra.mxu0 %v10853_v60  ;;  %v10967_v58 = vsub.f32 %v10905_v19, %v13708_v56  ;;  %v3792_v56 = vand.u32 4294901760, %v3791_v30 }
 0x527   : > { %7841 = vrcp.f32 %v10896_v34  ;;  %v3529_v27 = vand.u32 4294901760, %v3528_v45  ;;  %v10949_v45 = vsub.f32 %v628_v57, %v10920_v11  ;;  %v3797_v57 = vsub.f32 %v10902_v25, %v13707_v49  ;;  %3742 = vmatpush.msrb.mxu2 %v10846_v13  ;;  %3627 = vmatpush.msra.mxu3 %v10853_v60  ;;  %v13709_v49 = vld [vmem:[#allocation38_spill] sm:$0xff] }
 0x528   : > { %v3535_v40 = vand.u32 4294901760, %v3534_v32  ;;  %v10975_v1 = vsub.f32 %v620_v4, %v10941_v9  ;;  %3251 = vmatmul.f32.vlgmr.msrb.gmra.mxu0 %v13709_v49  ;;  %v10980_v25 = vand.u32 4294901760, %v604_v33  ;;  %3396 = vmatmul.f32.vlgmr.msrb.gmra.mxu3 %v13692_v62  ;;  %v13710_v32 = vand.u32 4294901760, %v10659_v10  ;;  %v588_v60 = vld [vmem:[%s8351_s22 + $0x560] sm:$0xff] }
 0x529   : > { %3530 = vmatpush.msra.mxu1 %v3529_v27  ;;  %v1493_v27 = vpop.f32.mrf.mxu1  ;;  %v10986_v4 = vsub.f32 %v612_v44, %v10954_v23  ;;  %v10988_v13 = vand.u32 4294901760, %v596_v7  ;;  %3744 = vmatpush.msrb.mxu2 %v10859_v29  ;;  %v3798_v30 = vand.u32 4294901760, %v3797_v57  ;;  %v3804_v19 = vand.u32 4294901760, %v10967_v58 }
 0x52a   : > { %3638 = vmatpush.msrb.mxu0 %v13710_v32  ;;  %v1494_v49 = vadd.f32 %v1493_v27, %v1392_v47  ;;  %3787 = vmatpush.msrb.mxu3 %v3786_v51  ;;  %v13711_v10 = vand.u32 4294901760, %v10674_v20  ;;  %v13359_v47 = vand.u32 4294901760, %v10975_v1  ;;  %v580_v27 = vld [vmem:[%s8351_s22 + $0x520] sm:$0xff]  ;;  %v13713_v51 = vld [vmem:[#allocation39_spill] sm:$0xff]  ;;  %v11008_v57 = vsub.f32 %v604_v33, %v10980_v25 }
 0x52b   : > { %3536 = vmatpush.msra.mxu1 %v3535_v40  ;;  %3746 = vmatpush.msrb.mxu2 %v10871_v15  ;;  %v13714_v40 = vand.u32 4294901760, %v10949_v45  ;;  %v11010_v58 = vand.u32 4294901760, %v588_v60  ;;  %v13715_v33 = vand.u32 4294901760, %v10686_v46  ;;  %vm6935_vm11 = vweird.f32 %v10896_v34 }
 0x52c   : > { %3642 = vmatpush.msrb.mxu0 %v13711_v10  ;;  %3290 = vmatmul.f32.vlgmr.msrb.gmra.mxu1 %v13713_v51  ;;  %v11017_v10 = vsub.f32 %v596_v7, %v10988_v13  ;;  %v3821_v46 = vsub.f32 %v10975_v1, %v13359_v47  ;;  %v556_v7 = vld [vmem:[%s8351_s22 + $0x460] sm:$0xff] }
 0x52d   : > { %v10957_v8 = vpop.eup %7841  ;;  %v1547_v22 = vpop.f32.mrf.mxu2  ;;  %v3815_v20 = vsub.f32 %v10949_v45, %v13714_v40  ;;  %3705 = vmatpush.msrb.mxu1 %v10639_v39  ;;  %3793 = vmatpush.msrb.mxu3 %v3792_v56  ;;  %v6939_v39 = vand.u32 2147483647, %v10896_v34  ;;  %v11025_v56 = vand.u32 4294901760, %v580_v27 }
 0x52e   : > { %v6931_v6 = vmul.f32 %v10957_v8, %v10896_v34  ;;  %v1548_v62 = vadd.f32 %v1547_v22, %v1494_v49  ;;  %vm6936_vm10 = vweird.f32 %v10957_v8  ;;  %v1586_v40 = vpop.f32.mrf.mxu3  ;;  %3646 = vmatpush.msrb.mxu0 %v13715_v33  ;;  %3748 = vmatpush.msrb.mxu2 %v10873_v63  ;;  %v564_v33 = vld [vmem:[%s8351_s22 + $0x4a0] sm:$0xff] }
 0x52f   : > { %3707 = vmatpush.msrb.mxu1 %v10653_v24  ;;  %3799 = vmatpush.msrb.mxu3 %v3798_v30  ;;  %vm11030_vm12 = vmor %vm6935_vm11, %vm6936_vm10  ;;  %v11046_v30 = vsub.f32 %v588_v60, %v11010_v58  ;;  %v3816_v47 = vand.u32 4294901760, %v3815_v20  ;;  %vm6940_vm13 = vcmp.eq.f32.partialorder %v6939_v39, 8.507059e+37  ;;  %v3838_v60 = vand.u32 4294901760, %v11017_v10 }
 0x530   : > { %v6932_v43 = vsub.f32 1.0, %v6931_v6  ;;  %v13712_v6 = vand.u32 4294901760, %v10939_v35  ;;  %3750 = vmatpush.msrb.mxu2 %v10912_v37 }
 0x531   : > { %3709 = vmatpush.msrb.mxu1 %v10664_v42  ;;  %3805 = vmatpush.msrb.mxu3 %v3804_v19  ;;  %v11060_v42 = vsub.f32 %v580_v27, %v11025_v56  ;;  %v11062_v19 = vand.u32 4294901760, %v564_v33  ;;  %v1692_v20 = vpop.f32.mrf.mxu1  ;;  %v3844_v39 = vand.u32 4294901760, %v11046_v30 }
 0x532   : > { %v3809_v44 = vsub.f32 %v10939_v35, %v13712_v6  ;;  %v6933_v32 = vmul.f32 %v10957_v8, %v6932_v43  ;;  %v6941_v43 = vand.u32 2147483648, %v10896_v34  ;;  %v572_v6 = vld [vmem:[%s8351_s22 + $0x4e0] sm:$0xff]  ;;  %v13718_v34 = vand.u32 4294901760, %v10703_v50  ;;  %3752 = vmatpush.msrb.mxu2 %v10920_v11 }
 0x533   : > { %3711 = vmatpush.msrb.mxu1 %v10676_v18  ;;  %v11076_v18 = vand.u32 4294901760, %v556_v7  ;;  %3592 = vmatmul.f32.vlgmr.msra.gmra.mxu2 %v8914_v41 }
 0x534   : > { %v6934_v22 = vadd.f32 %v10957_v8, %v6933_v32  ;;  %v1587_v32 = vadd.f32 %v1586_v40, %v1548_v62  ;;  %v3810_v49 = vand.u32 4294901760, %v3809_v44  ;;  %3650 = vmatpush.msrb.mxu0 %v13718_v34  ;;  %v3832_v62 = vand.u32 4294901760, %v11008_v57  ;;  %v1655_v40 = vpop.f32.mrf.mxu0  ;;  %3754 = vmatpush.msrb.mxu2 %v10941_v9 }
 0x535   : > { %v11048_v44 = vand.u32 4294901760, %v572_v6  ;;  %v6942_v50 = vor.u32 1.1754944e-38, %v6941_v43  ;;  %v13719_v34 = vand.u32 4294901760, %v10986_v4  ;;  %3713 = vmatpush.msrb.mxu1 %v10688_v54 }
 0x536   : > { %v6938_v24 = vsel %vm11030_vm12, %v10957_v8, %v6934_v22  ;;  %v1656_v8 = vadd.f32 %v1655_v40, %v1587_v32  ;;  %v13720_v22 = vand.u32 4294901760, %v10716_v14  ;;  %3811 = vmatpush.msrb.mxu3 %v3810_v49  ;;  %v548_v32 = vld [vmem:[%s8351_s22 + $0x420] sm:$0xff]  ;;  %v13721_v14 = vand.u32 4294901760, %v10724_v36  ;;  %v1733_v49 = vpop.f32.mrf.mxu2  ;;  %3756 = vmatpush.msrb.mxu2 %v10954_v23 }
 0x537   : > { %v3827_v51 = vsub.f32 %v10986_v4, %v13719_v34  ;;  %v6943_v43 = vsel %vm6940_vm13, %v6942_v50, %v6938_v24  ;;  %v3822_v34 = vand.u32 4294901760, %v3821_v46  ;;  %v3833_v27 = vsub.f32 %v11008_v57, %v3832_v62  ;;  %3715 = vmatpush.msrb.mxu1 %v10693_v2 }
 0x538   : > { %3654 = vmatpush.msrb.mxu0 %v13720_v22  ;;  %v1693_v40 = vadd.f32 %v1692_v20, %v1656_v8  ;;  %v11074_v22 = vsub.f32 %v572_v6, %v11048_v44  ;;  %3817 = vmatpush.msrb.mxu3 %v3816_v47  ;;  %v13722_v24 = vand.u32 4294901760, %v10747_v31  ;;  %v3839_v50 = vsub.f32 %v11017_v10, %v3838_v60 }
 0x539   : > { %v3828_v46 = vand.u32 4294901760, %v3827_v51  ;;  %6947 = vperm.xlu1 %7826, %v6943_v43   ;;  %v3850_v8 = vand.u32 4294901760, %v11060_v42  ;;  %v11086_v6 = vsub.f32 %v564_v33, %v11062_v19  ;;  %v11088_v20 = vand.u32 4294901760, %v548_v32  ;;  %3717 = vmatpush.msrb.mxu1 %v10718_v0 }
 0x53a   : > { %3658 = vmatpush.msrb.mxu0 %v13721_v14  ;;  %v1734_v36 = vadd.f32 %v1733_v49, %v1693_v40  ;;  %v1834_v14 = vpop.f32.mrf.mxu3  ;;  %3823 = vmatpush.msrb.mxu3 %v3822_v34  ;;  %v13724_v31 = vand.u32 4294901760, %v10754_v48  ;;  %v3834_v47 = vand.u32 4294901760, %v3833_v27  ;;  %v3845_v51 = vsub.f32 %v11046_v30, %v3844_v39 }
 0x53b   : > { %v3856_v33 = vand.u32 4294901760, %v11074_v22  ;;  %v11101_v43 = vsub.f32 %v556_v7, %v11076_v18  ;;  %3758 = vmatpush.msrb.mxu2 %v10980_v25  ;;  %v13725_v2 = vand.u32 4294901760, %v10766_v26  ;;  %v3840_v48 = vand.u32 4294901760, %v3839_v50  ;;  %3719 = vmatpush.msrb.mxu1 %v10726_v12 }
 0x53c   : > { %3662 = vmatpush.msrb.mxu0 %v13722_v24  ;;  %v11092_v54 = vadd.f32 %v1834_v14, %v1734_v36  ;;  %3829 = vmatpush.msrb.mxu3 %v3828_v46  ;;  %v3851_v34 = vsub.f32 %v11060_v42, %v3850_v8  ;;  %v3862_v40 = vand.u32 4294901760, %v11086_v6  ;;  %v11112_v27 = vsub.f32 %v548_v32, %v11088_v20 }
 0x53d   : > { %3760 = vmatpush.msrb.mxu2 %v10988_v13  ;;  %v13726_v0 = vand.u32 4294901760, %v10786_v5  ;;  %v3846_v26 = vand.u32 4294901760, %v3845_v51  ;;  %v3857_v7 = vsub.f32 %v11074_v22, %v3856_v33  ;;  %v3868_v49 = vand.u32 4294901760, %v11101_v43  ;;  %3721 = vmatpush.msrb.mxu1 %v10736_v61  ;;  %v13737_v51 = vld [vmem:[#allocation36_spill] sm:$0xff] }
 0x53e   : > { %13723 = vst [vmem:[#allocation59_spill] sm:$0xff] %v11092_v54  ;;  %3666 = vmatpush.msrb.mxu0 %v13724_v31  ;;  %3835 = vmatpush.msrb.mxu3 %v3834_v47  ;;  %v13727_v12 = vand.u32 4294901760, %v10794_v59  ;;  %v3852_v32 = vand.u32 4294901760, %v3851_v34  ;;  %v3863_v5 = vsub.f32 %v11086_v6, %v3862_v40  ;;  %v3874_v46 = vand.u32 4294901760, %v11112_v27  ;;  %v13734_v31 = vld [vmem:[#allocation45_spill] sm:$0xff] }
 0x53f   : > { %3762 = vmatpush.msrb.mxu2 %v11010_v58  ;;  %3723 = vmatpush.msrb.mxu1 %v10761_v28  ;;  %v13728_v61 = vand.u32 4294901760, %v10812_v16  ;;  %v3858_v36 = vand.u32 4294901760, %v3857_v7  ;;  %v3869_v59 = vsub.f32 %v11101_v43, %v3868_v49  ;;  %v13729_v24 = vand.u32 4294901760, %v10824_v53  ;;  %v13742_v34 = vld [vmem:[#allocation41_spill] sm:$0xff] }
 0x540   : > { %3670 = vmatpush.msrb.mxu0 %v13725_v2  ;;  %3841 = vmatpush.msrb.mxu3 %v3840_v48  ;;  %v3864_v28 = vand.u32 4294901760, %v3863_v5  ;;  %v3875_v50 = vsub.f32 %v11112_v27, %v3874_v46  ;;  %v13730_v16 = vand.u32 4294901760, %v10838_v52  ;;  %v13731_v53 = vand.u32 4294901760, %v10851_v3  ;;  %v13738_v3 = vld [vmem:[#allocation35_spill] sm:$0xff]  ;;  %v13741_v48 = vld [vmem:[#allocation44_spill] sm:$0xff] }
 0x541   : > { %3764 = vmatpush.msrb.mxu2 %v11025_v56  ;;  %3725 = vmatpush.msrb.mxu1 %v10768_v55  ;;  %v3870_v55 = vand.u32 4294901760, %v3869_v59  ;;  %v13735_v47 = vand.u32 4294901760, %v13734_v31  ;;  %v13748_v5 = vand.u32 4294901760, %v10939_v35  ;;  %v469_v59 = vld [vmem:[%s8351_s22 + $0x1a8] sm:$0xff] }
 0x542   : > { %3674 = vmatpush.msrb.mxu0 %v13726_v0  ;;  %3847 = vmatpush.msrb.mxu3 %v3846_v26  ;;  %v3876_v14 = vand.u32 4294901760, %v3875_v50  ;;  %v13743_v0 = vld [vmem:[#allocation37_spill] sm:$0xff]  ;;  %v13744_v26 = vld [vmem:[#allocation52_spill] sm:$0xff] }
 0x543   : > { %3766 = vmatpush.msrb.mxu2 %v11048_v44  ;;  %3727 = vmatpush.msrb.mxu1 %v10788_v17  ;;  %v13732_v17 = vld [vmem:[#allocation42_spill] sm:$0xff]  ;;  %v13745_v7 = vand.u32 4294901760, %v13744_v26 }
 0x544   : > { %3678 = vmatpush.msrb.mxu0 %v13727_v12  ;;  %3853 = vmatpush.msrb.mxu3 %v3852_v32  ;;  %v13733_v52 = vand.u32 4294901760, %v13732_v17  ;;  %v13746_v12 = vld [vmem:[#allocation55_spill] sm:$0xff] }
 0x545   : > { %3768 = vmatpush.msrb.mxu2 %v11062_v19  ;;  %3729 = vmatpush.msrb.mxu1 %v10801_v21  ;;  %v13736_v21 = vld [vmem:[#allocation43_spill] sm:$0xff]  ;;  %v13747_v32 = vand.u32 4294901760, %v13746_v12 }
 0x546   : > { %3682 = vmatpush.msrb.mxu0 %v13728_v61  ;;  %3859 = vmatpush.msrb.mxu3 %v3858_v36 }
 0x547   : > { %3770 = vmatpush.msrb.mxu2 %v11076_v18  ;;  %3731 = vmatpush.msrb.mxu1 %v10814_v38  ;;  %v13739_v38 = vld [vmem:[#allocation53_spill] sm:$0xff] }
 0x548   : > { %3686 = vmatpush.msrb.mxu0 %v13729_v24  ;;  %3865 = vmatpush.msrb.mxu3 %v3864_v28  ;;  %v13740_v2 = vand.u32 4294901760, %v13739_v38  ;;  %v13753_v24 = vld [vmem:[#allocation34_spill] sm:$0xff] }
 0x549   : > { %3772 = vmatpush.msrb.mxu2 %v11088_v20  ;;  %3733 = vmatpush.msrb.mxu1 %v13736_v21 }
 0x54a   : > { %3690 = vmatpush.msrb.mxu0 %v13730_v16  ;;  %3871 = vmatpush.msrb.mxu3 %v3870_v55  ;;  %v461_v55 = vld [vmem:[%s8351_s22 + $0x168] sm:$0xff] }
 0x54b   : > { %3979 = vmatpush.msra.mxu2 %v13733_v52  ;;  %3437 = vmatmul.f32.vlgmr.msra.gmra.mxu0 %v13737_v51  ;;  %v11320_v52 = vand.u32 4294901760, %v469_v59  ;;  %v13766_v51 = vld [vmem:[#allocation38_spill] sm:$0xff] }
 0x54c   : > { %3694 = vmatpush.msrb.mxu0 %v13731_v53  ;;  %3877 = vmatpush.msrb.mxu3 %v3876_v14 }
 0x54d   : > { %3631 = vmatmul.f32.vlgmr.msra.gmra.mxu3 %v13738_v3  ;;  %3983 = vmatpush.msra.mxu2 %v13740_v2  ;;  %v11333_v2 = vand.u32 4294901760, %v461_v55 }
 0x54e   : > { %3698 = vmatpush.msrb.mxu0 %v13735_v47  ;;  %4046 = vmatpush.msra.mxu3 %v13741_v48  ;;  %v453_v47 = vld [vmem:[%s8351_s22 + $0x128] sm:$0xff] }
 0x54f   : > { %3735 = vmatpush.msrb.mxu1 %v13742_v34  ;;  %3987 = vmatpush.msra.mxu2 %v13745_v7  ;;  %v445_v34 = vld [vmem:[%s8351_s22 + $0xe8] sm:$0xff] }
 0x550   : > { %3885 = vmatpush.msra.mxu0 %v13732_v17  ;;  %3538 = vmatmul.f32.vlgmr.msra.gmra.mxu1 %v13743_v0 }
 0x551   : > { %3938 = vmatpush.msra.mxu1 %v13741_v48  ;;  %4048 = vmatpush.msra.mxu3 %v10859_v29 }
 0x552   : > { %3888 = vmatpush.msra.mxu0 %v13739_v38  ;;  %3991 = vmatpush.msra.mxu2 %v13747_v32  ;;  %v11346_v32 = vand.u32 4294901760, %v453_v47 }
 0x553   : > { %3940 = vmatpush.msra.mxu1 %v10859_v29  ;;  %4050 = vmatpush.msra.mxu3 %v10871_v15  ;;  %v13749_v29 = vand.u32 4294901760, %v10949_v45 }
 0x554   : > { %3891 = vmatpush.msra.mxu0 %v13744_v26  ;;  %3995 = vmatpush.msra.mxu2 %v13748_v5 }
 0x555   : > { %3942 = vmatpush.msra.mxu1 %v10871_v15  ;;  %4052 = vmatpush.msra.mxu3 %v10873_v63  ;;  %v13750_v15 = vand.u32 4294901760, %v10975_v1 }
 0x556   : > { %3894 = vmatpush.msra.mxu0 %v13746_v12  ;;  %3999 = vmatpush.msra.mxu2 %v13749_v29  ;;  %v11344_v12 = vsub.f32 %v469_v59, %v11320_v52  ;;  %v437_v29 = vld [vmem:[%s8351_s22 + $0xa8] sm:$0xff] }
 0x557   : > { %3944 = vmatpush.msra.mxu1 %v10873_v63  ;;  %4054 = vmatpush.msra.mxu3 %v10912_v37  ;;  %v541_v63 = vld [vmem:[%s8351_s22 + $0x3e8] sm:$0xff] }
 0x558   : > { %3897 = vmatpush.msra.mxu0 %v10939_v35  ;;  %4003 = vmatpush.msra.mxu2 %v13750_v15  ;;  %v13751_v35 = vand.u32 4294901760, %v10986_v4 }
 0x559   : > { %3946 = vmatpush.msra.mxu1 %v10912_v37  ;;  %4056 = vmatpush.msra.mxu3 %v10920_v11  ;;  %v533_v37 = vld [vmem:[%s8351_s22 + $0x3a8] sm:$0xff] }
 0x55a   : > { %3900 = vmatpush.msra.mxu0 %v10949_v45  ;;  %4007 = vmatpush.msra.mxu2 %v13751_v35  ;;  %v517_v45 = vld [vmem:[%s8351_s22 + $0x328] sm:$0xff] }
 0x55b   : > { %3948 = vmatpush.msra.mxu1 %v10920_v11  ;;  %4058 = vmatpush.msra.mxu3 %v10941_v9  ;;  %v11217_v11 = vand.u32 4294901760, %v533_v37 }
 0x55c   : > { %3903 = vmatpush.msra.mxu0 %v10975_v1  ;;  %4011 = vmatpush.msra.mxu2 %v3832_v62  ;;  %v11209_v1 = vand.u32 4294901760, %v541_v63 }
 0x55d   : > { %3950 = vmatpush.msra.mxu1 %v10941_v9  ;;  %4060 = vmatpush.msra.mxu3 %v10954_v23  ;;  %v525_v9 = vld [vmem:[%s8351_s22 + $0x368] sm:$0xff] }
 0x55e   : > { %3906 = vmatpush.msra.mxu0 %v10986_v4  ;;  %4015 = vmatpush.msra.mxu2 %v3838_v60  ;;  %v509_v4 = vld [vmem:[%s8351_s22 + $0x2e8] sm:$0xff] }
 0x55f   : > { %3952 = vmatpush.msra.mxu1 %v10954_v23  ;;  %4062 = vmatpush.msra.mxu3 %v10980_v25  ;;  %v11226_v23 = vsub.f32 %v541_v63, %v11209_v1  ;;  %v11357_v63 = vsub.f32 %v461_v55, %v11333_v2  ;;  %v669_v55 = vld [vmem:[%s8351_s22 + $0x7e8] sm:$0xff] }
 0x560   : > { %3909 = vmatpush.msra.mxu0 %v11008_v57  ;;  %4019 = vmatpush.msra.mxu2 %v3844_v39  ;;  %v11239_v57 = vand.u32 4294901760, %v517_v45 }
 0x561   : > { %3954 = vmatpush.msra.mxu1 %v10980_v25  ;;  %4064 = vmatpush.msra.mxu3 %v10988_v13  ;;  %v11228_v25 = vand.u32 4294901760, %v525_v9 }
 0x562   : > { %3912 = vmatpush.msra.mxu0 %v11017_v10  ;;  %4023 = vmatpush.msra.mxu2 %v3850_v8  ;;  %v501_v10 = vld [vmem:[%s8351_s22 + $0x2a8] sm:$0xff]  ;;  %v11263_v39 = vsub.f32 %v517_v45, %v11239_v57 }
 0x563   : > { %3956 = vmatpush.msra.mxu1 %v10988_v13  ;;  %4066 = vmatpush.msra.mxu3 %v11010_v58  ;;  %v11237_v13 = vsub.f32 %v533_v37, %v11217_v11  ;;  %v11249_v62 = vsub.f32 %v525_v9, %v11228_v25  ;;  %v11255_v60 = vand.u32 4294901760, %v501_v10  ;;  %v11359_v37 = vand.u32 4294901760, %v445_v34 }
 0x564   : > { %3915 = vmatpush.msra.mxu0 %v11046_v30  ;;  %4027 = vmatpush.msra.mxu2 %v3856_v33  ;;  %v11251_v30 = vand.u32 4294901760, %v509_v4 }
 0x565   : > { %3958 = vmatpush.msra.mxu1 %v11010_v58  ;;  %4068 = vmatpush.msra.mxu3 %v11025_v56  ;;  %v13373_v58 = vand.u32 4294901760, %v11226_v23  ;;  %v13371_v8 = vand.u32 4294901760, %v11249_v62  ;;  %v11382_v59 = vsub.f32 %v445_v34, %v11359_v37 }
 0x566   : > { %3918 = vmatpush.msra.mxu0 %v11060_v42  ;;  %4031 = vmatpush.msra.mxu2 %v3862_v40  ;;  %v493_v42 = vld [vmem:[%s8351_s22 + $0x268] sm:$0xff] }
 0x567   : > { %3960 = vmatpush.msra.mxu1 %v11025_v56  ;;  %4070 = vmatpush.msra.mxu3 %v11048_v44  ;;  %v13372_v56 = vand.u32 4294901760, %v11237_v13  ;;  %v11278_v33 = vand.u32 4294901760, %v493_v42  ;;  %v477_v40 = vld [vmem:[%s8351_s22 + $0x1e8] sm:$0xff]  ;;  %v4138_v28 = vsub.f32 %v11249_v62, %v13371_v8  ;;  %v13364_v34 = vand.u32 4294901760, %v11382_v59 }
 0x568   : > { %3921 = vmatpush.msra.mxu0 %v11074_v22  ;;  %4035 = vmatpush.msra.mxu2 %v3868_v49  ;;  %v485_v22 = vld [vmem:[%s8351_s22 + $0x228] sm:$0xff]  ;;  %v11296_v36 = vand.u32 4294901760, %v477_v40 }
 0x569   : > { %3962 = vmatpush.msra.mxu1 %v11048_v44  ;;  %4072 = vmatpush.msra.mxu3 %v11062_v19  ;;  %v4126_v44 = vsub.f32 %v11226_v23, %v13373_v58  ;;  %v4132_v49 = vsub.f32 %v11237_v13, %v13372_v56  ;;  %v11292_v61 = vand.u32 4294901760, %v485_v22  ;;  %v11306_v16 = vsub.f32 %v493_v42, %v11278_v33  ;;  %v11473_v56 = vpop.f32.mrf.mxu2 }
 0x56a   : > { %3924 = vmatpush.msra.mxu0 %v11086_v6  ;;  %4039 = vmatpush.msra.mxu2 %v3874_v46  ;;  %v11276_v6 = vsub.f32 %v509_v4, %v11251_v30  ;;  %v13370_v46 = vand.u32 4294901760, %v11263_v39  ;;  %v11325_v31 = vsub.f32 %v477_v40, %v11296_v36  ;;  %v13362_v4 = vand.u32 4294901760, %v11344_v12  ;;  %13760 = vst [vmem:[#allocation52_spill] sm:$0xff] %v11473_v56 }
 0x56b   : > { %3964 = vmatpush.msra.mxu1 %v11062_v19  ;;  %4074 = vmatpush.msra.mxu3 %v11076_v18  ;;  %v11284_v19 = vsub.f32 %v501_v10, %v11255_v60  ;;  %v4133_v53 = vand.u32 4294901760, %v4132_v49  ;;  %v11318_v17 = vsub.f32 %v485_v22, %v11292_v61  ;;  %v13366_v38 = vand.u32 4294901760, %v11306_v16  ;;  %v429_v22 = vld [vmem:[%s8351_s22 + $0x68] sm:$0xff] }
 0x56c   : > { %3927 = vmatpush.msra.mxu0 %v11101_v43  ;;  %v13752_v43 = vld [vmem:[#allocation40_spill] sm:$0xff]  ;;  %3879 = vmatmul.f32.vlgmr.msrb.gmra.mxu3 %v13753_v24  ;;  %v13369_v50 = vand.u32 4294901760, %v11276_v6  ;;  %v4144_v14 = vsub.f32 %v11263_v39, %v13370_v46  ;;  %v13363_v5 = vand.u32 4294901760, %v11325_v31  ;;  %v11369_v10 = vsub.f32 %v453_v47, %v11346_v32  ;;  %v11461_v46 = vpop.f32.mrf.mxu1 }
 0x56d   : > { %3778 = vmatmul.f32.vlgmr.msrb.gmra.mxu2 %v13752_v43  ;;  %3966 = vmatpush.msra.mxu1 %v11076_v18  ;;  %v13367_v18 = vand.u32 4294901760, %v11284_v19  ;;  %v13365_v7 = vand.u32 4294901760, %v11318_v17  ;;  %v4162_v35 = vsub.f32 %v11306_v16, %v13366_v38  ;;  %v11371_v42 = vand.u32 4294901760, %v437_v29  ;;  %13758 = vst [vmem:[#allocation44_spill] sm:$0xff] %v11461_v46 }
 0x56e   : > { %4226 = vmatpush.msrb.mxu2 %v11226_v23  ;;  %3930 = vmatpush.msra.mxu0 %v11112_v27  ;;  %v4127_v27 = vand.u32 4294901760, %v4126_v44  ;;  %v4150_v21 = vsub.f32 %v11276_v6, %v13369_v50  ;;  %v4145_v26 = vand.u32 4294901760, %v4144_v14  ;;  %v4174_v44 = vsub.f32 %v11325_v31, %v13363_v5  ;;  %v11459_v50 = vpop.f32.mrf.mxu0 }
 0x56f   : > { %4076 = vmatpush.msra.mxu3 %v11088_v20  ;;  %3700 = vmatmul.f32.vlgmr.msrb.gmra.mxu0 %v13743_v0  ;;  %v4156_v48 = vsub.f32 %v11284_v19, %v13367_v18  ;;  %v4168_v45 = vsub.f32 %v11318_v17, %v13365_v7  ;;  %v4163_v40 = vand.u32 4294901760, %v4162_v35  ;;  %v13360_v49 = vand.u32 4294901760, %v11357_v63  ;;  %13757 = vst [vmem:[#allocation53_spill] sm:$0xff] %v11459_v50  ;;  %v605_v50 = vld [vmem:[%s8351_s22 + $0x5e8] sm:$0xff] }
 0x570   : > { %4083 = vmatpush.msrb.mxu0 %v11209_v1  ;;  %4229 = vmatpush.msrb.mxu2 %v11237_v13  ;;  %v4151_v15 = vand.u32 4294901760, %v4150_v21  ;;  %v4180_v14 = vsub.f32 %v11344_v12, %v13362_v4  ;;  %v13361_v47 = vand.u32 4294901760, %v11369_v10  ;;  %v4175_v21 = vand.u32 4294901760, %v4174_v44  ;;  %v645_v4 = vld [vmem:[%s8351_s22 + $0x728] sm:$0xff] }
 0x571   : > { %4279 = vmatpush.msrb.mxu3 %v11209_v1  ;;  %3968 = vmatpush.msra.mxu1 %v11088_v20  ;;  %v4139_v20 = vand.u32 4294901760, %v4138_v28  ;;  %v4157_v9 = vand.u32 4294901760, %v4156_v48  ;;  %v421_v28 = vld [vmem:[%s8351_s22 + $0x28] sm:$0xff]  ;;  %v4186_v48 = vsub.f32 %v11357_v63, %v13360_v49  ;;  %v11451_v7 = vand.u32 4294901760, %v645_v4 }
 0x572   : > { %3737 = vmatmul.f32.vlgmr.msrb.gmra.mxu1 %v13743_v0  ;;  %4085 = vmatpush.msrb.mxu0 %v11217_v11 }
 0x573   : > { %4128 = vmatpush.msrb.mxu1 %v4127_v27  ;;  %4232 = vmatpush.msrb.mxu2 %v11249_v62  ;;  %v11386_v27 = vand.u32 4294901760, %v429_v22  ;;  %v11479_v38 = vsub.f32 %v645_v4, %v11451_v7 }
 0x574   : > { %4281 = vmatpush.msrb.mxu3 %v11217_v11  ;;  %4087 = vmatpush.msrb.mxu0 %v11228_v25 }
 0x575   : > { %4134 = vmatpush.msrb.mxu1 %v4133_v53  ;;  %4235 = vmatpush.msrb.mxu2 %v11263_v39  ;;  %v4169_v53 = vand.u32 4294901760, %v4168_v45  ;;  %v11413_v35 = vsub.f32 %v429_v22, %v11386_v27  ;;  %v4192_v45 = vsub.f32 %v11369_v10, %v13361_v47  ;;  %v4187_v22 = vand.u32 4294901760, %v4186_v48  ;;  %v637_v48 = vld [vmem:[%s8351_s22 + $0x6e8] sm:$0xff]  ;;  %13761 = vst [vmem:[#allocation55_spill] sm:$0xff] %v11479_v38 }
 0x576   : > { %4283 = vmatpush.msrb.mxu3 %v11228_v25  ;;  %4089 = vmatpush.msrb.mxu0 %v11239_v57  ;;  %v11456_v18 = vand.u32 4294901760, %v637_v48  ;;  %v13768_v0 = vand.u32 4294901760, %v11479_v38 }
 0x577   : > { %4140 = vmatpush.msrb.mxu1 %v4139_v20  ;;  %4238 = vmatpush.msrb.mxu2 %v11276_v6  ;;  %v11396_v20 = vsub.f32 %v437_v29, %v11371_v42  ;;  %v661_v29 = vld [vmem:[%s8351_s22 + $0x7a8] sm:$0xff] }
 0x578   : > { %4285 = vmatpush.msrb.mxu3 %v11239_v57  ;;  %4091 = vmatpush.msrb.mxu0 %v11251_v30  ;;  %v11423_v49 = vand.u32 4294901760, %v661_v29  ;;  %v11492_v58 = vsub.f32 %v637_v48, %v11456_v18 }
 0x579   : > { %4146 = vmatpush.msrb.mxu1 %v4145_v26  ;;  %4241 = vmatpush.msrb.mxu2 %v11284_v19  ;;  %v11405_v26 = vand.u32 4294901760, %v421_v28  ;;  %v13368_v44 = vand.u32 4294901760, %v11396_v20 }
 0x57a   : > { %4287 = vmatpush.msrb.mxu3 %v11251_v30  ;;  %4093 = vmatpush.msrb.mxu0 %v11255_v60 }
 0x57b   : > { %4152 = vmatpush.msrb.mxu1 %v4151_v15  ;;  %4244 = vmatpush.msrb.mxu2 %v11306_v16  ;;  %13754 = vst [vmem:[#allocation42_spill] sm:$0xff] %v11405_v26  ;;  %v11407_v15 = vand.u32 4294901760, %v669_v55 }
 0x57c   : > { %4289 = vmatpush.msrb.mxu3 %v11255_v60  ;;  %4095 = vmatpush.msrb.mxu0 %v11278_v33 }
 0x57d   : > { %4158 = vmatpush.msrb.mxu1 %v4157_v9  ;;  %4247 = vmatpush.msrb.mxu2 %v11318_v17  ;;  %13755 = vst [vmem:[#allocation45_spill] sm:$0xff] %v11407_v15  ;;  %v4181_v9 = vand.u32 4294901760, %v4180_v14  ;;  %v11430_v14 = vsub.f32 %v421_v28, %v11405_v26  ;;  %v11433_v47 = vsub.f32 %v669_v55, %v11407_v15 }
 0x57e   : > { %4291 = vmatpush.msrb.mxu3 %v11278_v33  ;;  %4097 = vmatpush.msrb.mxu0 %v11292_v61  ;;  %v4204_v28 = vsub.f32 %v11396_v20, %v13368_v44  ;;  %v11449_v55 = vsub.f32 %v661_v29, %v11423_v49  ;;  %v629_v44 = vld [vmem:[%s8351_s22 + $0x6a8] sm:$0xff] }
 0x57f   : > { %4164 = vmatpush.msrb.mxu1 %v4163_v40  ;;  %4250 = vmatpush.msrb.mxu2 %v11325_v31  ;;  %v653_v40 = vld [vmem:[%s8351_s22 + $0x768] sm:$0xff] }
 0x580   : > { %4293 = vmatpush.msrb.mxu3 %v11292_v61  ;;  %4099 = vmatpush.msrb.mxu0 %v11296_v36  ;;  %v11439_v5 = vand.u32 4294901760, %v653_v40  ;;  %13756 = vst [vmem:[#allocation43_spill] sm:$0xff] %v11449_v55  ;;  %v4205_v8 = vand.u32 4294901760, %v4204_v28  ;;  %v13762_v28 = vand.u32 4294901760, %v11430_v14  ;;  %v13763_v48 = vand.u32 4294901760, %v11449_v55 }
 0x581   : > { %4170 = vmatpush.msrb.mxu1 %v4169_v53  ;;  %4253 = vmatpush.msrb.mxu2 %v11344_v12  ;;  %v4198_v53 = vsub.f32 %v11382_v59, %v13364_v34  ;;  %v4193_v34 = vand.u32 4294901760, %v4192_v45  ;;  %v13375_v45 = vand.u32 4294901760, %v11433_v47 }
 0x582   : > { %4295 = vmatpush.msrb.mxu3 %v11296_v36  ;;  %4101 = vmatpush.msrb.mxu0 %v11320_v52  ;;  %v4216_v56 = vsub.f32 %v11430_v14, %v13762_v28  ;;  %v4473_v28 = vsub.f32 %v11449_v55, %v13763_v48  ;;  %v597_v48 = vld [vmem:[%s8351_s22 + $0x5a8] sm:$0xff]  ;;  %v2175_v55 = vpop.f32.mrf.mxu1 }
 0x583   : > { %4176 = vmatpush.msrb.mxu1 %v4175_v21  ;;  %4256 = vmatpush.msrb.mxu2 %v11357_v63  ;;  %v13374_v21 = vand.u32 4294901760, %v11413_v35 }
 0x584   : > { %4297 = vmatpush.msrb.mxu3 %v11320_v52  ;;  %4103 = vmatpush.msrb.mxu0 %v11333_v2  ;;  %v4217_v43 = vand.u32 4294901760, %v4216_v56 }
 0x585   : > { %4182 = vmatpush.msrb.mxu1 %v4181_v9  ;;  %4259 = vmatpush.msrb.mxu2 %v11369_v10  ;;  %v4199_v9 = vand.u32 4294901760, %v4198_v53  ;;  %v4210_v29 = vsub.f32 %v11413_v35, %v13374_v21  ;;  %v621_v53 = vld [vmem:[%s8351_s22 + $0x668] sm:$0xff]  ;;  %v11481_v21 = vand.u32 4294901760, %v629_v44 }
 0x586   : > { %4299 = vmatpush.msrb.mxu3 %v11333_v2  ;;  %4105 = vmatpush.msrb.mxu0 %v11346_v32  ;;  %v11494_v4 = vand.u32 4294901760, %v621_v53 }
 0x587   : > { %4188 = vmatpush.msrb.mxu1 %v4187_v22  ;;  %4262 = vmatpush.msrb.mxu2 %v11382_v59  ;;  %v11469_v22 = vsub.f32 %v653_v40, %v11439_v5  ;;  %v613_v40 = vld [vmem:[%s8351_s22 + $0x628] sm:$0xff] }
 0x588   : > { %4301 = vmatpush.msrb.mxu3 %v11346_v32  ;;  %4107 = vmatpush.msrb.mxu0 %v11359_v37  ;;  %v11518_v3 = vsub.f32 %v621_v53, %v11494_v4  ;;  %v589_v53 = vld [vmem:[%s8351_s22 + $0x568] sm:$0xff] }
 0x589   : > { %13759 = vst [vmem:[#allocation41_spill] sm:$0xff] %v11469_v22  ;;  %4194 = vmatpush.msrb.mxu1 %v4193_v34  ;;  %4265 = vmatpush.msrb.mxu2 %v11396_v20  ;;  %v4467_v34 = vsub.f32 %v11433_v47, %v13375_v45  ;;  %v11500_v45 = vand.u32 4294901760, %v613_v40 }
 0x58a   : > { %4303 = vmatpush.msrb.mxu3 %v11359_v37  ;;  %4109 = vmatpush.msrb.mxu0 %v11371_v42 }
 0x58b   : > { %4200 = vmatpush.msrb.mxu1 %v4199_v9  ;;  %4268 = vmatpush.msrb.mxu2 %v11413_v35  ;;  %v4211_v9 = vand.u32 4294901760, %v4210_v29  ;;  %v11510_v29 = vsub.f32 %v629_v44, %v11481_v21  ;;  %v4468_v46 = vand.u32 4294901760, %v4467_v34  ;;  %v13765_v44 = vand.u32 4294901760, %v11469_v22 }
 0x58c   : > { %4305 = vmatpush.msrb.mxu3 %v11371_v42  ;;  %4111 = vmatpush.msrb.mxu0 %v11386_v27  ;;  %v11530_v56 = vsub.f32 %v613_v40, %v11500_v45  ;;  %v581_v40 = vld [vmem:[%s8351_s22 + $0x528] sm:$0xff] }
 0x58d   : > { %4206 = vmatpush.msrb.mxu1 %v4205_v8  ;;  %4271 = vmatpush.msrb.mxu2 %v11430_v14  ;;  %v11512_v8 = vpop.f32.mrf.mxu3  ;;  %v4479_v54 = vsub.f32 %v11469_v22, %v13765_v44  ;;  %v4474_v44 = vand.u32 4294901760, %v4473_v28  ;;  %v4485_v22 = vsub.f32 %v11479_v38, %v13768_v0  ;;  %v13771_v0 = vand.u32 4294901760, %v11237_v13 }
 0x58e   : > { %4307 = vmatpush.msrb.mxu3 %v11386_v27  ;;  %4041 = vmatmul.f32.vlgmr.msra.gmra.mxu2 %v13753_v24  ;;  %13764 = vst [vmem:[#allocation60_spill] sm:$0xff] %v11512_v8  ;;  %v11525_v8 = vand.u32 4294901760, %v605_v50 }
 0x58f   : > { %4424 = vmatpush.msra.mxu2 %v11407_v15  ;;  %4113 = vmatpush.msrb.mxu0 %v11405_v26  ;;  %v2074_v15 = vpop.f32.mrf.mxu0  ;;  %v4486_v13 = vand.u32 4294901760, %v4485_v22  ;;  %v565_v22 = vld [vmem:[%s8351_s22 + $0x4a8] sm:$0xff] }
 0x590   : > { %4212 = vmatpush.msrb.mxu1 %v4211_v9  ;;  %4309 = vmatpush.msrb.mxu3 %v11405_v26  ;;  %v2176_v34 = vadd.f32 %v2175_v55, %v2074_v15  ;;  %v13767_v9 = vand.u32 4294901760, %v11226_v23  ;;  %v11540_v26 = vand.u32 4294901760, %v597_v48  ;;  %v13769_v15 = vand.u32 4294901760, %v11492_v58 }
 0x591   : > { %3933 = vmatmul.f32.vlgmr.msra.gmra.mxu0 %v13766_v51  ;;  %4078 = vmatmul.f32.vlgmr.msra.gmra.mxu3 %v13753_v24  ;;  %v2229_v24 = vpop.f32.mrf.mxu2  ;;  %v13387_v55 = vand.u32 4294901760, %v11518_v3  ;;  %v4480_v51 = vand.u32 4294901760, %v4479_v54  ;;  %v11551_v38 = vsub.f32 %v605_v50, %v11525_v8  ;;  %v13773_v54 = vand.u32 4294901760, %v11510_v29 }
 0x592   : > { %4320 = vmatpush.msra.mxu0 %v13767_v9  ;;  %4426 = vmatpush.msra.mxu2 %v11423_v49  ;;  %v4491_v23 = vsub.f32 %v11492_v58, %v13769_v15  ;;  %v2230_v28 = vadd.f32 %v2229_v24, %v2176_v34  ;;  %v13770_v9 = vld [vmem:[#allocation39_spill] sm:$0xff]  ;;  %v13772_v24 = vand.u32 4294901760, %v11249_v62  ;;  %v11565_v34 = vsub.f32 %v597_v48, %v11540_v26 }
 0x593   : > { %4469 = vmatpush.msra.mxu3 %v4468_v46  ;;  %4218 = vmatpush.msrb.mxu1 %v4217_v43  ;;  %v11553_v46 = vand.u32 4294901760, %v589_v53  ;;  %v573_v15 = vld [vmem:[%s8351_s22 + $0x4e8] sm:$0xff]  ;;  %v4497_v50 = vsub.f32 %v11510_v29, %v13773_v54  ;;  %v4503_v62 = vsub.f32 %v11518_v3, %v13387_v55 }
 0x594   : > { %3972 = vmatmul.f32.vlgmr.msra.gmra.mxu1 %v13770_v9  ;;  %4324 = vmatpush.msra.mxu0 %v13771_v0  ;;  %v11567_v0 = vand.u32 4294901760, %v581_v40  ;;  %v11581_v43 = vand.u32 4294901760, %v573_v15  ;;  %v557_v55 = vld [vmem:[%s8351_s22 + $0x468] sm:$0xff] }
 0x595   : > { %4387 = vmatpush.msra.mxu1 %v11209_v1  ;;  %4428 = vmatpush.msra.mxu2 %v11439_v5  ;;  %v4492_v1 = vand.u32 4294901760, %v4491_v23  ;;  %v11579_v54 = vsub.f32 %v589_v53, %v11553_v46  ;;  %v13775_v23 = vand.u32 4294901760, %v11530_v56  ;;  %v11609_v53 = vand.u32 4294901760, %v557_v55 }
 0x596   : > { %4475 = vmatpush.msra.mxu3 %v4474_v44  ;;  %4328 = vmatpush.msra.mxu0 %v13772_v24  ;;  %v2268_v44 = vpop.f32.mrf.mxu3  ;;  %v13774_v24 = vand.u32 4294901760, %v11263_v39  ;;  %v13776_v39 = vand.u32 4294901760, %v11276_v6  ;;  %v11593_v48 = vsub.f32 %v581_v40, %v11567_v0  ;;  %v13777_v6 = vand.u32 4294901760, %v11284_v19 }
 0x597   : > { %4389 = vmatpush.msra.mxu1 %v11217_v11  ;;  %4430 = vmatpush.msra.mxu2 %v11451_v7  ;;  %v2269_v11 = vadd.f32 %v2268_v44, %v2230_v28  ;;  %v11595_v28 = vand.u32 4294901760, %v565_v22  ;;  %v4504_v44 = vand.u32 4294901760, %v4503_v62  ;;  %v4526_v40 = vand.u32 4294901760, %v11579_v54 }
 0x598   : > { %4481 = vmatpush.msra.mxu3 %v4480_v51  ;;  %4332 = vmatpush.msra.mxu0 %v13774_v24  ;;  %v4509_v51 = vsub.f32 %v11530_v56, %v13775_v23  ;;  %v4498_v24 = vand.u32 4294901760, %v4497_v50  ;;  %v549_v23 = vld [vmem:[%s8351_s22 + $0x428] sm:$0xff]  ;;  %v13779_v19 = vand.u32 4294901760, %v11306_v16  ;;  %v13781_v16 = vand.u32 4294901760, %v11318_v17 }
 0x599   : > { %4391 = vmatpush.msra.mxu1 %v11228_v25  ;;  %4432 = vmatpush.msra.mxu2 %v11456_v18  ;;  %v2337_v25 = vpop.f32.mrf.mxu0  ;;  %v13783_v17 = vand.u32 4294901760, %v11325_v31 }
 0x59a   : > { %4487 = vmatpush.msra.mxu3 %v4486_v13  ;;  %4336 = vmatpush.msra.mxu0 %v13776_v39  ;;  %v2338_v9 = vadd.f32 %v2337_v25, %v2269_v11  ;;  %v13778_v13 = vand.u32 4294901760, %v11551_v38  ;;  %v11607_v39 = vsub.f32 %v573_v15, %v11581_v43  ;;  %v13780_v11 = vand.u32 4294901760, %v11565_v34 }
 0x59b   : > { %4393 = vmatpush.msra.mxu1 %v11239_v57  ;;  %4434 = vmatpush.msra.mxu2 %v11481_v21  ;;  %v2374_v57 = vpop.f32.mrf.mxu1  ;;  %v4532_v15 = vand.u32 4294901760, %v11593_v48 }
 0x59c   : > { %4493 = vmatpush.msra.mxu3 %v4492_v1  ;;  %4340 = vmatpush.msra.mxu0 %v13777_v6  ;;  %v4515_v50 = vsub.f32 %v11551_v38, %v13778_v13  ;;  %v4510_v1 = vand.u32 4294901760, %v4509_v51  ;;  %v2375_v62 = vadd.f32 %v2374_v57, %v2338_v9  ;;  %v4521_v25 = vsub.f32 %v11565_v34, %v13780_v11 }
 0x59d   : > { %4395 = vmatpush.msra.mxu1 %v11251_v30  ;;  %4436 = vmatpush.msra.mxu2 %v11494_v4  ;;  %v11620_v6 = vsub.f32 %v565_v22, %v11595_v28  ;;  %v11622_v13 = vand.u32 4294901760, %v549_v23  ;;  %v2415_v30 = vpop.f32.mrf.mxu2  ;;  %v4538_v22 = vand.u32 4294901760, %v11607_v39  ;;  %v11633_v57 = vsub.f32 %v557_v55, %v11609_v53 }
 0x59e   : > { %4499 = vmatpush.msra.mxu3 %v4498_v24  ;;  %4344 = vmatpush.msra.mxu0 %v13779_v19  ;;  %v2416_v9 = vadd.f32 %v2415_v30, %v2375_v62  ;;  %v4516_v51 = vand.u32 4294901760, %v4515_v50  ;;  %v4527_v24 = vsub.f32 %v11579_v54, %v4526_v40  ;;  %v2516_v19 = vpop.f32.mrf.mxu3  ;;  %v4533_v50 = vsub.f32 %v11593_v48, %v4532_v15 }
 0x59f   : > { %4397 = vmatpush.msra.mxu1 %v11255_v60  ;;  %4438 = vmatpush.msra.mxu2 %v11500_v45  ;;  %v4544_v62 = vand.u32 4294901760, %v11620_v6  ;;  %v11646_v55 = vsub.f32 %v549_v23, %v11622_v13  ;;  %v4550_v11 = vand.u32 4294901760, %v11633_v57 }
 0x5a0   : > { %4505 = vmatpush.msra.mxu3 %v4504_v44  ;;  %4348 = vmatpush.msra.mxu0 %v13781_v16  ;;  %v11637_v60 = vadd.f32 %v2516_v19, %v2416_v9  ;;  %v4522_v44 = vand.u32 4294901760, %v4521_v25  ;;  %v4528_v31 = vand.u32 4294901760, %v4527_v24  ;;  %v4534_v23 = vand.u32 4294901760, %v4533_v50 }
 0x5a1   : > { %4399 = vmatpush.msra.mxu1 %v11278_v33  ;;  %4440 = vmatpush.msra.mxu2 %v11525_v8  ;;  %v13784_v33 = vand.u32 4294901760, %v11344_v12  ;;  %v4545_v12 = vsub.f32 %v11620_v6, %v4544_v62  ;;  %v4556_v25 = vand.u32 4294901760, %v11646_v55  ;;  %v13787_v9 = vand.u32 4294901760, %v11382_v59  ;;  %v13790_v59 = vld [vmem:[#allocation48_spill] sm:$0xff] }
 0x5a2   : > { %13782 = vst [vmem:[#allocation61_spill] sm:$0xff] %v11637_v60  ;;  %4511 = vmatpush.msra.mxu3 %v4510_v1  ;;  %4352 = vmatpush.msra.mxu0 %v13783_v17  ;;  %v4539_v1 = vsub.f32 %v11607_v39, %v4538_v22 }
 0x5a3   : > { %4401 = vmatpush.msra.mxu1 %v11292_v61  ;;  %4442 = vmatpush.msra.mxu2 %v11540_v26  ;;  %v13785_v61 = vand.u32 4294901760, %v11357_v63  ;;  %v4551_v63 = vsub.f32 %v11633_v57, %v4550_v11  ;;  %v4557_v16 = vsub.f32 %v11646_v55, %v4556_v25 }
 0x5a4   : > { %4517 = vmatpush.msra.mxu3 %v4516_v51  ;;  %4356 = vmatpush.msra.mxu0 %v13784_v33  ;;  %v4540_v30 = vand.u32 4294901760, %v4539_v1  ;;  %v13788_v51 = vld [vmem:[#allocation23_spill] sm:$0xff] }
 0x5a5   : > { %4403 = vmatpush.msra.mxu1 %v11296_v36  ;;  %4444 = vmatpush.msra.mxu2 %v11553_v46  ;;  %v13786_v36 = vand.u32 4294901760, %v11369_v10  ;;  %v4552_v19 = vand.u32 4294901760, %v4551_v63 }
 0x5a6   : > { %4523 = vmatpush.msra.mxu3 %v4522_v44  ;;  %4360 = vmatpush.msra.mxu0 %v13785_v61  ;;  %v13791_v44 = vand.u32 4294901760, %v11413_v35  ;;  %v13793_v61 = vand.u32 4294901760, %v11430_v14 }
 0x5a7   : > { %4405 = vmatpush.msra.mxu1 %v11320_v52  ;;  %4446 = vmatpush.msra.mxu2 %v11567_v0  ;;  %v4546_v52 = vand.u32 4294901760, %v4545_v12 }
 0x5a8   : > { %4529 = vmatpush.msra.mxu3 %v4528_v31  ;;  %4364 = vmatpush.msra.mxu0 %v13786_v36 }
 0x5a9   : > { %4407 = vmatpush.msra.mxu1 %v11333_v2  ;;  %4448 = vmatpush.msra.mxu2 %v11581_v43  ;;  %v13789_v2 = vand.u32 4294901760, %v11396_v20 }
 0x5aa   : > { %4535 = vmatpush.msra.mxu3 %v4534_v23  ;;  %4368 = vmatpush.msra.mxu0 %v13787_v9 }
 0x5ab   : > { %v6948_v10 = vpop.permute.xlu1 %6947  ;;  %4409 = vmatpush.msra.mxu1 %v11346_v32  ;;  %4450 = vmatpush.msra.mxu2 %v11595_v28  ;;  %v4558_v32 = vand.u32 4294901760, %v4557_v16  ;;  %v13794_v16 = vld [vmem:[#allocation36_spill] sm:$0xff] }
 0x5ac   : > { %v6952_v24 = vperm.slane %v6948_v10, %v13788_v51  ;;  %4541 = vmatpush.msra.mxu3 %v4540_v30  ;;  %4372 = vmatpush.msra.mxu0 %v13789_v2  ;;  %v13795_v10 = vld [vmem:[#allocation35_spill] sm:$0xff]  ;;  %v614_v51 = vld [vmem:[%s8351_s22 + $0x630] sm:$0xff] }
 0x5ad   : > { %4411 = vmatpush.msra.mxu1 %v11359_v37  ;;  %4452 = vmatpush.msra.mxu2 %v11609_v53 }
 0x5ae   : > { %v11686_v17 = vmul.f32 %v13790_v59, %v6952_v24  ;;  %4547 = vmatpush.msra.mxu3 %v4546_v52  ;;  %4376 = vmatpush.msra.mxu0 %v13791_v44  ;;  %v13796_v24 = vld [vmem:[#allocation24_spill] sm:$0xff] }
 0x5af   : > { %4413 = vmatpush.msra.mxu1 %v11371_v42  ;;  %4454 = vmatpush.msra.mxu2 %v11622_v13  ;;  %v13792_v42 = vand.u32 4294901760, %v11433_v47 }
 0x5b0   : > { %v6956_v20 = vperm.slane %v11686_v17, 0  ;;  %v6957_v50 = vperm.slane %v11686_v17, 4  ;;  %v6964_v37 = vperm.slane %v11686_v17, 1  ;;  %v6965_v33 = vperm.slane %v11686_v17, 5  ;;  %4553 = vmatpush.msra.mxu3 %v4552_v19  ;;  %4274 = vmatmul.f32.vlgmr.msrb.gmra.mxu2 %v8914_v41  ;;  %v13797_v19 = vld [vmem:[#allocation26_spill] sm:$0xff] }
 0x5b1   : > { %v6974_v31 = vperm.slane %v11686_v17, 2  ;;  %v6975_v35 = vperm.slane %v11686_v17, 6  ;;  %v6985_v1 = vperm.slane %v11686_v17, 7  ;;  %4661 = vmatpush.msrb.mxu2 %v13792_v42  ;;  %4380 = vmatpush.msra.mxu0 %v13793_v61  ;;  %v6984_v52 = vperm.slane %v11686_v17, 3  ;;  %v13802_v42 = vld [vmem:[#allocation25_spill] sm:$0xff] }
 0x5b2   : > { %v6960_v23 = vperm.slane %v6956_v20, 0  ;;  %v6961_v12 = vperm.slane %v6957_v50, 0  ;;  %v6968_v36 = vperm.slane %v6964_v37, 1  ;;  %v6969_v30 = vperm.slane %v6965_v33, 1  ;;  %4415 = vmatpush.msra.mxu1 %v11386_v27  ;;  %4559 = vmatpush.msra.mxu3 %v4558_v32  ;;  %v13798_v20 = vld [vmem:[#allocation43_spill] sm:$0xff]  ;;  %v13800_v37 = vld [vmem:[#allocation45_spill] sm:$0xff] }
 0x5b3   : > { %v6978_v63 = vperm.slane %v6974_v31, 2  ;;  %v6979_v9 = vperm.slane %v6975_v35, 2  ;;  %4119 = vmatmul.f32.vlgmr.msrb.gmra.mxu0 %v13794_v16  ;;  %4313 = vmatmul.f32.vlgmr.msrb.gmra.mxu3 %v13795_v10  ;;  %v13799_v50 = vand.u32 4294901760, %v13798_v20  ;;  %v6989_v32 = vperm.slane %v6985_v1, 3  ;;  %v13801_v31 = vld [vmem:[#allocation42_spill] sm:$0xff]  ;;  %v590_v10 = vld [vmem:[%s8351_s22 + $0x570] sm:$0xff] }
 0x5b4   : > { %v6962_v2 = vmul.f32 %v6960_v23, %v13796_v24  ;;  %v6963_v14 = vmul.f32 %v6961_v12, %v13796_v24  ;;  %v6970_v44 = vmul.f32 %v6968_v36, %v13797_v19  ;;  %4567 = vmatpush.msrb.mxu0 %v11433_v47  ;;  %v6971_v27 = vmul.f32 %v6969_v30, %v13797_v19  ;;  %v13803_v36 = vld [vmem:[#allocation37_spill] sm:$0xff] }
 0x5b5   : > { %4665 = vmatpush.msrb.mxu2 %v13799_v50  ;;  %4728 = vmatpush.msrb.mxu3 %v13800_v37  ;;  %v6980_v61 = vmul.f32 %v6978_v63, %v13802_v42  ;;  %v6981_v23 = vmul.f32 %v6979_v9, %v13802_v42  ;;  %v6988_v12 = vperm.slane %v6984_v52, 3  ;;  %v13804_v47 = vld [vmem:[#allocation41_spill] sm:$0xff]  ;;  %v13807_v63 = vld [vmem:[#allocation55_spill] sm:$0xff]  ;;  %v622_v42 = vld [vmem:[%s8351_s22 + $0x670] sm:$0xff] }
 0x5b6   : > { %v6972_v33 = vadd.f32 %v6970_v44, %v6962_v2  ;;  %4417 = vmatpush.msra.mxu1 %v13801_v31  ;;  %v6973_v35 = vadd.f32 %v6971_v27, %v6963_v14  ;;  %4570 = vmatpush.msrb.mxu0 %v13798_v20  ;;  %v13805_v30 = vand.u32 4294901760, %v13804_v47  ;;  %v13806_v2 = vld [vmem:[#allocation27_spill] sm:$0xff]  ;;  %v13808_v9 = vand.u32 4294901760, %v13807_v63 }
 0x5b7   : > { %4220 = vmatmul.f32.vlgmr.msrb.gmra.mxu1 %v13803_v36  ;;  %v6991_v44 = vmul.f32 %v6989_v32, %v13806_v2  ;;  %4730 = vmatpush.msrb.mxu3 %v11423_v49  ;;  %v6990_v52 = vmul.f32 %v6988_v12, %v13806_v2  ;;  %v13809_v20 = vand.u32 4294901760, %v11492_v58  ;;  %v13813_v31 = vand.u32 4294901760, %v11530_v56  ;;  %v646_v2 = vld [vmem:[%s8351_s22 + $0x730] sm:$0xff] }
 0x5b8   : > { %4620 = vmatpush.msrb.mxu1 %v13800_v37  ;;  %4669 = vmatpush.msrb.mxu2 %v13805_v30  ;;  %v6982_v1 = vadd.f32 %v6980_v61, %v6972_v33  ;;  %v6983_v50 = vadd.f32 %v6981_v23, %v6973_v35  ;;  %v13811_v33 = vand.u32 4294901760, %v11518_v3  ;;  %v494_v61 = vld [vmem:[%s8351_s22 + $0x270] sm:$0xff]  ;;  %v11843_v30 = vld [vmem:[%s8343_s10 + $0x18] sm:$0xff] }
 0x5b9   : > { %4573 = vmatpush.msrb.mxu0 %v13804_v47  ;;  %4732 = vmatpush.msrb.mxu3 %v11439_v5  ;;  %v486_v23 = vld [vmem:[%s8351_s22 + $0x230] sm:$0xff]  ;;  %v11839_v12 = vand.u32 4294901760, %v494_v61  ;;  %13818 = vst [vmem:[#allocation45_spill] sm:$0xff] %v11843_v30 }
 0x5ba   : > { %4622 = vmatpush.msrb.mxu1 %v11423_v49  ;;  %4673 = vmatpush.msrb.mxu2 %v13808_v9  ;;  %v6993_v14 = vadd.f32 %v6991_v44, %v6983_v50  ;;  %v6992_v27 = vadd.f32 %v6990_v52, %v6982_v1  ;;  %v13810_v49 = vand.u32 4294901760, %v11510_v29  ;;  %v478_v47 = vld [vmem:[%s8351_s22 + $0x1f0] sm:$0xff]  ;;  %v11851_v1 = vand.u32 4294901760, %v486_v23 }
 0x5bb   : > { %4576 = vmatpush.msrb.mxu0 %v13807_v63  ;;  %4734 = vmatpush.msrb.mxu3 %v11451_v7  ;;  %v11864_v9 = vand.u32 4294901760, %v478_v47  ;;  %v470_v52 = vld [vmem:[%s8351_s22 + $0x1b0] sm:$0xff] }
 0x5bc   : > { %4624 = vmatpush.msrb.mxu1 %v11439_v5  ;;  %4677 = vmatpush.msrb.mxu2 %v13809_v20  ;;  %v6996_v32 = vrot.slane %v6993_v14, 4 }
 0x5bd   : > { %4579 = vmatpush.msrb.mxu0 %v11492_v58  ;;  %4736 = vmatpush.msrb.mxu3 %v11456_v18  ;;  %v13812_v58 = vld [vmem:[#allocation28_spill] sm:$0xff] }
 0x5be   : > { %4626 = vmatpush.msrb.mxu1 %v11451_v7  ;;  %4681 = vmatpush.msrb.mxu2 %v13810_v49  ;;  %v6997_v37 = vsel %vm6140_vm0, %v6992_v27, %v6996_v32  ;;  %v462_v32 = vld [vmem:[%s8351_s22 + $0x170] sm:$0xff] }
 0x5bf   : > { %4582 = vmatpush.msrb.mxu0 %v11510_v29  ;;  %v6999_v5 = vadd.f32 %v6997_v37, %v11686_v17  ;;  %4738 = vmatpush.msrb.mxu3 %v11481_v21  ;;  %v13814_v29 = vand.u32 4294901760, %v11551_v38 }
 0x5c0   : > { %4628 = vmatpush.msrb.mxu1 %v11456_v18  ;;  %4685 = vmatpush.msrb.mxu2 %v13811_v33  ;;  %v542_v18 = vld [vmem:[%s8351_s22 + $0x3f0] sm:$0xff] }
 0x5c1   : > { %4585 = vmatpush.msrb.mxu0 %v11518_v3  ;;  %v7000_v7 = vadd.f32 %v6999_v5, %v13812_v58  ;;  %4740 = vmatpush.msrb.mxu3 %v11494_v4  ;;  %v534_v3 = vld [vmem:[%s8351_s22 + $0x3b0] sm:$0xff]  ;;  %v11766_v17 = vand.u32 4294901760, %v542_v18  ;;  %v11885_v5 = vsub.f32 %v486_v23, %v11851_v1 }
 0x5c2   : > { %4630 = vmatpush.msrb.mxu1 %v11481_v21  ;;  %4689 = vmatpush.msrb.mxu2 %v13813_v31  ;;  %v13815_v21 = vand.u32 4294901760, %v11565_v34  ;;  %v454_v31 = vld [vmem:[%s8351_s22 + $0x130] sm:$0xff] }
 0x5c3   : > { %4588 = vmatpush.msrb.mxu0 %v11530_v56  ;;  %7004 = vst [vmem:[#allocation1] ss:$2 sm:$0xff] %v7000_v7  ;;  %4742 = vmatpush.msrb.mxu3 %v11500_v45  ;;  %v11783_v56 = vsub.f32 %v542_v18, %v11766_v17  ;;  %v11895_v18 = vsub.f32 %v478_v47, %v11864_v9 }
 0x5c4   : > { %4632 = vmatpush.msrb.mxu1 %v11494_v4  ;;  %4693 = vmatpush.msrb.mxu2 %v13814_v29  ;;  %v526_v4 = vld [vmem:[%s8351_s22 + $0x370] sm:$0xff]  ;;  %v11897_v29 = vand.u32 4294901760, %v462_v32 }
 0x5c5   : > { %4591 = vmatpush.msrb.mxu0 %v11551_v38  ;;  %4744 = vmatpush.msrb.mxu3 %v11525_v8  ;;  %v11774_v38 = vand.u32 4294901760, %v534_v3 }
 0x5c6   : > { %4634 = vmatpush.msrb.mxu1 %v11500_v45  ;;  %4697 = vmatpush.msrb.mxu2 %v13815_v21  ;;  %v518_v45 = vld [vmem:[%s8351_s22 + $0x330] sm:$0xff] }
 0x5c7   : > { %4594 = vmatpush.msrb.mxu0 %v11565_v34  ;;  %4746 = vmatpush.msrb.mxu3 %v11540_v26  ;;  %v11789_v34 = vand.u32 4294901760, %v518_v45 }
 0x5c8   : > { %4636 = vmatpush.msrb.mxu1 %v11525_v8  ;;  %4701 = vmatpush.msrb.mxu2 %v4526_v40  ;;  %v11785_v8 = vand.u32 4294901760, %v526_v4  ;;  %v510_v40 = vld [vmem:[%s8351_s22 + $0x2f0] sm:$0xff] }
 0x5c9   : > { %4597 = vmatpush.msrb.mxu0 %v11579_v54  ;;  %4748 = vmatpush.msrb.mxu3 %v11553_v46  ;;  %v502_v54 = vld [vmem:[%s8351_s22 + $0x2b0] sm:$0xff] }
 0x5ca   : > { %4638 = vmatpush.msrb.mxu1 %v11540_v26  ;;  %4705 = vmatpush.msrb.mxu2 %v4532_v15  ;;  %v11792_v35 = vld.sshfl [vmem:[#allocation1] sm:$0xff pattern:$0x75316420]  ;;  %v11798_v26 = vsub.f32 %v534_v3, %v11774_v38  ;;  %v11801_v15 = vld.sshfl [vmem:[#allocation1 + $0x8] sm:$0xff pattern:$0x75316420] }
 0x5cb   : > { %4600 = vmatpush.msrb.mxu0 %v11593_v48  ;;  %13816 = vst [vmem:[#allocation36_spill] sm:$0xff] %v11792_v35  ;;  %4750 = vmatpush.msrb.mxu3 %v11567_v0  ;;  %v11810_v48 = vsub.f32 %v526_v4, %v11785_v8  ;;  %v446_v4 = vld [vmem:[%s8351_s22 + $0xf0] sm:$0xff]  ;;  %v12072_v35 = vand.u32 4294901760, %v614_v51 }
 0x5cc   : > { %4640 = vmatpush.msrb.mxu1 %v11553_v46  ;;  %4709 = vmatpush.msrb.mxu2 %v4538_v22  ;;  %13817 = vst [vmem:[#allocation43_spill] sm:$0xff] %v11801_v15  ;;  %v13396_v46 = vand.u32 4294901760, %v11783_v56  ;;  %v11812_v22 = vand.u32 4294901760, %v510_v40  ;;  %v12062_v15 = vand.u32 4294901760, %v622_v42 }
 0x5cd   : > { %4603 = vmatpush.msrb.mxu0 %v11607_v39  ;;  %7113 = vst [vmem:[#allocation1] ss:$2 sm:$0xff] %v7000_v7  ;;  %4752 = vmatpush.msrb.mxu3 %v11581_v43  ;;  %v11817_v39 = vsub.f32 %v518_v45, %v11789_v34  ;;  %v11889_v7 = vand.u32 4294901760, %v470_v52 }
 0x5ce   : > { %4642 = vmatpush.msrb.mxu1 %v11567_v0  ;;  %4713 = vmatpush.msrb.mxu2 %v4544_v62  ;;  %v11819_v0 = vand.u32 4294901760, %v502_v54  ;;  %v13394_v62 = vand.u32 4294901760, %v11798_v26 }
 0x5cf   : > { %4606 = vmatpush.msrb.mxu0 %v11620_v6  ;;  %4754 = vmatpush.msrb.mxu3 %v11595_v28  ;;  %v4808_v6 = vsub.f32 %v11783_v56, %v13396_v46  ;;  %v11915_v23 = vsub.f32 %v470_v52, %v11889_v7 }
 0x5d0   : > { %4644 = vmatpush.msrb.mxu1 %v11581_v43  ;;  %4717 = vmatpush.msrb.mxu2 %v4550_v11  ;;  %v13393_v43 = vand.u32 4294901760, %v11810_v48  ;;  %v11837_v11 = vsub.f32 %v510_v40, %v11812_v22  ;;  %v4814_v50 = vsub.f32 %v11798_v26, %v13394_v62  ;;  %v670_v62 = vld [vmem:[%s8351_s22 + $0x7f0] sm:$0xff] }
 0x5d1   : > { %4609 = vmatpush.msrb.mxu0 %v11633_v57  ;;  %4756 = vmatpush.msrb.mxu3 %v11609_v53  ;;  %v13392_v57 = vand.u32 4294901760, %v11817_v39  ;;  %v4809_v14 = vand.u32 4294901760, %v4808_v6  ;;  %v11979_v59 = vand.u32 4294901760, %v670_v62 }
 0x5d2   : > { %4646 = vmatpush.msrb.mxu1 %v11595_v28  ;;  %4721 = vmatpush.msrb.mxu2 %v4556_v25  ;;  %v13819_v28 = vld [vmem:[#allocation40_spill] sm:$0xff]  ;;  %v11849_v25 = vsub.f32 %v502_v54, %v11819_v0  ;;  %v4820_v20 = vsub.f32 %v11810_v48, %v13393_v43  ;;  %v13390_v27 = vand.u32 4294901760, %v11837_v11  ;;  %v4815_v33 = vand.u32 4294901760, %v4814_v50 }
 0x5d3   : > { %4460 = vmatmul.f32.vlgmr.msra.gmra.mxu2 %v13819_v28  ;;  %4612 = vmatpush.msrb.mxu0 %v11646_v55  ;;  %v13822_v55 = vld [vmem:[#allocation34_spill] sm:$0xff]  ;;  %v4826_v49 = vsub.f32 %v11817_v39, %v13392_v57  ;;  %v13391_v54 = vand.u32 4294901760, %v11885_v5  ;;  %v13395_v50 = vand.u32 4294901760, %v11895_v18  ;;  %v422_v43 = vld [vmem:[%s8351_s22 + $0x30] sm:$0xff]  ;;  %13824 = vst [vmem:[#allocation62_spill] sm:$0xff] %v11979_v59 }
 0x5d4   : > { %4908 = vmatpush.msra.mxu2 %v11783_v56  ;;  %v11858_v44 = vld.sshfl [vmem:[#allocation1] sm:$0xff pattern:$0x75316420]  ;;  %v11860_v63 = vld.sshfl [vmem:[#allocation1 + $0x8] sm:$0xff pattern:$0x75316420]  ;;  %4648 = vmatpush.msrb.mxu1 %v11609_v53  ;;  %v11875_v53 = vsub.f32 %v494_v61, %v11839_v12 }
 0x5d5   : > { %13820 = vst [vmem:[#allocation42_spill] sm:$0xff] %v11858_v44  ;;  %4758 = vmatpush.msrb.mxu3 %v11622_v13  ;;  %4382 = vmatmul.f32.vlgmr.msra.gmra.mxu0 %v13803_v36  ;;  %v13388_v37 = vand.u32 4294901760, %v11849_v25  ;;  %v4821_v3 = vand.u32 4294901760, %v4820_v20  ;;  %v4827_v45 = vand.u32 4294901760, %v4826_v49  ;;  %v11911_v61 = vand.u32 4294901760, %v454_v31  ;;  %v438_v49 = vld [vmem:[%s8351_s22 + $0xb0] sm:$0xff] }
 0x5d6   : > { %13821 = vst [vmem:[#allocation41_spill] sm:$0xff] %v11860_v63  ;;  %4561 = vmatmul.f32.vlgmr.msra.gmra.mxu3 %v13822_v55  ;;  %4765 = vmatpush.msra.mxu0 %v11766_v17  ;;  %v13389_v21 = vand.u32 4294901760, %v11875_v53  ;;  %v11924_v20 = vand.u32 4294901760, %v446_v4  ;;  %v662_v63 = vld [vmem:[%s8351_s22 + $0x7b0] sm:$0xff] }
 0x5d7   : > { %7193 = vst [vmem:[#allocation1] ss:$2 sm:$0xff] %v11843_v30  ;;  %4911 = vmatpush.msra.mxu2 %v11798_v26  ;;  %4961 = vmatpush.msra.mxu3 %v11766_v17  ;;  %v4838_v40 = vsub.f32 %v11849_v25, %v13388_v37  ;;  %v4850_v37 = vsub.f32 %v11885_v5, %v13391_v54  ;;  %v11995_v58 = vand.u32 4294901760, %v662_v63 }
 0x5d8   : > { %4650 = vmatpush.msrb.mxu1 %v11622_v13  ;;  %4767 = vmatpush.msra.mxu0 %v11774_v38  ;;  %v4832_v13 = vsub.f32 %v11837_v11, %v13390_v27  ;;  %v430_v27 = vld [vmem:[%s8351_s22 + $0x70] sm:$0xff]  ;;  %v11951_v54 = vsub.f32 %v446_v4, %v11924_v20 }
 0x5d9   : > { %4419 = vmatmul.f32.vlgmr.msra.gmra.mxu1 %v13803_v36  ;;  %4914 = vmatpush.msra.mxu2 %v11810_v48  ;;  %v11956_v57 = vand.u32 4294901760, %v430_v27  ;;  %v12085_v36 = vsub.f32 %v622_v42, %v12062_v15 }
 0x5da   : > { %4810 = vmatpush.msra.mxu1 %v4809_v14  ;;  %4963 = vmatpush.msra.mxu3 %v11774_v38  ;;  %v11921_v14 = vsub.f32 %v462_v32, %v11897_v29  ;;  %v4833_v52 = vand.u32 4294901760, %v4832_v13  ;;  %v4839_v32 = vand.u32 4294901760, %v4838_v40  ;;  %v11939_v13 = vsub.f32 %v454_v31, %v11911_v61 }
 0x5db   : > { %4769 = vmatpush.msra.mxu0 %v11785_v8  ;;  %4917 = vmatpush.msra.mxu2 %v11817_v39 }
 0x5dc   : > { %4816 = vmatpush.msra.mxu1 %v4815_v33  ;;  %4965 = vmatpush.msra.mxu3 %v11785_v8  ;;  %v4844_v33 = vsub.f32 %v11875_v53, %v13389_v21  ;;  %v11941_v21 = vand.u32 4294901760, %v438_v49  ;;  %v13398_v40 = vand.u32 4294901760, %v11921_v14 }
 0x5dd   : > { %4771 = vmatpush.msra.mxu0 %v11789_v34  ;;  %4920 = vmatpush.msra.mxu2 %v11837_v11 }
 0x5de   : > { %v7194_v6 = vld.sshfl [vmem:[#allocation1] sm:$0xff pattern:$0x75316420]  ;;  %v7195_v47 = vld.sshfl [vmem:[#allocation1 + $0x8] sm:$0xff pattern:$0x75316420]  ;;  %4822 = vmatpush.msra.mxu1 %v4821_v3  ;;  %4967 = vmatpush.msra.mxu3 %v11789_v34 }
 0x5df   : > { %7204 = vst [vmem:[#allocation1] ss:$2 sm:$0xff] %v11843_v30  ;;  %4773 = vmatpush.msra.mxu0 %v11812_v22  ;;  %4923 = vmatpush.msra.mxu2 %v11849_v25  ;;  %v13397_v3 = vand.u32 4294901760, %v11915_v23  ;;  %v4845_v31 = vand.u32 4294901760, %v4844_v33  ;;  %v11966_v33 = vsub.f32 %v438_v49, %v11941_v21  ;;  %v7199_v49 = vsel %vm6140_vm0, %v7195_v47, 0.0 }
 0x5e0   : > { %4828 = vmatpush.msra.mxu1 %v4827_v45  ;;  %4969 = vmatpush.msra.mxu3 %v11812_v22  ;;  %v4856_v45 = vsub.f32 %v11895_v18, %v13395_v50  ;;  %v4851_v50 = vand.u32 4294901760, %v4850_v37  ;;  %v654_v37 = vld [vmem:[%s8351_s22 + $0x770] sm:$0xff] }
 0x5e1   : > { %4775 = vmatpush.msra.mxu0 %v11819_v0  ;;  %4926 = vmatpush.msra.mxu2 %v11875_v53  ;;  %v4862_v4 = vsub.f32 %v11915_v23, %v13397_v3  ;;  %v7198_v3 = vsel %vm6140_vm0, %v7194_v6, 0.0  ;;  %v13825_v6 = vand.u32 4294901760, %v11939_v13 }
 0x5e2   : > { %4834 = vmatpush.msra.mxu1 %v4833_v52  ;;  %4971 = vmatpush.msra.mxu3 %v11819_v0  ;;  %v4857_v46 = vand.u32 4294901760, %v4856_v45  ;;  %v11977_v52 = vand.u32 4294901760, %v422_v43  ;;  %v11985_v45 = vsub.f32 %v430_v27, %v11956_v57  ;;  %v7200_v44 = vadd.f32 %v7199_v49, %v7198_v3 }
 0x5e3   : > { %4777 = vmatpush.msra.mxu0 %v11839_v12  ;;  %4929 = vmatpush.msra.mxu2 %v11885_v5  ;;  %v4874_v47 = vsub.f32 %v11939_v13, %v13825_v6  ;;  %v12011_v3 = vand.u32 4294901760, %v654_v37  ;;  %v13827_v49 = vand.u32 4294901760, %v11966_v33 }
 0x5e4   : > { %4840 = vmatpush.msra.mxu1 %v4839_v32  ;;  %4973 = vmatpush.msra.mxu3 %v11839_v12  ;;  %v4868_v32 = vsub.f32 %v11921_v14, %v13398_v40  ;;  %13823 = vst [vmem:[#allocation55_spill] sm:$0xff] %v11977_v52  ;;  %v12002_v6 = vsub.f32 %v422_v43, %v11977_v52 }
 0x5e5   : > { %4779 = vmatpush.msra.mxu0 %v11851_v1  ;;  %4932 = vmatpush.msra.mxu2 %v11895_v18  ;;  %v12005_v40 = vsub.f32 %v670_v62, %v11979_v59  ;;  %v4886_v43 = vsub.f32 %v11966_v33, %v13827_v49  ;;  %v638_v62 = vld [vmem:[%s8351_s22 + $0x6f0] sm:$0xff]  ;;  %v12033_v49 = vsub.f32 %v654_v37, %v12011_v3 }
 0x5e6   : > { %4846 = vmatpush.msra.mxu1 %v4845_v31  ;;  %4975 = vmatpush.msra.mxu3 %v11851_v1  ;;  %v4863_v31 = vand.u32 4294901760, %v4862_v4  ;;  %v4869_v27 = vand.u32 4294901760, %v4868_v32  ;;  %v4875_v32 = vand.u32 4294901760, %v4874_v47  ;;  %v12035_v19 = vand.u32 4294901760, %v638_v62 }
 0x5e7   : > { %4781 = vmatpush.msra.mxu0 %v11864_v9  ;;  %4935 = vmatpush.msra.mxu2 %v11915_v23  ;;  %13830 = vst [vmem:[#allocation64_spill] sm:$0xff] %v12033_v49  ;;  %v13832_v37 = vand.u32 4294901760, %v12005_v40  ;;  %v13835_v28 = vand.u32 4294901760, %v12033_v49 }
 0x5e8   : > { %4852 = vmatpush.msra.mxu1 %v4851_v50  ;;  %4977 = vmatpush.msra.mxu3 %v11864_v9  ;;  %v13826_v50 = vand.u32 4294901760, %v11951_v54 }
 0x5e9   : > { %4783 = vmatpush.msra.mxu0 %v11889_v7  ;;  %4938 = vmatpush.msra.mxu2 %v11921_v14  ;;  %v5149_v24 = vsub.f32 %v12005_v40, %v13832_v37  ;;  %v606_v37 = vld [vmem:[%s8351_s22 + $0x5f0] sm:$0xff] }
 0x5ea   : > { %4858 = vmatpush.msra.mxu1 %v4857_v46  ;;  %v4880_v4 = vsub.f32 %v11951_v54, %v13826_v50  ;;  %4979 = vmatpush.msra.mxu3 %v11889_v7  ;;  %v12020_v50 = vsub.f32 %v662_v63, %v11995_v58  ;;  %v12022_v46 = vand.u32 4294901760, %v646_v2 }
 0x5eb   : > { %4785 = vmatpush.msra.mxu0 %v11897_v29  ;;  %4941 = vmatpush.msra.mxu2 %v11939_v13 }
 0x5ec   : > { %4864 = vmatpush.msra.mxu1 %v4863_v31  ;;  %4981 = vmatpush.msra.mxu3 %v11897_v29  ;;  %13828 = vst [vmem:[#allocation63_spill] sm:$0xff] %v12020_v50  ;;  %v4881_v31 = vand.u32 4294901760, %v4880_v4  ;;  %v4887_v4 = vand.u32 4294901760, %v4886_v43 }
 0x5ed   : > { %7201 = vadd.xlane.f32.xlu1 %v7200_v44  ;;  %4787 = vmatpush.msra.mxu0 %v11911_v61  ;;  %v13829_v44 = vand.u32 4294901760, %v11985_v45 }
 0x5ee   : > { %4870 = vmatpush.msra.mxu1 %v4869_v27  ;;  %4944 = vmatpush.msra.mxu2 %v11951_v54  ;;  %v630_v27 = vld [vmem:[%s8351_s22 + $0x6b0] sm:$0xff] }
 0x5ef   : > { %4983 = vmatpush.msra.mxu3 %v11911_v61  ;;  %v4892_v63 = vsub.f32 %v11985_v45, %v13829_v44  ;;  %4789 = vmatpush.msra.mxu0 %v11924_v20  ;;  %v12044_v44 = vsub.f32 %v646_v2, %v12022_v46  ;;  %v12053_v30 = vand.u32 4294901760, %v630_v27 }
 0x5f0   : > { %4876 = vmatpush.msra.mxu1 %v4875_v32  ;;  %4947 = vmatpush.msra.mxu2 %v11966_v33  ;;  %v13833_v32 = vand.u32 4294901760, %v12002_v6 }
 0x5f1   : > { %4985 = vmatpush.msra.mxu3 %v11924_v20  ;;  %13831 = vst [vmem:[#allocation65_spill] sm:$0xff] %v12044_v44  ;;  %4791 = vmatpush.msra.mxu0 %v11941_v21  ;;  %v4893_v2 = vand.u32 4294901760, %v4892_v63  ;;  %v12077_v60 = vsub.f32 %v630_v27, %v12053_v30  ;;  %v13836_v27 = vld [vmem:[#allocation38_spill] sm:$0xff]  ;;  %v13838_v47 = vand.u32 4294901760, %v12044_v44 }
 0x5f2   : > { %4882 = vmatpush.msra.mxu1 %v4881_v31  ;;  %v4898_v43 = vsub.f32 %v12002_v6, %v13833_v32  ;;  %4950 = vmatpush.msra.mxu2 %v11985_v45  ;;  %v12060_v31 = vsub.f32 %v638_v62, %v12035_v19  ;;  %v13834_v32 = vand.u32 4294901760, %v12020_v50  ;;  %v5150_v62 = vand.u32 4294901760, %v5149_v24  ;;  %v598_v24 = vld [vmem:[%s8351_s22 + $0x5b0] sm:$0xff] }
 0x5f3   : > { %4987 = vmatpush.msra.mxu3 %v11941_v21  ;;  %4793 = vmatpush.msra.mxu0 %v11956_v57  ;;  %v5167_v42 = vsub.f32 %v12044_v44, %v13838_v47  ;;  %v13840_v44 = vld [vmem:[#allocation39_spill] sm:$0xff] }
 0x5f4   : > { %4888 = vmatpush.msra.mxu1 %v4887_v4  ;;  %4953 = vmatpush.msra.mxu2 %v12002_v6  ;;  %v5155_v63 = vsub.f32 %v12020_v50, %v13834_v32  ;;  %v4899_v4 = vand.u32 4294901760, %v4898_v43  ;;  %v5161_v32 = vsub.f32 %v12033_v49, %v13835_v28  ;;  %v12087_v50 = vand.u32 4294901760, %v606_v37  ;;  %v7205_v43 = vld.sshfl [vmem:[#allocation1] sm:$0xff pattern:$0x75316420] }
 0x5f5   : > { %4989 = vmatpush.msra.mxu3 %v11956_v57  ;;  %4723 = vmatmul.f32.vlgmr.msrb.gmra.mxu2 %v13822_v55  ;;  %v12099_v49 = vsub.f32 %v614_v51, %v12072_v35  ;;  %v13842_v51 = vand.u32 4294901760, %v11810_v48 }
 0x5f6   : > { %4795 = vmatpush.msra.mxu0 %v11977_v52  ;;  %5106 = vmatpush.msrb.mxu2 %v11979_v59  ;;  %v7206_v59 = vld.sshfl [vmem:[#allocation1 + $0x8] sm:$0xff pattern:$0x75316420]  ;;  %v5156_v28 = vand.u32 4294901760, %v5155_v63  ;;  %v5162_v63 = vand.u32 4294901760, %v5161_v32  ;;  %v12120_v32 = vand.u32 4294901760, %v590_v10 }
 0x5f7   : > { %4894 = vmatpush.msra.mxu1 %v4893_v2  ;;  %4991 = vmatpush.msra.mxu3 %v11977_v52  ;;  %v13837_v2 = vand.u32 4294901760, %v11783_v56  ;;  %v12104_v52 = vand.u32 4294901760, %v598_v24  ;;  %v13839_v56 = vand.u32 4294901760, %v11798_v26  ;;  %v7210_v47 = vsel %vm6140_vm0, %v7206_v59, -inf }
 0x5f8   : > { %4615 = vmatmul.f32.vlgmr.msrb.gmra.mxu0 %v13836_v27  ;;  %4760 = vmatmul.f32.vlgmr.msrb.gmra.mxu3 %v13822_v55  ;;  %v582_v55 = vld [vmem:[%s8351_s22 + $0x530] sm:$0xff]  ;;  %v12118_v26 = vsub.f32 %v606_v37, %v12087_v50  ;;  %v5168_v59 = vand.u32 4294901760, %v5167_v42 }
 0x5f9   : > { %5002 = vmatpush.msrb.mxu0 %v13837_v2  ;;  %5108 = vmatpush.msrb.mxu2 %v11995_v58  ;;  %v7209_v2 = vsel %vm6140_vm0, %v7205_v43, -inf  ;;  %v5190_v43 = vand.u32 4294901760, %v12099_v49  ;;  %v566_v42 = vld [vmem:[%s8351_s22 + $0x4b0] sm:$0xff] }
 0x5fa   : > { %5151 = vmatpush.msrb.mxu3 %v5150_v62  ;;  %4900 = vmatpush.msra.mxu1 %v4899_v4  ;;  %v13841_v62 = vand.u32 4294901760, %v12060_v31  ;;  %v7211_v27 = vmax.f32 %v7209_v2, %v7210_v47  ;;  %v13845_v2 = vand.u32 4294901760, %v11817_v39  ;;  %v558_v39 = vld [vmem:[%s8351_s22 + $0x470] sm:$0xff] }
 0x5fb   : > { %5006 = vmatpush.msrb.mxu0 %v13839_v56  ;;  %4654 = vmatmul.f32.vlgmr.msrb.gmra.mxu1 %v13840_v44  ;;  %v574_v56 = vld [vmem:[%s8351_s22 + $0x4f0] sm:$0xff]  ;;  %v12132_v44 = vsub.f32 %v598_v24, %v12104_v52  ;;  %v12146_v24 = vsub.f32 %v590_v10, %v12120_v32 }
 0x5fc   : > { %5110 = vmatpush.msrb.mxu2 %v12011_v3  ;;  %v5173_v4 = vsub.f32 %v12060_v31, %v13841_v62  ;;  %5069 = vmatpush.msrb.mxu1 %v11766_v17  ;;  %v13843_v62 = vand.u32 4294901760, %v12077_v60  ;;  %v12134_v17 = vand.u32 4294901760, %v582_v55 }
 0x5fd   : > { %5157 = vmatpush.msrb.mxu3 %v5156_v28  ;;  %5010 = vmatpush.msrb.mxu0 %v13842_v51  ;;  %v13844_v28 = vand.u32 4294901760, %v12085_v36  ;;  %v5196_v51 = vand.u32 4294901760, %v12118_v26 }
 0x5fe   : > { %5112 = vmatpush.msrb.mxu2 %v12022_v46  ;;  %v5179_v37 = vsub.f32 %v12077_v60, %v13843_v62  ;;  %5071 = vmatpush.msrb.mxu1 %v11774_v38  ;;  %v5174_v47 = vand.u32 4294901760, %v5173_v4  ;;  %v12148_v62 = vand.u32 4294901760, %v574_v56  ;;  %v5191_v38 = vsub.f32 %v12099_v49, %v5190_v43 }
 0x5ff   : > { %5163 = vmatpush.msrb.mxu3 %v5162_v63  ;;  %v5185_v48 = vsub.f32 %v12085_v36, %v13844_v28  ;;  %5014 = vmatpush.msrb.mxu0 %v13845_v2  ;;  %v13846_v63 = vand.u32 4294901760, %v11837_v11  ;;  %v5202_v28 = vand.u32 4294901760, %v12132_v44  ;;  %v12159_v10 = vsub.f32 %v582_v55, %v12134_v17 }
 0x600   : > { %5114 = vmatpush.msrb.mxu2 %v12035_v19  ;;  %5073 = vmatpush.msrb.mxu1 %v11785_v8  ;;  %v5180_v4 = vand.u32 4294901760, %v5179_v37  ;;  %v12161_v2 = vand.u32 4294901760, %v566_v42  ;;  %v5197_v11 = vsub.f32 %v12118_v26, %v5196_v51  ;;  %v5208_v37 = vand.u32 4294901760, %v12146_v24 }
 0x601   : > { %5169 = vmatpush.msrb.mxu3 %v5168_v59  ;;  %7212 = vmax.xlane.f32.xlu0 %v7211_v27  ;;  %v5186_v8 = vand.u32 4294901760, %v5185_v48  ;;  %v550_v59 = vld [vmem:[%s8351_s22 + $0x430] sm:$0xff]  ;;  %v13847_v27 = vand.u32 4294901760, %v11849_v25  ;;  %v12173_v55 = vsub.f32 %v574_v56, %v12148_v62  ;;  %v13848_v25 = vand.u32 4294901760, %v11875_v53 }
 0x602   : > { %5018 = vmatpush.msrb.mxu0 %v13846_v63  ;;  %5075 = vmatpush.msrb.mxu1 %v11789_v34  ;;  %v12175_v63 = vand.u32 4294901760, %v558_v39  ;;  %v5192_v34 = vand.u32 4294901760, %v5191_v38  ;;  %v5203_v48 = vsub.f32 %v12132_v44, %v5202_v28  ;;  %v12186_v56 = vsub.f32 %v566_v42, %v12161_v2 }
 0x603   : > { %5116 = vmatpush.msrb.mxu2 %v12053_v30  ;;  %5175 = vmatpush.msrb.mxu3 %v5174_v47  ;;  %v5214_v47 = vand.u32 4294901760, %v12159_v10  ;;  %v5198_v53 = vand.u32 4294901760, %v5197_v11  ;;  %v5209_v38 = vsub.f32 %v12146_v24, %v5208_v37 }
 0x604   : > { %5022 = vmatpush.msrb.mxu0 %v13847_v27  ;;  %5077 = vmatpush.msrb.mxu1 %v11812_v22  ;;  %v12188_v27 = vand.u32 4294901760, %v550_v59  ;;  %v13849_v22 = vand.u32 4294901760, %v11885_v5  ;;  %v12199_v42 = vsub.f32 %v558_v39, %v12175_v63  ;;  %v5204_v5 = vand.u32 4294901760, %v5203_v48 }
 0x605   : > { %5118 = vmatpush.msrb.mxu2 %v12062_v15  ;;  %5181 = vmatpush.msrb.mxu3 %v5180_v4  ;;  %v5220_v4 = vand.u32 4294901760, %v12173_v55  ;;  %v5226_v11 = vand.u32 4294901760, %v12186_v56 }
 0x606   : > { %5026 = vmatpush.msrb.mxu0 %v13848_v25  ;;  %5079 = vmatpush.msrb.mxu1 %v11819_v0  ;;  %v13850_v0 = vand.u32 4294901760, %v11895_v18  ;;  %v12210_v25 = vsub.f32 %v550_v59, %v12188_v27  ;;  %v5210_v18 = vand.u32 4294901760, %v5209_v38 }
 0x607   : > { %5120 = vmatpush.msrb.mxu2 %v12072_v35  ;;  %5187 = vmatpush.msrb.mxu3 %v5186_v8  ;;  %v5215_v8 = vsub.f32 %v12159_v10, %v5214_v47  ;;  %v5221_v39 = vsub.f32 %v12173_v55, %v5220_v4 }
 0x608   : > { %5030 = vmatpush.msrb.mxu0 %v13849_v22  ;;  %5081 = vmatpush.msrb.mxu1 %v11839_v12  ;;  %v13851_v12 = vand.u32 4294901760, %v11915_v23  ;;  %v5227_v23 = vsub.f32 %v12186_v56, %v5226_v11  ;;  %v5238_v48 = vand.u32 4294901760, %v12210_v25 }
 0x609   : > { %5122 = vmatpush.msrb.mxu2 %v12087_v50  ;;  %5193 = vmatpush.msrb.mxu3 %v5192_v34  ;;  %v5232_v34 = vand.u32 4294901760, %v12199_v42  ;;  %v5216_v59 = vand.u32 4294901760, %v5215_v8  ;;  %v5222_v22 = vand.u32 4294901760, %v5221_v39  ;;  %v13863_v8 = vld [vmem:[#allocation55_spill] sm:$0xff]  ;;  %v13869_v39 = vand.u32 4294901760, %v12060_v31 }
 0x60a   : > { %5034 = vmatpush.msrb.mxu0 %v13850_v0  ;;  %5083 = vmatpush.msrb.mxu1 %v11851_v1  ;;  %v13852_v1 = vand.u32 4294901760, %v11921_v14  ;;  %v5239_v38 = vsub.f32 %v12210_v25, %v5238_v48 }
 0x60b   : > { %5124 = vmatpush.msrb.mxu2 %v12104_v52  ;;  %5199 = vmatpush.msrb.mxu3 %v5198_v53  ;;  %v5233_v14 = vsub.f32 %v12199_v42, %v5232_v34  ;;  %v13854_v53 = vand.u32 4294901760, %v11951_v54  ;;  %v13856_v54 = vand.u32 4294901760, %v11985_v45 }
 0x60c   : > { %5038 = vmatpush.msrb.mxu0 %v13851_v12  ;;  %5085 = vmatpush.msrb.mxu1 %v11864_v9  ;;  %v13853_v9 = vand.u32 4294901760, %v11939_v13  ;;  %v13855_v13 = vand.u32 4294901760, %v11966_v33  ;;  %v5240_v0 = vand.u32 4294901760, %v5239_v38  ;;  %v13858_v33 = vand.u32 4294901760, %v12002_v6  ;;  %v13864_v12 = vld [vmem:[#allocation37_spill] sm:$0xff] }
 0x60d   : > { %5126 = vmatpush.msrb.mxu2 %v12120_v32  ;;  %5205 = vmatpush.msrb.mxu3 %v5204_v5  ;;  %v13862_v5 = vld [vmem:[#allocation62_spill] sm:$0xff]  ;;  %v463_v38 = vld [vmem:[%s8351_s22 + $0x178] sm:$0xff] }
 0x60e   : > { %5042 = vmatpush.msrb.mxu0 %v13852_v1  ;;  %5087 = vmatpush.msrb.mxu1 %v11889_v7  ;;  %v5228_v7 = vand.u32 4294901760, %v5227_v23 }
 0x60f   : > { %5128 = vmatpush.msrb.mxu2 %v12134_v17  ;;  %5211 = vmatpush.msrb.mxu3 %v5210_v18 }
 0x610   : > { %5046 = vmatpush.msrb.mxu0 %v13853_v9  ;;  %5089 = vmatpush.msrb.mxu1 %v11897_v29  ;;  %v5234_v29 = vand.u32 4294901760, %v5233_v14  ;;  %v13875_v9 = vld [vmem:[#allocation34_spill] sm:$0xff] }
 0x611   : > { %5130 = vmatpush.msrb.mxu2 %v12148_v62  ;;  %5217 = vmatpush.msrb.mxu3 %v5216_v59 }
 0x612   : > { %5050 = vmatpush.msrb.mxu0 %v13854_v53  ;;  %5091 = vmatpush.msrb.mxu1 %v11911_v61  ;;  %v13857_v61 = vand.u32 4294901760, %v12005_v40 }
 0x613   : > { %5132 = vmatpush.msrb.mxu2 %v12161_v2  ;;  %5223 = vmatpush.msrb.mxu3 %v5222_v22 }
 0x614   : > { %5054 = vmatpush.msrb.mxu0 %v13855_v13  ;;  %5093 = vmatpush.msrb.mxu1 %v11924_v20  ;;  %v13859_v20 = vld [vmem:[#allocation35_spill] sm:$0xff] }
 0x615   : > { %5134 = vmatpush.msrb.mxu2 %v12175_v63  ;;  %5229 = vmatpush.msrb.mxu3 %v5228_v7 }
 0x616   : > { %5058 = vmatpush.msrb.mxu0 %v13856_v54  ;;  %5095 = vmatpush.msrb.mxu1 %v11941_v21  ;;  %v13860_v21 = vld [vmem:[#allocation63_spill] sm:$0xff] }
 0x617   : > { %5136 = vmatpush.msrb.mxu2 %v12188_v27  ;;  %5235 = vmatpush.msrb.mxu3 %v5234_v29  ;;  %v13861_v45 = vand.u32 4294901760, %v13860_v21 }
 0x618   : > { %4956 = vmatmul.f32.vlgmr.msra.gmra.mxu2 %v8914_v41  ;;  %5062 = vmatpush.msrb.mxu0 %v13858_v33  ;;  %v455_v33 = vld [vmem:[%s8351_s22 + $0x138] sm:$0xff] }
 0x619   : > { %5343 = vmatpush.msra.mxu2 %v13857_v61  ;;  %5097 = vmatpush.msrb.mxu1 %v11956_v57  ;;  %v13865_v57 = vld [vmem:[#allocation64_spill] sm:$0xff] }
 0x61a   : > { %5241 = vmatpush.msrb.mxu3 %v5240_v0  ;;  %4801 = vmatmul.f32.vlgmr.msra.gmra.mxu0 %v13794_v16  ;;  %v13866_v6 = vand.u32 4294901760, %v13865_v57 }
 0x61b   : > { %4995 = vmatmul.f32.vlgmr.msra.gmra.mxu3 %v13859_v20  ;;  %5249 = vmatpush.msra.mxu0 %v12005_v40  ;;  %v13867_v40 = vld [vmem:[#allocation65_spill] sm:$0xff]  ;;  %v13902_v20 = vld [vmem:[#allocation38_spill] sm:$0xff] }
 0x61c   : > { %5347 = vmatpush.msra.mxu2 %v13861_v45  ;;  %5410 = vmatpush.msra.mxu3 %v13862_v5  ;;  %v13868_v18 = vand.u32 4294901760, %v13867_v40 }
 0x61d   : > { %5099 = vmatpush.msrb.mxu1 %v13863_v8  ;;  %5252 = vmatpush.msra.mxu0 %v13860_v21  ;;  %v12439_v8 = vand.u32 4294901760, %v463_v38 }
 0x61e   : > { %4902 = vmatmul.f32.vlgmr.msra.gmra.mxu1 %v13864_v12  ;;  %5351 = vmatpush.msra.mxu2 %v13866_v6 }
 0x61f   : > { %5302 = vmatpush.msra.mxu1 %v13862_v5  ;;  %5412 = vmatpush.msra.mxu3 %v11995_v58 }
 0x620   : > { %5255 = vmatpush.msra.mxu0 %v13865_v57  ;;  %5355 = vmatpush.msra.mxu2 %v13868_v18 }
 0x621   : > { %5304 = vmatpush.msra.mxu1 %v11995_v58  ;;  %5414 = vmatpush.msra.mxu3 %v12011_v3  ;;  %v13870_v58 = vand.u32 4294901760, %v12077_v60 }
 0x622   : > { %5258 = vmatpush.msra.mxu0 %v13867_v40  ;;  %5359 = vmatpush.msra.mxu2 %v13869_v39  ;;  %v447_v40 = vld [vmem:[%s8351_s22 + $0xf8] sm:$0xff] }
 0x623   : > { %5306 = vmatpush.msra.mxu1 %v12011_v3  ;;  %5416 = vmatpush.msra.mxu3 %v12022_v46  ;;  %v13871_v3 = vand.u32 4294901760, %v12085_v36 }
 0x624   : > { %5261 = vmatpush.msra.mxu0 %v12060_v31  ;;  %5363 = vmatpush.msra.mxu2 %v13870_v58  ;;  %v503_v31 = vld [vmem:[%s8351_s22 + $0x2b8] sm:$0xff] }
 0x625   : > { %5308 = vmatpush.msra.mxu1 %v12022_v46  ;;  %5418 = vmatpush.msra.mxu3 %v12035_v19 }
 0x626   : > { %5264 = vmatpush.msra.mxu0 %v12077_v60  ;;  %5367 = vmatpush.msra.mxu2 %v13871_v3  ;;  %v543_v60 = vld [vmem:[%s8351_s22 + $0x3f8] sm:$0xff] }
 0x627   : > { %5310 = vmatpush.msra.mxu1 %v12035_v19  ;;  %5420 = vmatpush.msra.mxu3 %v12053_v30  ;;  %v535_v19 = vld [vmem:[%s8351_s22 + $0x3b8] sm:$0xff] }
 0x628   : > { %5267 = vmatpush.msra.mxu0 %v12085_v36  ;;  %5371 = vmatpush.msra.mxu2 %v5190_v43  ;;  %v12307_v36 = vand.u32 4294901760, %v543_v60 }
 0x629   : > { %5312 = vmatpush.msra.mxu1 %v12053_v30  ;;  %5422 = vmatpush.msra.mxu3 %v12062_v15  ;;  %v12315_v30 = vand.u32 4294901760, %v535_v19 }
 0x62a   : > { %5270 = vmatpush.msra.mxu0 %v12099_v49  ;;  %5375 = vmatpush.msra.mxu2 %v5196_v51  ;;  %v12324_v46 = vsub.f32 %v543_v60, %v12307_v36  ;;  %v511_v49 = vld [vmem:[%s8351_s22 + $0x2f8] sm:$0xff]  ;;  %v12353_v51 = vand.u32 4294901760, %v503_v31  ;;  %v12456_v60 = vand.u32 4294901760, %v455_v33 }
 0x62b   : > { %5314 = vmatpush.msra.mxu1 %v12062_v15  ;;  %5424 = vmatpush.msra.mxu3 %v12072_v35  ;;  %v527_v15 = vld [vmem:[%s8351_s22 + $0x378] sm:$0xff]  ;;  %v12349_v43 = vand.u32 4294901760, %v511_v49 }
 0x62c   : > { %5273 = vmatpush.msra.mxu0 %v12118_v26  ;;  %5379 = vmatpush.msra.mxu2 %v5202_v28  ;;  %v13426_v26 = vand.u32 4294901760, %v12324_v46 }
 0x62d   : > { %5316 = vmatpush.msra.mxu1 %v12072_v35  ;;  %5426 = vmatpush.msra.mxu3 %v12087_v50  ;;  %v519_v35 = vld [vmem:[%s8351_s22 + $0x338] sm:$0xff] }
 0x62e   : > { %5276 = vmatpush.msra.mxu0 %v12132_v44  ;;  %5383 = vmatpush.msra.mxu2 %v5208_v37  ;;  %v12337_v44 = vand.u32 4294901760, %v519_v35 }
 0x62f   : > { %5318 = vmatpush.msra.mxu1 %v12087_v50  ;;  %5428 = vmatpush.msra.mxu3 %v12104_v52  ;;  %v12326_v50 = vand.u32 4294901760, %v527_v15 }
 0x630   : > { %5279 = vmatpush.msra.mxu0 %v12146_v24  ;;  %5387 = vmatpush.msra.mxu2 %v5214_v47  ;;  %v495_v24 = vld [vmem:[%s8351_s22 + $0x278] sm:$0xff]  ;;  %v12361_v28 = vsub.f32 %v519_v35, %v12337_v44 }
 0x631   : > { %5320 = vmatpush.msra.mxu1 %v12104_v52  ;;  %5430 = vmatpush.msra.mxu3 %v12120_v32  ;;  %v12335_v52 = vsub.f32 %v535_v19, %v12315_v30  ;;  %v12376_v47 = vand.u32 4294901760, %v495_v24 }
 0x632   : > { %5282 = vmatpush.msra.mxu0 %v12159_v10  ;;  %5391 = vmatpush.msra.mxu2 %v5220_v4  ;;  %v487_v10 = vld [vmem:[%s8351_s22 + $0x238] sm:$0xff]  ;;  %v12379_v4 = vpop.f32.mrf.mxu0  ;;  %v13423_v1 = vand.u32 4294901760, %v12361_v28 }
 0x633   : > { %5322 = vmatpush.msra.mxu1 %v12120_v32  ;;  %5432 = vmatpush.msra.mxu3 %v12134_v17  ;;  %v12347_v32 = vsub.f32 %v527_v15, %v12326_v50  ;;  %13872 = vst [vmem:[#allocation63_spill] sm:$0xff] %v12379_v4  ;;  %v12394_v59 = vand.u32 4294901760, %v487_v10  ;;  %v12408_v53 = vsub.f32 %v495_v24, %v12376_v47  ;;  %v439_v15 = vld [vmem:[%s8351_s22 + $0xb8] sm:$0xff]  ;;  %v12469_v24 = vand.u32 4294901760, %v447_v40 }
 0x634   : > { %5285 = vmatpush.msra.mxu0 %v12173_v55  ;;  %5395 = vmatpush.msra.mxu2 %v5226_v11  ;;  %v12374_v55 = vsub.f32 %v511_v49, %v12349_v43  ;;  %v12386_v11 = vpop.f32.mrf.mxu1  ;;  %v5508_v29 = vsub.f32 %v12361_v28, %v13423_v1  ;;  %v639_v4 = vld [vmem:[%s8351_s22 + $0x6f8] sm:$0xff] }
 0x635   : > { %5324 = vmatpush.msra.mxu1 %v12134_v17  ;;  %5434 = vmatpush.msra.mxu3 %v12148_v62  ;;  %v13425_v17 = vand.u32 4294901760, %v12335_v52  ;;  %v13424_v37 = vand.u32 4294901760, %v12347_v32  ;;  %13874 = vst [vmem:[#allocation62_spill] sm:$0xff] %v12386_v11  ;;  %v12422_v54 = vsub.f32 %v487_v10, %v12394_v59  ;;  %v13418_v5 = vand.u32 4294901760, %v12408_v53 }
 0x636   : > { %5288 = vmatpush.msra.mxu0 %v12186_v56  ;;  %5399 = vmatpush.msra.mxu2 %v5232_v34  ;;  %v479_v56 = vld [vmem:[%s8351_s22 + $0x1f8] sm:$0xff]  ;;  %v13421_v14 = vand.u32 4294901760, %v12374_v55  ;;  %v5509_v39 = vand.u32 4294901760, %v5508_v29 }
 0x637   : > { %5326 = vmatpush.msra.mxu1 %v12148_v62  ;;  %5436 = vmatpush.msra.mxu3 %v12161_v2  ;;  %v5490_v62 = vsub.f32 %v12324_v46, %v13426_v26  ;;  %v5496_v34 = vsub.f32 %v12335_v52, %v13425_v17  ;;  %v12398_v23 = vand.u32 4294901760, %v479_v56  ;;  %v5502_v22 = vsub.f32 %v12347_v32, %v13424_v37  ;;  %v655_v17 = vld [vmem:[%s8351_s22 + $0x778] sm:$0xff] }
 0x638   : > { %5291 = vmatpush.msra.mxu0 %v12199_v42  ;;  %5403 = vmatpush.msra.mxu2 %v5238_v48  ;;  %v12384_v42 = vsub.f32 %v503_v31, %v12353_v51  ;;  %v471_v48 = vld [vmem:[%s8351_s22 + $0x1b8] sm:$0xff]  ;;  %v5514_v45 = vsub.f32 %v12374_v55, %v13421_v14  ;;  %v13417_v58 = vand.u32 4294901760, %v12422_v54  ;;  %v5526_v49 = vsub.f32 %v12408_v53, %v13418_v5 }
 0x639   : > { %5328 = vmatpush.msra.mxu1 %v12161_v2  ;;  %5438 = vmatpush.msra.mxu3 %v12175_v63  ;;  %v13873_v2 = vld [vmem:[#allocation40_spill] sm:$0xff]  ;;  %v5497_v13 = vand.u32 4294901760, %v5496_v34  ;;  %v12424_v0 = vand.u32 4294901760, %v471_v48  ;;  %v12429_v61 = vsub.f32 %v479_v56, %v12398_v23  ;;  %v5503_v21 = vand.u32 4294901760, %v5502_v22  ;;  %v431_v22 = vld [vmem:[%s8351_s22 + $0x78] sm:$0xff] }
 0x63a   : > { %5142 = vmatmul.f32.vlgmr.msrb.gmra.mxu2 %v13873_v2  ;;  %5294 = vmatpush.msra.mxu0 %v12210_v25  ;;  %v5491_v25 = vand.u32 4294901760, %v5490_v62  ;;  %v13419_v7 = vand.u32 4294901760, %v12384_v42  ;;  %v12441_v57 = vpop.f32.mrf.mxu0  ;;  %v5515_v35 = vand.u32 4294901760, %v5514_v45  ;;  %v12467_v31 = vsub.f32 %v463_v38, %v12439_v8  ;;  %v599_v2 = vld [vmem:[%s8351_s22 + $0x5b8] sm:$0xff] }
 0x63b   : > { %5590 = vmatpush.msrb.mxu2 %v12324_v46  ;;  %5330 = vmatpush.msra.mxu1 %v12175_v63  ;;  %v12410_v63 = vpop.f32.mrf.mxu2  ;;  %13878 = vst [vmem:[#allocation65_spill] sm:$0xff] %v12441_v57  ;;  %v12454_v3 = vsub.f32 %v471_v48, %v12424_v0  ;;  %v13416_v19 = vand.u32 4294901760, %v12429_v61  ;;  %v5532_v56 = vsub.f32 %v12422_v54, %v13417_v58  ;;  %v5527_v29 = vand.u32 4294901760, %v5526_v49  ;;  %v607_v57 = vld [vmem:[%s8351_s22 + $0x5f8] sm:$0xff] }
 0x63c   : > { %5440 = vmatpush.msra.mxu3 %v12188_v27  ;;  %5064 = vmatmul.f32.vlgmr.msrb.gmra.mxu0 %v13864_v12  ;;  %13876 = vst [vmem:[#allocation55_spill] sm:$0xff] %v12410_v63  ;;  %v5520_v6 = vsub.f32 %v12384_v42, %v13419_v7  ;;  %v12449_v18 = vpop.f32.mrf.mxu1  ;;  %v12481_v48 = vsub.f32 %v455_v33, %v12456_v60  ;;  %v13422_v33 = vand.u32 4294901760, %v12467_v31  ;;  %v12500_v45 = vand.u32 4294901760, %v431_v22 }
 0x63d   : > { %5243 = vmatmul.f32.vlgmr.msrb.gmra.mxu3 %v13875_v9  ;;  %5447 = vmatpush.msrb.mxu0 %v12307_v36  ;;  %13879 = vst [vmem:[#allocation66_spill] sm:$0xff] %v12449_v18  ;;  %v13420_v34 = vand.u32 4294901760, %v12454_v3  ;;  %v5538_v38 = vsub.f32 %v12429_v61, %v13416_v19 }
 0x63e   : > { %5593 = vmatpush.msrb.mxu2 %v12335_v52  ;;  %5643 = vmatpush.msrb.mxu3 %v12307_v36  ;;  %v5521_v62 = vand.u32 4294901760, %v5520_v6  ;;  %v423_v6 = vld [vmem:[%s8351_s22 + $0x38] sm:$0xff] }
 0x63f   : > { %5332 = vmatpush.msra.mxu1 %v12188_v27  ;;  %5449 = vmatpush.msrb.mxu0 %v12315_v30  ;;  %v12432_v27 = vpop.f32.mrf.mxu3  ;;  %v5544_v49 = vsub.f32 %v12454_v3, %v13420_v34  ;;  %v5539_v5 = vand.u32 4294901760, %v5538_v38  ;;  %v12524_v34 = vand.u32 4294901760, %v423_v6  ;;  %v12531_v38 = vsub.f32 %v431_v22, %v12500_v45  ;;  %v647_v22 = vld [vmem:[%s8351_s22 + $0x738] sm:$0xff] }
 0x640   : > { %5101 = vmatmul.f32.vlgmr.msrb.gmra.mxu1 %v13864_v12  ;;  %13877 = vst [vmem:[#allocation64_spill] sm:$0xff] %v12432_v27  ;;  %5596 = vmatpush.msrb.mxu2 %v12347_v32  ;;  %v12559_v27 = vand.u32 4294901760, %v655_v17  ;;  %v12570_v11 = vand.u32 4294901760, %v647_v22 }
 0x641   : > { %5492 = vmatpush.msrb.mxu1 %v5491_v25  ;;  %5645 = vmatpush.msrb.mxu3 %v12315_v30  ;;  %v12483_v25 = vand.u32 4294901760, %v439_v15  ;;  %13884 = vst [vmem:[#allocation71_spill] sm:$0xff] %v12524_v34 }
 0x642   : > { %5451 = vmatpush.msrb.mxu0 %v12326_v50  ;;  %5599 = vmatpush.msrb.mxu2 %v12361_v28  ;;  %v12512_v58 = vpop.f32.mrf.mxu0 }
 0x643   : > { %5498 = vmatpush.msrb.mxu1 %v5497_v13  ;;  %5647 = vmatpush.msrb.mxu3 %v12326_v50  ;;  %v12471_v10 = vpop.f32.mrf.mxu2  ;;  %v12510_v19 = vsub.f32 %v439_v15, %v12483_v25  ;;  %13882 = vst [vmem:[#allocation69_spill] sm:$0xff] %v12512_v58  ;;  %v623_v58 = vld [vmem:[%s8351_s22 + $0x678] sm:$0xff] }
 0x644   : > { %5453 = vmatpush.msrb.mxu0 %v12337_v44  ;;  %5602 = vmatpush.msrb.mxu2 %v12374_v55  ;;  %13880 = vst [vmem:[#allocation67_spill] sm:$0xff] %v12471_v10  ;;  %v12517_v7 = vpop.f32.mrf.mxu1  ;;  %v12619_v18 = vand.u32 4294901760, %v623_v58 }
 0x645   : > { %5504 = vmatpush.msrb.mxu1 %v5503_v21  ;;  %5649 = vmatpush.msrb.mxu3 %v12337_v44  ;;  %v12496_v21 = vsub.f32 %v447_v40, %v12469_v24  ;;  %v13427_v40 = vand.u32 4294901760, %v12481_v48  ;;  %13883 = vst [vmem:[#allocation70_spill] sm:$0xff] %v12517_v7  ;;  %v12596_v7 = vsub.f32 %v647_v22, %v12570_v11 }
 0x646   : > { %5455 = vmatpush.msrb.mxu0 %v12349_v43  ;;  %5605 = vmatpush.msrb.mxu2 %v12384_v42 }
 0x647   : > { %5510 = vmatpush.msrb.mxu1 %v5509_v39  ;;  %5651 = vmatpush.msrb.mxu3 %v12349_v43  ;;  %v12491_v13 = vpop.f32.mrf.mxu3  ;;  %v671_v39 = vld [vmem:[%s8351_s22 + $0x7f8] sm:$0xff]  ;;  %v13428_v15 = vand.u32 4294901760, %v12496_v21  ;;  %13895 = vst [vmem:[#allocation80_spill] sm:$0xff] %v12596_v7 }
 0x648   : > { %5457 = vmatpush.msrb.mxu0 %v12353_v51  ;;  %13881 = vst [vmem:[#allocation68_spill] sm:$0xff] %v12491_v13  ;;  %5608 = vmatpush.msrb.mxu2 %v12408_v53  ;;  %v12526_v14 = vand.u32 4294901760, %v671_v39 }
 0x649   : > { %5516 = vmatpush.msrb.mxu1 %v5515_v35  ;;  %5653 = vmatpush.msrb.mxu3 %v12353_v51  ;;  %v5533_v35 = vand.u32 4294901760, %v5532_v56  ;;  %v5550_v56 = vsub.f32 %v12467_v31, %v13422_v33  ;;  %v5556_v33 = vsub.f32 %v12481_v48, %v13427_v40  ;;  %v12551_v40 = vsub.f32 %v423_v6, %v12524_v34 }
 0x64a   : > { %5459 = vmatpush.msrb.mxu0 %v12376_v47  ;;  %5611 = vmatpush.msrb.mxu2 %v12422_v54  ;;  %13885 = vst [vmem:[#allocation72_spill] sm:$0xff] %v12526_v14  ;;  %v12554_v1 = vsub.f32 %v671_v39, %v12526_v14  ;;  %v13889_v6 = vand.u32 4294901760, %v12510_v19 }
 0x64b   : > { %5522 = vmatpush.msrb.mxu1 %v5521_v62  ;;  %5655 = vmatpush.msrb.mxu3 %v12376_v47  ;;  %v663_v62 = vld [vmem:[%s8351_s22 + $0x7b8] sm:$0xff]  ;;  %v12541_v26 = vpop.f32.mrf.mxu2 }
 0x64c   : > { %5461 = vmatpush.msrb.mxu0 %v12394_v59  ;;  %5614 = vmatpush.msrb.mxu2 %v12429_v61  ;;  %v12538_v37 = vand.u32 4294901760, %v663_v62  ;;  %13887 = vst [vmem:[#allocation74_spill] sm:$0xff] %v12541_v26  ;;  %v5568_v39 = vsub.f32 %v12510_v19, %v13889_v6  ;;  %v631_v6 = vld [vmem:[%s8351_s22 + $0x6b8] sm:$0xff] }
 0x64d   : > { %5528 = vmatpush.msrb.mxu1 %v5527_v29  ;;  %5657 = vmatpush.msrb.mxu3 %v12394_v59  ;;  %v5545_v29 = vand.u32 4294901760, %v5544_v49  ;;  %v5562_v49 = vsub.f32 %v12496_v21, %v13428_v15  ;;  %v5557_v15 = vand.u32 4294901760, %v5556_v33  ;;  %v12591_v33 = vpop.f32.mrf.mxu1 }
 0x64e   : > { %5463 = vmatpush.msrb.mxu0 %v12398_v23  ;;  %5617 = vmatpush.msrb.mxu2 %v12454_v3  ;;  %13886 = vst [vmem:[#allocation73_spill] sm:$0xff] %v12538_v37  ;;  %v12568_v63 = vsub.f32 %v663_v62, %v12538_v37  ;;  %v13892_v62 = vand.u32 4294901760, %v12531_v38 }
 0x64f   : > { %5534 = vmatpush.msrb.mxu1 %v5533_v35  ;;  %5659 = vmatpush.msrb.mxu3 %v12398_v23  ;;  %v5551_v35 = vand.u32 4294901760, %v5550_v56  ;;  %v12561_v56 = vpop.f32.mrf.mxu3  ;;  %13894 = vst [vmem:[#allocation79_spill] sm:$0xff] %v12591_v33 }
 0x650   : > { %5465 = vmatpush.msrb.mxu0 %v12424_v0  ;;  %5620 = vmatpush.msrb.mxu2 %v12467_v31  ;;  %13888 = vst [vmem:[#allocation75_spill] sm:$0xff] %v12561_v56  ;;  %v12579_v56 = vpop.f32.mrf.mxu0  ;;  %v5574_v26 = vsub.f32 %v12531_v38, %v13892_v62  ;;  %v13897_v62 = vand.u32 4294901760, %v12551_v40 }
 0x651   : > { %5540 = vmatpush.msrb.mxu1 %v5539_v5  ;;  %5661 = vmatpush.msrb.mxu3 %v12424_v0  ;;  %13890 = vst [vmem:[#allocation76_spill] sm:$0xff] %v12568_v63  ;;  %v5569_v5 = vand.u32 4294901760, %v5568_v39 }
 0x652   : > { %5467 = vmatpush.msrb.mxu0 %v12439_v8  ;;  %5623 = vmatpush.msrb.mxu2 %v12481_v48  ;;  %13891 = vst [vmem:[#allocation77_spill] sm:$0xff] %v12579_v56  ;;  %v5580_v22 = vsub.f32 %v12551_v40, %v13897_v62  ;;  %v615_v56 = vld [vmem:[%s8351_s22 + $0x638] sm:$0xff]  ;;  %v5575_v13 = vand.u32 4294901760, %v5574_v26 }
 0x653   : > { %5546 = vmatpush.msrb.mxu1 %v5545_v29  ;;  %5663 = vmatpush.msrb.mxu3 %v12439_v8  ;;  %v5563_v29 = vand.u32 4294901760, %v5562_v49  ;;  %v12589_v49 = vand.u32 4294901760, %v639_v4  ;;  %v12611_v33 = vpop.f32.mrf.mxu2 }
 0x654   : > { %5469 = vmatpush.msrb.mxu0 %v12456_v60  ;;  %5626 = vmatpush.msrb.mxu2 %v12496_v21  ;;  %13898 = vst [vmem:[#allocation81_spill] sm:$0xff] %v12611_v33 }
 0x655   : > { %5552 = vmatpush.msrb.mxu1 %v5551_v35  ;;  %5665 = vmatpush.msrb.mxu3 %v12456_v60  ;;  %v12587_v35 = vsub.f32 %v655_v17, %v12559_v27  ;;  %v12601_v17 = vand.u32 4294901760, %v631_v6  ;;  %v12617_v10 = vsub.f32 %v639_v4, %v12589_v49  ;;  %v12632_v4 = vand.u32 4294901760, %v615_v56 }
 0x656   : > { %5471 = vmatpush.msrb.mxu0 %v12469_v24  ;;  %5629 = vmatpush.msrb.mxu2 %v12510_v19 }
 0x657   : > { %13893 = vst [vmem:[#allocation78_spill] sm:$0xff] %v12587_v35  ;;  %5558 = vmatpush.msrb.mxu1 %v5557_v15  ;;  %5667 = vmatpush.msrb.mxu3 %v12469_v24  ;;  %v13896_v15 = vand.u32 4294901760, %v12554_v1  ;;  %v12630_v26 = vsub.f32 %v631_v6, %v12601_v17  ;;  %v13901_v33 = vand.u32 4294901760, %v12587_v35  ;;  %v12659_v12 = vsub.f32 %v615_v56, %v12632_v4 }
 0x658   : > { %5473 = vmatpush.msrb.mxu0 %v12483_v25  ;;  %5632 = vmatpush.msrb.mxu2 %v12531_v38 }
 0x659   : > { %5564 = vmatpush.msrb.mxu1 %v5563_v29  ;;  %v5831_v39 = vsub.f32 %v12554_v1, %v13896_v15  ;;  %5669 = vmatpush.msrb.mxu3 %v12483_v25  ;;  %v13899_v15 = vand.u32 4294901760, %v12568_v63  ;;  %v12634_v29 = vpop.f32.mrf.mxu3  ;;  %v5843_v6 = vsub.f32 %v12587_v35, %v13901_v33  ;;  %v13904_v33 = vand.u32 4294901760, %v12324_v46  ;;  %v13905_v35 = vld [vmem:[#allocation39_spill] sm:$0xff] }
 0x65a   : > { %5475 = vmatpush.msrb.mxu0 %v12500_v45  ;;  %5635 = vmatpush.msrb.mxu2 %v12551_v40  ;;  %13900 = vst [vmem:[#allocation82_spill] sm:$0xff] %v12634_v29  ;;  %v12647_v29 = vand.u32 4294901760, %v607_v57 }
 0x65b   : > { %5570 = vmatpush.msrb.mxu1 %v5569_v5  ;;  %v5837_v62 = vsub.f32 %v12568_v63, %v13899_v15  ;;  %5671 = vmatpush.msrb.mxu3 %v12500_v45  ;;  %v5832_v5 = vand.u32 4294901760, %v5831_v39  ;;  %v5581_v15 = vand.u32 4294901760, %v5580_v22  ;;  %v12645_v63 = vsub.f32 %v623_v58, %v12619_v18 }
 0x65c   : > { %5405 = vmatmul.f32.vlgmr.msra.gmra.mxu2 %v13875_v9  ;;  %5477 = vmatpush.msrb.mxu0 %v12524_v34  ;;  %v13903_v39 = vand.u32 4294901760, %v12596_v7  ;;  %v5844_v46 = vand.u32 4294901760, %v5843_v6  ;;  %v13909_v6 = vand.u32 4294901760, %v12630_v26 }
 0x65d   : > { %5788 = vmatpush.msra.mxu2 %v12526_v14  ;;  %5576 = vmatpush.msrb.mxu1 %v5575_v13  ;;  %v3438_v14 = vpop.f32.mrf.mxu0  ;;  %v5838_v13 = vand.u32 4294901760, %v5837_v62  ;;  %v13442_v56 = vand.u32 4294901760, %v12645_v63 }
 0x65e   : > { %5673 = vmatpush.msrb.mxu3 %v12524_v34  ;;  %5297 = vmatmul.f32.vlgmr.msra.gmra.mxu0 %v13902_v20  ;;  %v5849_v22 = vsub.f32 %v12596_v7, %v13903_v39  ;;  %v3539_v34 = vpop.f32.mrf.mxu1  ;;  %v12661_v20 = vand.u32 4294901760, %v599_v2  ;;  %v13906_v39 = vand.u32 4294901760, %v12335_v52  ;;  %v12672_v7 = vsub.f32 %v607_v57, %v12647_v29 }
 0x65f   : > { %5442 = vmatmul.f32.vlgmr.msra.gmra.mxu3 %v13875_v9  ;;  %5684 = vmatpush.msra.mxu0 %v13904_v33  ;;  %v591_v9 = vld [vmem:[%s8351_s22 + $0x578] sm:$0xff]  ;;  %v3540_v62 = vadd.f32 %v3539_v34, %v3438_v14  ;;  %v13907_v33 = vand.u32 4294901760, %v12617_v10  ;;  %v3593_v14 = vpop.f32.mrf.mxu2  ;;  %v5861_v57 = vsub.f32 %v12630_v26, %v13909_v6 }
 0x660   : > { %5790 = vmatpush.msra.mxu2 %v12538_v37  ;;  %5833 = vmatpush.msra.mxu3 %v5832_v5  ;;  %v583_v37 = vld [vmem:[%s8351_s22 + $0x538] sm:$0xff]  ;;  %v12677_v34 = vand.u32 4294901760, %v591_v9  ;;  %v13908_v5 = vand.u32 4294901760, %v12347_v32 }
 0x661   : > { %5582 = vmatpush.msrb.mxu1 %v5581_v15  ;;  %5688 = vmatpush.msra.mxu0 %v13906_v39  ;;  %v5855_v58 = vsub.f32 %v12617_v10, %v13907_v33  ;;  %v3594_v52 = vadd.f32 %v3593_v14, %v3540_v62  ;;  %v5850_v15 = vand.u32 4294901760, %v5849_v22  ;;  %v12686_v33 = vsub.f32 %v599_v2, %v12661_v20  ;;  %v3632_v32 = vpop.f32.mrf.mxu3  ;;  %v567_v6 = vld [vmem:[%s8351_s22 + $0x4b8] sm:$0xff] }
 0x662   : > { %5336 = vmatmul.f32.vlgmr.msra.gmra.mxu1 %v13905_v35  ;;  %5792 = vmatpush.msra.mxu2 %v12559_v27  ;;  %v12691_v62 = vand.u32 4294901760, %v583_v37  ;;  %v13910_v22 = vand.u32 4294901760, %v12361_v28  ;;  %v5867_v2 = vsub.f32 %v12645_v63, %v13442_v56  ;;  %v12703_v39 = vsub.f32 %v591_v9, %v12677_v34 }
 0x663   : > { %5751 = vmatpush.msra.mxu1 %v12307_v36  ;;  %5839 = vmatpush.msra.mxu3 %v5838_v13  ;;  %v575_v36 = vld [vmem:[%s8351_s22 + $0x4f8] sm:$0xff]  ;;  %v7202_v13 = vpop.xlane.xlu1 %7201  ;;  %v5856_v14 = vand.u32 4294901760, %v5855_v58  ;;  %v13911_v28 = vand.u32 4294901760, %v12374_v55  ;;  %v5862_v58 = vand.u32 4294901760, %v5861_v57  ;;  %v12722_v9 = vand.u32 4294901760, %v567_v6 }
 0x664   : > { %5692 = vmatpush.msra.mxu0 %v13908_v5  ;;  %5794 = vmatpush.msra.mxu2 %v12570_v11  ;;  %v13913_v5 = vand.u32 4294901760, %v12659_v12  ;;  %v12720_v55 = vsub.f32 %v583_v37, %v12691_v62  ;;  %v13914_v57 = vand.u32 4294901760, %v12384_v42 }
 0x665   : > { %5753 = vmatpush.msra.mxu1 %v12315_v30  ;;  %5845 = vmatpush.msra.mxu3 %v5844_v46  ;;  %v3633_v30 = vadd.f32 %v3632_v32, %v3594_v52  ;;  %v12705_v46 = vand.u32 4294901760, %v575_v36  ;;  %v559_v32 = vld [vmem:[%s8351_s22 + $0x478] sm:$0xff]  ;;  %v3701_v35 = vpop.f32.mrf.mxu0 }
 0x666   : > { %5696 = vmatpush.msra.mxu0 %v13910_v22  ;;  %5796 = vmatpush.msra.mxu2 %v12589_v49  ;;  %v13912_v22 = vld [vmem:[#allocation22_spill] sm:$0xff]  ;;  %v5873_v52 = vsub.f32 %v12659_v12, %v13913_v5  ;;  %v13915_v5 = vand.u32 4294901760, %v12672_v7 }
 0x667   : > { %5755 = vmatpush.msra.mxu1 %v12326_v50  ;;  %5851 = vmatpush.msra.mxu3 %v5850_v15  ;;  %v12710_v56 = vmul.f32 %v7202_v13, %v13912_v22  ;;  %v3702_v15 = vadd.f32 %v3701_v35, %v3633_v30  ;;  %v5868_v13 = vand.u32 4294901760, %v5867_v2  ;;  %v3738_v50 = vpop.f32.mrf.mxu1  ;;  %v12733_v37 = vsub.f32 %v575_v36, %v12705_v46  ;;  %v3779_v22 = vpop.f32.mrf.mxu2 }
 0x668   : > { %5700 = vmatpush.msra.mxu0 %v13911_v28  ;;  %5798 = vmatpush.msra.mxu2 %v12601_v17  ;;  %v5879_v28 = vsub.f32 %v12672_v7, %v13915_v5  ;;  %v12735_v35 = vand.u32 4294901760, %v559_v32  ;;  %v13916_v2 = vand.u32 4294901760, %v12408_v53  ;;  %v5874_v30 = vand.u32 4294901760, %v5873_v52 }
 0x669   : > { %5757 = vmatpush.msra.mxu1 %v12337_v44  ;;  %5857 = vmatpush.msra.mxu3 %v5856_v14  ;;  %v5890_v44 = vand.u32 4294901760, %v12703_v39  ;;  %v551_v14 = vld [vmem:[%s8351_s22 + $0x438] sm:$0xff]  ;;  %v3739_v42 = vadd.f32 %v3738_v50, %v3702_v15  ;;  %v7252_v5 = vperm.slane %v12710_v56, 3  ;;  %v7224_v36 = vperm.slane %v12710_v56, 1 }
 0x66a   : > { %5704 = vmatpush.msra.mxu0 %v13914_v57  ;;  %5800 = vmatpush.msra.mxu2 %v12619_v18  ;;  %v13917_v57 = vand.u32 4294901760, %v12686_v33  ;;  %v5896_v50 = vand.u32 4294901760, %v12720_v55  ;;  %v13918_v52 = vand.u32 4294901760, %v12422_v54  ;;  %v5880_v15 = vand.u32 4294901760, %v5879_v28 }
 0x66b   : > { %5759 = vmatpush.msra.mxu1 %v12349_v43  ;;  %5863 = vmatpush.msra.mxu3 %v5862_v58  ;;  %v12749_v58 = vsub.f32 %v567_v6, %v12722_v9  ;;  %v3780_v53 = vadd.f32 %v3779_v22, %v3739_v42  ;;  %v5902_v6 = vand.u32 4294901760, %v12733_v37  ;;  %v12762_v22 = vsub.f32 %v559_v32, %v12735_v35  ;;  %v12768_v42 = vld [vmem:[#allocation7] sm:$0xf] }
 0x66c   : > { %5708 = vmatpush.msra.mxu0 %v13916_v2  ;;  %v5885_v43 = vsub.f32 %v12686_v33, %v13917_v57  ;;  %5802 = vmatpush.msra.mxu2 %v12632_v4  ;;  %v12753_v2 = vand.u32 4294901760, %v551_v14  ;;  %v3880_v57 = vpop.f32.mrf.mxu3  ;;  %v13919_v54 = vand.u32 4294901760, %v12429_v61  ;;  %v5897_v32 = vsub.f32 %v12720_v55, %v5896_v50 }
 0x66d   : > { %5761 = vmatpush.msra.mxu1 %v12353_v51  ;;  %5869 = vmatpush.msra.mxu3 %v5868_v13  ;;  %v5891_v51 = vsub.f32 %v12703_v39, %v5890_v44  ;;  %v12764_v13 = vadd.f32 %v3880_v57, %v3780_v53  ;;  %v13920_v61 = vand.u32 4294901760, %v12454_v3  ;;  %v13921_v3 = vand.u32 4294901760, %v12467_v31 }
 0x66e   : > { %5712 = vmatpush.msra.mxu0 %v13918_v52  ;;  %5804 = vmatpush.msra.mxu2 %v12647_v29  ;;  %v5886_v28 = vand.u32 4294901760, %v5885_v43  ;;  %v7225_v52 = vmul.f32 %v12768_v42, %v7224_v36  ;;  %v12781_v43 = vsub.f32 %v551_v14, %v12753_v2  ;;  %v5914_v36 = vand.u32 4294901760, %v12762_v22 }
 0x66f   : > { %5763 = vmatpush.msra.mxu1 %v12376_v47  ;;  %5875 = vmatpush.msra.mxu3 %v5874_v30  ;;  %v7253_v47 = vmul.f32 %v12768_v42, %v7252_v5  ;;  %v5908_v30 = vand.u32 4294901760, %v12749_v58  ;;  %v5903_v5 = vsub.f32 %v12733_v37, %v5902_v6  ;;  %v5898_v14 = vand.u32 4294901760, %v5897_v32 }
 0x670   : > { %5716 = vmatpush.msra.mxu0 %v13919_v54  ;;  %5806 = vmatpush.msra.mxu2 %v12661_v20  ;;  %v5920_v53 = vand.u32 4294901760, %v12781_v43  ;;  %v5915_v31 = vsub.f32 %v12762_v22, %v5914_v36  ;;  %v13927_v32 = vand.u32 4294901760, %v12554_v1 }
 0x671   : > { %5765 = vmatpush.msra.mxu1 %v12394_v59  ;;  %5881 = vmatpush.msra.mxu3 %v5880_v15  ;;  %v5892_v59 = vand.u32 4294901760, %v5891_v51  ;;  %v13922_v15 = vand.u32 4294901760, %v12481_v48  ;;  %v5904_v57 = vand.u32 4294901760, %v5903_v5  ;;  %v7238_v51 = vperm.slane %v12710_v56, 2  ;;  %v13933_v5 = vld [vmem:[#allocation37_spill] sm:$0xff] }
 0x672   : > { %5720 = vmatpush.msra.mxu0 %v13920_v61  ;;  %5808 = vmatpush.msra.mxu2 %v12677_v34  ;;  %v5921_v48 = vsub.f32 %v12781_v43, %v5920_v53 }
 0x673   : > { %5767 = vmatpush.msra.mxu1 %v12398_v23  ;;  %5887 = vmatpush.msra.mxu3 %v5886_v28  ;;  %v5909_v23 = vsub.f32 %v12749_v58, %v5908_v30  ;;  %v13924_v28 = vand.u32 4294901760, %v12510_v19 }
 0x674   : > { %7255 = vrot.lane.b32.xlu1 %v7253_v47, %s8159_s2  ;;  %7227 = vrot.lane.b32.xlu2 %v7225_v52, %s8157_s23  ;;  %v5916_v47 = vand.u32 4294901760, %v5915_v31  ;;  %v5922_v52 = vand.u32 4294901760, %v5921_v48  ;;  %v13949_v48 = vld [vmem:[#allocation29_spill] sm:$0xff] }
 0x675   : > { %5724 = vmatpush.msra.mxu0 %v13921_v3  ;;  %5769 = vmatpush.msra.mxu1 %v12424_v0  ;;  %v13923_v0 = vand.u32 4294901760, %v12496_v21  ;;  %v5910_v54 = vand.u32 4294901760, %v5909_v23  ;;  %v13925_v21 = vand.u32 4294901760, %v12531_v38  ;;  %v13929_v38 = vld [vmem:[#allocation76_spill] sm:$0xff] }
 0x676   : > { %5810 = vmatpush.msra.mxu2 %v12691_v62  ;;  %5893 = vmatpush.msra.mxu3 %v5892_v59  ;;  %v13930_v61 = vand.u32 4294901760, %v13929_v38  ;;  %v13932_v59 = vld [vmem:[#allocation71_spill] sm:$0xff] }
 0x677   : > { %5728 = vmatpush.msra.mxu0 %v13922_v15  ;;  %5771 = vmatpush.msra.mxu1 %v12439_v8  ;;  %v7239_v8 = vmul.f32 %v12768_v42, %v7238_v51  ;;  %v13939_v15 = vand.u32 4294901760, %v12617_v10 }
 0x678   : > { %5812 = vmatpush.msra.mxu2 %v12705_v46  ;;  %5899 = vmatpush.msra.mxu3 %v5898_v14 }
 0x679   : > { %5732 = vmatpush.msra.mxu0 %v13923_v0  ;;  %5773 = vmatpush.msra.mxu1 %v12456_v60  ;;  %v12820_v60 = vpop.xlane.xlu0 %7212 }
 0x67a   : > { %5814 = vmatpush.msra.mxu2 %v12722_v9  ;;  %5905 = vmatpush.msra.mxu3 %v5904_v57  ;;  %v7217_v19 = vperm.slane %v12820_v60, 0  ;;  %v7231_v23 = vperm.slane %v12820_v60, 1  ;;  %v13940_v57 = vand.u32 4294901760, %v12630_v26 }
 0x67b   : > { %5736 = vmatpush.msra.mxu0 %v13924_v28  ;;  %5775 = vmatpush.msra.mxu1 %v12469_v24  ;;  %v13926_v24 = vand.u32 4294901760, %v12551_v40  ;;  %v6330_v28 = vsel %vm6140_vm0, %v13949_v48, 0.0  ;;  %v13967_v48 = vld [vmem:[#allocation44_spill] sm:$0xff] }
 0x67c   : > { %5816 = vmatpush.msra.mxu2 %v12735_v35  ;;  %5911 = vmatpush.msra.mxu3 %v5910_v54  ;;  %v7218_v40 = vmul.f32 %v12768_v42, %v7217_v19  ;;  %v7232_v51 = vmul.f32 %v12768_v42, %v7231_v23  ;;  %v13955_v23 = vld [vmem:[#allocation69_spill] sm:$0xff] }
 0x67d   : > { %7241 = vrot.lane.b32.xlu2 %v7239_v8, %s8153_s11  ;;  %5740 = vmatpush.msra.mxu0 %v13925_v21  ;;  %v13950_v8 = vld [vmem:[#allocation30_spill] sm:$0xff] }
 0x67e   : > { %5777 = vmatpush.msra.mxu1 %v12483_v25  ;;  %5818 = vmatpush.msra.mxu2 %v12753_v2  ;;  %v13928_v25 = vld [vmem:[#allocation35_spill] sm:$0xff] }
 0x67f   : > { %5917 = vmatpush.msra.mxu3 %v5916_v47  ;;  %5638 = vmatmul.f32.vlgmr.msrb.gmra.mxu2 %v8914_v41  ;;  %v13931_v41 = vld [vmem:[#allocation72_spill] sm:$0xff]  ;;  %v6331_v47 = vsel %vm6140_vm0, %v13950_v8, 0.0  ;;  %v13968_v8 = vld [vmem:[#allocation62_spill] sm:$0xff] }
 0x680   : > { %5744 = vmatpush.msra.mxu0 %v13926_v24  ;;  %6025 = vmatpush.msrb.mxu2 %v13927_v32  ;;  %v6332_v19 = vadd.f32 %v6331_v47, %v6330_v28 }
 0x681   : > { %5779 = vmatpush.msra.mxu1 %v12500_v45  ;;  %5923 = vmatpush.msra.mxu3 %v5922_v52  ;;  %v13934_v45 = vld [vmem:[#allocation78_spill] sm:$0xff] }
 0x682   : > { %5483 = vmatmul.f32.vlgmr.msrb.gmra.mxu0 %v13794_v16  ;;  %5677 = vmatmul.f32.vlgmr.msrb.gmra.mxu3 %v13928_v25  ;;  %v13935_v3 = vand.u32 4294901760, %v13934_v45  ;;  %v13936_v16 = vld [vmem:[#allocation73_spill] sm:$0xff] }
 0x683   : > { %5931 = vmatpush.msrb.mxu0 %v12554_v1  ;;  %6029 = vmatpush.msrb.mxu2 %v13930_v61  ;;  %v13937_v1 = vld [vmem:[#allocation80_spill] sm:$0xff]  ;;  %v13951_v61 = vld [vmem:[#allocation65_spill] sm:$0xff] }
 0x684   : > { %6092 = vmatpush.msrb.mxu3 %v13931_v41  ;;  %5781 = vmatpush.msra.mxu1 %v13932_v59  ;;  %v13938_v14 = vand.u32 4294901760, %v13937_v1  ;;  %v13953_v59 = vld [vmem:[#allocation67_spill] sm:$0xff] }
 0x685   : > { %5934 = vmatpush.msrb.mxu0 %v13929_v38  ;;  %5584 = vmatmul.f32.vlgmr.msrb.gmra.mxu1 %v13933_v5 }
 0x686   : > { %6033 = vmatpush.msrb.mxu2 %v13935_v3  ;;  %5984 = vmatpush.msrb.mxu1 %v13931_v41  ;;  %v13952_v41 = vld [vmem:[#allocation66_spill] sm:$0xff]  ;;  %v7214_v3 = vperm.slane %v12710_v56, 0 }
 0x687   : > { %6094 = vmatpush.msrb.mxu3 %v13936_v16  ;;  %7220 = vrot.lane.b32.xlu2 %v7218_v40, %s8155_s4  ;;  %v2858_v40 = vadd.f32 %v13952_v41, %v13951_v61  ;;  %v13970_v61 = vld [vmem:[#allocation57_spill] sm:$0xff] }
 0x688   : > { %5937 = vmatpush.msrb.mxu0 %v13934_v45  ;;  %5986 = vmatpush.msrb.mxu1 %v13936_v16  ;;  %v13954_v16 = vld [vmem:[#allocation68_spill] sm:$0xff] }
 0x689   : > { %6037 = vmatpush.msrb.mxu2 %v13938_v14  ;;  %6096 = vmatpush.msrb.mxu3 %v12559_v27  ;;  %v7215_v14 = vmul.f32 %v12768_v42, %v7214_v3  ;;  %v13973_v3 = vld [vmem:[#allocation81_spill] sm:$0xff] }
 0x68a   : > { %5940 = vmatpush.msrb.mxu0 %v13937_v1  ;;  %5988 = vmatpush.msrb.mxu1 %v12559_v27  ;;  %v13941_v27 = vand.u32 4294901760, %v12645_v63 }
 0x68b   : > { %6041 = vmatpush.msrb.mxu2 %v13939_v15  ;;  %6098 = vmatpush.msrb.mxu3 %v12570_v11 }
 0x68c   : > { %5943 = vmatpush.msrb.mxu0 %v12617_v10  ;;  %5990 = vmatpush.msrb.mxu1 %v12570_v11  ;;  %v13942_v11 = vand.u32 4294901760, %v12659_v12  ;;  %v7245_v10 = vperm.slane %v12820_v60, 2 }
 0x68d   : > { %6045 = vmatpush.msrb.mxu2 %v13940_v57  ;;  %6100 = vmatpush.msrb.mxu3 %v12589_v49  ;;  %v7914_v57 = vld [vmem:[%s13177_s3] sm:$0xf] }
 0x68e   : > { %5946 = vmatpush.msrb.mxu0 %v12630_v26  ;;  %5992 = vmatpush.msrb.mxu1 %v12589_v49  ;;  %v13943_v49 = vand.u32 4294901760, %v12672_v7  ;;  %v6132_v26 = vld [vmem:[%s13181_s7] sm:$0xf] }
 0x68f   : > { %6049 = vmatpush.msrb.mxu2 %v13941_v27  ;;  %6102 = vmatpush.msrb.mxu3 %v12601_v17 }
 0x690   : > { %7234 = vrot.lane.b32.xlu2 %v7232_v51, %s8156_s6  ;;  %5949 = vmatpush.msrb.mxu0 %v12645_v63  ;;  %v13944_v63 = vand.u32 4294901760, %v12686_v33  ;;  %v7216_v51 = vadd.f32 %v7914_v57, %v7215_v14  ;;  %v13974_v57 = vld [vmem:[#allocation58_spill] sm:$0xff]  ;;  %s7531_s6 = scalar_lea.sflag [#allocation4], %s8337_s13 }
 0x691   : > { %5994 = vmatpush.msrb.mxu1 %v12601_v17  ;;  %6053 = vmatpush.msrb.mxu2 %v13942_v11  ;;  %v13956_v11 = vld [vmem:[#allocation70_spill] sm:$0xff] }
 0x692   : > { %6104 = vmatpush.msrb.mxu3 %v12619_v18  ;;  %5952 = vmatpush.msrb.mxu0 %v12659_v12  ;;  %v7246_v12 = vmul.f32 %v12768_v42, %v7245_v10 }
 0x693   : > { %5996 = vmatpush.msrb.mxu1 %v12619_v18  ;;  %6057 = vmatpush.msrb.mxu2 %v13943_v49  ;;  %v7259_v18 = vperm.slane %v12820_v60, 3 }
 0x694   : > { %6106 = vmatpush.msrb.mxu3 %v12632_v4  ;;  %5955 = vmatpush.msrb.mxu0 %v12672_v7  ;;  %v13945_v7 = vld [vmem:[#allocation40_spill] sm:$0xff] }
 0x695   : > { %5998 = vmatpush.msrb.mxu1 %v12632_v4  ;;  %6061 = vmatpush.msrb.mxu2 %v13944_v63  ;;  %v7260_v17 = vmul.f32 %v12768_v42, %v7259_v18  ;;  %v13948_v4 = vld [vmem:[#allocation39_spill] sm:$0xff] }
 0x696   : > { %6108 = vmatpush.msrb.mxu3 %v12647_v29  ;;  %5958 = vmatpush.msrb.mxu0 %v12686_v33  ;;  %v12941_v33 = vpop.f32.mrf.mxu2  ;;  %v13958_v42 = vld [vmem:[#allocation75_spill] sm:$0xff] }
 0x697   : > { %6000 = vmatpush.msrb.mxu1 %v12647_v29  ;;  %6065 = vmatpush.msrb.mxu2 %v5890_v44  ;;  %v13947_v29 = vld [vmem:[#allocation38_spill] sm:$0xff] }
 0x698   : > { %6110 = vmatpush.msrb.mxu3 %v12661_v20  ;;  %7248 = vrot.lane.b32.xlu2 %v7246_v12, %s8154_s24  ;;  %v13957_v12 = vld [vmem:[#allocation74_spill] sm:$0xff]  ;;  %s7543_s24 = scalar_lea.hbm %s13182_s8, %s7719_s19 }
 0x699   : > { %5961 = vmatpush.msrb.mxu0 %v12703_v39  ;;  %6002 = vmatpush.msrb.mxu1 %v12661_v20  ;;  %v13946_v20 = vld [vmem:[#allocation34_spill] sm:$0xff]  ;;  %v12939_v39 = vpop.f32.mrf.mxu1  ;;  %s7546_s4 = sshll.u32 %s7543_s24, 4  ;;  %s7547_s4 = int_to_ptr.hbm [resolvable:$true] %s7546_s4 }
 0x69a   : > { %6069 = vmatpush.msrb.mxu2 %v5896_v50  ;;  %6112 = vmatpush.msrb.mxu3 %v12677_v34  ;;  %s8079_s23 = sshra.s32 %s7547_s4, 4  ;;  %s8080_s23 = int_to_ptr.hbm [resolvable:$true] %s8079_s23 }
 0x69b   : > { %5824 = vmatmul.f32.vlgmr.msra.gmra.mxu2 %v13945_v7  ;;  %5964 = vmatpush.msrb.mxu0 %v12720_v55  ;;  %p8086_p2 = scmp.lt.s32.totalorder %s8080_s23, %s13182_s8 }
 0x69c   : > { %6004 = vmatpush.msrb.mxu1 %v12677_v34  ;;  %6073 = vmatpush.msrb.mxu2 %v5902_v6  ;;  %v12937_v34 = vpop.f32.mrf.mxu0 }
 0x69d   : > { %6114 = vmatpush.msrb.mxu3 %v12691_v62  ;;  %5746 = vmatmul.f32.vlgmr.msra.gmra.mxu0 %v13933_v5 }
 0x69e   : > { %5925 = vmatmul.f32.vlgmr.msra.gmra.mxu3 %v13946_v20  ;;  %5967 = vmatpush.msrb.mxu0 %v12733_v37  ;;  %v12943_v37 = vpop.f32.mrf.mxu3 }
 0x69f   : > { %6006 = vmatpush.msrb.mxu1 %v12691_v62  ;;  %6077 = vmatpush.msrb.mxu2 %v5908_v30 }
 0x6a0   : > { %6116 = vmatpush.msrb.mxu3 %v12705_v46  ;;  %5783 = vmatmul.f32.vlgmr.msra.gmra.mxu1 %v13933_v5  ;;  %v2912_v5 = vadd.f32 %v13953_v59, %v2858_v40  ;;  %v13971_v40 = vld [vmem:[#allocation52_spill] sm:$0xff] }
 0x6a1   : > { %5970 = vmatpush.msrb.mxu0 %v12749_v58  ;;  %6008 = vmatpush.msrb.mxu1 %v12705_v46  ;;  %v4221_v46 = vpop.f32.mrf.mxu1 }
 0x6a2   : > { %6081 = vmatpush.msrb.mxu2 %v5914_v36  ;;  %6118 = vmatpush.msrb.mxu3 %v12722_v9  ;;  %v2951_v1 = vadd.f32 %v13954_v16, %v2912_v5  ;;  %v13972_v5 = vld [vmem:[#allocation55_spill] sm:$0xff] }
 0x6a3   : > { %7262 = vrot.lane.b32.xlu2 %v7260_v17, %s8158_s25  ;;  %5973 = vmatpush.msrb.mxu0 %v12762_v22  ;;  %s8081_s25 = scalar_lea.hbm %s8080_s23, 32 }
 0x6a4   : > { %6010 = vmatpush.msrb.mxu1 %v12722_v9  ;;  %6085 = vmatpush.msrb.mxu2 %v5920_v53  ;;  %v4120_v62 = vpop.f32.mrf.mxu0  ;;  %v4275_v9 = vpop.f32.mrf.mxu2  ;;  %v3020_v15 = vadd.f32 %v13955_v23, %v2951_v1  ;;  %p8082_p1 = scmp.ne.s32.totalorder %s8080_s23, %s8081_s25  ;;  %p8087_p11 = scmp.lt.s32.totalorder %s8085_s20, %s8081_s25 }
 0x6a5   : > { %6120 = vmatpush.msrb.mxu3 %v12735_v35  ;;  %6087 = vmatmul.f32.vlgmr.msrb.gmra.mxu2 %v13946_v20  ;;  %v4222_v55 = vadd.f32 %v4221_v46, %v4120_v62  ;;  %v13959_v62 = vld [vmem:[#allocation54_spill] sm:$0xff]  ;;  %v13960_v46 = vld [vmem:[#allocation51_spill] sm:$0xff] }
 0x6a6   : > { %5976 = vmatpush.msrb.mxu0 %v12781_v43  ;;  %6012 = vmatpush.msrb.mxu1 %v12735_v35  ;;  %v4314_v35 = vpop.f32.mrf.mxu3  ;;  %v3057_v10 = vadd.f32 %v13956_v11, %v3020_v15  ;;  %p8083_p4 = pnand %p8082_p1, %p8285_p7  ;;  %p8088_p9 = por %p8087_p11, %p8086_p2 }
 0x6a7   : > { %6122 = vmatpush.msrb.mxu3 %v12753_v2  ;;  %5979 = vmatmul.f32.vlgmr.msrb.gmra.mxu0 %v13947_v29  ;;  %v4276_v44 = vadd.f32 %v4275_v9, %v4222_v55  ;;  %v1207_v55 = vadd.f32 %v13960_v46, %v13959_v62 }
 0x6a8   : > { %6124 = vmatmul.f32.vlgmr.msrb.gmra.mxu3 %v13946_v20  ;;  %6014 = vmatpush.msrb.mxu1 %v12753_v2  ;;  %v3098_v7 = vadd.f32 %v13957_v12, %v3057_v10  ;;  %v13976_v10 = vld [vmem:[#allocation64_spill] sm:$0xff]  ;;  %p8084_p8 = pneg %p8083_p4 }
 0x6a9   : > { %6018 = vmatmul.f32.vlgmr.msrb.gmra.mxu1 %v13948_v4  ;;  %v4315_v58 = vadd.f32 %v4314_v35, %v4276_v44  ;;  %v4420_v2 = vpop.f32.mrf.mxu1  ;;  %v13961_v44 = vld [vmem:[#allocation59_spill] sm:$0xff]  ;;  %v13962_v35 = vld [vmem:[#allocation53_spill] sm:$0xff] }
 0x6aa   : > { %p8089_p10 = pnand %p8088_p9, %p8084_p8 }
 0x6ab   : > { %6319 = vperm.xlu2 %7828, %v6132_v26   ;;  %v3199_v26 = vadd.f32 %v13958_v42, %v3098_v7 }
 0x6ac   : > { %v4383_v50 = vpop.f32.mrf.mxu0  ;;  %v4461_v6 = vpop.f32.mrf.mxu2 }
 0x6ad   : > { %v4384_v22 = vadd.f32 %v4383_v50, %v4315_v58  ;;  %v1889_v50 = vadd.f32 %v13962_v35, %v13961_v44  ;;  %v13963_v58 = vld [vmem:[#allocation61_spill] sm:$0xff] }
 0x6ae   : > { %v4562_v36 = vpop.f32.mrf.mxu3 }
 0x6af   : > { %v4421_v30 = vadd.f32 %v4420_v2, %v4384_v22  ;;  %v13964_v2 = vld [vmem:[#allocation63_spill] sm:$0xff]  ;;  %v13965_v22 = vld [vmem:[#allocation77_spill] sm:$0xff]  ;;  %v1928_v28 = vadd.f32 %v13967_v48, %v1889_v50 }
 0x6b1   : > { %v4462_v43 = vadd.f32 %v4461_v6, %v4421_v30  ;;  %v4655_v0 = vpop.f32.mrf.mxu1  ;;  %v2571_v6 = vadd.f32 %v13964_v2, %v13963_v58  ;;  %v3253_v30 = vadd.f32 %v13965_v22, %v3199_v26  ;;  %v1997_v59 = vadd.f32 %v13971_v40, %v1928_v28 }
 0x6b3   : > { %v4563_v31 = vadd.f32 %v4562_v36, %v4462_v43  ;;  %v2610_v47 = vadd.f32 %v13968_v8, %v2571_v6 }
 0x6b4   : > { %v4616_v53 = vpop.f32.mrf.mxu0  ;;  %v4724_v21 = vpop.f32.mrf.mxu2 }
 0x6b5   : > { %v4617_v54 = vadd.f32 %v4616_v53, %v4563_v31  ;;  %v13966_v53 = vld [vmem:[#allocation56_spill] sm:$0xff] }
 0x6b6   : > { %v4761_v32 = vpop.f32.mrf.mxu3  ;;  %v1246_v31 = vadd.f32 %v13966_v53, %v1207_v55  ;;  %v13979_v53 = vld [vmem:[#allocation43_spill] sm:$0xff] }
 0x6b7   : > { %v4656_v52 = vadd.f32 %v4655_v0, %v4617_v54 }
 0x6b8   : > { %v1315_v41 = vadd.f32 %v13970_v61, %v1246_v31  ;;  %v7010_v31 = vsel %vm6140_vm0, %v13979_v53, 0.0 }
 0x6b9   : > { %v4725_v24 = vadd.f32 %v4724_v21, %v4656_v52  ;;  %v4903_v63 = vpop.f32.mrf.mxu1 }
 0x6bb   : > { %v12949_v25 = vadd.f32 %v4761_v32, %v4725_v24 }
 0x6bc   : > { %v4802_v56 = vpop.f32.mrf.mxu0  ;;  %v4957_v29 = vpop.f32.mrf.mxu2 }
 0x6bd   : > { %v4904_v24 = vadd.f32 %v4903_v63, %v4802_v56  ;;  %v13977_v63 = vld [vmem:[#allocation82_spill] sm:$0xff] }
 0x6be   : > { %v4996_v9 = vpop.f32.mrf.mxu3 }
 0x6bf   : > { %v4958_v14 = vadd.f32 %v4957_v29, %v4904_v24 }
 0x6c1   : > { %v5102_v36 = vpop.f32.mrf.mxu1  ;;  %v4997_v7 = vadd.f32 %v4996_v9, %v4958_v14 }
 0x6c4   : > { %v5065_v54 = vpop.f32.mrf.mxu0  ;;  %v5143_v32 = vpop.f32.mrf.mxu2 }
 0x6c5   : > { %v5066_v58 = vadd.f32 %v5065_v54, %v4997_v7 }
 0x6c6   : > { %v5244_v23 = vpop.f32.mrf.mxu3 }
 0x6c7   : > { %v5103_v22 = vadd.f32 %v5102_v36, %v5066_v58 }
 0x6ce   : > { %v7228_v60 = vpop.permute.xlu2 %7227 }
 0x6d4   : > { %6333 = vadd.xlane.f32.xlu2 %v6332_v19 }
 0x6d7   : > { %v7242_v38 = vpop.permute.xlu2 %7241 }
 0x6db   : > { %v5298_v56 = vpop.f32.mrf.mxu0 }
 0x6df   : > { %v5337_v15 = vpop.f32.mrf.mxu1  ;;  %v5406_v26 = vpop.f32.mrf.mxu2 }
 0x6e1   : > { %v7221_v45 = vpop.permute.xlu2 %7220 }
 0x6e2   : > { %v7223_v49 = vadd.f32 %v7221_v45, %v7216_v51  ;;  %v2679_v45 = vadd.f32 %v13972_v5, %v2610_v47  ;;  %v1352_v51 = vadd.f32 %v13974_v57, %v1315_v41  ;;  %v5443_v2 = vpop.f32.mrf.mxu3 }
 0x6e4   : > { %v7230_v18 = vadd.f32 %v7228_v60, %v7223_v49  ;;  %v13969_v60 = vld [vmem:[#allocation79_spill] sm:$0xff]  ;;  %v2716_v49 = vadd.f32 %v13976_v10, %v2679_v45 }
 0x6e5   : > { %v3292_v21 = vadd.f32 %v13969_v60, %v3253_v30  ;;  %v13978_v30 = vld [vmem:[#allocation36_spill] sm:$0xff]  ;;  %v5144_v60 = vadd.f32 %v5143_v32, %v5103_v22 }
 0x6e6   : > { %v7256_v0 = vpop.permute.xlu1 %7255 }
 0x6e7   : > { %v3361_v16 = vadd.f32 %v13973_v3, %v3292_v21 }
 0x6e9   : > { %v3398_v12 = vadd.f32 %v13977_v63, %v3361_v16 }
 0x6ea   : > { %v7235_v27 = vpop.permute.xlu2 %7234 }
 0x6eb   : > { %v7237_v20 = vadd.f32 %v7235_v27, %v7230_v18  ;;  %v13975_v27 = vld [vmem:[#allocation60_spill] sm:$0xff] }
 0x6ec   : > { %v2034_v11 = vadd.f32 %v13975_v27, %v1997_v59 }
 0x6ed   : > { %v7244_v4 = vadd.f32 %v7242_v38, %v7237_v20 }
 0x6f2   : > { %v7249_v17 = vpop.permute.xlu2 %7248 }
 0x6f3   : > { %v7251_v43 = vadd.f32 %v7249_v17, %v7244_v4 }
 0x6f5   : > { %v7258_v52 = vadd.f32 %v7256_v0, %v7251_v43  ;;  %v7009_v43 = vsel %vm6140_vm0, %v13978_v30, 0.0  ;;  %v13981_v30 = vld [vmem:[#allocation47_spill] sm:$0xff] }
 0x6f6   : > { %v7011_v8 = vadd.f32 %v7010_v31, %v7009_v43  ;;  %v6670_v43 = vsel %vm6140_vm0, %v13981_v30, 0.0 }
 0x6fd   : > { %v7263_v19 = vpop.permute.xlu2 %7262 }
 0x6fe   : > { %v7265_v38 = vadd.f32 %v7263_v19, %v7258_v52 }
 0x6ff   : > { %v5484_v0 = vpop.f32.mrf.mxu0 }
 0x700   : > { %v7705_v1 = vmul.f32 -1.442695, %v7265_v38  ;;  %v5245_v38 = vadd.f32 %v5244_v23, %v5144_v60 }
 0x702   : > { %7843 = vpow2.f32 %v7705_v1  ;;  %v5585_v6 = vpop.f32.mrf.mxu1  ;;  %v5639_v47 = vpop.f32.mrf.mxu2  ;;  %v5299_v5 = vadd.f32 %v5298_v56, %v5245_v38 }
 0x703   : > { %v5586_v48 = vadd.f32 %v5585_v6, %v5484_v0  ;;  %v13980_v6 = vld [vmem:[#allocation46_spill] sm:$0xff] }
 0x704   : > { %v5338_v1 = vadd.f32 %v5337_v15, %v5299_v5  ;;  %v6669_v22 = vsel %vm6140_vm0, %v13980_v6, 0.0 }
 0x705   : > { %v12983_v18 = vpop.permute.xlu2 %6319  ;;  %v5640_v54 = vadd.f32 %v5639_v47, %v5586_v48  ;;  %v5678_v19 = vpop.f32.mrf.mxu3  ;;  %v6671_v31 = vadd.f32 %v6670_v43, %v6669_v22 }
 0x706   : > { %v12986_v20 = vadd.f32 %v12983_v18, %v2716_v49  ;;  %v12989_v17 = vadd.f32 %v12983_v18, %v3398_v12  ;;  %v12992_v29 = vadd.f32 %v12983_v18, %v1352_v51  ;;  %v12995_v42 = vadd.f32 %v12983_v18, %v2034_v11 }
 0x707   : > { %v5679_v41 = vadd.f32 %v5678_v19, %v5640_v54  ;;  %v5407_v11 = vadd.f32 %v5406_v26, %v5338_v1  ;;  %v13033_v48 = vadd.f32 %v12983_v18, %v12949_v25 }
 0x708   : > { %v7844_v4 = vpop.eup %7843  ;;  %v6675_v62 = vsel %vm6140_vm0, %v12986_v20, 0.0  ;;  %v6676_v46 = vsel %vm6140_vm0, %v12989_v17, 0.0  ;;  %v6336_v55 = vsel %vm6140_vm0, %v12992_v29, 0.0  ;;  %v6337_v9 = vsel %vm6140_vm0, %v12995_v42, 0.0 }
 0x709   : > { %v7269_v44 = vadd.f32 1.0, %v7844_v4  ;;  %v6677_v35 = vadd.f32 %v6676_v46, %v6675_v62  ;;  %v6338_v50 = vadd.f32 %v6337_v9, %v6336_v55  ;;  %v5444_v63 = vadd.f32 %v5443_v2, %v5407_v11 }
 0x70b   : > { %7845 = vrcp.f32 %v7269_v44  ;;  %6678 = vadd.xlane.f32.xlu2 %v6677_v35  ;;  %6339 = vadd.xlane.f32.xlu1 %v6338_v50  ;;  %v7281_v24 = vand.u32 2147483648, %v7269_v44  ;;  %v7279_v61 = vand.u32 2147483647, %v7269_v44  ;;  %vm7275_vm15 = vweird.f32 %v7269_v44 }
 0x70c   : > { %v13010_v62 = vadd.f32 %v12983_v18, %v5444_v63  ;;  %v3935_v50 = vadd.f32 %v12937_v34, %v12764_v13  ;;  %v13982_v34 = vld [vmem:[#allocation22_spill] sm:$0xff] }
 0x70d   : > { %v7282_v59 = vor.u32 1.1754944e-38, %v7281_v24  ;;  %vm7280_vm2 = vcmp.eq.f32.partialorder %v7279_v61, 8.507059e+37 }
 0x70e   : > { %v3974_v58 = vadd.f32 %v12939_v39, %v3935_v50 }
 0x710   : > { %v4043_v2 = vadd.f32 %v12941_v33, %v3974_v58 }
 0x711   : > { %v7846_v28 = vpop.eup %7845 }
 0x712   : > { %v7271_v21 = vmul.f32 %v7846_v28, %v7269_v44  ;;  %vm7276_vm14 = vweird.f32 %v7846_v28  ;;  %v7355_v44 = vsel %vm6140_vm0, %v13010_v62, 0.0  ;;  %v4080_v53 = vadd.f32 %v12943_v37, %v4043_v2 }
 0x713   : > { %7012 = vadd.xlane.f32.xlu1 %v7011_v8  ;;  %vm7277_vm1 = vmor %vm7275_vm15, %vm7276_vm14 }
 0x714   : > { %v7272_v52 = vsub.f32 1.0, %v7271_v21  ;;  %v13029_v0 = vadd.f32 %v12983_v18, %v4080_v53 }
 0x716   : > { %v7273_v36 = vmul.f32 %v7846_v28, %v7272_v52  ;;  %v7015_v33 = vsel %vm6140_vm0, %v13029_v0, 0.0 }
 0x718   : > { %v7274_v40 = vadd.f32 %v7846_v28, %v7273_v36 }
 0x71a   : > { %v7278_v45 = vsel %vm7277_vm1, %v7846_v28, %v7274_v40  ;;  %v5747_v3 = vpop.f32.mrf.mxu0  ;;  %v7016_v28 = vsel %vm6140_vm0, %v13033_v48, 0.0 }
 0x71b   : > { %v7283_v32 = vsel %vm7280_vm2, %v7282_v59, %v7278_v45  ;;  %v5748_v16 = vadd.f32 %v5747_v3, %v5679_v41  ;;  %v7017_v60 = vadd.f32 %v7016_v28, %v7015_v33 }
 0x71c   : > { %7287 = vperm.xlu0 %7827, %v7283_v32  }
 0x71d   : > { %v5784_v14 = vpop.f32.mrf.mxu1 }
 0x71e   : > { %v5825_v57 = vpop.f32.mrf.mxu2  ;;  %v5785_v51 = vadd.f32 %v5784_v14, %v5748_v16 }
 0x720   : > { %v5826_v23 = vadd.f32 %v5825_v57, %v5785_v51 }
 0x721   : > { %v5926_v27 = vpop.f32.mrf.mxu3 }
 0x722   : > { %v5927_v10 = vadd.f32 %v5926_v27, %v5826_v23 }
 0x724   : > { %v5980_v49 = vpop.f32.mrf.mxu0 }
 0x725   : > { %v5981_v12 = vadd.f32 %v5980_v49, %v5927_v10 }
 0x726   : > { %v6019_v7 = vpop.f32.mrf.mxu1 }
 0x727   : > { %v6020_v4 = vadd.f32 %v6019_v7, %v5981_v12 }
 0x728   : > { %v6088_v56 = vpop.f32.mrf.mxu2 }
 0x729   : > { %v6089_v46 = vadd.f32 %v6088_v56, %v6020_v4 }
 0x72b   : > { %v6125_v55 = vpop.f32.mrf.mxu3 }
 0x72c   : > { %v6126_v9 = vadd.f32 %v6125_v55, %v6089_v46 }
 0x72e   : > { %v13013_v15 = vadd.f32 %v12983_v18, %v6126_v9 }
 0x730   : > { %v7356_v26 = vsel %vm6140_vm0, %v13013_v15, 0.0 }
 0x731   : > { %v7357_v35 = vadd.f32 %v7356_v26, %v7355_v44 }
 0x733   : > { %7358 = vadd.xlane.f32.xlu1 %v7357_v35 }
 0x746   : > { %6672 = vadd.xlane.f32.xlu0 %v6671_v31 }
 0x747   : > { %v6334_v13 = vpop.xlane.xlu2 %6333 }
 0x748   : > { %v6335_v39 = vmul.f32 %v6334_v13, %v13982_v34 }
 0x74a   : > { %v6343_v8 = vrot.slane %v6335_v39, 1  ;;  %v6346_v47 = vrot.slane %v6335_v39, 2  ;;  %v6349_v54 = vrot.slane %v6335_v39, 3 }
 0x74c   : > { %v6345_v37 = vmax.f32 %v6335_v39, %v6343_v8 }
 0x74e   : > { %v6348_v21 = vmax.f32 %v6345_v37, %v6346_v47  ;;  %7018 = vadd.xlane.f32.xlu0 %v7017_v60 }
 0x750   : > { %v6351_v52 = vmax.f32 %v6348_v21, %v6349_v54  ;;  %v13983_v54 = vld [vmem:[#allocation23_spill] sm:$0xff] }
 0x752   : > { %v6352_v25 = vperm.slane %v6351_v52, 0 }
 0x754   : > { %v6353_v18 = vsub.f32 %v6335_v39, %v6352_v25 }
 0x756   : > { %v6354_v19 = vmul.f32 1.442695, %v6353_v18  ;;  %v13984_v18 = vld [vmem:[#allocation45_spill] sm:$0xff] }
 0x758   : > { %7847 = vpow2.f32 %v6354_v19 }
 0x75e   : > { %v7848_v24 = vpop.eup %7847 }
 0x75f   : > { %v6357_v38 = vrot.slane %v7848_v24, 1  ;;  %v6360_v61 = vrot.slane %v7848_v24, 2  ;;  %v6363_v40 = vrot.slane %v7848_v24, 3 }
 0x761   : > { %v6359_v36 = vadd.f32 %v7848_v24, %v6357_v38 }
 0x763   : > { %v6362_v41 = vadd.f32 %v6360_v61, %v6359_v36 }
 0x765   : > { %v6365_v59 = vadd.f32 %v6363_v40, %v6362_v41 }
 0x767   : > { %v6366_v5 = vperm.slane %v6365_v59, 0 }
 0x769   : > { %7849 = vrcp.f32 %v6366_v5  ;;  %v6378_v16 = vand.u32 2147483648, %v6366_v5  ;;  %v6376_v14 = vand.u32 2147483647, %v6366_v5  ;;  %vm6372_vm4 = vweird.f32 %v6366_v5 }
 0x76b   : > { %v6379_v51 = vor.u32 1.1754944e-38, %v6378_v16  ;;  %vm6377_vm6 = vcmp.eq.f32.partialorder %v6376_v14, 8.507059e+37 }
 0x76f   : > { %v7850_v45 = vpop.eup %7849 }
 0x770   : > { %v6368_v3 = vmul.f32 %v7850_v45, %v6366_v5  ;;  %vm6373_vm3 = vweird.f32 %v7850_v45 }
 0x771   : > { %vm6374_vm5 = vmor %vm6372_vm4, %vm6373_vm3 }
 0x772   : > { %v6369_v32 = vsub.f32 1.0, %v6368_v3 }
 0x774   : > { %v6370_v1 = vmul.f32 %v7850_v45, %v6369_v32 }
 0x776   : > { %v6371_v57 = vadd.f32 %v7850_v45, %v6370_v1 }
 0x778   : > { %v6375_v23 = vsel %vm6374_vm5, %v7850_v45, %v6371_v57 }
 0x779   : > { %v6380_v27 = vsel %vm6377_vm6, %v6379_v51, %v6375_v23 }
 0x77a   : > { %v6381_v11 = vmul.f32 %v7848_v24, %v6380_v27 }
 0x77c   : > { %6424 = vperm.xlu0 %7827, %v6381_v11   ;;  %v13985_v11 = vld [vmem:[#allocation24_spill] sm:$0xff] }
 0x77e   : > { %v6679_v10 = vpop.xlane.xlu2 %6678  ;;  %v6340_v49 = vpop.xlane.xlu1 %6339 }
 0x77f   : > { %v6680_v63 = vmul.f32 %v6679_v10, %v13982_v34  ;;  %v6341_v12 = vmul.f32 %v6340_v49, %v13982_v34 }
 0x781   : > { %v6722_v7 = vrot.slane %v6680_v63, 1  ;;  %v6383_v4 = vrot.slane %v6341_v12, 1  ;;  %v6725_v46 = vrot.slane %v6680_v63, 2  ;;  %v6386_v9 = vrot.slane %v6341_v12, 2 }
 0x782   : > { %v6728_v26 = vrot.slane %v6680_v63, 3  ;;  %v6389_v50 = vrot.slane %v6341_v12, 3 }
 0x783   : > { %v6724_v56 = vmax.f32 %v6680_v63, %v6722_v7  ;;  %v6385_v55 = vmax.f32 %v6341_v12, %v6383_v4  ;;  %v13987_v4 = vld [vmem:[#allocation25_spill] sm:$0xff] }
 0x785   : > { %v6727_v44 = vmax.f32 %v6724_v56, %v6725_v46  ;;  %v6388_v35 = vmax.f32 %v6385_v55, %v6386_v9 }
 0x786   : > { %v7013_v58 = vpop.xlane.xlu1 %7012 }
 0x787   : > { %v6730_v2 = vmax.f32 %v6727_v44, %v6728_v26  ;;  %v6391_v6 = vmax.f32 %v6388_v35, %v6389_v50  ;;  %v7014_v22 = vmul.f32 %v7013_v58, %v13982_v34 }
 0x789   : > { %v6731_v30 = vperm.slane %v6730_v2, 0  ;;  %v6392_v43 = vperm.slane %v6391_v6, 0  ;;  %v7022_v53 = vrot.slane %v7014_v22, 1  ;;  %v7025_v33 = vrot.slane %v7014_v22, 2 }
 0x78a   : > { %v7028_v47 = vrot.slane %v7014_v22, 3 }
 0x78b   : > { %v6732_v31 = vsub.f32 %v6680_v63, %v6731_v30  ;;  %v6393_v13 = vsub.f32 %v6341_v12, %v6392_v43  ;;  %v7024_v39 = vmax.f32 %v7014_v22, %v7022_v53  ;;  %v13986_v63 = vld [vmem:[#allocation26_spill] sm:$0xff]  ;;  %v13988_v30 = vld [vmem:[#allocation27_spill] sm:$0xff] }
 0x78d   : > { %v6733_v28 = vmul.f32 1.442695, %v6732_v31  ;;  %v6394_v8 = vmul.f32 1.442695, %v6393_v13  ;;  %v7027_v37 = vmax.f32 %v7024_v39, %v7025_v33 }
 0x78e   : > { %v7288_v60 = vpop.permute.xlu0 %7287 }
 0x78f   : > { %v7030_v21 = vmax.f32 %v7027_v37, %v7028_v47  ;;  %v7292_v52 = vperm.slane %v7288_v60, %v13983_v54  ;;  %7851 = vpow2.f32 %v6733_v28 }
 0x790   : > { %7853 = vpow2.f32 %v6394_v8 }
 0x791   : > { %v7031_v25 = vperm.slane %v7030_v21, 0  ;;  %v7294_v19 = vmul.f32 %v13984_v18, %v7292_v52 }
 0x793   : > { %v7032_v24 = vsub.f32 %v7014_v22, %v7031_v25  ;;  %v7296_v38 = vperm.slane %v7294_v19, 0  ;;  %v7297_v36 = vperm.slane %v7294_v19, 4  ;;  %v7304_v61 = vperm.slane %v7294_v19, 1 }
 0x794   : > { %v7305_v41 = vperm.slane %v7294_v19, 5  ;;  %v7314_v40 = vperm.slane %v7294_v19, 2  ;;  %v7315_v59 = vperm.slane %v7294_v19, 6  ;;  %v7324_v5 = vperm.slane %v7294_v19, 3 }
 0x795   : > { %v7033_v45 = vmul.f32 1.442695, %v7032_v24  ;;  %v7300_v3 = vperm.slane %v7296_v38, 0  ;;  %v7301_v32 = vperm.slane %v7297_v36, 0  ;;  %v7308_v16 = vperm.slane %v7304_v61, 1  ;;  %v13045_v1 = vpop.eup %7851 }
 0x796   : > { %v7309_v14 = vperm.slane %v7305_v41, 1  ;;  %v7318_v57 = vperm.slane %v7314_v40, 2  ;;  %v7319_v51 = vperm.slane %v7315_v59, 2  ;;  %v7325_v23 = vperm.slane %v7294_v19, 7  ;;  %v13047_v27 = vpop.eup %7853 }
 0x797   : > { %7855 = vpow2.f32 %v7033_v45  ;;  %v7302_v10 = vmul.f32 %v7300_v3, %v13985_v11  ;;  %v7303_v49 = vmul.f32 %v7301_v32, %v13985_v11  ;;  %v7310_v12 = vmul.f32 %v7308_v16, %v13986_v63 }
 0x798   : > { %v7311_v7 = vmul.f32 %v7309_v14, %v13986_v63  ;;  %v7320_v56 = vmul.f32 %v7318_v57, %v13987_v4  ;;  %v7328_v55 = vperm.slane %v7324_v5, 3  ;;  %v7329_v9 = vperm.slane %v7325_v23, 3  ;;  %v13989_v5 = vld [vmem:[#allocation28_spill] sm:$0xff] }
 0x799   : > { %v7312_v46 = vadd.f32 %v7310_v12, %v7302_v10  ;;  %v6736_v44 = vrot.slane %v13045_v1, 1  ;;  %v7321_v35 = vmul.f32 %v7319_v51, %v13987_v4  ;;  %v6397_v50 = vrot.slane %v13047_v27, 1 }
 0x79a   : > { %v7313_v26 = vadd.f32 %v7311_v7, %v7303_v49  ;;  %v6739_v6 = vrot.slane %v13045_v1, 2  ;;  %v7331_v43 = vmul.f32 %v7329_v9, %v13988_v30  ;;  %v6400_v31 = vrot.slane %v13047_v27, 2 }
 0x79b   : > { %v7322_v58 = vadd.f32 %v7320_v56, %v7312_v46  ;;  %v6738_v2 = vadd.f32 %v13045_v1, %v6736_v44  ;;  %v6399_v53 = vadd.f32 %v13047_v27, %v6397_v50  ;;  %v7330_v39 = vmul.f32 %v7328_v55, %v13988_v30 }
 0x79c   : > { %v7323_v22 = vadd.f32 %v7321_v35, %v7313_v26  ;;  %v6742_v28 = vrot.slane %v13045_v1, 3  ;;  %v6403_v47 = vrot.slane %v13047_v27, 3 }
 0x79d   : > { %v13062_v13 = vpop.eup %7855  ;;  %v6741_v33 = vadd.f32 %v6739_v6, %v6738_v2  ;;  %v6402_v37 = vadd.f32 %v6400_v31, %v6399_v53  ;;  %v7332_v54 = vadd.f32 %v7330_v39, %v7322_v58 }
 0x79e   : > { %v7333_v8 = vadd.f32 %v7331_v43, %v7323_v22  ;;  %v7036_v60 = vrot.slane %v13062_v13, 1  ;;  %v7039_v61 = vrot.slane %v13062_v13, 2  ;;  %v7042_v32 = vrot.slane %v13062_v13, 3 }
 0x79f   : > { %v6744_v21 = vadd.f32 %v6742_v28, %v6741_v33  ;;  %v6405_v25 = vadd.f32 %v6403_v47, %v6402_v37 }
 0x7a0   : > { %v7336_v52 = vrot.slane %v7333_v8, 4  ;;  %v7038_v24 = vadd.f32 %v13062_v13, %v7036_v60 }
 0x7a1   : > { %v6745_v38 = vperm.slane %v6744_v21, 0  ;;  %v13071_v40 = vperm.slane %v6405_v25, 0 }
 0x7a2   : > { %v7337_v36 = vsel %vm6140_vm0, %v7332_v54, %v7336_v52  ;;  %v7041_v59 = vadd.f32 %v7039_v61, %v7038_v24 }
 0x7a3   : > { %v7339_v41 = vadd.f32 %v7337_v36, %v7294_v19  ;;  %7857 = vrcp.f32 %v6745_v38  ;;  %v6755_v7 = vand.u32 2147483647, %v6745_v38  ;;  %v6757_v4 = vand.u32 2147483648, %v6745_v38 }
 0x7a4   : > { %7859 = vrcp.f32 %v13071_v40  ;;  %v7044_v14 = vadd.f32 %v7042_v32, %v7041_v59  ;;  %vm6751_vm8 = vweird.f32 %v6745_v38  ;;  %vm6412_vm12 = vweird.f32 %v13071_v40 }
 0x7a5   : > { %v7340_v45 = vadd.f32 %v7339_v41, %v13989_v5  ;;  %v6758_v6 = vor.u32 1.1754944e-38, %v6757_v4  ;;  %vm6756_vm10 = vcmp.eq.f32.partialorder %v6755_v7, 8.507059e+37  ;;  %v6418_v61 = vand.u32 2147483648, %v13071_v40 }
 0x7a6   : > { %v7359_v3 = vpop.xlane.xlu1 %7358  ;;  %v13077_v63 = vperm.slane %v7044_v14, 0  ;;  %v6416_v5 = vand.u32 2147483647, %v13071_v40 }
 0x7a7   : > { %7344 = vst [vmem:[#allocation1] ss:$2 sm:$0xff] %v7340_v45  ;;  %v7360_v16 = vmul.f32 %v7359_v3, %v13982_v34 }
 0x7a8   : > { %7861 = vrcp.f32 %v13077_v63  ;;  %vm6417_vm14 = vcmp.eq.f32.partialorder %v6416_v5, 8.507059e+37  ;;  %vm7051_vm1 = vweird.f32 %v13077_v63 }
 0x7a9   : > { %v7858_v57 = vpop.eup %7857  ;;  %v7402_v51 = vrot.slane %v7360_v16, 1  ;;  %v7405_v23 = vrot.slane %v7360_v16, 2  ;;  %v7408_v10 = vrot.slane %v7360_v16, 3 }
 0x7aa   : > { %v6747_v11 = vmul.f32 %v7858_v57, %v6745_v38  ;;  %v7860_v56 = vpop.eup %7859  ;;  %vm6752_vm7 = vweird.f32 %v7858_v57 }
 0x7ab   : > { %v7404_v19 = vmax.f32 %v7360_v16, %v7402_v51  ;;  %vm6753_vm9 = vmor %vm6751_vm8, %vm6752_vm7  ;;  %v6408_v22 = vmul.f32 %v7860_v56, %v13071_v40  ;;  %vm6413_vm11 = vweird.f32 %v7860_v56 }
 0x7ac   : > { %v6748_v49 = vsub.f32 1.0, %v6747_v11  ;;  %vm6414_vm13 = vmor %vm6412_vm12, %vm6413_vm11  ;;  %v6419_v11 = vor.u32 1.1754944e-38, %v6418_v61 }
 0x7ad   : > { %v7407_v12 = vmax.f32 %v7404_v19, %v7405_v23  ;;  %v6409_v33 = vsub.f32 1.0, %v6408_v22 }
 0x7ae   : > { %v7345_v46 = vld.sshfl [vmem:[#allocation1] sm:$0xff pattern:$0x75316420]  ;;  %v7346_v55 = vld.sshfl [vmem:[#allocation1 + $0x8] sm:$0xff pattern:$0x75316420]  ;;  %v6749_v9 = vmul.f32 %v7858_v57, %v6748_v49  ;;  %v7862_v28 = vpop.eup %7861 }
 0x7af   : > { %v7410_v44 = vmax.f32 %v7407_v12, %v7408_v10  ;;  %v7349_v26 = vsel %vm6140_vm0, %v7345_v46, 0.0  ;;  %v7350_v35 = vsel %vm6140_vm0, %v7346_v55, 0.0  ;;  %7453 = vst [vmem:[#allocation1] ss:$2 sm:$0xff] %v7340_v45  ;;  %v6410_v37 = vmul.f32 %v7860_v56, %v6409_v33 }
 0x7b0   : > { %v7351_v50 = vadd.f32 %v7350_v35, %v7349_v26  ;;  %v6750_v58 = vadd.f32 %v7858_v57, %v6749_v9  ;;  %v7047_v47 = vmul.f32 %v7862_v28, %v13077_v63  ;;  %vm7052_vm15 = vweird.f32 %v7862_v28 }
 0x7b1   : > { %v7411_v2 = vperm.slane %v7410_v44, 0  ;;  %v6411_v52 = vadd.f32 %v7860_v56, %v6410_v37  ;;  %v7057_v55 = vand.u32 2147483648, %v13077_v63  ;;  %vm7053_vm2 = vmor %vm7051_vm1, %vm7052_vm15 }
 0x7b2   : > { %7352 = vadd.xlane.f32.xlu2 %v7351_v50  ;;  %v6754_v30 = vsel %vm6753_vm9, %v7858_v57, %v6750_v58  ;;  %v7048_v25 = vsub.f32 1.0, %v7047_v47 }
 0x7b3   : > { %v7412_v43 = vsub.f32 %v7360_v16, %v7411_v2  ;;  %v6759_v53 = vsel %vm6756_vm10, %v6758_v6, %v6754_v30  ;;  %v6415_v32 = vsel %vm6414_vm13, %v7860_v56, %v6411_v52  ;;  %v7055_v56 = vand.u32 2147483647, %v13077_v63 }
 0x7b4   : > { %v6760_v31 = vmul.f32 %v13045_v1, %v6759_v53  ;;  %v7049_v51 = vmul.f32 %v7862_v28, %v7048_v25  ;;  %v6420_v49 = vsel %vm6417_vm14, %v6419_v11, %v6415_v32  ;;  %v7058_v6 = vor.u32 1.1754944e-38, %v7057_v55 }
 0x7b5   : > { %v7413_v39 = vmul.f32 1.442695, %v7412_v43  ;;  %v6421_v50 = vmul.f32 %v13047_v27, %v6420_v49  ;;  %vm7056_vm3 = vcmp.eq.f32.partialorder %v7055_v56, 8.507059e+37 }
 0x7b6   : > { %6770 = vperm.xlu0 %7827, %v6760_v31   ;;  %v7050_v46 = vadd.f32 %v7862_v28, %v7049_v51 }
 0x7b7   : > { %7863 = vpow2.f32 %v7413_v39 }
 0x7b8   : > { %v7054_v2 = vsel %vm7053_vm2, %v7862_v28, %v7050_v46 }
 0x7b9   : > { %v6673_v8 = vpop.xlane.xlu0 %6672  ;;  %v7059_v30 = vsel %vm7056_vm3, %v7058_v6, %v7054_v2 }
 0x7ba   : > { %v6674_v60 = vmul.f32 %v6673_v8, %v13982_v34  ;;  %v7060_v39 = vmul.f32 %v13062_v13, %v7059_v30 }
 0x7bc   : > { %v6682_v21 = vrot.slane %v6674_v60, 1  ;;  %v6685_v38 = vrot.slane %v6674_v60, 2  ;;  %v6688_v59 = vrot.slane %v6674_v60, 3 }
 0x7bd   : > { %v13086_v54 = vpop.eup %7863 }
 0x7be   : > { %v6684_v24 = vmax.f32 %v6674_v60, %v6682_v21  ;;  %v7416_v1 = vrot.slane %v13086_v54, 1  ;;  %v7419_v36 = vrot.slane %v13086_v54, 2  ;;  %v7422_v16 = vrot.slane %v13086_v54, 3 }
 0x7c0   : > { %v6687_v41 = vmax.f32 %v6684_v24, %v6685_v38  ;;  %v7418_v45 = vadd.f32 %v13086_v54, %v7416_v1 }
 0x7c1   : > { %v7019_v3 = vpop.xlane.xlu0 %7018 }
 0x7c2   : > { %v6690_v14 = vmax.f32 %v6687_v41, %v6688_v59  ;;  %v7020_v57 = vmul.f32 %v7019_v3, %v13982_v34  ;;  %v7421_v23 = vadd.f32 %v7419_v36, %v7418_v45 }
 0x7c4   : > { %v6691_v19 = vperm.slane %v6690_v14, 0  ;;  %v7062_v10 = vrot.slane %v7020_v57, 1  ;;  %v7424_v12 = vadd.f32 %v7422_v16, %v7421_v23  ;;  %v7065_v4 = vrot.slane %v7020_v57, 2 }
 0x7c5   : > { %v7068_v35 = vrot.slane %v7020_v57, 3 }
 0x7c6   : > { %v6692_v7 = vsub.f32 %v6674_v60, %v6691_v19  ;;  %v7064_v40 = vmax.f32 %v7020_v57, %v7062_v10  ;;  %v7425_v9 = vperm.slane %v7424_v12, 0 }
 0x7c8   : > { %v6693_v44 = vmul.f32 1.442695, %v6692_v7  ;;  %v7067_v26 = vmax.f32 %v7064_v40, %v7065_v4  ;;  %7865 = vrcp.f32 %v7425_v9  ;;  %vm7431_vm4 = vweird.f32 %v7425_v9 }
 0x7c9   : > { %v7437_v8 = vand.u32 2147483648, %v7425_v9  ;;  %v7435_v47 = vand.u32 2147483647, %v7425_v9 }
 0x7ca   : > { %7867 = vpow2.f32 %v6693_v44  ;;  %v7070_v58 = vmax.f32 %v7067_v26, %v7068_v35  ;;  %6431 = vperm.xlu2 %7828, %v6421_v50  }
 0x7cb   : > { %v7438_v52 = vor.u32 1.1754944e-38, %v7437_v8  ;;  %vm7436_vm7 = vcmp.eq.f32.partialorder %v7435_v47, 8.507059e+37 }
 0x7cc   : > { %v7071_v22 = vperm.slane %v7070_v58, 0 }
 0x7ce   : > { %v7072_v43 = vsub.f32 %v7020_v57, %v7071_v22  ;;  %v7866_v53 = vpop.eup %7865 }
 0x7cf   : > { %v7427_v33 = vmul.f32 %v7866_v53, %v7425_v9  ;;  %vm7432_vm5 = vweird.f32 %v7866_v53 }
 0x7d0   : > { %v7868_v31 = vpop.eup %7867  ;;  %v7073_v63 = vmul.f32 1.442695, %v7072_v43  ;;  %vm7433_vm6 = vmor %vm7431_vm4, %vm7432_vm5 }
 0x7d1   : > { %v6696_v27 = vrot.slane %v7868_v31, 1  ;;  %v7428_v37 = vsub.f32 1.0, %v7427_v33  ;;  %v6699_v60 = vrot.slane %v7868_v31, 2  ;;  %v6702_v24 = vrot.slane %v7868_v31, 3 }
 0x7d2   : > { %7869 = vpow2.f32 %v7073_v63  ;;  %7103 = vperm.xlu2 %7828, %v7060_v39  }
 0x7d3   : > { %v6698_v28 = vadd.f32 %v7868_v31, %v6696_v27  ;;  %v7429_v21 = vmul.f32 %v7866_v53, %v7428_v37 }
 0x7d5   : > { %v6701_v25 = vadd.f32 %v6699_v60, %v6698_v28  ;;  %v7430_v38 = vadd.f32 %v7866_v53, %v7429_v21  ;;  %v13990_v28 = vld [vmem:[#allocation32_spill] sm:$0xff]  ;;  %v13991_v21 = vld [vmem:[#allocation33_spill] sm:$0xff] }
 0x7d7   : > { %v6704_v1 = vadd.f32 %v6702_v24, %v6701_v25  ;;  %v7434_v36 = vsel %vm7433_vm6, %v7866_v53, %v7430_v38 }
 0x7d8   : > { %v7870_v13 = vpop.eup %7869  ;;  %v7439_v61 = vsel %vm7436_vm7, %v7438_v52, %v7434_v36 }
 0x7d9   : > { %v6705_v41 = vperm.slane %v6704_v1, 0  ;;  %v7076_v59 = vrot.slane %v7870_v13, 1  ;;  %v7440_v5 = vmul.f32 %v13086_v54, %v7439_v61  ;;  %v7079_v3 = vrot.slane %v7870_v13, 2 }
 0x7da   : > { %v7082_v16 = vrot.slane %v7870_v13, 3 }
 0x7db   : > { %7871 = vrcp.f32 %v6705_v41  ;;  %7450 = vperm.xlu2 %7828, %v7440_v5   ;;  %v7078_v45 = vadd.f32 %v7870_v13, %v7076_v59  ;;  %v6717_v19 = vand.u32 2147483648, %v6705_v41  ;;  %v6715_v49 = vand.u32 2147483647, %v6705_v41 }
 0x7dc   : > { %vm6711_vm9 = vweird.f32 %v6705_v41 }
 0x7dd   : > { %v7081_v32 = vadd.f32 %v7079_v3, %v7078_v45  ;;  %v6718_v54 = vor.u32 1.1754944e-38, %v6717_v19  ;;  %vm6716_vm11 = vcmp.eq.f32.partialorder %v6715_v49, 8.507059e+37 }
 0x7df   : > { %v7084_v14 = vadd.f32 %v7082_v16, %v7081_v32 }
 0x7e1   : > { %v7872_v57 = vpop.eup %7871  ;;  %v7085_v23 = vperm.slane %v7084_v14, 0 }
 0x7e2   : > { %v6707_v51 = vmul.f32 %v7872_v57, %v6705_v41  ;;  %vm6712_vm8 = vweird.f32 %v7872_v57 }
 0x7e3   : > { %7873 = vrcp.f32 %v7085_v23  ;;  %vm6713_vm10 = vmor %vm6711_vm9, %vm6712_vm8  ;;  %v7097_v9 = vand.u32 2147483648, %v7085_v23  ;;  %v7095_v26 = vand.u32 2147483647, %v7085_v23  ;;  %vm7091_vm13 = vweird.f32 %v7085_v23 }
 0x7e4   : > { %v6708_v11 = vsub.f32 1.0, %v6707_v51 }
 0x7e5   : > { %v7098_v50 = vor.u32 1.1754944e-38, %v7097_v9  ;;  %vm7096_vm15 = vcmp.eq.f32.partialorder %v7095_v26, 8.507059e+37 }
 0x7e6   : > { %v6709_v10 = vmul.f32 %v7872_v57, %v6708_v11 }
 0x7e8   : > { %v6710_v12 = vadd.f32 %v7872_v57, %v6709_v10 }
 0x7e9   : > { %v7874_v7 = vpop.eup %7873 }
 0x7ea   : > { %v6714_v40 = vsel %vm6713_vm10, %v7872_v57, %v6710_v12  ;;  %v7087_v46 = vmul.f32 %v7874_v7, %v7085_v23  ;;  %vm7092_vm12 = vweird.f32 %v7874_v7 }
 0x7eb   : > { %v6719_v4 = vsel %vm6716_vm11, %v6718_v54, %v6714_v40  ;;  %vm7093_vm14 = vmor %vm7091_vm13, %vm7092_vm12 }
 0x7ec   : > { %v6720_v56 = vmul.f32 %v7868_v31, %v6719_v4  ;;  %v7088_v55 = vsub.f32 1.0, %v7087_v46 }
 0x7ee   : > { %6763 = vperm.xlu1 %7826, %v6720_v56   ;;  %v7089_v44 = vmul.f32 %v7874_v7, %v7088_v55  ;;  %v6425_v53 = vpop.permute.xlu0 %6424 }
 0x7ef   : > { %v6427_v8 = vmul.f32 %v6425_v53, %v12992_v29  ;;  %v6428_v37 = vmul.f32 %v6425_v53, %v12995_v42 }
 0x7f0   : > { %v7090_v35 = vadd.f32 %v7874_v7, %v7089_v44 }
 0x7f2   : > { %v7094_v58 = vsel %vm7093_vm14, %v7874_v7, %v7090_v35 }
 0x7f3   : > { %v7099_v2 = vsel %vm7096_vm15, %v7098_v50, %v7094_v58 }
 0x7f4   : > { %v7100_v6 = vmul.f32 %v7870_v13, %v7099_v2 }
 0x7f6   : > { %7110 = vperm.xlu0 %7827, %v7100_v6  }
 0x825   : > { %v7353_v22 = vpop.xlane.xlu2 %7352 }
 0x826   : > { %v7354_v30 = vmul.f32 %v7353_v22, %v13982_v34 }
 0x828   : > { %v7362_v43 = vrot.slane %v7354_v30, 1  ;;  %v7365_v63 = vrot.slane %v7354_v30, 2  ;;  %v7368_v33 = vrot.slane %v7354_v30, 3 }
 0x82a   : > { %v7364_v31 = vmax.f32 %v7354_v30, %v7362_v43 }
 0x82c   : > { %v7367_v39 = vmax.f32 %v7364_v31, %v7365_v63 }
 0x82d   : > { %v6432_v27 = vpop.permute.xlu2 %6431 }
 0x82e   : > { %v7370_v47 = vmax.f32 %v7367_v39, %v7368_v33  ;;  %v6439_v60 = vmul.f32 %v13990_v28, %v6432_v27  ;;  %v6440_v52 = vmul.f32 %v13991_v21, %v6432_v27 }
 0x830   : > { %v7371_v25 = vperm.slane %v7370_v47, 0  ;;  %v6441_v24 = vadd.f32 %v6439_v60, %v6427_v8  ;;  %v6442_v38 = vadd.f32 %v6440_v52, %v6428_v37 }
 0x832   : > { %v7372_v34 = vsub.f32 %v7354_v30, %v7371_v25  ;;  %v6445_v1 = vrot.slane %v6441_v24, 1  ;;  %v6446_v13 = vrot.slane %v6442_v38, 1  ;;  %v6451_v36 = vrot.slane %v6441_v24, 2 }
 0x833   : > { %v6452_v5 = vrot.slane %v6442_v38, 2  ;;  %v6457_v29 = vrot.slane %v6441_v24, 3  ;;  %v6458_v3 = vrot.slane %v6442_v38, 3 }
 0x834   : > { %v7373_v61 = vmul.f32 1.442695, %v7372_v34  ;;  %v6449_v41 = vadd.f32 %v6445_v1, %v6441_v24  ;;  %v6450_v59 = vadd.f32 %v6446_v13, %v6442_v38 }
 0x836   : > { %7875 = vpow2.f32 %v7373_v61  ;;  %v6455_v45 = vadd.f32 %v6451_v36, %v6449_v41  ;;  %v6456_v42 = vadd.f32 %v6452_v5, %v6450_v59  ;;  %v13992_v59 = vld [vmem:[#allocation21_spill] sm:$0xff] }
 0x838   : > { %v6461_v32 = vadd.f32 %v6457_v29, %v6455_v45  ;;  %v6462_v16 = vadd.f32 %v6458_v3, %v6456_v42  ;;  %v6771_v29 = vpop.permute.xlu0 %6770  ;;  %v13993_v42 = vld [vmem:[#allocation49_spill] sm:$0xff] }
 0x839   : > { %v6778_v3 = vmul.f32 %v13993_v42, %v6771_v29 }
 0x83a   : > { %v7692_v14 = vmul.f32 -1.442695, %v6461_v32  ;;  %v7693_v57 = vmul.f32 -1.442695, %v6462_v16  ;;  %v13994_v32 = vld [vmem:[#allocation50_spill] sm:$0xff] }
 0x83b   : > { %v6779_v16 = vmul.f32 %v13994_v32, %v6771_v29 }
 0x83c   : > { %v13107_v51 = vpop.eup %7875  ;;  %7877 = vpow2.f32 %v7692_v14 }
 0x83d   : > { %7879 = vpow2.f32 %v7693_v57  ;;  %v7376_v23 = vrot.slane %v13107_v51, 1  ;;  %v7379_v19 = vrot.slane %v13107_v51, 2  ;;  %v7382_v49 = vrot.slane %v13107_v51, 3 }
 0x83f   : > { %v7378_v11 = vadd.f32 %v13107_v51, %v7376_v23 }
 0x841   : > { %v7381_v10 = vadd.f32 %v7379_v19, %v7378_v11 }
 0x842   : > { %v7878_v12 = vpop.eup %7877 }
 0x843   : > { %v7880_v54 = vpop.eup %7879  ;;  %v6469_v7 = vadd.f32 1.0, %v7878_v12  ;;  %v7384_v40 = vadd.f32 %v7382_v49, %v7381_v10  ;;  %v7104_v10 = vpop.permute.xlu2 %7103 }
 0x844   : > { %v6470_v4 = vadd.f32 1.0, %v7880_v54 }
 0x845   : > { %7881 = vrcp.f32 %v6469_v7  ;;  %v7385_v46 = vperm.slane %v7384_v40, 0  ;;  %v6482_v50 = vand.u32 2147483648, %v6469_v7  ;;  %v6480_v30 = vand.u32 2147483647, %v6469_v7 }
 0x846   : > { %7883 = vrcp.f32 %v6470_v4  ;;  %v6497_v2 = vand.u32 2147483648, %v6470_v4  ;;  %v6495_v53 = vand.u32 2147483647, %v6470_v4  ;;  %vm6476_vm3 = vweird.f32 %v6469_v7 }
 0x847   : > { %7885 = vrcp.f32 %v7385_v46  ;;  %vm6491_vm4 = vweird.f32 %v6470_v4  ;;  %v6483_v39 = vor.u32 1.1754944e-38, %v6482_v50  ;;  %v7397_v27 = vand.u32 2147483648, %v7385_v46 }
 0x848   : > { %v6498_v8 = vor.u32 1.1754944e-38, %v6497_v2  ;;  %v7395_v28 = vand.u32 2147483647, %v7385_v46  ;;  %vm6481_vm8 = vcmp.eq.f32.partialorder %v6480_v30, 8.507059e+37  ;;  %vm6496_vm9 = vcmp.eq.f32.partialorder %v6495_v53, 8.507059e+37 }
 0x849   : > { %vm7391_vm10 = vweird.f32 %v7385_v46  ;;  %v7398_v38 = vor.u32 1.1754944e-38, %v7397_v27 }
 0x84a   : > { %vm7396_vm12 = vcmp.eq.f32.partialorder %v7395_v28, 8.507059e+37 }
 0x84b   : > { %v7882_v56 = vpop.eup %7881 }
 0x84c   : > { %v7884_v55 = vpop.eup %7883  ;;  %v6472_v9 = vmul.f32 %v7882_v56, %v6469_v7  ;;  %vm6477_vm1 = vweird.f32 %v7882_v56 }
 0x84d   : > { %v6487_v44 = vmul.f32 %v7884_v55, %v6470_v4  ;;  %v7886_v35 = vpop.eup %7885  ;;  %vm6492_vm2 = vweird.f32 %v7884_v55  ;;  %vm6478_vm5 = vmor %vm6476_vm3, %vm6477_vm1 }
 0x84e   : > { %v6473_v26 = vsub.f32 1.0, %v6472_v9  ;;  %v7387_v22 = vmul.f32 %v7886_v35, %v7385_v46  ;;  %vm6493_vm6 = vmor %vm6491_vm4, %vm6492_vm2  ;;  %vm7392_vm7 = vweird.f32 %v7886_v35  ;;  %v7106_v9 = vmul.f32 %v7104_v10, %v13029_v0 }
 0x84f   : > { %v6488_v58 = vsub.f32 1.0, %v6487_v44  ;;  %vm7393_vm11 = vmor %vm7391_vm10, %vm7392_vm7  ;;  %v13995_v44 = vld [vmem:[#allocation42_spill] sm:$0xff] }
 0x850   : > { %v6474_v6 = vmul.f32 %v7882_v56, %v6473_v26  ;;  %v7388_v63 = vsub.f32 1.0, %v7387_v22  ;;  %v13996_v26 = vld [vmem:[#allocation41_spill] sm:$0xff] }
 0x851   : > { %v6489_v43 = vmul.f32 %v7884_v55, %v6488_v58 }
 0x852   : > { %v6475_v31 = vadd.f32 %v7882_v56, %v6474_v6  ;;  %v7389_v47 = vmul.f32 %v7886_v35, %v7388_v63 }
 0x853   : > { %v6490_v33 = vadd.f32 %v7884_v55, %v6489_v43 }
 0x854   : > { %v6479_v37 = vsel %vm6478_vm5, %v7882_v56, %v6475_v31  ;;  %v7390_v25 = vadd.f32 %v7886_v35, %v7389_v47 }
 0x855   : > { %v6494_v60 = vsel %vm6493_vm6, %v7884_v55, %v6490_v33  ;;  %v6484_v21 = vsel %vm6481_vm8, %v6483_v39, %v6479_v37 }
 0x856   : > { %v6499_v52 = vsel %vm6496_vm9, %v6498_v8, %v6494_v60  ;;  %v7394_v34 = vsel %vm7393_vm11, %v7886_v35, %v7390_v25  ;;  %v6501_v1 = vperm.slane %v6484_v21, 0 }
 0x857   : > { %v6502_v24 = vperm.slane %v6499_v52, 0  ;;  %v7399_v36 = vsel %vm7396_vm12, %v7398_v38, %v7394_v34 }
 0x858   : > { %v7400_v61 = vmul.f32 %v13107_v51, %v7399_v36 }
 0x859   : > { %v6505_v13 = vrot.slane %v6502_v24, 4 }
 0x85a   : > { %7443 = vperm.xlu1 %7826, %v7400_v61  }
 0x85b   : > { %v6506_v41 = vsel %vm6140_vm0, %v6501_v1, %v6505_v13 }
 0x85c   : > { %v6508_v5 = vmul.f32 %v6506_v41, %v13992_v59 }
 0x85e   : > { %6509 = vst [vmem:[%s13118_s21] sm:$0xff] %v6508_v5 }
 0x860   : > { %v6764_v45 = vpop.permute.xlu1 %6763 }
 0x861   : > { %v6766_v14 = vmul.f32 %v6764_v45, %v12986_v20  ;;  %v6767_v57 = vmul.f32 %v6764_v45, %v12989_v17  ;;  %v7107_v20 = vmul.f32 %v7104_v10, %v13033_v48 }
 0x863   : > { %v6780_v51 = vadd.f32 %v6778_v3, %v6766_v14  ;;  %v6781_v23 = vadd.f32 %v6779_v16, %v6767_v57 }
 0x865   : > { %v6784_v11 = vrot.slane %v6780_v51, 1  ;;  %v6785_v19 = vrot.slane %v6781_v23, 1  ;;  %v6790_v54 = vrot.slane %v6780_v51, 2  ;;  %v6791_v7 = vrot.slane %v6781_v23, 2 }
 0x866   : > { %v6796_v46 = vrot.slane %v6780_v51, 3  ;;  %v6797_v56 = vrot.slane %v6781_v23, 3 }
 0x867   : > { %v6788_v49 = vadd.f32 %v6784_v11, %v6780_v51  ;;  %v6789_v12 = vadd.f32 %v6785_v19, %v6781_v23 }
 0x868   : > { %v7111_v55 = vpop.permute.xlu0 %7110 }
 0x869   : > { %v6794_v40 = vadd.f32 %v6790_v54, %v6788_v49  ;;  %v6795_v4 = vadd.f32 %v6791_v7, %v6789_v12  ;;  %v7118_v17 = vmul.f32 %v13995_v44, %v7111_v55  ;;  %v7119_v35 = vmul.f32 %v13996_v26, %v7111_v55 }
 0x86b   : > { %v6800_v50 = vadd.f32 %v6796_v46, %v6794_v40  ;;  %v6801_v58 = vadd.f32 %v6797_v56, %v6795_v4  ;;  %v7120_v2 = vadd.f32 %v7118_v17, %v7106_v9  ;;  %v7121_v6 = vadd.f32 %v7119_v35, %v7107_v20 }
 0x86d   : > { %v7696_v22 = vmul.f32 -1.442695, %v6800_v50  ;;  %v7697_v30 = vmul.f32 -1.442695, %v6801_v58  ;;  %v7124_v43 = vrot.slane %v7120_v2, 1  ;;  %v7125_v53 = vrot.slane %v7121_v6, 1 }
 0x86e   : > { %v7130_v31 = vrot.slane %v7120_v2, 2  ;;  %v7131_v0 = vrot.slane %v7121_v6, 2  ;;  %v7136_v8 = vrot.slane %v7120_v2, 3  ;;  %v7137_v27 = vrot.slane %v7121_v6, 3 }
 0x86f   : > { %7887 = vpow2.f32 %v7696_v22  ;;  %v7128_v63 = vadd.f32 %v7124_v43, %v7120_v2  ;;  %v7129_v39 = vadd.f32 %v7125_v53, %v7121_v6  ;;  %v13997_v6 = vld [vmem:[#allocation31_spill] sm:$0xff] }
 0x870   : > { %7889 = vpow2.f32 %v7697_v30 }
 0x871   : > { %v7134_v33 = vadd.f32 %v7130_v31, %v7128_v63  ;;  %v7135_v48 = vadd.f32 %v7131_v0, %v7129_v39 }
 0x873   : > { %v7140_v37 = vadd.f32 %v7136_v8, %v7134_v33  ;;  %v7141_v47 = vadd.f32 %v7137_v27, %v7135_v48 }
 0x875   : > { %v7888_v28 = vpop.eup %7887  ;;  %v7701_v52 = vmul.f32 -1.442695, %v7140_v37  ;;  %v7702_v24 = vmul.f32 -1.442695, %v7141_v47  ;;  %v13998_v47 = vld [vmem:[#allocation48_spill] sm:$0xff] }
 0x876   : > { %v7890_v60 = vpop.eup %7889  ;;  %v6808_v21 = vadd.f32 1.0, %v7888_v28 }
 0x877   : > { %v6809_v25 = vadd.f32 1.0, %v7890_v60  ;;  %v7451_v60 = vpop.permute.xlu2 %7450 }
 0x878   : > { %7891 = vrcp.f32 %v6808_v21  ;;  %v6819_v5 = vand.u32 2147483647, %v6808_v21  ;;  %v6821_v29 = vand.u32 2147483648, %v6808_v21  ;;  %vm6815_vm15 = vweird.f32 %v6808_v21 }
 0x879   : > { %7893 = vrcp.f32 %v6809_v25  ;;  %v6836_v32 = vand.u32 2147483648, %v6809_v25  ;;  %v6834_v14 = vand.u32 2147483647, %v6809_v25  ;;  %vm6830_vm2 = vweird.f32 %v6809_v25 }
 0x87a   : > { %7895 = vpow2.f32 %v7701_v52  ;;  %v6822_v11 = vor.u32 1.1754944e-38, %v6821_v29  ;;  %vm6820_vm4 = vcmp.eq.f32.partialorder %v6819_v5, 8.507059e+37  ;;  %v7455_v52 = vld.sshfl [vmem:[#allocation1 + $0x8] sm:$0xff pattern:$0x75316420] }
 0x87b   : > { %7897 = vpow2.f32 %v7702_v24  ;;  %v6837_v19 = vor.u32 1.1754944e-38, %v6836_v32  ;;  %vm6835_vm5 = vcmp.eq.f32.partialorder %v6834_v14, 8.507059e+37 }
 0x87e   : > { %v7892_v38 = vpop.eup %7891 }
 0x87f   : > { %v7894_v34 = vpop.eup %7893  ;;  %v6811_v1 = vmul.f32 %v7892_v38, %v6808_v21  ;;  %vm6816_vm13 = vweird.f32 %v7892_v38  ;;  %v7454_v21 = vld.sshfl [vmem:[#allocation1] sm:$0xff pattern:$0x75316420] }
 0x880   : > { %v7896_v13 = vpop.eup %7895  ;;  %v6826_v36 = vmul.f32 %v7894_v34, %v6809_v25  ;;  %vm6831_vm14 = vweird.f32 %v7894_v34  ;;  %vm6817_vm1 = vmor %vm6815_vm15, %vm6816_vm13  ;;  %v7458_v24 = vmul.f32 %v7454_v21, %v7451_v60 }
 0x881   : > { %v7898_v61 = vpop.eup %7897  ;;  %v6812_v41 = vsub.f32 1.0, %v6811_v1  ;;  %v7148_v59 = vadd.f32 1.0, %v7896_v13  ;;  %vm6832_vm3 = vmor %vm6830_vm2, %vm6831_vm14 }
 0x882   : > { %v6827_v45 = vsub.f32 1.0, %v6826_v36  ;;  %v7149_v42 = vadd.f32 1.0, %v7898_v61 }
 0x883   : > { %v6813_v3 = vmul.f32 %v7892_v38, %v6812_v41  ;;  %7899 = vrcp.f32 %v7148_v59  ;;  %v7159_v20 = vand.u32 2147483647, %v7148_v59  ;;  %v7161_v44 = vand.u32 2147483648, %v7148_v59 }
 0x884   : > { %v6828_v16 = vmul.f32 %v7894_v34, %v6827_v45  ;;  %7901 = vrcp.f32 %v7149_v42  ;;  %v7176_v35 = vand.u32 2147483648, %v7149_v42  ;;  %v7174_v2 = vand.u32 2147483647, %v7149_v42 }
 0x885   : > { %v6814_v57 = vadd.f32 %v7892_v38, %v6813_v3  ;;  %vm7155_vm8 = vweird.f32 %v7148_v59  ;;  %vm7170_vm10 = vweird.f32 %v7149_v42  ;;  %v7162_v31 = vor.u32 1.1754944e-38, %v7161_v44 }
 0x886   : > { %v6829_v51 = vadd.f32 %v7894_v34, %v6828_v16  ;;  %v7177_v63 = vor.u32 1.1754944e-38, %v7176_v35  ;;  %vm7160_vm12 = vcmp.eq.f32.partialorder %v7159_v20, 8.507059e+37  ;;  %vm7175_vm13 = vcmp.eq.f32.partialorder %v7174_v2, 8.507059e+37 }
 0x887   : > { %v6818_v23 = vsel %vm6817_vm1, %v7892_v38, %v6814_v57  ;;  %v7459_v38 = vmul.f32 %v7455_v52, %v7451_v60 }
 0x888   : > { %v6833_v10 = vsel %vm6832_vm3, %v7894_v34, %v6829_v51  ;;  %v6823_v12 = vsel %vm6820_vm4, %v6822_v11, %v6818_v23 }
 0x889   : > { %v7900_v49 = vpop.eup %7899  ;;  %v6838_v54 = vsel %vm6835_vm5, %v6837_v19, %v6833_v10  ;;  %v6840_v56 = vperm.slane %v6823_v12, 0 }
 0x88a   : > { %v7902_v7 = vpop.eup %7901  ;;  %v6841_v40 = vperm.slane %v6838_v54, 0  ;;  %v7151_v4 = vmul.f32 %v7900_v49, %v7148_v59  ;;  %vm7156_vm6 = vweird.f32 %v7900_v49 }
 0x88b   : > { %v7166_v46 = vmul.f32 %v7902_v7, %v7149_v42  ;;  %vm7171_vm7 = vweird.f32 %v7902_v7  ;;  %vm7157_vm9 = vmor %vm7155_vm8, %vm7156_vm6 }
 0x88c   : > { %v6844_v55 = vrot.slane %v6841_v40, 4  ;;  %v7152_v9 = vsub.f32 1.0, %v7151_v4  ;;  %vm7172_vm11 = vmor %vm7170_vm10, %vm7171_vm7 }
 0x88d   : > { %v7167_v17 = vsub.f32 1.0, %v7166_v46 }
 0x88e   : > { %v7153_v26 = vmul.f32 %v7900_v49, %v7152_v9  ;;  %v6845_v50 = vsel %vm6140_vm0, %v6840_v56, %v6844_v55 }
 0x88f   : > { %v7168_v58 = vmul.f32 %v7902_v7, %v7167_v17  ;;  %v6847_v22 = vmul.f32 %v13997_v6, %v6845_v50 }
 0x890   : > { %v7154_v30 = vadd.f32 %v7900_v49, %v7153_v26 }
 0x891   : > { %v7169_v43 = vadd.f32 %v7902_v7, %v7168_v58  ;;  %7698 = vst [vmem:[%s13118_s21 + $0x8] sm:$0xff] %v6847_v22 }
 0x892   : > { %v7158_v53 = vsel %vm7157_vm9, %v7900_v49, %v7154_v30 }
 0x893   : > { %v7173_v39 = vsel %vm7172_vm11, %v7902_v7, %v7169_v43  ;;  %v7163_v0 = vsel %vm7160_vm12, %v7162_v31, %v7158_v53 }
 0x894   : > { %v7178_v33 = vsel %vm7175_vm13, %v7177_v63, %v7173_v39  ;;  %v7180_v8 = vperm.slane %v7163_v0, 0 }
 0x895   : > { %v7181_v48 = vperm.slane %v7178_v33, 0 }
 0x897   : > { %v7184_v27 = vrot.slane %v7181_v48, 4 }
 0x899   : > { %v7185_v37 = vsel %vm6140_vm0, %v7180_v8, %v7184_v27 }
 0x89a   : > { %v7187_v28 = vmul.f32 %v13998_v47, %v7185_v37 }
 0x89c   : > { %7703 = vst [vmem:[%s13118_s21 + $0x10] sm:$0xff] %v7187_v28 }
 0x8cc   : > { %v7444_v25 = vpop.permute.xlu1 %7443 }
 0x8cd   : > { %v7446_v34 = vmul.f32 %v7444_v25, %v13010_v62  ;;  %v7447_v1 = vmul.f32 %v7444_v25, %v13013_v15 }
 0x8cf   : > { %v7460_v13 = vadd.f32 %v7458_v24, %v7446_v34  ;;  %v7461_v36 = vadd.f32 %v7459_v38, %v7447_v1 }
 0x8d1   : > { %v7464_v61 = vrot.slane %v7460_v13, 1  ;;  %v7465_v41 = vrot.slane %v7461_v36, 1  ;;  %v7470_v29 = vrot.slane %v7460_v13, 2  ;;  %v7471_v45 = vrot.slane %v7461_v36, 2 }
 0x8d2   : > { %v7476_v32 = vrot.slane %v7460_v13, 3  ;;  %v7477_v16 = vrot.slane %v7461_v36, 3 }
 0x8d3   : > { %v7468_v59 = vadd.f32 %v7464_v61, %v7460_v13  ;;  %v7469_v5 = vadd.f32 %v7465_v41, %v7461_v36 }
 0x8d5   : > { %v7474_v42 = vadd.f32 %v7470_v29, %v7468_v59  ;;  %v7475_v3 = vadd.f32 %v7471_v45, %v7469_v5 }
 0x8d7   : > { %v7480_v14 = vadd.f32 %v7476_v32, %v7474_v42  ;;  %v7481_v57 = vadd.f32 %v7477_v16, %v7475_v3 }
 0x8d9   : > { %v7706_v51 = vmul.f32 -1.442695, %v7480_v14  ;;  %v7707_v23 = vmul.f32 -1.442695, %v7481_v57 }
 0x8db   : > { %7903 = vpow2.f32 %v7706_v51 }
 0x8dc   : > { %7905 = vpow2.f32 %v7707_v23 }
 0x8e1   : > { %v7904_v62 = vpop.eup %7903 }
 0x8e2   : > { %v7906_v15 = vpop.eup %7905  ;;  %v7488_v11 = vadd.f32 1.0, %v7904_v62 }
 0x8e3   : > { %v7489_v19 = vadd.f32 1.0, %v7906_v15 }
 0x8e4   : > { %7907 = vrcp.f32 %v7488_v11  ;;  %v7501_v46 = vand.u32 2147483648, %v7488_v11  ;;  %v7499_v55 = vand.u32 2147483647, %v7488_v11  ;;  %vm7495_vm1 = vweird.f32 %v7488_v11 }
 0x8e5   : > { %7909 = vrcp.f32 %v7489_v19  ;;  %v7516_v56 = vand.u32 2147483648, %v7489_v19  ;;  %v7514_v20 = vand.u32 2147483647, %v7489_v19  ;;  %vm7510_vm3 = vweird.f32 %v7489_v19 }
 0x8e6   : > { %v7502_v35 = vor.u32 1.1754944e-38, %v7501_v46  ;;  %vm7500_vm5 = vcmp.eq.f32.partialorder %v7499_v55, 8.507059e+37 }
 0x8e7   : > { %v7517_v50 = vor.u32 1.1754944e-38, %v7516_v56  ;;  %vm7515_vm6 = vcmp.eq.f32.partialorder %v7514_v20, 8.507059e+37 }
 0x8ea   : > { %v7908_v10 = vpop.eup %7907 }
 0x8eb   : > { %v7910_v49 = vpop.eup %7909  ;;  %v7491_v12 = vmul.f32 %v7908_v10, %v7488_v11  ;;  %vm7496_vm14 = vweird.f32 %v7908_v10 }
 0x8ec   : > { %v7506_v54 = vmul.f32 %v7910_v49, %v7489_v19  ;;  %vm7511_vm15 = vweird.f32 %v7910_v49  ;;  %vm7497_vm2 = vmor %vm7495_vm1, %vm7496_vm14 }
 0x8ed   : > { %v7492_v7 = vsub.f32 1.0, %v7491_v12  ;;  %vm7512_vm4 = vmor %vm7510_vm3, %vm7511_vm15 }
 0x8ee   : > { %v7507_v40 = vsub.f32 1.0, %v7506_v54 }
 0x8ef   : > { %v7493_v4 = vmul.f32 %v7908_v10, %v7492_v7 }
 0x8f0   : > { %v7508_v9 = vmul.f32 %v7910_v49, %v7507_v40 }
 0x8f1   : > { %v7494_v44 = vadd.f32 %v7908_v10, %v7493_v4 }
 0x8f2   : > { %v7509_v17 = vadd.f32 %v7910_v49, %v7508_v9 }
 0x8f3   : > { %v7498_v26 = vsel %vm7497_vm2, %v7908_v10, %v7494_v44 }
 0x8f4   : > { %v7513_v58 = vsel %vm7512_vm4, %v7910_v49, %v7509_v17  ;;  %v7503_v2 = vsel %vm7500_vm5, %v7502_v35, %v7498_v26 }
 0x8f5   : > { %v7518_v6 = vsel %vm7515_vm6, %v7517_v50, %v7513_v58  ;;  %v7520_v30 = vperm.slane %v7503_v2, 0 }
 0x8f6   : > { %v7521_v22 = vperm.slane %v7518_v6, 0 }
 0x8f8   : > { %v7524_v43 = vrot.slane %v7521_v22, 4 }
 0x8fa   : > { %v7525_v53 = vsel %vm6140_vm0, %v7520_v30, %v7524_v43 }
 0x8fb   : > { %v7527_v31 = vmul.f32 %v13984_v18, %v7525_v53 }
 0x8fd   : > { %7708 = vst [vmem:[%s13118_s21 + $0x18] sm:$0xff] %v7527_v31 }
 0x8fe   : > { %8092 = shalt.err (!%p8089_p10)
}
 0x8ff   : > { %s8165_s13 = smov 128   ;;  %s8166_s29 = smov 8  }
 0x900   : > { %7736 = dma.vmem_to_hbm [thread:$0]  (%p8285_p7), %s7545_s9, 512, %s7547_s4, %s7531_s6, %s8165_s13, %s8165_s13, %s8166_s29  }
 0x901 PF: > { %s7561_s0 = sand.u32 1, %s8131_s27   ;;  %p14000_p12 = scmp.ge.s32.totalorder %s8143_s30, 2 }
 0x902   : > { %s7562_s10 = scalar_lea.sflag [#allocation4], %s7561_s0 }
 0x903   : > { %p7756_p13 = pnand %p14000_p12, %p8247_p6 }
 0x905   : > { %p7757_p0 = pneg %p7756_p13 }
 0x907   : > { %8126 = dma.done.wait (%p7757_p0), %s7562_s10, 512  }
 0x908   : > { %8128 = vsyncadd (%p7757_p0), %s7562_s10, 4294966784  ;;  %s14001_s30 = sld [smem:[#allocation19_spill]]  ;;  %s14004_s27 = smov %s8135_s28 }
 0x909   : > { %s14002_s16 = sld [smem:[#allocation17_spill]] }
 0x90a   : > { %s14003_s29 = sld [smem:[#allocation20_spill]] }
 0x90e   : > { %p25_p3 = scmp.ge.s32.totalorder %s14001_s30, 4  }
 0x90f   : > { %s14005_s28 = smov %s14002_s16 }
 0x910   :  { %27 = sbr.rel (!%p25_p3) target bundleno = 13 (0xd), region = 128 }
 0x915   :  { %7568 = vsyncpa [#allocation3], 1 }
 0x916   :  { %7570 = vsyncpa [#allocation3 + $0x1], 1 }
 0x917   :  { %7571 = vsyncpa [#allocation6], 1 }
 0x918   :  { %7573 = vsyncpa [#allocation6 + $0x1], 1 }
 0x919   :  { %7574 = vsyncpa [#allocation9], 1 }
 0x91a   :  { %7575 = vsyncpa [#allocation4], 1 }
 0x91b   :  { %7577 = vsyncpa [#allocation4 + $0x1], 1 }

</bundles_post_ra>
